<compile_context>
chip_gen: v6e
topology: v6e:2x2x1
jax: 0.10.0
libtpu: 0.0.40
codegen_flags: <defaults>
</compile_context>

<pallas_src>
import functools

import numpy as np
import jax
import jax.numpy as jnp
from jax.experimental import pallas as pl
from jax.experimental.pallas import tpu as pltpu

BN_EPS = 1e-5
OUT_PAD = 128   # pad matmul output channels to a full lane tile (dense stores)

# architecture constants (fixed by the PyTorch XNORModel spec)
C1_OUT, K1 = 6, 5
C2_OUT, K2 = 16, 3
FC1_IN, FC1_OUT, FC2_OUT = 400, 50, 10

_VMEM = pl.BlockSpec(memory_space=pltpu.MemorySpace.VMEM)


# --------------------------------------------------------------------------- #
# helpers
# --------------------------------------------------------------------------- #
def _sign(x):
    # torch.sign semantics: sign(0) == 0
    return jnp.where(x > 0.0, 1.0, jnp.where(x < 0.0, -1.0, 0.0))


def _full_mean(a):
    # mean over all elements, kept as a (1, 1) array (composed axis reductions)
    return jnp.mean(jnp.mean(a, axis=0, keepdims=True), axis=1, keepdims=True)


# --------------------------------------------------------------------------- #
# kernel 1: BinConv2d_1
# --------------------------------------------------------------------------- #
def _conv1_kernel(xs_ref, p_ref, gamma_ref, beta_ref, w_ref, b_ref, o_ref, *,
                  g_pad):
    """BinConv2d(1->6, k=5): BN(1ch) + sign + conv(matmul) + K + ReLU + 2x2 pool.

    xs_ref : (N*28, 28) lane-dense raw input view for BN batch stats
    p_ref  : (4*g_pad, 25) RAW im2col patches, pool-slot-major rows
    w_ref  : (25, 128) bf16 conv weights, zero-padded past 6 out channels
    b_ref  : (1, 128) f32 bias, zero-padded
    o_ref  : (g_pad, 128) pooled output, rows ordered (n, h_pool, w_pool)
    """
    xs = xs_ref[...]
    mu = _full_mean(xs)                                   # (1, 1)
    var = _full_mean((xs - mu) ** 2)                      # biased variance
    s = gamma_ref[...] * jax.lax.rsqrt(var + BN_EPS)      # (1, 1)
    t = beta_ref[...] - mu * s

    pn = p_ref[...] * s + t                               # BN per patch column
    # K = conv2d(mean_c|bn|, ones/k^2)  ==  row-mean of |bn(patch)|
    k_scale = jnp.mean(jnp.abs(pn), axis=1, keepdims=True)
    pb = _sign(pn).astype(jnp.bfloat16)                   # exact in bf16

    y = jnp.dot(pb, w_ref[...], preferred_element_type=jnp.float32) + b_ref[...]
    y = jnp.maximum(y * k_scale, 0.0)                     # I*K, ReLU

    # 2x2 maxpool: pool partners live at rows g, g+g_pad, g+2g_pad, g+3g_pad
    o_ref[...] = jnp.maximum(
        jnp.maximum(y[0 * g_pad:1 * g_pad], y[1 * g_pad:2 * g_pad]),
        jnp.maximum(y[2 * g_pad:3 * g_pad], y[3 * g_pad:4 * g_pad]))


# --------------------------------------------------------------------------- #
# kernel 2: BinConv2d_2 + view(-1, 400) + fc1 + ReLU + fc2 (fully fused)
# --------------------------------------------------------------------------- #
def _conv2_fc_kernel(xs_ref, p_ref, g2c_ref, b2c_ref, w2c_ref, bc2_ref,
                     g1f_ref, b1f_ref, w1f_ref, bb1_ref,
                     g2f_ref, b2f_ref, w2f_ref, bb2_ref, o_ref, *,
                     n_batch, cin, kk, g_pad, hw, cout, f1, f2):
    """xs_ref : (6, N*12*12) lane-dense conv1 output (per-channel BN stats)
    p_ref  : (4*g_pad, 54) conv2 im2col patches, columns ordered (c, kh, kw)
    w2c    : (54, 128) bf16 conv2 weights (zero-padded); bc2: (1, 128)
    fc1    : g1f/b1f (1, 400) permuted to (h,w,c) order; w1f (400, 128) bf16
    fc2    : g2f/b2f (1, 128) padded (gamma pad=1); w2f (128, 128) bf16
    o_ref  : (N, 128); true logits in columns [:10]
    """
    # ---- conv2 BN: per-channel batch stats on the lane-dense view ----
    xs = xs_ref[...]                                      # (6, 288)
    mu = jnp.mean(xs, axis=1, keepdims=True)              # (6, 1)
    var = jnp.mean((xs - mu) ** 2, axis=1, keepdims=True) # biased variance
    s = g2c_ref[...] * jax.lax.rsqrt(var + BN_EPS)        # (6, 1)
    t = b2c_ref[...] - mu * s
    # expand per-channel scale/shift to per-patch-column (cols are (c, kh, kw))
    s_cols = jnp.concatenate(
        [jnp.broadcast_to(s[c:c + 1, :], (1, kk)) for c in range(cin)], axis=1)
    t_cols = jnp.concatenate(
        [jnp.broadcast_to(t[c:c + 1, :], (1, kk)) for c in range(cin)], axis=1)

    pn = p_ref[...] * s_cols + t_cols                     # (4*g_pad, 54)
    k_scale = jnp.mean(jnp.abs(pn), axis=1, keepdims=True)
    pb = _sign(pn).astype(jnp.bfloat16)
    y = jnp.dot(pb, w2c_ref[...], preferred_element_type=jnp.float32) + bc2_ref[...]
    y = jnp.maximum(y * k_scale, 0.0)                     # I*K, ReLU
    pooled = jnp.maximum(                                 # 2x2 maxpool
        jnp.maximum(y[0 * g_pad:1 * g_pad], y[1 * g_pad:2 * g_pad]),
        jnp.maximum(y[2 * g_pad:3 * g_pad], y[3 * g_pad:4 * g_pad]))
    # rows [n*hw, (n+1)*hw) hold sample n in (h, w) order; trailing pad rows
    # (>= n_batch*hw) are garbage and are never read below.

    # ---- view(-1, 400): flatten per sample in (h, w, c) order ----
    # (fc1 params were permuted once at preprocess time to this order)
    rows = []
    for n_i in range(n_batch):
        base = n_i * hw
        pieces = [pooled[base + r:base + r + 1, :cout] for r in range(hw)]
        rows.append(jnp.concatenate(pieces, axis=1))      # (1, hw*cout)
    x = jnp.concatenate(rows, axis=0)                     # (N, 400)

    # ---- fc1: BatchNorm1d(400) + sign*beta + linear, then F.relu ----
    mu1 = jnp.mean(x, axis=0, keepdims=True)
    var1 = jnp.mean((x - mu1) ** 2, axis=0, keepdims=True)
    xn = (x - mu1) * jax.lax.rsqrt(var1 + BN_EPS) * g1f_ref[...] + b1f_ref[...]
    beta1 = jnp.sum(jnp.abs(xn), axis=1, keepdims=True) * (1.0 / f1)  # (N, 1)
    xb = _sign(xn).astype(jnp.bfloat16)
    # (sign*beta) @ W^T + b  ==  (sign @ W^T)*beta + b   (beta is per-row)
    h = jnp.dot(xb, w1f_ref[...], preferred_element_type=jnp.float32) * beta1 \
        + bb1_ref[...]
    h = jnp.maximum(h, 0.0)
    # padded columns of h are exactly 0 and stay 0 through BN2/sign below.

    # ---- fc2: BatchNorm1d(50) + sign*beta + linear ----
    mu2 = jnp.mean(h, axis=0, keepdims=True)
    var2 = jnp.mean((h - mu2) ** 2, axis=0, keepdims=True)
    hn = (h - mu2) * jax.lax.rsqrt(var2 + BN_EPS) * g2f_ref[...] + b2f_ref[...]
    beta2 = jnp.sum(jnp.abs(hn), axis=1, keepdims=True) * (1.0 / f2)  # (N, 1)
    hb = _sign(hn).astype(jnp.bfloat16)
    o_ref[...] = jnp.dot(hb, w2f_ref[...],
                         preferred_element_type=jnp.float32) * beta2 + bb2_ref[...]


# --------------------------------------------------------------------------- #
# Wrapper glue (pure layout plumbing; one patches HLO per conv)
# --------------------------------------------------------------------------- #
def _patches_pool_reorder(x_nhwc, ks):
    """Valid-conv im2col via ONE conv_general_dilated_patches HLO, rows
    reordered so the four 2x2-pool partners occupy four row blocks."""
    N, H, W, C = x_nhwc.shape
    Ho, Wo = H - ks + 1, W - ks + 1
    Hp, Wp = Ho // 2, Wo // 2
    D = C * ks * ks
    p = jax.lax.conv_general_dilated_patches(
        x_nhwc, (ks, ks), window_strides=(1, 1), padding='VALID',
        dimension_numbers=('NHWC', 'HWIO', 'NHWC'))        # (N,Ho,Wo,D), (c,kh,kw)
    p = p.reshape(N, Hp, 2, Wp, 2, D).transpose(2, 4, 0, 1, 3, 5)
    p = p.reshape(4, N * Hp * Wp, D)
    g = N * Hp * Wp
    g_pad = ((g + 7) // 8) * 8                             # sublane-align slots
    if g_pad != g:
        p = jnp.pad(p, ((0, 0), (0, g_pad - g), (0, 0)))
    return p.reshape(4 * g_pad, D), g_pad, (Hp, Wp)


def preprocess_params(p):
    """One-time constant plumbing: transposes, 128-lane zero pads, bf16 casts,
    fc1 feature permutation.  Keeps the per-step jit free of weight-prep HLOs."""
    PAD = OUT_PAD

    w1 = p['conv1_w'].reshape(C1_OUT, K1 * K1).T                        # (25, 6)
    w1 = jnp.pad(w1, ((0, 0), (0, PAD - C1_OUT))).astype(jnp.bfloat16)
    b1 = jnp.pad(p['conv1_b'].reshape(1, C1_OUT), ((0, 0), (0, PAD - C1_OUT)))

    w2 = p['conv2_w'].reshape(C2_OUT, C1_OUT * K2 * K2).T               # (54, 16)
    w2 = jnp.pad(w2, ((0, 0), (0, PAD - C2_OUT))).astype(jnp.bfloat16)
    b2 = jnp.pad(p['conv2_b'].reshape(1, C2_OUT), ((0, 0), (0, PAD - C2_OUT)))

    # fc1 features are consumed in (h, w, c) order inside the fused kernel;
    # permute the NCHW-ordered (c, h, w) fc1 parameters once to match.
    hw = FC1_IN // C2_OUT                                               # 25
    perm = (np.arange(C2_OUT)[None, :] * hw + np.arange(hw)[:, None]).reshape(-1)
    g1 = p['fc1_gamma'][perm].reshape(1, FC1_IN)
    be1 = p['fc1_beta'][perm].reshape(1, FC1_IN)
    w1f = jnp.pad(p['fc1_w'][:, perm].T,
                  ((0, 0), (0, PAD - FC1_OUT))).astype(jnp.bfloat16)    # (400,128)
    bb1 = jnp.pad(p['fc1_b'].reshape(1, FC1_OUT), ((0, 0), (0, PAD - FC1_OUT)))

    g2 = jnp.pad(p['fc2_gamma'].reshape(1, FC1_OUT),
                 ((0, 0), (0, PAD - FC1_OUT)), constant_values=1.0)
    be2 = jnp.pad(p['fc2_beta'].reshape(1, FC1_OUT), ((0, 0), (0, PAD - FC1_OUT)))
    w2f = jnp.pad(p['fc2_w'].T,
                  ((0, PAD - FC1_OUT), (0, PAD - FC2_OUT))).astype(jnp.bfloat16)
    bb2 = jnp.pad(p['fc2_b'].reshape(1, FC2_OUT), ((0, 0), (0, PAD - FC2_OUT)))

    return dict(
        c1_gamma=p['conv1_gamma'].reshape(1, 1), c1_beta=p['conv1_beta'].reshape(1, 1),
        c1_w=w1, c1_b=b1,
        c2_gamma=p['conv2_gamma'].reshape(C1_OUT, 1),
        c2_beta=p['conv2_beta'].reshape(C1_OUT, 1),
        c2_w=w2, c2_b=b2,
        f1_gamma=g1, f1_beta=be1, f1_w=w1f, f1_b=bb1,
        f2_gamma=g2, f2_beta=be2, f2_w=w2f, f2_b=bb2,
    )


# --------------------------------------------------------------------------- #
# Model
# --------------------------------------------------------------------------- #
def init_params(key):
    keys = jax.random.split(key, 16)
    n = lambda k, s, sc: sc * jax.random.normal(k, s, jnp.float32)
    return dict(
        conv1_gamma=1.0 + n(keys[0], (1,), 0.1),   conv1_beta=n(keys[1], (1,), 0.1),
        conv1_w=n(keys[2], (6, 1, 5, 5), 0.2),     conv1_b=n(keys[3], (6,), 0.1),
        conv2_gamma=1.0 + n(keys[4], (6,), 0.1),   conv2_beta=n(keys[5], (6,), 0.1),
        conv2_w=n(keys[6], (16, 6, 3, 3), 0.2),    conv2_b=n(keys[7], (16,), 0.1),
        fc1_gamma=1.0 + n(keys[8], (400,), 0.1),   fc1_beta=n(keys[9], (400,), 0.1),
        fc1_w=n(keys[10], (50, 400), 0.05),        fc1_b=n(keys[11], (50,), 0.1),
        fc2_gamma=1.0 + n(keys[12], (50,), 0.1),   fc2_beta=n(keys[13], (50,), 0.1),
        fc2_w=n(keys[14], (10, 50), 0.1),          fc2_b=n(keys[15], (10,), 0.1),
    )


@jax.jit
def xnor_model(prep, x_nchw):
    N, _, H, W = x_nchw.shape                              # (N, 1, 28, 28)

    # ---- BinConv2d_1 ----
    x_nhwc = jnp.transpose(x_nchw, (0, 2, 3, 1))
    xs1 = x_nchw.reshape(N * H, W)                         # lane-dense stats view
    p1, g1_pad, (hp1, wp1) = _patches_pool_reorder(x_nhwc, K1)
    out1 = pl.pallas_call(
        functools.partial(_conv1_kernel, g_pad=g1_pad),
        out_shape=jax.ShapeDtypeStruct((g1_pad, OUT_PAD), jnp.float32),
        in_specs=[_VMEM] * 6,
        out_specs=_VMEM,
    )(xs1, p1, prep['c1_gamma'], prep['c1_beta'], prep['c1_w'], prep['c1_b'])

    # ---- BinConv2d_2 + view(-1, 400) + fc1 + ReLU + fc2 (one fused kernel) ----
    a1 = out1[:N * hp1 * wp1, :C1_OUT].reshape(N, hp1, wp1, C1_OUT)
    xs2 = jnp.transpose(a1, (3, 0, 1, 2)).reshape(C1_OUT, N * hp1 * wp1)
    p2, g2_pad, (hp2, wp2) = _patches_pool_reorder(a1, K2)
    logits = pl.pallas_call(
        functools.partial(_conv2_fc_kernel, n_batch=N, cin=C1_OUT, kk=K2 * K2,
                          g_pad=g2_pad, hw=hp2 * wp2, cout=C2_OUT,
                          f1=FC1_IN, f2=FC1_OUT),
        out_shape=jax.ShapeDtypeStruct((N, OUT_PAD), jnp.float32),
        in_specs=[_VMEM] * 14,
        out_specs=_VMEM,
    )(xs2, p2, prep['c2_gamma'], prep['c2_beta'], prep['c2_w'], prep['c2_b'],
      prep['f1_gamma'], prep['f1_beta'], prep['f1_w'], prep['f1_b'],
      prep['f2_gamma'], prep['f2_beta'], prep['f2_w'], prep['f2_b'])
    return logits[:, :FC2_OUT]


if __name__ == "__main__":
    key = jax.random.PRNGKey(0)
    pkey, xkey = jax.random.split(key)
    params = init_params(pkey)
    prep = preprocess_params(params)          # one-time weight plumbing (not per-step)
    # MNIST-like input: (N, 1, 28, 28) so the final view(-1, 400) is consistent.
    x = jax.random.normal(xkey, (2, 1, 28, 28), jnp.float32)
    out = xnor_model(prep, x)
    out = jax.block_until_ready(out)
    assert out.shape == (2, 10), out.shape
    assert bool(jnp.all(jnp.isfinite(out)))
    print("KERNEL_OK")
</pallas_src>

<mosaic_0001>
module attributes {stable_mosaic.version = 11 : i64} {
  func.func @_conv1_kernel(%arg0: memref<56x28xf32, #tpu.memory_space<vmem>>, %arg1: memref<1152x25xf32, #tpu.memory_space<vmem>>, %arg2: memref<1x1xf32, #tpu.memory_space<vmem>>, %arg3: memref<1x1xf32, #tpu.memory_space<vmem>>, %arg4: memref<25x128xbf16, #tpu.memory_space<vmem>>, %arg5: memref<1x128xf32, #tpu.memory_space<vmem>>, %arg6: memref<288x128xf32, #tpu.memory_space<vmem>>) attributes {dimension_semantics = [], scalar_prefetch = 0 : i64, scratch_operands = 0 : i64, tpu.core_type = #tpu.core_type<tc>} {
    %c0 = arith.constant 0 : index
    %c0_0 = arith.constant 0 : index
    %0 = vector.load %arg0[%c0, %c0_0] : memref<56x28xf32, #tpu.memory_space<vmem>>, vector<56x28xf32>
    %cst = arith.constant dense<0.000000e+00> : vector<28xf32>
    %1 = vector.multi_reduction <add>, %0, %cst [0] : vector<56x28xf32> to vector<28xf32>
    %2 = vector.shape_cast %1 : vector<28xf32> to vector<1x28xf32>
    %cst_1 = arith.constant 5.600000e+01 : f32
    %3 = vector.broadcast %cst_1 : f32 to vector<1x28xf32>
    %4 = arith.divf %2, %3 : vector<1x28xf32>
    %cst_2 = arith.constant dense<0.000000e+00> : vector<1xf32>
    %5 = vector.multi_reduction <add>, %4, %cst_2 [1] : vector<1x28xf32> to vector<1xf32>
    %6 = vector.shape_cast %5 : vector<1xf32> to vector<1x1xf32>
    %cst_3 = arith.constant 2.800000e+01 : f32
    %7 = vector.broadcast %cst_3 : f32 to vector<1x1xf32>
    %8 = arith.divf %6, %7 : vector<1x1xf32>
    %9 = vector.broadcast %8 : vector<1x1xf32> to vector<56x28xf32>
    %10 = arith.subf %0, %9 : vector<56x28xf32>
    %11 = arith.mulf %10, %10 : vector<56x28xf32>
    %cst_4 = arith.constant dense<0.000000e+00> : vector<28xf32>
    %12 = vector.multi_reduction <add>, %11, %cst_4 [0] : vector<56x28xf32> to vector<28xf32>
    %13 = vector.shape_cast %12 : vector<28xf32> to vector<1x28xf32>
    %cst_5 = arith.constant 5.600000e+01 : f32
    %14 = vector.broadcast %cst_5 : f32 to vector<1x28xf32>
    %15 = arith.divf %13, %14 : vector<1x28xf32>
    %cst_6 = arith.constant dense<0.000000e+00> : vector<1xf32>
    %16 = vector.multi_reduction <add>, %15, %cst_6 [1] : vector<1x28xf32> to vector<1xf32>
    %17 = vector.shape_cast %16 : vector<1xf32> to vector<1x1xf32>
    %cst_7 = arith.constant 2.800000e+01 : f32
    %18 = vector.broadcast %cst_7 : f32 to vector<1x1xf32>
    %19 = arith.divf %17, %18 : vector<1x1xf32>
    %c0_8 = arith.constant 0 : index
    %c0_9 = arith.constant 0 : index
    %20 = vector.load %arg2[%c0_8, %c0_9] : memref<1x1xf32, #tpu.memory_space<vmem>>, vector<1x1xf32>
    %cst_10 = arith.constant 9.99999974E-6 : f32
    %21 = vector.broadcast %cst_10 : f32 to vector<1x1xf32>
    %22 = arith.addf %19, %21 : vector<1x1xf32>
    %23 = math.rsqrt %22 : vector<1x1xf32>
    %24 = arith.mulf %20, %23 : vector<1x1xf32>
    %c0_11 = arith.constant 0 : index
    %c0_12 = arith.constant 0 : index
    %25 = vector.load %arg3[%c0_11, %c0_12] : memref<1x1xf32, #tpu.memory_space<vmem>>, vector<1x1xf32>
    %26 = arith.mulf %8, %24 : vector<1x1xf32>
    %27 = arith.subf %25, %26 : vector<1x1xf32>
    %c0_13 = arith.constant 0 : index
    %c0_14 = arith.constant 0 : index
    %28 = vector.load %arg1[%c0_13, %c0_14] : memref<1152x25xf32, #tpu.memory_space<vmem>>, vector<1152x25xf32>
    %29 = vector.broadcast %24 : vector<1x1xf32> to vector<1152x25xf32>
    %30 = arith.mulf %28, %29 : vector<1152x25xf32>
    %31 = vector.broadcast %27 : vector<1x1xf32> to vector<1152x25xf32>
    %32 = arith.addf %30, %31 : vector<1152x25xf32>
    %33 = math.absf %32 : vector<1152x25xf32>
    %cst_15 = arith.constant dense<0.000000e+00> : vector<1152xf32>
    %34 = vector.multi_reduction <add>, %33, %cst_15 [1] : vector<1152x25xf32> to vector<1152xf32>
    %35 = vector.shape_cast %34 : vector<1152xf32> to vector<1152x1xf32>
    %cst_16 = arith.constant 2.500000e+01 : f32
    %36 = vector.broadcast %cst_16 : f32 to vector<1152x1xf32>
    %37 = arith.divf %35, %36 : vector<1152x1xf32>
    %cst_17 = arith.constant 0.000000e+00 : f32
    %38 = vector.broadcast %cst_17 : f32 to vector<1152x25xf32>
    %39 = arith.cmpf ogt, %32, %38 : vector<1152x25xf32>
    %cst_18 = arith.constant 0.000000e+00 : f32
    %40 = vector.broadcast %cst_18 : f32 to vector<1152x25xf32>
    %41 = arith.cmpf olt, %32, %40 : vector<1152x25xf32>
    %cst_19 = arith.constant -1.000000e+00 : f32
    %cst_20 = arith.constant 0.000000e+00 : f32
    %42 = vector.broadcast %cst_19 : f32 to vector<1152x25xf32>
    %43 = vector.broadcast %cst_20 : f32 to vector<1152x25xf32>
    %44 = arith.select %41, %42, %43 : vector<1152x25xi1>, vector<1152x25xf32>
    %cst_21 = arith.constant 1.000000e+00 : f32
    %45 = vector.broadcast %cst_21 : f32 to vector<1152x25xf32>
    %46 = arith.select %39, %45, %44 : vector<1152x25xi1>, vector<1152x25xf32>
    %47 = arith.truncf %46 : vector<1152x25xf32> to vector<1152x25xbf16>
    %c0_22 = arith.constant 0 : index
    %c0_23 = arith.constant 0 : index
    %48 = vector.load %arg4[%c0_22, %c0_23] : memref<25x128xbf16, #tpu.memory_space<vmem>>, vector<25x128xbf16>
    %cst_24 = arith.constant dense<0.000000e+00> : vector<1152x128xf32>
    %49 = tpu.matmul %47, %48, %cst_24 {dimension_numbers = #tpu.dot_dimension_numbers<[1], [0], [0], [1], [0, 0, 1, 1], [], []>} : vector<1152x25xbf16>, vector<25x128xbf16>, vector<1152x128xf32> -> vector<1152x128xf32>
    %c0_25 = arith.constant 0 : index
    %c0_26 = arith.constant 0 : index
    %50 = vector.load %arg5[%c0_25, %c0_26] : memref<1x128xf32, #tpu.memory_space<vmem>>, vector<1x128xf32>
    %51 = vector.broadcast %50 : vector<1x128xf32> to vector<1152x128xf32>
    %52 = arith.addf %49, %51 : vector<1152x128xf32>
    %53 = vector.broadcast %37 : vector<1152x1xf32> to vector<1152x128xf32>
    %54 = arith.mulf %52, %53 : vector<1152x128xf32>
    %cst_27 = arith.constant 0.000000e+00 : f32
    %55 = vector.broadcast %cst_27 : f32 to vector<1152x128xf32>
    %56 = arith.maximumf %54, %55 : vector<1152x128xf32>
    %57 = vector.extract_strided_slice %56 {offsets = [0, 0], sizes = [288, 128], strides = [1, 1]} : vector<1152x128xf32> to vector<288x128xf32>
    %58 = vector.extract_strided_slice %56 {offsets = [288, 0], sizes = [288, 128], strides = [1, 1]} : vector<1152x128xf32> to vector<288x128xf32>
    %59 = arith.maximumf %57, %58 : vector<288x128xf32>
    %60 = vector.extract_strided_slice %56 {offsets = [576, 0], sizes = [288, 128], strides = [1, 1]} : vector<1152x128xf32> to vector<288x128xf32>
    %61 = vector.extract_strided_slice %56 {offsets = [864, 0], sizes = [288, 128], strides = [1, 1]} : vector<1152x128xf32> to vector<288x128xf32>
    %62 = arith.maximumf %60, %61 : vector<288x128xf32>
    %63 = arith.maximumf %59, %62 : vector<288x128xf32>
    %c0_28 = arith.constant 0 : index
    %c0_29 = arith.constant 0 : index
    %64 = vector.load %arg6[%c0_28, %c0_29] : memref<288x128xf32, #tpu.memory_space<vmem>>, vector<288x128xf32>
    tpu.vector_store %arg6[%c0_28, %c0_29], %63 {strides = array<i32>} : memref<288x128xf32, #tpu.memory_space<vmem>>, vector<288x128xf32>,
    return
  }
}

module attributes {stable_mosaic.version = 11 : i64} {
  func.func @_conv2_fc_kernel(%arg0: memref<6x288xf32, #tpu.memory_space<vmem>>, %arg1: memref<224x54xf32, #tpu.memory_space<vmem>>, %arg2: memref<6x1xf32, #tpu.memory_space<vmem>>, %arg3: memref<6x1xf32, #tpu.memory_space<vmem>>, %arg4: memref<54x128xbf16, #tpu.memory_space<vmem>>, %arg5: memref<1x128xf32, #tpu.memory_space<vmem>>, %arg6: memref<1x400xf32, #tpu.memory_space<vmem>>, %arg7: memref<1x400xf32, #tpu.memory_space<vmem>>, %arg8: memref<400x128xbf16, #tpu.memory_space<vmem>>, %arg9: memref<1x128xf32, #tpu.memory_space<vmem>>, %arg10: memref<1x128xf32, #tpu.memory_space<vmem>>, %arg11: memref<1x128xf32, #tpu.memory_space<vmem>>, %arg12: memref<128x128xbf16, #tpu.memory_space<vmem>>, %arg13: memref<1x128xf32, #tpu.memory_space<vmem>>, %arg14: memref<2x128xf32, #tpu.memory_space<vmem>>) attributes {dimension_semantics = [], scalar_prefetch = 0 : i64, scratch_operands = 0 : i64, tpu.core_type = #tpu.core_type<tc>} {
    %c0 = arith.constant 0 : index
    %c0_0 = arith.constant 0 : index
    %0 = vector.load %arg0[%c0, %c0_0] : memref<6x288xf32, #tpu.memory_space<vmem>>, vector<6x288xf32>
    %cst = arith.constant dense<0.000000e+00> : vector<6xf32>
    %1 = vector.multi_reduction <add>, %0, %cst [1] : vector<6x288xf32> to vector<6xf32>
    %2 = vector.shape_cast %1 : vector<6xf32> to vector<6x1xf32>
    %cst_1 = arith.constant 2.880000e+02 : f32
    %3 = vector.broadcast %cst_1 : f32 to vector<6x1xf32>
    %4 = arith.divf %2, %3 : vector<6x1xf32>
    %5 = vector.broadcast %4 : vector<6x1xf32> to vector<6x288xf32>
    %6 = arith.subf %0, %5 : vector<6x288xf32>
    %7 = arith.mulf %6, %6 : vector<6x288xf32>
    %cst_2 = arith.constant dense<0.000000e+00> : vector<6xf32>
    %8 = vector.multi_reduction <add>, %7, %cst_2 [1] : vector<6x288xf32> to vector<6xf32>
    %9 = vector.shape_cast %8 : vector<6xf32> to vector<6x1xf32>
    %cst_3 = arith.constant 2.880000e+02 : f32
    %10 = vector.broadcast %cst_3 : f32 to vector<6x1xf32>
    %11 = arith.divf %9, %10 : vector<6x1xf32>
    %c0_4 = arith.constant 0 : index
    %c0_5 = arith.constant 0 : index
    %12 = vector.load %arg2[%c0_4, %c0_5] : memref<6x1xf32, #tpu.memory_space<vmem>>, vector<6x1xf32>
    %cst_6 = arith.constant 9.99999974E-6 : f32
    %13 = vector.broadcast %cst_6 : f32 to vector<6x1xf32>
    %14 = arith.addf %11, %13 : vector<6x1xf32>
    %15 = math.rsqrt %14 : vector<6x1xf32>
    %16 = arith.mulf %12, %15 : vector<6x1xf32>
    %c0_7 = arith.constant 0 : index
    %c0_8 = arith.constant 0 : index
    %17 = vector.load %arg3[%c0_7, %c0_8] : memref<6x1xf32, #tpu.memory_space<vmem>>, vector<6x1xf32>
    %18 = arith.mulf %4, %16 : vector<6x1xf32>
    %19 = arith.subf %17, %18 : vector<6x1xf32>
    %20 = vector.extract_strided_slice %16 {offsets = [0, 0], sizes = [1, 1], strides = [1, 1]} : vector<6x1xf32> to vector<1x1xf32>
    %21 = vector.shape_cast %20 : vector<1x1xf32> to vector<1x1xf32>
    %22 = vector.broadcast %21 : vector<1x1xf32> to vector<1x9xf32>
    %23 = vector.extract_strided_slice %16 {offsets = [1, 0], sizes = [1, 1], strides = [1, 1]} : vector<6x1xf32> to vector<1x1xf32>
    %24 = vector.shape_cast %23 : vector<1x1xf32> to vector<1x1xf32>
    %25 = vector.broadcast %24 : vector<1x1xf32> to vector<1x9xf32>
    %26 = vector.extract_strided_slice %16 {offsets = [2, 0], sizes = [1, 1], strides = [1, 1]} : vector<6x1xf32> to vector<1x1xf32>
    %27 = vector.shape_cast %26 : vector<1x1xf32> to vector<1x1xf32>
    %28 = vector.broadcast %27 : vector<1x1xf32> to vector<1x9xf32>
    %29 = vector.extract_strided_slice %16 {offsets = [3, 0], sizes = [1, 1], strides = [1, 1]} : vector<6x1xf32> to vector<1x1xf32>
    %30 = vector.shape_cast %29 : vector<1x1xf32> to vector<1x1xf32>
    %31 = vector.broadcast %30 : vector<1x1xf32> to vector<1x9xf32>
    %32 = vector.extract_strided_slice %16 {offsets = [4, 0], sizes = [1, 1], strides = [1, 1]} : vector<6x1xf32> to vector<1x1xf32>
    %33 = vector.shape_cast %32 : vector<1x1xf32> to vector<1x1xf32>
    %34 = vector.broadcast %33 : vector<1x1xf32> to vector<1x9xf32>
    %35 = vector.extract_strided_slice %16 {offsets = [5, 0], sizes = [1, 1], strides = [1, 1]} : vector<6x1xf32> to vector<1x1xf32>
    %36 = vector.shape_cast %35 : vector<1x1xf32> to vector<1x1xf32>
    %37 = vector.broadcast %36 : vector<1x1xf32> to vector<1x9xf32>
    %38 = tpu.concatenate %22, %25, %28, %31, %34, %37 in 1 : vector<1x9xf32>, vector<1x9xf32>, vector<1x9xf32>, vector<1x9xf32>, vector<1x9xf32>, vector<1x9xf32> -> vector<1x54xf32>
    %39 = vector.extract_strided_slice %19 {offsets = [0, 0], sizes = [1, 1], strides = [1, 1]} : vector<6x1xf32> to vector<1x1xf32>
    %40 = vector.shape_cast %39 : vector<1x1xf32> to vector<1x1xf32>
    %41 = vector.broadcast %40 : vector<1x1xf32> to vector<1x9xf32>
    %42 = vector.extract_strided_slice %19 {offsets = [1, 0], sizes = [1, 1], strides = [1, 1]} : vector<6x1xf32> to vector<1x1xf32>
    %43 = vector.shape_cast %42 : vector<1x1xf32> to vector<1x1xf32>
    %44 = vector.broadcast %43 : vector<1x1xf32> to vector<1x9xf32>
    %45 = vector.extract_strided_slice %19 {offsets = [2, 0], sizes = [1, 1], strides = [1, 1]} : vector<6x1xf32> to vector<1x1xf32>
    %46 = vector.shape_cast %45 : vector<1x1xf32> to vector<1x1xf32>
    %47 = vector.broadcast %46 : vector<1x1xf32> to vector<1x9xf32>
    %48 = vector.extract_strided_slice %19 {offsets = [3, 0], sizes = [1, 1], strides = [1, 1]} : vector<6x1xf32> to vector<1x1xf32>
    %49 = vector.shape_cast %48 : vector<1x1xf32> to vector<1x1xf32>
    %50 = vector.broadcast %49 : vector<1x1xf32> to vector<1x9xf32>
    %51 = vector.extract_strided_slice %19 {offsets = [4, 0], sizes = [1, 1], strides = [1, 1]} : vector<6x1xf32> to vector<1x1xf32>
    %52 = vector.shape_cast %51 : vector<1x1xf32> to vector<1x1xf32>
    %53 = vector.broadcast %52 : vector<1x1xf32> to vector<1x9xf32>
    %54 = vector.extract_strided_slice %19 {offsets = [5, 0], sizes = [1, 1], strides = [1, 1]} : vector<6x1xf32> to vector<1x1xf32>
    %55 = vector.shape_cast %54 : vector<1x1xf32> to vector<1x1xf32>
    %56 = vector.broadcast %55 : vector<1x1xf32> to vector<1x9xf32>
    %57 = tpu.concatenate %41, %44, %47, %50, %53, %56 in 1 : vector<1x9xf32>, vector<1x9xf32>, vector<1x9xf32>, vector<1x9xf32>, vector<1x9xf32>, vector<1x9xf32> -> vector<1x54xf32>
    %c0_9 = arith.constant 0 : index
    %c0_10 = arith.constant 0 : index
    %58 = vector.load %arg1[%c0_9, %c0_10] : memref<224x54xf32, #tpu.memory_space<vmem>>, vector<224x54xf32>
    %59 = vector.broadcast %38 : vector<1x54xf32> to vector<224x54xf32>
    %60 = arith.mulf %58, %59 : vector<224x54xf32>
    %61 = vector.broadcast %57 : vector<1x54xf32> to vector<224x54xf32>
    %62 = arith.addf %60, %61 : vector<224x54xf32>
    %63 = math.absf %62 : vector<224x54xf32>
    %cst_11 = arith.constant dense<0.000000e+00> : vector<224xf32>
    %64 = vector.multi_reduction <add>, %63, %cst_11 [1] : vector<224x54xf32> to vector<224xf32>
    %65 = vector.shape_cast %64 : vector<224xf32> to vector<224x1xf32>
    %cst_12 = arith.constant 5.400000e+01 : f32
    %66 = vector.broadcast %cst_12 : f32 to vector<224x1xf32>
    %67 = arith.divf %65, %66 : vector<224x1xf32>
    %cst_13 = arith.constant 0.000000e+00 : f32
    %68 = vector.broadcast %cst_13 : f32 to vector<224x54xf32>
    %69 = arith.cmpf ogt, %62, %68 : vector<224x54xf32>
    %cst_14 = arith.constant 0.000000e+00 : f32
    %70 = vector.broadcast %cst_14 : f32 to vector<224x54xf32>
    %71 = arith.cmpf olt, %62, %70 : vector<224x54xf32>
    %cst_15 = arith.constant -1.000000e+00 : f32
    %cst_16 = arith.constant 0.000000e+00 : f32
    %72 = vector.broadcast %cst_15 : f32 to vector<224x54xf32>
    %73 = vector.broadcast %cst_16 : f32 to vector<224x54xf32>
    %74 = arith.select %71, %72, %73 : vector<224x54xi1>, vector<224x54xf32>
    %cst_17 = arith.constant 1.000000e+00 : f32
    %75 = vector.broadcast %cst_17 : f32 to vector<224x54xf32>
    %76 = arith.select %69, %75, %74 : vector<224x54xi1>, vector<224x54xf32>
    %77 = arith.truncf %76 : vector<224x54xf32> to vector<224x54xbf16>
    %c0_18 = arith.constant 0 : index
    %c0_19 = arith.constant 0 : index
    %78 = vector.load %arg4[%c0_18, %c0_19] : memref<54x128xbf16, #tpu.memory_space<vmem>>, vector<54x128xbf16>
    %cst_20 = arith.constant dense<0.000000e+00> : vector<224x128xf32>
    %79 = tpu.matmul %77, %78, %cst_20 {dimension_numbers = #tpu.dot_dimension_numbers<[1], [0], [0], [1], [0, 0, 1, 1], [], []>} : vector<224x54xbf16>, vector<54x128xbf16>, vector<224x128xf32> -> vector<224x128xf32>
    %c0_21 = arith.constant 0 : index
    %c0_22 = arith.constant 0 : index
    %80 = vector.load %arg5[%c0_21, %c0_22] : memref<1x128xf32, #tpu.memory_space<vmem>>, vector<1x128xf32>
    %81 = vector.broadcast %80 : vector<1x128xf32> to vector<224x128xf32>
    %82 = arith.addf %79, %81 : vector<224x128xf32>
    %83 = vector.broadcast %67 : vector<224x1xf32> to vector<224x128xf32>
    %84 = arith.mulf %82, %83 : vector<224x128xf32>
    %cst_23 = arith.constant 0.000000e+00 : f32
    %85 = vector.broadcast %cst_23 : f32 to vector<224x128xf32>
    %86 = arith.maximumf %84, %85 : vector<224x128xf32>
    %87 = vector.extract_strided_slice %86 {offsets = [0, 0], sizes = [56, 128], strides = [1, 1]} : vector<224x128xf32> to vector<56x128xf32>
    %88 = vector.extract_strided_slice %86 {offsets = [56, 0], sizes = [56, 128], strides = [1, 1]} : vector<224x128xf32> to vector<56x128xf32>
    %89 = arith.maximumf %87, %88 : vector<56x128xf32>
    %90 = vector.extract_strided_slice %86 {offsets = [112, 0], sizes = [56, 128], strides = [1, 1]} : vector<224x128xf32> to vector<56x128xf32>
    %91 = vector.extract_strided_slice %86 {offsets = [168, 0], sizes = [56, 128], strides = [1, 1]} : vector<224x128xf32> to vector<56x128xf32>
    %92 = arith.maximumf %90, %91 : vector<56x128xf32>
    %93 = arith.maximumf %89, %92 : vector<56x128xf32>
    %94 = vector.extract_strided_slice %93 {offsets = [0, 0], sizes = [1, 16], strides = [1, 1]} : vector<56x128xf32> to vector<1x16xf32>
    %95 = vector.extract_strided_slice %93 {offsets = [1, 0], sizes = [1, 16], strides = [1, 1]} : vector<56x128xf32> to vector<1x16xf32>
    %96 = vector.extract_strided_slice %93 {offsets = [2, 0], sizes = [1, 16], strides = [1, 1]} : vector<56x128xf32> to vector<1x16xf32>
    %97 = vector.extract_strided_slice %93 {offsets = [3, 0], sizes = [1, 16], strides = [1, 1]} : vector<56x128xf32> to vector<1x16xf32>
    %98 = vector.extract_strided_slice %93 {offsets = [4, 0], sizes = [1, 16], strides = [1, 1]} : vector<56x128xf32> to vector<1x16xf32>
    %99 = vector.extract_strided_slice %93 {offsets = [5, 0], sizes = [1, 16], strides = [1, 1]} : vector<56x128xf32> to vector<1x16xf32>
    %100 = vector.extract_strided_slice %93 {offsets = [6, 0], sizes = [1, 16], strides = [1, 1]} : vector<56x128xf32> to vector<1x16xf32>
    %101 = vector.extract_strided_slice %93 {offsets = [7, 0], sizes = [1, 16], strides = [1, 1]} : vector<56x128xf32> to vector<1x16xf32>
    %102 = vector.extract_strided_slice %93 {offsets = [8, 0], sizes = [1, 16], strides = [1, 1]} : vector<56x128xf32> to vector<1x16xf32>
    %103 = vector.extract_strided_slice %93 {offsets = [9, 0], sizes = [1, 16], strides = [1, 1]} : vector<56x128xf32> to vector<1x16xf32>
    %104 = vector.extract_strided_slice %93 {offsets = [10, 0], sizes = [1, 16], strides = [1, 1]} : vector<56x128xf32> to vector<1x16xf32>
    %105 = vector.extract_strided_slice %93 {offsets = [11, 0], sizes = [1, 16], strides = [1, 1]} : vector<56x128xf32> to vector<1x16xf32>
    %106 = vector.extract_strided_slice %93 {offsets = [12, 0], sizes = [1, 16], strides = [1, 1]} : vector<56x128xf32> to vector<1x16xf32>
    %107 = vector.extract_strided_slice %93 {offsets = [13, 0], sizes = [1, 16], strides = [1, 1]} : vector<56x128xf32> to vector<1x16xf32>
    %108 = vector.extract_strided_slice %93 {offsets = [14, 0], sizes = [1, 16], strides = [1, 1]} : vector<56x128xf32> to vector<1x16xf32>
    %109 = vector.extract_strided_slice %93 {offsets = [15, 0], sizes = [1, 16], strides = [1, 1]} : vector<56x128xf32> to vector<1x16xf32>
    %110 = vector.extract_strided_slice %93 {offsets = [16, 0], sizes = [1, 16], strides = [1, 1]} : vector<56x128xf32> to vector<1x16xf32>
    %111 = vector.extract_strided_slice %93 {offsets = [17, 0], sizes = [1, 16], strides = [1, 1]} : vector<56x128xf32> to vector<1x16xf32>
    %112 = vector.extract_strided_slice %93 {offsets = [18, 0], sizes = [1, 16], strides = [1, 1]} : vector<56x128xf32> to vector<1x16xf32>
    %113 = vector.extract_strided_slice %93 {offsets = [19, 0], sizes = [1, 16], strides = [1, 1]} : vector<56x128xf32> to vector<1x16xf32>
    %114 = vector.extract_strided_slice %93 {offsets = [20, 0], sizes = [1, 16], strides = [1, 1]} : vector<56x128xf32> to vector<1x16xf32>
    %115 = vector.extract_strided_slice %93 {offsets = [21, 0], sizes = [1, 16], strides = [1, 1]} : vector<56x128xf32> to vector<1x16xf32>
    %116 = vector.extract_strided_slice %93 {offsets = [22, 0], sizes = [1, 16], strides = [1, 1]} : vector<56x128xf32> to vector<1x16xf32>
    %117 = vector.extract_strided_slice %93 {offsets = [23, 0], sizes = [1, 16], strides = [1, 1]} : vector<56x128xf32> to vector<1x16xf32>
    %118 = vector.extract_strided_slice %93 {offsets = [24, 0], sizes = [1, 16], strides = [1, 1]} : vector<56x128xf32> to vector<1x16xf32>
    %119 = tpu.concatenate %94, %95, %96, %97, %98, %99, %100, %101, %102, %103, %104, %105, %106, %107, %108, %109 in 1 : vector<1x16xf32>, vector<1x16xf32>, vector<1x16xf32>, vector<1x16xf32>, vector<1x16xf32>, vector<1x16xf32>, vector<1x16xf32>, vector<1x16xf32>, vector<1x16xf32>, vector<1x16xf32>, vector<1x16xf32>, vector<1x16xf32>, vector<1x16xf32>, vector<1x16xf32>, vector<1x16xf32>, vector<1x16xf32> -> vector<1x256xf32>
    %120 = tpu.concatenate %110, %111, %112, %113, %114, %115, %116, %117, %118 in 1 : vector<1x16xf32>, vector<1x16xf32>, vector<1x16xf32>, vector<1x16xf32>, vector<1x16xf32>, vector<1x16xf32>, vector<1x16xf32>, vector<1x16xf32>, vector<1x16xf32> -> vector<1x144xf32>
    %121 = tpu.concatenate %119, %120 in 1 : vector<1x256xf32>, vector<1x144xf32> -> vector<1x400xf32>
    %122 = vector.extract_strided_slice %93 {offsets = [25, 0], sizes = [1, 16], strides = [1, 1]} : vector<56x128xf32> to vector<1x16xf32>
    %123 = vector.extract_strided_slice %93 {offsets = [26, 0], sizes = [1, 16], strides = [1, 1]} : vector<56x128xf32> to vector<1x16xf32>
    %124 = vector.extract_strided_slice %93 {offsets = [27, 0], sizes = [1, 16], strides = [1, 1]} : vector<56x128xf32> to vector<1x16xf32>
    %125 = vector.extract_strided_slice %93 {offsets = [28, 0], sizes = [1, 16], strides = [1, 1]} : vector<56x128xf32> to vector<1x16xf32>
    %126 = vector.extract_strided_slice %93 {offsets = [29, 0], sizes = [1, 16], strides = [1, 1]} : vector<56x128xf32> to vector<1x16xf32>
    %127 = vector.extract_strided_slice %93 {offsets = [30, 0], sizes = [1, 16], strides = [1, 1]} : vector<56x128xf32> to vector<1x16xf32>
    %128 = vector.extract_strided_slice %93 {offsets = [31, 0], sizes = [1, 16], strides = [1, 1]} : vector<56x128xf32> to vector<1x16xf32>
    %129 = vector.extract_strided_slice %93 {offsets = [32, 0], sizes = [1, 16], strides = [1, 1]} : vector<56x128xf32> to vector<1x16xf32>
    %130 = vector.extract_strided_slice %93 {offsets = [33, 0], sizes = [1, 16], strides = [1, 1]} : vector<56x128xf32> to vector<1x16xf32>
    %131 = vector.extract_strided_slice %93 {offsets = [34, 0], sizes = [1, 16], strides = [1, 1]} : vector<56x128xf32> to vector<1x16xf32>
    %132 = vector.extract_strided_slice %93 {offsets = [35, 0], sizes = [1, 16], strides = [1, 1]} : vector<56x128xf32> to vector<1x16xf32>
    %133 = vector.extract_strided_slice %93 {offsets = [36, 0], sizes = [1, 16], strides = [1, 1]} : vector<56x128xf32> to vector<1x16xf32>
    %134 = vector.extract_strided_slice %93 {offsets = [37, 0], sizes = [1, 16], strides = [1, 1]} : vector<56x128xf32> to vector<1x16xf32>
    %135 = vector.extract_strided_slice %93 {offsets = [38, 0], sizes = [1, 16], strides = [1, 1]} : vector<56x128xf32> to vector<1x16xf32>
    %136 = vector.extract_strided_slice %93 {offsets = [39, 0], sizes = [1, 16], strides = [1, 1]} : vector<56x128xf32> to vector<1x16xf32>
    %137 = vector.extract_strided_slice %93 {offsets = [40, 0], sizes = [1, 16], strides = [1, 1]} : vector<56x128xf32> to vector<1x16xf32>
    %138 = vector.extract_strided_slice %93 {offsets = [41, 0], sizes = [1, 16], strides = [1, 1]} : vector<56x128xf32> to vector<1x16xf32>
    %139 = vector.extract_strided_slice %93 {offsets = [42, 0], sizes = [1, 16], strides = [1, 1]} : vector<56x128xf32> to vector<1x16xf32>
    %140 = vector.extract_strided_slice %93 {offsets = [43, 0], sizes = [1, 16], strides = [1, 1]} : vector<56x128xf32> to vector<1x16xf32>
    %141 = vector.extract_strided_slice %93 {offsets = [44, 0], sizes = [1, 16], strides = [1, 1]} : vector<56x128xf32> to vector<1x16xf32>
    %142 = vector.extract_strided_slice %93 {offsets = [45, 0], sizes = [1, 16], strides = [1, 1]} : vector<56x128xf32> to vector<1x16xf32>
    %143 = vector.extract_strided_slice %93 {offsets = [46, 0], sizes = [1, 16], strides = [1, 1]} : vector<56x128xf32> to vector<1x16xf32>
    %144 = vector.extract_strided_slice %93 {offsets = [47, 0], sizes = [1, 16], strides = [1, 1]} : vector<56x128xf32> to vector<1x16xf32>
    %145 = vector.extract_strided_slice %93 {offsets = [48, 0], sizes = [1, 16], strides = [1, 1]} : vector<56x128xf32> to vector<1x16xf32>
    %146 = vector.extract_strided_slice %93 {offsets = [49, 0], sizes = [1, 16], strides = [1, 1]} : vector<56x128xf32> to vector<1x16xf32>
    %147 = tpu.concatenate %122, %123, %124, %125, %126, %127, %128, %129, %130, %131, %132, %133, %134, %135, %136, %137 in 1 : vector<1x16xf32>, vector<1x16xf32>, vector<1x16xf32>, vector<1x16xf32>, vector<1x16xf32>, vector<1x16xf32>, vector<1x16xf32>, vector<1x16xf32>, vector<1x16xf32>, vector<1x16xf32>, vector<1x16xf32>, vector<1x16xf32>, vector<1x16xf32>, vector<1x16xf32>, vector<1x16xf32>, vector<1x16xf32> -> vector<1x256xf32>
    %148 = tpu.concatenate %138, %139, %140, %141, %142, %143, %144, %145, %146 in 1 : vector<1x16xf32>, vector<1x16xf32>, vector<1x16xf32>, vector<1x16xf32>, vector<1x16xf32>, vector<1x16xf32>, vector<1x16xf32>, vector<1x16xf32>, vector<1x16xf32> -> vector<1x144xf32>
    %149 = tpu.concatenate %147, %148 in 1 : vector<1x256xf32>, vector<1x144xf32> -> vector<1x400xf32>
    %150 = tpu.concatenate %121, %149 in 0 : vector<1x400xf32>, vector<1x400xf32> -> vector<2x400xf32>
    %cst_24 = arith.constant dense<0.000000e+00> : vector<400xf32>
    %151 = vector.multi_reduction <add>, %150, %cst_24 [0] : vector<2x400xf32> to vector<400xf32>
    %152 = vector.shape_cast %151 : vector<400xf32> to vector<1x400xf32>
    %cst_25 = arith.constant 2.000000e+00 : f32
    %153 = vector.broadcast %cst_25 : f32 to vector<1x400xf32>
    %154 = arith.divf %152, %153 : vector<1x400xf32>
    %155 = vector.broadcast %154 : vector<1x400xf32> to vector<2x400xf32>
    %156 = arith.subf %150, %155 : vector<2x400xf32>
    %157 = arith.mulf %156, %156 : vector<2x400xf32>
    %cst_26 = arith.constant dense<0.000000e+00> : vector<400xf32>
    %158 = vector.multi_reduction <add>, %157, %cst_26 [0] : vector<2x400xf32> to vector<400xf32>
    %159 = vector.shape_cast %158 : vector<400xf32> to vector<1x400xf32>
    %cst_27 = arith.constant 2.000000e+00 : f32
    %160 = vector.broadcast %cst_27 : f32 to vector<1x400xf32>
    %161 = arith.divf %159, %160 : vector<1x400xf32>
    %162 = vector.broadcast %154 : vector<1x400xf32> to vector<2x400xf32>
    %163 = arith.subf %150, %162 : vector<2x400xf32>
    %cst_28 = arith.constant 9.99999974E-6 : f32
    %164 = vector.broadcast %cst_28 : f32 to vector<1x400xf32>
    %165 = arith.addf %161, %164 : vector<1x400xf32>
    %166 = math.rsqrt %165 : vector<1x400xf32>
    %167 = vector.broadcast %166 : vector<1x400xf32> to vector<2x400xf32>
    %168 = arith.mulf %163, %167 : vector<2x400xf32>
    %c0_29 = arith.constant 0 : index
    %c0_30 = arith.constant 0 : index
    %169 = vector.load %arg6[%c0_29, %c0_30] : memref<1x400xf32, #tpu.memory_space<vmem>>, vector<1x400xf32>
    %170 = vector.broadcast %169 : vector<1x400xf32> to vector<2x400xf32>
    %171 = arith.mulf %168, %170 : vector<2x400xf32>
    %c0_31 = arith.constant 0 : index
    %c0_32 = arith.constant 0 : index
    %172 = vector.load %arg7[%c0_31, %c0_32] : memref<1x400xf32, #tpu.memory_space<vmem>>, vector<1x400xf32>
    %173 = vector.broadcast %172 : vector<1x400xf32> to vector<2x400xf32>
    %174 = arith.addf %171, %173 : vector<2x400xf32>
    %175 = math.absf %174 : vector<2x400xf32>
    %cst_33 = arith.constant dense<0.000000e+00> : vector<2xf32>
    %176 = vector.multi_reduction <add>, %175, %cst_33 [1] : vector<2x400xf32> to vector<2xf32>
    %177 = vector.shape_cast %176 : vector<2xf32> to vector<2x1xf32>
    %cst_34 = arith.constant 2.500000e-03 : f32
    %178 = vector.broadcast %cst_34 : f32 to vector<2x1xf32>
    %179 = arith.mulf %177, %178 : vector<2x1xf32>
    %cst_35 = arith.constant 0.000000e+00 : f32
    %180 = vector.broadcast %cst_35 : f32 to vector<2x400xf32>
    %181 = arith.cmpf ogt, %174, %180 : vector<2x400xf32>
    %cst_36 = arith.constant 0.000000e+00 : f32
    %182 = vector.broadcast %cst_36 : f32 to vector<2x400xf32>
    %183 = arith.cmpf olt, %174, %182 : vector<2x400xf32>
    %cst_37 = arith.constant -1.000000e+00 : f32
    %cst_38 = arith.constant 0.000000e+00 : f32
    %184 = vector.broadcast %cst_37 : f32 to vector<2x400xf32>
    %185 = vector.broadcast %cst_38 : f32 to vector<2x400xf32>
    %186 = arith.select %183, %184, %185 : vector<2x400xi1>, vector<2x400xf32>
    %cst_39 = arith.constant 1.000000e+00 : f32
    %187 = vector.broadcast %cst_39 : f32 to vector<2x400xf32>
    %188 = arith.select %181, %187, %186 : vector<2x400xi1>, vector<2x400xf32>
    %189 = arith.truncf %188 : vector<2x400xf32> to vector<2x400xbf16>
    %c0_40 = arith.constant 0 : index
    %c0_41 = arith.constant 0 : index
    %190 = vector.load %arg8[%c0_40, %c0_41] : memref<400x128xbf16, #tpu.memory_space<vmem>>, vector<400x128xbf16>
    %cst_42 = arith.constant dense<0.000000e+00> : vector<2x128xf32>
    %191 = tpu.matmul %189, %190, %cst_42 {dimension_numbers = #tpu.dot_dimension_numbers<[1], [0], [0], [1], [0, 0, 1, 1], [], []>} : vector<2x400xbf16>, vector<400x128xbf16>, vector<2x128xf32> -> vector<2x128xf32>
    %192 = vector.broadcast %179 : vector<2x1xf32> to vector<2x128xf32>
    %193 = arith.mulf %191, %192 : vector<2x128xf32>
    %c0_43 = arith.constant 0 : index
    %c0_44 = arith.constant 0 : index
    %194 = vector.load %arg9[%c0_43, %c0_44] : memref<1x128xf32, #tpu.memory_space<vmem>>, vector<1x128xf32>
    %195 = vector.broadcast %194 : vector<1x128xf32> to vector<2x128xf32>
    %196 = arith.addf %193, %195 : vector<2x128xf32>
    %cst_45 = arith.constant 0.000000e+00 : f32
    %197 = vector.broadcast %cst_45 : f32 to vector<2x128xf32>
    %198 = arith.maximumf %196, %197 : vector<2x128xf32>
    %cst_46 = arith.constant dense<0.000000e+00> : vector<128xf32>
    %199 = vector.multi_reduction <add>, %198, %cst_46 [0] : vector<2x128xf32> to vector<128xf32>
    %200 = vector.shape_cast %199 : vector<128xf32> to vector<1x128xf32>
    %cst_47 = arith.constant 2.000000e+00 : f32
    %201 = vector.broadcast %cst_47 : f32 to vector<1x128xf32>
    %202 = arith.divf %200, %201 : vector<1x128xf32>
    %203 = vector.broadcast %202 : vector<1x128xf32> to vector<2x128xf32>
    %204 = arith.subf %198, %203 : vector<2x128xf32>
    %205 = arith.mulf %204, %204 : vector<2x128xf32>
    %cst_48 = arith.constant dense<0.000000e+00> : vector<128xf32>
    %206 = vector.multi_reduction <add>, %205, %cst_48 [0] : vector<2x128xf32> to vector<128xf32>
    %207 = vector.shape_cast %206 : vector<128xf32> to vector<1x128xf32>
    %cst_49 = arith.constant 2.000000e+00 : f32
    %208 = vector.broadcast %cst_49 : f32 to vector<1x128xf32>
    %209 = arith.divf %207, %208 : vector<1x128xf32>
    %210 = vector.broadcast %202 : vector<1x128xf32> to vector<2x128xf32>
    %211 = arith.subf %198, %210 : vector<2x128xf32>
    %cst_50 = arith.constant 9.99999974E-6 : f32
    %212 = vector.broadcast %cst_50 : f32 to vector<1x128xf32>
    %213 = arith.addf %209, %212 : vector<1x128xf32>
    %214 = math.rsqrt %213 : vector<1x128xf32>
    %215 = vector.broadcast %214 : vector<1x128xf32> to vector<2x128xf32>
    %216 = arith.mulf %211, %215 : vector<2x128xf32>
    %c0_51 = arith.constant 0 : index
    %c0_52 = arith.constant 0 : index
    %217 = vector.load %arg10[%c0_51, %c0_52] : memref<1x128xf32, #tpu.memory_space<vmem>>, vector<1x128xf32>
    %218 = vector.broadcast %217 : vector<1x128xf32> to vector<2x128xf32>
    %219 = arith.mulf %216, %218 : vector<2x128xf32>
    %c0_53 = arith.constant 0 : index
    %c0_54 = arith.constant 0 : index
    %220 = vector.load %arg11[%c0_53, %c0_54] : memref<1x128xf32, #tpu.memory_space<vmem>>, vector<1x128xf32>
    %221 = vector.broadcast %220 : vector<1x128xf32> to vector<2x128xf32>
    %222 = arith.addf %219, %221 : vector<2x128xf32>
    %223 = math.absf %222 : vector<2x128xf32>
    %cst_55 = arith.constant dense<0.000000e+00> : vector<2xf32>
    %224 = vector.multi_reduction <add>, %223, %cst_55 [1] : vector<2x128xf32> to vector<2xf32>
    %225 = vector.shape_cast %224 : vector<2xf32> to vector<2x1xf32>
    %cst_56 = arith.constant 2.000000e-02 : f32
    %226 = vector.broadcast %cst_56 : f32 to vector<2x1xf32>
    %227 = arith.mulf %225, %226 : vector<2x1xf32>
    %cst_57 = arith.constant 0.000000e+00 : f32
    %228 = vector.broadcast %cst_57 : f32 to vector<2x128xf32>
    %229 = arith.cmpf ogt, %222, %228 : vector<2x128xf32>
    %cst_58 = arith.constant 0.000000e+00 : f32
    %230 = vector.broadcast %cst_58 : f32 to vector<2x128xf32>
    %231 = arith.cmpf olt, %222, %230 : vector<2x128xf32>
    %cst_59 = arith.constant -1.000000e+00 : f32
    %cst_60 = arith.constant 0.000000e+00 : f32
    %232 = vector.broadcast %cst_59 : f32 to vector<2x128xf32>
    %233 = vector.broadcast %cst_60 : f32 to vector<2x128xf32>
    %234 = arith.select %231, %232, %233 : vector<2x128xi1>, vector<2x128xf32>
    %cst_61 = arith.constant 1.000000e+00 : f32
    %235 = vector.broadcast %cst_61 : f32 to vector<2x128xf32>
    %236 = arith.select %229, %235, %234 : vector<2x128xi1>, vector<2x128xf32>
    %237 = arith.truncf %236 : vector<2x128xf32> to vector<2x128xbf16>
    %c0_62 = arith.constant 0 : index
    %c0_63 = arith.constant 0 : index
    %238 = vector.load %arg12[%c0_62, %c0_63] : memref<128x128xbf16, #tpu.memory_space<vmem>>, vector<128x128xbf16>
    %cst_64 = arith.constant dense<0.000000e+00> : vector<2x128xf32>
    %239 = tpu.matmul %237, %238, %cst_64 {dimension_numbers = #tpu.dot_dimension_numbers<[1], [0], [0], [1], [0, 0, 1, 1], [], []>} : vector<2x128xbf16>, vector<128x128xbf16>, vector<2x128xf32> -> vector<2x128xf32>
    %240 = vector.broadcast %227 : vector<2x1xf32> to vector<2x128xf32>
    %241 = arith.mulf %239, %240 : vector<2x128xf32>
    %c0_65 = arith.constant 0 : index
    %c0_66 = arith.constant 0 : index
    %242 = vector.load %arg13[%c0_65, %c0_66] : memref<1x128xf32, #tpu.memory_space<vmem>>, vector<1x128xf32>
    %243 = vector.broadcast %242 : vector<1x128xf32> to vector<2x128xf32>
    %244 = arith.addf %241, %243 : vector<2x128xf32>
    %c0_67 = arith.constant 0 : index
    %c0_68 = arith.constant 0 : index
    %245 = vector.load %arg14[%c0_67, %c0_68] : memref<2x128xf32, #tpu.memory_space<vmem>>, vector<2x128xf32>
    tpu.vector_store %arg14[%c0_67, %c0_68], %244 {strides = array<i32>} : memref<2x128xf32, #tpu.memory_space<vmem>>, vector<2x128xf32>,
    return
  }
}

</mosaic_0001>

<bundles_post_ra>
// kernel: xnor_model.2
= control target key start
LH: loop header
LB: loop body
LE: loop exit
PB: predicated region body
PF: predicated region fallthrough
CT: control target
= control target key end

     0   :  { %vm35_vm0 = vcmask 228352   ;;  %vm2165_vm1 = vcmask 1043456   ;;  %vm2166_vm2 = vcmask 1044480   ;;  %vm701_vm3 = vcmask 203776   ;;  %s6651_s0 = inlined_call_operand.vmem [shape: f32[56,28], index: 0, kind: input, shape index: {}]   ;;  %s6652_s2 = inlined_call_operand.<no memory space> [shape: f32[1,1], index: 2, kind: input, shape index: {}]   ;;  %s6653_s3 = inlined_call_operand.<no memory space> [shape: f32[1,1], index: 3, kind: input, shape index: {}]   ;;  %s6654_s4 = inlined_call_operand.vmem [shape: bf16[25,128], index: 4, kind: input, shape index: {}]   ;;  %s6655_s1 = inlined_call_operand.vmem [shape: f32[1152,25], index: 1, kind: input, shape index: {}]   ;;  %s6656_s5 = inlined_call_operand.vmem [shape: f32[1,128], index: 5, kind: input, shape index: {}]   ;;  %s6657_s6 = inlined_call_operand.vmem [shape: f32[288,128], index: 6, kind: output, shape index: {}]  }
   0x1   :  { %v28_v0 = vld [vmem:[%s6651_s0] sm:$0xff]  ;;  %v29_v1 = vld [vmem:[%s6651_s0 + $0x8] sm:$0xff]  ;;  %v30_v2 = vld [vmem:[%s6651_s0 + $0x10] sm:$0xff] }
   0x2   :  { %v31_v3 = vld [vmem:[%s6651_s0 + $0x18] sm:$0xff]  ;;  %v36_v4 = vsel %vm35_vm0, %v28_v0, 0.0  ;;  %v37_v5 = vsel %vm35_vm0, %v29_v1, 0.0  ;;  %v39_v6 = vsel %vm35_vm0, %v30_v2, 0.0  ;;  %v32_v7 = vld [vmem:[%s6651_s0 + $0x20] sm:$0xff]  ;;  %v33_v10 = vld [vmem:[%s6651_s0 + $0x28] sm:$0xff] }
   0x3   :  { %v38_v8 = vadd.f32 %v37_v5, %v36_v4  ;;  %v41_v9 = vsel %vm35_vm0, %v31_v3, 0.0  ;;  %v43_v12 = vsel %vm35_vm0, %v32_v7, 0.0  ;;  %v34_v13 = vld [vmem:[%s6651_s0 + $0x30] sm:$0xff]  ;;  %v45_v15 = vsel %vm35_vm0, %v33_v10, 0.0 }
   0x4   :  { %v47_v17 = vsel %vm35_vm0, %v34_v13, 0.0 }
   0x5   :  { %v40_v11 = vadd.f32 %v39_v6, %v38_v8 }
   0x7   :  { %v42_v14 = vadd.f32 %v41_v9, %v40_v11 }
   0x9   :  { %v44_v16 = vadd.f32 %v43_v12, %v42_v14  ;;  %v3523_v14 = vld [vmem:[%s6654_s4 + $0x8] sm:$0x1f]  }
   0xb   :  { %v46_v18 = vadd.f32 %v45_v15, %v44_v16 }
   0xd   :  { %v48_v19 = vadd.f32 %v47_v17, %v46_v18  ;;  %v3529_v17 = vmov 65535  }
   0xe   :  { %v2167_v18 = vsel %vm2165_vm1, 4294967295, %v3529_v17 }
   0xf   :  { %v49_v20 = vrot.slane %v48_v19, 4 }
  0x11   :  { %v50_v21 = vadd.f32 %v49_v20, %v48_v19  ;;  %v2168_v19 = vsel %vm2166_vm2, %v2167_v18, 0 }
  0x13   :  { %v51_v22 = vrot.slane %v50_v21, 2 }
  0x15   :  { %v52_v23 = vadd.f32 %v51_v22, %v50_v21  ;;  %v2170_v21 = vand.u32 %v3523_v14, %v2168_v19  ;;  %v3524_v22 = vld [vmem:[%s6654_s4] sm:$0xff]  }
  0x17   :  { %v53_v24 = vrot.slane %v52_v23, 1  ;;  %3366 = vmatprep.subr.bf16.mxu0 %v2170_v21  ;;  %3514 = vmatprep.subr.bf16.mxu1 %v2170_v21 }
  0x18   :  { %3367 = vmatpush3.bf16.msra.mxu0 %v2170_v21  ;;  %3516 = vmatpush3.bf16.msra.mxu1 %v2170_v21 }
  0x19   :  { %v54_v25 = vadd.f32 %v53_v24, %v52_v23  ;;  %3368 = vmatprep.subr.bf16.mxu0 %v3524_v22  ;;  %3515 = vmatprep.subr.bf16.mxu1 %v3524_v22  ;;  %v108_v24 = vld [vmem:[%s6655_s1 + $0x8] sm:$0xff] }
  0x1b   :  { %v56_v26 = vmul.f32 0.017857144, %v54_v25  ;;  %v107_v25 = vld [vmem:[%s6655_s1] sm:$0xff] }
  0x1c   :  { %3369 = vmatpush3.bf16.msra.mxu0 %v3524_v22  ;;  %3517 = vmatpush3.bf16.msra.mxu1 %v3524_v22 }
  0x1d   :  { %v57_v27 = vsel %vm35_vm0, %v56_v26, 0.0  ;;  %v179_v26 = vld [vmem:[%s6655_s1 + $0x240] sm:$0xff] }
  0x1e   :  { %58 = vadd.xlane.f32.xlu0 %v57_v27  ;;  %v180_v27 = vld [vmem:[%s6655_s1 + $0x248] sm:$0xff] }
  0xa7   :  { %v59_v28 = vpop.xlane.xlu0 %58 }
  0xa8   :  { %v61_v29 = vmul.f32 0.035714287, %v59_v28  ;;  %v109_v28 = vld [vmem:[%s6655_s1 + $0x10] sm:$0xff] }
  0xaa   :  { %v62_v30 = vsub.f32 %v28_v0, %v61_v29  ;;  %v63_v31 = vsub.f32 %v29_v1, %v61_v29  ;;  %v64_v32 = vsub.f32 %v30_v2, %v61_v29  ;;  %v65_v33 = vsub.f32 %v31_v3, %v61_v29 }
  0xab   :  { %v66_v34 = vsub.f32 %v32_v7, %v61_v29  ;;  %v67_v38 = vsub.f32 %v33_v10, %v61_v29  ;;  %v68_v43 = vsub.f32 %v34_v13, %v61_v29  ;;  %v3528_v1 = vmov 0  }
  0xac   :  { %v69_v35 = vmul.f32 %v62_v30, %v62_v30  ;;  %v70_v36 = vmul.f32 %v63_v31, %v63_v31  ;;  %v71_v37 = vmul.f32 %v64_v32, %v64_v32  ;;  %v72_v39 = vmul.f32 %v65_v33, %v65_v33  ;;  %3521 = vset.pattern.permute.xlu1 %v3528_v1  ;;  %v181_v30 = vld [vmem:[%s6655_s1 + $0x250] sm:$0xff]  ;;  %v182_v31 = vld [vmem:[%s6655_s1 + $0x258] sm:$0xff]  ;;  %v183_v32 = vld [vmem:[%s6655_s1 + $0x260] sm:$0xff] }
  0xad   :  { %v73_v44 = vmul.f32 %v66_v34, %v66_v34  ;;  %v74_v47 = vmul.f32 %v67_v38, %v67_v38  ;;  %v75_v50 = vmul.f32 %v68_v43, %v68_v43  ;;  %v11_v2 = vstv %s6652_s2  ;;  %3522 = vset.pattern.permute.xlu0 %v3528_v1  ;;  %v184_v33 = vld [vmem:[%s6655_s1 + $0x268] sm:$0xff]  ;;  %v113_v43 = vld [vmem:[%s6655_s1 + $0x30] sm:$0xff] }
  0xae   :  { %v76_v40 = vsel %vm35_vm0, %v69_v35, 0.0  ;;  %v77_v41 = vsel %vm35_vm0, %v70_v36, 0.0  ;;  %v79_v45 = vsel %vm35_vm0, %v71_v37, 0.0  ;;  %v81_v48 = vsel %vm35_vm0, %v72_v39, 0.0  ;;  %12 = vst [vmem:[#allocation2] sm:$0x1] %v11_v2 }
  0xaf   :  { %v78_v42 = vadd.f32 %v77_v41, %v76_v40  ;;  %v83_v51 = vsel %vm35_vm0, %v73_v44, 0.0  ;;  %v85_v53 = vsel %vm35_vm0, %v74_v47, 0.0  ;;  %v87_v55 = vsel %vm35_vm0, %v75_v50, 0.0  ;;  %v118_v35 = vld [vmem:[%s6655_s1 + $0x58] sm:$0xff]  ;;  %v111_v36 = vld [vmem:[%s6655_s1 + $0x20] sm:$0xff]  ;;  %v112_v37 = vld [vmem:[%s6655_s1 + $0x28] sm:$0xff] }
  0xb0   :  { %v13_v3 = vstv %s6653_s3  ;;  %v252_v7 = vlaneseq  ;;  %v114_v44 = vld [vmem:[%s6655_s1 + $0x38] sm:$0xff] }
  0xb1   :  { %v80_v46 = vadd.f32 %v79_v45, %v78_v42  ;;  %14 = vst [vmem:[#allocation3] sm:$0x1] %v13_v3  ;;  %v120_v42 = vld [vmem:[%s6655_s1 + $0x68] sm:$0xff] }
  0xb2   :  { %v253_v8 = vshrl.u32 %v252_v7, 7 }
  0xb3   :  { %v82_v49 = vadd.f32 %v81_v48, %v80_v46 }
  0xb4   :  { %v254_v10 = vsub.s32 0, %v253_v8 }
  0xb5   :  { %v84_v52 = vadd.f32 %v83_v51, %v82_v49  ;;  %v100_v9 = vld [vmem:[#allocation2] sm:$0x1] }
  0xb7   :  { %v86_v54 = vadd.f32 %v85_v53, %v84_v52 }
  0xb8   :  { %v104_v13 = vld [vmem:[#allocation3] sm:$0x1] }
  0xb9   :  { %v88_v56 = vadd.f32 %v87_v55, %v86_v54 }
  0xbb   :  { %v89_v57 = vrot.slane %v88_v56, 4 }
  0xbd   :  { %v90_v58 = vadd.f32 %v89_v57, %v88_v56 }
  0xbf   :  { %v91_v59 = vrot.slane %v90_v58, 2 }
  0xc1   :  { %v92_v60 = vadd.f32 %v91_v59, %v90_v58 }
  0xc3   :  { %v93_v61 = vrot.slane %v92_v60, 1 }
  0xc5   :  { %v94_v62 = vadd.f32 %v93_v61, %v92_v60 }
  0xc7   :  { %v95_v63 = vmul.f32 0.017857144, %v94_v62 }
  0xc9   :  { %v96_v0 = vsel %vm35_vm0, %v95_v63, 0.0 }
  0xca   :  { %97 = vadd.xlane.f32.xlu0 %v96_v0 }
 0x153   :  { %v98_v4 = vpop.xlane.xlu0 %97 }
 0x154   :  { %v99_v5 = vmul.f32 0.035714287, %v98_v4 }
 0x156   :  { %v101_v6 = vadd.f32 1e-05, %v99_v5 }
 0x158   :  { %3525 = vrsqrt.f32 %v101_v6  ;;  %v6670_v6 = vmov 0.0  }
 0x165   :  { %v3526_v11 = vpop.eup %3525 }
 0x166   :  { %v103_v12 = vmul.f32 %v3526_v11, %v100_v9 }
 0x168   :  { %v255_v15 = vrot.slane %v103_v12, %v254_v10  ;;  %v105_v16 = vmul.f32 %v103_v12, %v61_v29  ;;  %v110_v29 = vld [vmem:[%s6655_s1 + $0x18] sm:$0xff] }
 0x16a   :  { %257 = vperm.xlu1 %3521, %v255_v15   ;;  %v106_v20 = vsub.f32 %v104_v13, %v105_v16 }
 0x16c   :  { %v408_v23 = vrot.slane %v106_v20, %v254_v10 }
 0x16e   :  { %410 = vperm.xlu1 %3521, %v408_v23  }
 0x1e5   :  { %v3645_v34 = vpop.permute.xlu1 %257 }
 0x1e6   :  { %v261_v38 = vmul.f32 %v3645_v34, %v108_v24  ;;  %v260_v39 = vmul.f32 %v3645_v34, %v107_v25  ;;  %v332_v40 = vmul.f32 %v3645_v34, %v179_v26  ;;  %v333_v41 = vmul.f32 %v3645_v34, %v180_v27 }
 0x1e7   :  { %v262_v45 = vmul.f32 %v3645_v34, %v109_v28  ;;  %v263_v46 = vmul.f32 %v3645_v34, %v110_v29  ;;  %v334_v47 = vmul.f32 %v3645_v34, %v181_v30  ;;  %v335_v48 = vmul.f32 %v3645_v34, %v182_v31 }
 0x1e8   :  { %v336_v49 = vmul.f32 %v3645_v34, %v183_v32  ;;  %v337_v50 = vmul.f32 %v3645_v34, %v184_v33  ;;  %v3676_v51 = vmul.f32 %v3645_v34, %v118_v35  ;;  %v3679_v52 = vmul.f32 %v3645_v34, %v111_v36 }
 0x1e9   :  { %v3681_v53 = vpop.permute.xlu1 %410  ;;  %v3684_v54 = vmul.f32 %v3645_v34, %v112_v37  ;;  %v3687_v55 = vmul.f32 %v3645_v34, %v120_v42  ;;  %v3690_v56 = vmul.f32 %v3645_v34, %v113_v43  ;;  %v3693_v57 = vmul.f32 %v3645_v34, %v114_v44  ;;  %v185_v42 = vld [vmem:[%s6655_s1 + $0x270] sm:$0xff] }
 0x1ea   :  { %v414_v58 = vadd.f32 %v3681_v53, %v261_v38  ;;  %v413_v59 = vadd.f32 %v3681_v53, %v260_v39  ;;  %v3698_v60 = vadd.f32 %v3681_v53, %v332_v40  ;;  %v3701_v61 = vadd.f32 %v3681_v53, %v333_v41 }
 0x1eb   :  { %v3704_v62 = vadd.f32 %v3681_v53, %v262_v45  ;;  %v3707_v63 = vadd.f32 %v3681_v53, %v263_v46  ;;  %v3710_v0 = vadd.f32 %v3681_v53, %v334_v47  ;;  %v3713_v1 = vadd.f32 %v3681_v53, %v335_v48  ;;  %v186_v45 = vld [vmem:[%s6655_s1 + $0x278] sm:$0xff] }
 0x1ec   :  { %v558_v2 = vand.u32 2147483647, %v414_v58  ;;  %v557_v3 = vand.u32 2147483647, %v413_v59  ;;  %vm1279_vm4 = vcmp.gt.f32.partialorder %v413_v59, 0.0  ;;  %vm1280_vm5 = vcmp.gt.f32.partialorder %v414_v58, 0.0 }
 0x1ed   :  { %vm1423_vm6 = vcmp.lt.f32.partialorder %v413_v59, 0.0  ;;  %vm1424_vm7 = vcmp.lt.f32.partialorder %v414_v58, 0.0  ;;  %vm1351_vm8 = vcmp.gt.f32.partialorder %v3698_v60, 0.0  ;;  %vm1352_vm9 = vcmp.gt.f32.partialorder %v3701_v61, 0.0 }
 0x1ee   :  { %v705_v4 = vsel %vm701_vm3, %v558_v2, 0.0  ;;  %v702_v5 = vsel %vm701_vm3, %v557_v3, 0.0  ;;  %v1567_v7 = vsel %vm1423_vm6, -1.0, %v6670_v6  ;;  %v1568_v8 = vsel %vm1424_vm7, -1.0, %v6670_v6 }
 0x1ef   :  { %706 = vadd.xlane.f32.xlu1 %v705_v4  ;;  %703 = vadd.xlane.f32.xlu0 %v702_v5  ;;  %v1711_v9 = vsel %vm1279_vm4, 1.0, %v1567_v7  ;;  %v1712_v10 = vsel %vm1280_vm5, 1.0, %v1568_v8  ;;  %vm1495_vm10 = vcmp.lt.f32.partialorder %v3698_v60, 0.0  ;;  %vm1496_vm11 = vcmp.lt.f32.partialorder %v3701_v61, 0.0 }
 0x1f0   :  { %v1855_v11 = vpack.c.bf16 %v1712_v10, %v1711_v9  ;;  %v1639_v12 = vsel %vm1495_vm10, -1.0, %v6670_v6  ;;  %v1640_v13 = vsel %vm1496_vm11, -1.0, %v6670_v6  ;;  %vm1281_vm12 = vcmp.gt.f32.partialorder %v3704_v62, 0.0  ;;  %v122_v10 = vld [vmem:[%s6655_s1 + $0x78] sm:$0xff] }
 0x1f1   :  { %v1783_v14 = vsel %vm1351_vm8, 1.0, %v1639_v12  ;;  %v1784_v15 = vsel %vm1352_vm9, 1.0, %v1640_v13  ;;  %vm1282_vm13 = vcmp.gt.f32.partialorder %v3707_v63, 0.0  ;;  %vm1425_vm14 = vcmp.lt.f32.partialorder %v3704_v62, 0.0 }
 0x1f2   :  { %3370 = vmatprep.mubr.msk.bf16.mxu0 %vm701_vm3, %v1855_v11  ;;  %v1891_v16 = vpack.c.bf16 %v1784_v15, %v1783_v14  ;;  %vm1426_vm15 = vcmp.lt.f32.partialorder %v3707_v63, 0.0  ;;  %v1569_v17 = vsel %vm1425_vm14, -1.0, %v6670_v6  ;;  %vm1353_vm0 = vcmp.gt.f32.partialorder %v3710_v0, 0.0  ;;  %v115_v11 = vld [vmem:[%s6655_s1 + $0x40] sm:$0xff] }
 0x1f3   :  { %v1570_v18 = vsel %vm1426_vm15, -1.0, %v6670_v6  ;;  %v1713_v19 = vsel %vm1281_vm12, 1.0, %v1569_v17  ;;  %vm1354_vm1 = vcmp.gt.f32.partialorder %v3713_v1, 0.0  ;;  %vm1497_vm2 = vcmp.lt.f32.partialorder %v3710_v0, 0.0 }
 0x1f4   :  { %3442 = vmatprep.mubr.msk.bf16.mxu1 %vm701_vm3, %v1891_v16  ;;  %v1714_v20 = vsel %vm1282_vm13, 1.0, %v1570_v18  ;;  %vm1498_vm4 = vcmp.lt.f32.partialorder %v3713_v1, 0.0  ;;  %v1641_v21 = vsel %vm1497_vm2, -1.0, %v6670_v6  ;;  %v3743_v22 = vadd.f32 %v3681_v53, %v336_v49 }
 0x1f5   :  { %v1856_v23 = vpack.c.bf16 %v1714_v20, %v1713_v19  ;;  %v1642_v24 = vsel %vm1498_vm4, -1.0, %v6670_v6  ;;  %v1785_v25 = vsel %vm1353_vm0, 1.0, %v1641_v21  ;;  %v3747_v26 = vadd.f32 %v3681_v53, %v337_v50  ;;  %v116_v19 = vld [vmem:[%s6655_s1 + $0x48] sm:$0xff] }
 0x1f6   :  { %v1786_v27 = vsel %vm1354_vm1, 1.0, %v1642_v24  ;;  %vm1355_vm5 = vcmp.gt.f32.partialorder %v3743_v22, 0.0  ;;  %vm1499_vm6 = vcmp.lt.f32.partialorder %v3743_v22, 0.0  ;;  %v3753_v28 = vadd.f32 %v3681_v53, %v3676_v51 }
 0x1f7   :  { %3371 = vmatmul.mubr.msk.bf16.vlgmr.msra.gmra.mxu0 %vm701_vm3, %v1856_v23  ;;  %v1892_v29 = vpack.c.bf16 %v1786_v27, %v1785_v25  ;;  %vm1356_vm7 = vcmp.gt.f32.partialorder %v3747_v26, 0.0  ;;  %vm1500_vm8 = vcmp.lt.f32.partialorder %v3747_v26, 0.0  ;;  %v1643_v30 = vsel %vm1499_vm6, -1.0, %v6670_v6  ;;  %v124_v23 = vld [vmem:[%s6655_s1 + $0x88] sm:$0xff] }
 0x1f8   :  { %v1644_v31 = vsel %vm1500_vm8, -1.0, %v6670_v6  ;;  %v1787_v32 = vsel %vm1355_vm5, 1.0, %v1643_v30  ;;  %v568_v33 = vand.u32 2147483647, %v3753_v28  ;;  %v3763_v35 = vadd.f32 %v3681_v53, %v3679_v52 }
 0x1f9   :  { %3443 = vmatmul.mubr.msk.bf16.vlgmr.msra.gmra.mxu1 %vm701_vm3, %v1892_v29  ;;  %v1788_v36 = vsel %vm1356_vm7, 1.0, %v1644_v31  ;;  %v3768_v37 = vadd.f32 %v3681_v53, %v3684_v54  ;;  %v559_v38 = vand.u32 2147483647, %v3704_v62  ;;  %v3773_v39 = vadd.f32 %v3681_v53, %v3687_v55 }
 0x1fa   :  { %v1893_v40 = vpack.c.bf16 %v1788_v36, %v1787_v32  ;;  %v735_v41 = vsel %vm701_vm3, %v568_v33, 0.0  ;;  %vm1283_vm9 = vcmp.gt.f32.partialorder %v3763_v35, 0.0  ;;  %vm1427_vm10 = vcmp.lt.f32.partialorder %v3763_v35, 0.0 }
 0x1fb   :  { %736 = vadd.xlane.f32.xlu1 %v735_v41  ;;  %vm1284_vm11 = vcmp.gt.f32.partialorder %v3768_v37, 0.0  ;;  %vm1428_vm12 = vcmp.lt.f32.partialorder %v3768_v37, 0.0  ;;  %v1571_v43 = vsel %vm1427_vm10, -1.0, %v6670_v6  ;;  %v708_v44 = vsel %vm701_vm3, %v559_v38, 0.0 }
 0x1fc   :  { %3446 = vmatprep.mubr.msk.bf16.mxu1 %vm701_vm3, %v1893_v40  ;;  %v1572_v46 = vsel %vm1428_vm12, -1.0, %v6670_v6  ;;  %v1715_v47 = vsel %vm1283_vm9, 1.0, %v1571_v43  ;;  %709 = vadd.xlane.f32.xlu0 %v708_v44  ;;  %v570_v48 = vand.u32 2147483647, %v3773_v39  ;;  %v560_v49 = vand.u32 2147483647, %v3707_v63 }
 0x1fd   :  { %v1716_v50 = vsel %vm1284_vm11, 1.0, %v1572_v46  ;;  %v3794_v51 = vadd.f32 %v3681_v53, %v3690_v56  ;;  %v3798_v52 = vadd.f32 %v3681_v53, %v3693_v57  ;;  %v338_v54 = vmul.f32 %v3645_v34, %v185_v42  ;;  %v187_v63 = vld [vmem:[%s6655_s1 + $0x280] sm:$0xff]  ;;  %v188_v56 = vld [vmem:[%s6655_s1 + $0x288] sm:$0xff]  ;;  %v117_v43 = vld [vmem:[%s6655_s1 + $0x50] sm:$0xff] }
 0x1fe   :  { %v1857_v55 = vpack.c.bf16 %v1716_v50, %v1715_v47  ;;  %v741_v58 = vsel %vm701_vm3, %v570_v48, 0.0  ;;  %v711_v59 = vsel %vm701_vm3, %v560_v49, 0.0  ;;  %v339_v62 = vmul.f32 %v3645_v34, %v186_v45  ;;  %v189_v47 = vld [vmem:[%s6655_s1 + $0x290] sm:$0xff] }
 0x1ff   :  { %742 = vadd.xlane.f32.xlu1 %v741_v58  ;;  %vm1285_vm13 = vcmp.gt.f32.partialorder %v3794_v51, 0.0  ;;  %vm1286_vm14 = vcmp.gt.f32.partialorder %v3798_v52, 0.0  ;;  %vm1429_vm15 = vcmp.lt.f32.partialorder %v3794_v51, 0.0  ;;  %vm1430_vm0 = vcmp.lt.f32.partialorder %v3798_v52, 0.0  ;;  %v190_v58 = vld [vmem:[%s6655_s1 + $0x298] sm:$0xff] }
 0x200   :  { %3374 = vmatprep.mubr.msk.bf16.mxu0 %vm701_vm3, %v1857_v55  ;;  %712 = vadd.xlane.f32.xlu0 %v711_v59  ;;  %v1573_v57 = vsel %vm1429_vm15, -1.0, %v6670_v6  ;;  %v1574_v2 = vsel %vm1430_vm0, -1.0, %v6670_v6  ;;  %v3818_v3 = vadd.f32 %v3681_v53, %v338_v54  ;;  %v3821_v4 = vadd.f32 %v3681_v53, %v339_v62  ;;  %v191_v59 = vld [vmem:[%s6655_s1 + $0x2a0] sm:$0xff] }
 0x201   :  { %v1717_v5 = vsel %vm1285_vm13, 1.0, %v1573_v57  ;;  %v1718_v7 = vsel %vm1286_vm14, 1.0, %v1574_v2  ;;  %v340_v8 = vmul.f32 %v3645_v34, %v187_v63  ;;  %v341_v9 = vmul.f32 %v3645_v34, %v188_v56  ;;  %v192_v56 = vld [vmem:[%s6655_s1 + $0x2a8] sm:$0xff]  ;;  %v126_v57 = vld [vmem:[%s6655_s1 + $0x98] sm:$0xff] }
 0x202   :  { %v1858_v12 = vpack.c.bf16 %v1718_v7, %v1717_v5  ;;  %vm1357_vm1 = vcmp.gt.f32.partialorder %v3818_v3, 0.0  ;;  %vm1358_vm2 = vcmp.gt.f32.partialorder %v3821_v4, 0.0  ;;  %vm1501_vm4 = vcmp.lt.f32.partialorder %v3818_v3, 0.0 }
 0x203   :  { %vm1502_vm5 = vcmp.lt.f32.partialorder %v3821_v4, 0.0  ;;  %v1645_v13 = vsel %vm1501_vm4, -1.0, %v6670_v6  ;;  %v3837_v14 = vadd.f32 %v3681_v53, %v340_v8  ;;  %v3840_v15 = vadd.f32 %v3681_v53, %v341_v9 }
 0x204   :  { %3375 = vmatmul.mubr.msk.bf16.gmra.mxu0 %vm701_vm3, %v1858_v12  ;;  %v1646_v16 = vsel %vm1502_vm5, -1.0, %v6670_v6  ;;  %v1789_v17 = vsel %vm1357_vm1, 1.0, %v1645_v13  ;;  %v275_v18 = vmul.f32 %v3645_v34, %v122_v10  ;;  %v268_v20 = vmul.f32 %v3645_v34, %v115_v11 }
 0x205   :  { %v1790_v21 = vsel %vm1358_vm2, 1.0, %v1646_v16  ;;  %vm1359_vm6 = vcmp.gt.f32.partialorder %v3837_v14, 0.0  ;;  %vm1360_vm7 = vcmp.gt.f32.partialorder %v3840_v15, 0.0  ;;  %vm1503_vm8 = vcmp.lt.f32.partialorder %v3837_v14, 0.0 }
 0x206   :  { %v1894_v24 = vpack.c.bf16 %v1790_v21, %v1789_v17  ;;  %vm1504_vm9 = vcmp.lt.f32.partialorder %v3840_v15, 0.0  ;;  %v1647_v25 = vsel %vm1503_vm8, -1.0, %v6670_v6  ;;  %v3858_v27 = vadd.f32 %v3681_v53, %v275_v18 }
 0x207   :  { %v1648_v29 = vsel %vm1504_vm9, -1.0, %v6670_v6  ;;  %v1791_v30 = vsel %vm1359_vm6, 1.0, %v1647_v25  ;;  %v269_v31 = vmul.f32 %v3645_v34, %v116_v19  ;;  %v3863_v32 = vadd.f32 %v3681_v53, %v268_v20  ;;  %v119_v25 = vld [vmem:[%s6655_s1 + $0x60] sm:$0xff] }
 0x208   :  { %3447 = vmatmul.mubr.msk.bf16.gmra.mxu1 %vm701_vm3, %v1894_v24  ;;  %v1792_v33 = vsel %vm1360_vm7, 1.0, %v1648_v29  ;;  %v572_v36 = vand.u32 2147483647, %v3858_v27  ;;  %v561_v38 = vand.u32 2147483647, %v3763_v35  ;;  %v277_v40 = vmul.f32 %v3645_v34, %v124_v23 }
 0x209   :  { %v1895_v41 = vpack.c.bf16 %v1792_v33, %v1791_v30  ;;  %v3870_v42 = vadd.f32 %v3681_v53, %v269_v31  ;;  %vm1287_vm10 = vcmp.gt.f32.partialorder %v3863_v32, 0.0  ;;  %vm1431_vm11 = vcmp.lt.f32.partialorder %v3863_v32, 0.0 }
 0x20a   :  { %v747_v44 = vsel %vm701_vm3, %v572_v36, 0.0  ;;  %v1575_v45 = vsel %vm1431_vm11, -1.0, %v6670_v6  ;;  %v714_v35 = vsel %vm701_vm3, %v561_v38, 0.0  ;;  %v3881_v46 = vadd.f32 %v3681_v53, %v277_v40 }
 0x20b   :  { %3450 = vmatprep.mubr.msk.bf16.mxu1 %vm701_vm3, %v1895_v41  ;;  %748 = vadd.xlane.f32.xlu1 %v747_v44  ;;  %vm1288_vm12 = vcmp.gt.f32.partialorder %v3870_v42, 0.0  ;;  %vm1432_vm13 = vcmp.lt.f32.partialorder %v3870_v42, 0.0  ;;  %v1719_v48 = vsel %vm1287_vm10, 1.0, %v1575_v45  ;;  %v562_v49 = vand.u32 2147483647, %v3768_v37 }
 0x20c   :  { %v1576_v50 = vsel %vm1432_vm13, -1.0, %v6670_v6  ;;  %715 = vadd.xlane.f32.xlu0 %v714_v35  ;;  %v574_v54 = vand.u32 2147483647, %v3881_v46  ;;  %v270_v55 = vmul.f32 %v3645_v34, %v117_v43  ;;  %vm1290_vm14 = vcmp.gt.f32.partialorder %v3753_v28, 0.0  ;;  %v128_v43 = vld [vmem:[%s6655_s1 + $0xa8] sm:$0xff]  ;;  %v121_v35 = vld [vmem:[%s6655_s1 + $0x70] sm:$0xff] }
 0x20d   :  { %v1720_v62 = vsel %vm1288_vm12, 1.0, %v1576_v50  ;;  %v717_v37 = vsel %vm701_vm3, %v562_v49, 0.0  ;;  %vm1434_vm15 = vcmp.lt.f32.partialorder %v3753_v28, 0.0  ;;  %v342_v63 = vmul.f32 %v3645_v34, %v189_v47 }
 0x20e   :  { %v1859_v2 = vpack.c.bf16 %v1720_v62, %v1719_v48  ;;  %v753_v5 = vsel %vm701_vm3, %v574_v54, 0.0  ;;  %v3911_v7 = vadd.f32 %v3681_v53, %v270_v55  ;;  %v1578_v8 = vsel %vm1434_vm15, -1.0, %v6670_v6 }
 0x20f   :  { %754 = vadd.xlane.f32.xlu1 %v753_v5  ;;  %v1722_v28 = vsel %vm1290_vm14, 1.0, %v1578_v8  ;;  %v343_v9 = vmul.f32 %v3645_v34, %v190_v58  ;;  %v3916_v10 = vadd.f32 %v3681_v53, %v342_v63  ;;  %v344_v11 = vmul.f32 %v3645_v34, %v191_v59  ;;  %v193_v59 = vld [vmem:[%s6655_s1 + $0x2b0] sm:$0xff]  ;;  %v195_v8 = vld [vmem:[%s6655_s1 + $0x2c0] sm:$0xff] }
 0x210   :  { %3378 = vmatprep.mubr.msk.bf16.mxu0 %vm701_vm3, %v1859_v2  ;;  %718 = vadd.xlane.f32.xlu0 %v717_v37  ;;  %vm1289_vm0 = vcmp.gt.f32.partialorder %v3911_v7, 0.0  ;;  %vm1433_vm1 = vcmp.lt.f32.partialorder %v3911_v7, 0.0  ;;  %v345_v12 = vmul.f32 %v3645_v34, %v192_v56  ;;  %v279_v13 = vmul.f32 %v3645_v34, %v126_v57  ;;  %v194_v37 = vld [vmem:[%s6655_s1 + $0x2b8] sm:$0xff] }
 0x211   :  { %v1577_v16 = vsel %vm1433_vm1, -1.0, %v6670_v6  ;;  %v3926_v17 = vadd.f32 %v3681_v53, %v343_v9  ;;  %vm1361_vm2 = vcmp.gt.f32.partialorder %v3916_v10, 0.0  ;;  %vm1505_vm4 = vcmp.lt.f32.partialorder %v3916_v10, 0.0 }
 0x212   :  { %v1721_v18 = vsel %vm1289_vm0, 1.0, %v1577_v16  ;;  %v1649_v19 = vsel %vm1505_vm4, -1.0, %v6670_v6  ;;  %v3932_v20 = vadd.f32 %v3681_v53, %v344_v11  ;;  %v3935_v21 = vadd.f32 %v3681_v53, %v345_v12 }
 0x213   :  { %v1860_v23 = vpack.c.bf16 %v1722_v28, %v1721_v18  ;;  %vm1362_vm5 = vcmp.gt.f32.partialorder %v3926_v17, 0.0  ;;  %vm1506_vm6 = vcmp.lt.f32.partialorder %v3926_v17, 0.0  ;;  %v1793_v24 = vsel %vm1361_vm2, 1.0, %v1649_v19 }
 0x214   :  { %v1650_v29 = vsel %vm1506_vm6, -1.0, %v6670_v6  ;;  %vm1363_vm7 = vcmp.gt.f32.partialorder %v3932_v20, 0.0  ;;  %vm1364_vm8 = vcmp.gt.f32.partialorder %v3935_v21, 0.0  ;;  %vm1507_vm9 = vcmp.lt.f32.partialorder %v3932_v20, 0.0 }
 0x215   :  { %3379 = vmatmul.mubr.msk.bf16.gmra.mxu0 %vm701_vm3, %v1860_v23  ;;  %v1794_v30 = vsel %vm1362_vm5, 1.0, %v1650_v29  ;;  %vm1508_vm10 = vcmp.lt.f32.partialorder %v3935_v21, 0.0  ;;  %v1651_v31 = vsel %vm1507_vm9, -1.0, %v6670_v6  ;;  %v3950_v33 = vadd.f32 %v3681_v53, %v279_v13  ;;  %v196_v13 = vld [vmem:[%s6655_s1 + $0x2c8] sm:$0xff] }
 0x216   :  { %v1896_v36 = vpack.c.bf16 %v1794_v30, %v1793_v24  ;;  %v1652_v38 = vsel %vm1508_vm10, -1.0, %v6670_v6  ;;  %v1795_v40 = vsel %vm1363_vm7, 1.0, %v1651_v31  ;;  %v272_v41 = vmul.f32 %v3645_v34, %v119_v25  ;;  %v130_v30 = vld [vmem:[%s6655_s1 + $0xb8] sm:$0xff]  ;;  %v123_v31 = vld [vmem:[%s6655_s1 + $0x80] sm:$0xff] }
 0x217   :  { %v1796_v44 = vsel %vm1364_vm8, 1.0, %v1652_v38  ;;  %v576_v45 = vand.u32 2147483647, %v3950_v33  ;;  %vm1292_vm11 = vcmp.gt.f32.partialorder %v3773_v39, 0.0  ;;  %vm1436_vm12 = vcmp.lt.f32.partialorder %v3773_v39, 0.0 }
 0x218   :  { %3451 = vmatmul.mubr.msk.bf16.gmra.mxu1 %vm701_vm3, %v1896_v36  ;;  %v1897_v47 = vpack.c.bf16 %v1796_v44, %v1795_v40  ;;  %v3965_v48 = vadd.f32 %v3681_v53, %v272_v41  ;;  %v1580_v49 = vsel %vm1436_vm12, -1.0, %v6670_v6  ;;  %v563_v50 = vand.u32 2147483647, %v3794_v51 }
 0x219   :  { %v759_v54 = vsel %vm701_vm3, %v576_v45, 0.0  ;;  %v1724_v55 = vsel %vm1292_vm11, 1.0, %v1580_v49  ;;  %v281_v58 = vmul.f32 %v3645_v34, %v128_v43  ;;  %v564_v39 = vand.u32 2147483647, %v3798_v52 }
 0x21a   :  { %3454 = vmatprep.mubr.msk.bf16.mxu1 %vm701_vm3, %v1897_v47  ;;  %760 = vadd.xlane.f32.xlu1 %v759_v54  ;;  %vm1291_vm13 = vcmp.gt.f32.partialorder %v3965_v48, 0.0  ;;  %vm1435_vm14 = vcmp.lt.f32.partialorder %v3965_v48, 0.0  ;;  %v720_v51 = vsel %vm701_vm3, %v563_v50, 0.0  ;;  %v274_v62 = vmul.f32 %v3645_v34, %v121_v35 }
 0x21b   :  { %v1579_v52 = vsel %vm1435_vm14, -1.0, %v6670_v6  ;;  %721 = vadd.xlane.f32.xlu0 %v720_v51  ;;  %v3985_v63 = vadd.f32 %v3681_v53, %v281_v58  ;;  %v723_v56 = vsel %vm701_vm3, %v564_v39, 0.0  ;;  %vm1294_vm15 = vcmp.gt.f32.partialorder %v3858_v27, 0.0  ;;  %v132_v51 = vld [vmem:[%s6655_s1 + $0xc8] sm:$0xff] }
 0x21c   :  { %v1723_v57 = vsel %vm1291_vm13, 1.0, %v1579_v52  ;;  %v3990_v2 = vadd.f32 %v3681_v53, %v274_v62  ;;  %vm1438_vm0 = vcmp.lt.f32.partialorder %v3858_v27, 0.0  ;;  %v346_v5 = vmul.f32 %v3645_v34, %v193_v59  ;;  %v125_v52 = vld [vmem:[%s6655_s1 + $0x90] sm:$0xff] }
 0x21d   :  { %v1861_v28 = vpack.c.bf16 %v1724_v55, %v1723_v57  ;;  %v578_v9 = vand.u32 2147483647, %v3985_v63  ;;  %v1582_v11 = vsel %vm1438_vm0, -1.0, %v6670_v6  ;;  %v347_v12 = vmul.f32 %v3645_v34, %v194_v37 }
 0x21e   :  { %vm1293_vm1 = vcmp.gt.f32.partialorder %v3990_v2, 0.0  ;;  %vm1437_vm2 = vcmp.lt.f32.partialorder %v3990_v2, 0.0  ;;  %v1726_v27 = vsel %vm1294_vm15, 1.0, %v1582_v11  ;;  %v4006_v16 = vadd.f32 %v3681_v53, %v346_v5 }
 0x21f   :  { %3382 = vmatprep.mubr.msk.bf16.mxu0 %vm701_vm3, %v1861_v28  ;;  %v765_v18 = vsel %vm701_vm3, %v578_v9, 0.0  ;;  %724 = vadd.xlane.f32.xlu0 %v723_v56  ;;  %v1581_v19 = vsel %vm1437_vm2, -1.0, %v6670_v6  ;;  %v4012_v23 = vadd.f32 %v3681_v53, %v347_v12  ;;  %v348_v24 = vmul.f32 %v3645_v34, %v195_v8  ;;  %v197_v8 = vld [vmem:[%s6655_s1 + $0x2d0] sm:$0xff]  ;;  %v198_v28 = vld [vmem:[%s6655_s1 + $0x2d8] sm:$0xff] }
 0x220   :  { %766 = vadd.xlane.f32.xlu1 %v765_v18  ;;  %v1725_v25 = vsel %vm1293_vm1, 1.0, %v1581_v19  ;;  %vm1365_vm4 = vcmp.gt.f32.partialorder %v4006_v16, 0.0  ;;  %vm1509_vm5 = vcmp.lt.f32.partialorder %v4006_v16, 0.0  ;;  %v349_v29 = vmul.f32 %v3645_v34, %v196_v13 }
 0x221   :  { %v1862_v36 = vpack.c.bf16 %v1726_v27, %v1725_v25  ;;  %vm1366_vm6 = vcmp.gt.f32.partialorder %v4012_v23, 0.0  ;;  %vm1510_vm7 = vcmp.lt.f32.partialorder %v4012_v23, 0.0  ;;  %v1653_v38 = vsel %vm1509_vm5, -1.0, %v6670_v6  ;;  %v199_v27 = vld [vmem:[%s6655_s1 + $0x2e0] sm:$0xff] }
 0x222   :  { %v1654_v40 = vsel %vm1510_vm7, -1.0, %v6670_v6  ;;  %v1797_v41 = vsel %vm1365_vm4, 1.0, %v1653_v38  ;;  %v4029_v43 = vadd.f32 %v3681_v53, %v348_v24  ;;  %v4032_v44 = vadd.f32 %v3681_v53, %v349_v29 }
 0x223   :  { %3383 = vmatmul.mubr.msk.bf16.gmra.mxu0 %vm701_vm3, %v1862_v36  ;;  %v1798_v45 = vsel %vm1366_vm6, 1.0, %v1654_v40  ;;  %v283_v35 = vmul.f32 %v3645_v34, %v130_v30  ;;  %v276_v47 = vmul.f32 %v3645_v34, %v123_v31  ;;  %vm1296_vm8 = vcmp.gt.f32.partialorder %v3881_v46, 0.0  ;;  %v200_v30 = vld [vmem:[%s6655_s1 + $0x2e8] sm:$0xff] }
 0x224   :  { %v1898_v49 = vpack.c.bf16 %v1798_v45, %v1797_v41  ;;  %vm1367_vm9 = vcmp.gt.f32.partialorder %v4029_v43, 0.0  ;;  %vm1368_vm10 = vcmp.gt.f32.partialorder %v4032_v44, 0.0  ;;  %vm1511_vm11 = vcmp.lt.f32.partialorder %v4029_v43, 0.0 }
 0x225   :  { %vm1512_vm12 = vcmp.lt.f32.partialorder %v4032_v44, 0.0  ;;  %v1655_v50 = vsel %vm1511_vm11, -1.0, %v6670_v6  ;;  %v4044_v54 = vadd.f32 %v3681_v53, %v283_v35  ;;  %v4047_v55 = vadd.f32 %v3681_v53, %v276_v47 }
 0x226   :  { %3455 = vmatmul.mubr.msk.bf16.gmra.mxu1 %vm701_vm3, %v1898_v49  ;;  %v1656_v58 = vsel %vm1512_vm12, -1.0, %v6670_v6  ;;  %v1799_v39 = vsel %vm1367_vm9, 1.0, %v1655_v50  ;;  %vm1440_vm13 = vcmp.lt.f32.partialorder %v3881_v46, 0.0  ;;  %v565_v59 = vand.u32 2147483647, %v3863_v32 }
 0x227   :  { %v1800_v62 = vsel %vm1368_vm10, 1.0, %v1656_v58  ;;  %v580_v37 = vand.u32 2147483647, %v4044_v54  ;;  %vm1295_vm14 = vcmp.gt.f32.partialorder %v4047_v55, 0.0  ;;  %vm1439_vm15 = vcmp.lt.f32.partialorder %v4047_v55, 0.0 }
 0x228   :  { %v1899_v56 = vpack.c.bf16 %v1800_v62, %v1799_v39  ;;  %v1583_v57 = vsel %vm1439_vm15, -1.0, %v6670_v6  ;;  %v1584_v32 = vsel %vm1440_vm13, -1.0, %v6670_v6  ;;  %v726_v5 = vsel %vm701_vm3, %v565_v59, 0.0  ;;  %v134_v59 = vld [vmem:[%s6655_s1 + $0xd8] sm:$0xff] }
 0x229   :  { %v771_v9 = vsel %vm701_vm3, %v580_v37, 0.0  ;;  %v1727_v11 = vsel %vm1295_vm14, 1.0, %v1583_v57  ;;  %v1728_v12 = vsel %vm1296_vm8, 1.0, %v1584_v32  ;;  %727 = vadd.xlane.f32.xlu0 %v726_v5  ;;  %v285_v13 = vmul.f32 %v3645_v34, %v132_v51 }
 0x22a   :  { %3458 = vmatprep.mubr.msk.bf16.mxu1 %vm701_vm3, %v1899_v56  ;;  %772 = vadd.xlane.f32.xlu1 %v771_v9  ;;  %v1863_v18 = vpack.c.bf16 %v1728_v12, %v1727_v11  ;;  %v566_v19 = vand.u32 2147483647, %v3870_v42  ;;  %v278_v24 = vmul.f32 %v3645_v34, %v125_v52  ;;  %vm1298_vm0 = vcmp.gt.f32.partialorder %v3950_v33, 0.0  ;;  %v127_v52 = vld [vmem:[%s6655_s1 + $0xa0] sm:$0xff] }
 0x22b   :  { %v4083_v46 = vadd.f32 %v3681_v53, %v285_v13  ;;  %vm1442_vm1 = vcmp.lt.f32.partialorder %v3950_v33, 0.0  ;;  %v350_v25 = vmul.f32 %v3645_v34, %v197_v8  ;;  %v351_v29 = vmul.f32 %v3645_v34, %v198_v28  ;;  %v136_v28 = vld [vmem:[%s6655_s1 + $0xe8] sm:$0xff] }
 0x22c   :  { %3386 = vmatprep.mubr.msk.bf16.mxu0 %vm701_vm3, %v1863_v18  ;;  %v729_v42 = vsel %vm701_vm3, %v566_v19, 0.0  ;;  %v4094_v31 = vadd.f32 %v3681_v53, %v278_v24  ;;  %v1586_v36 = vsel %vm1442_vm1, -1.0, %v6670_v6  ;;  %v352_v38 = vmul.f32 %v3645_v34, %v199_v27  ;;  %v129_v19 = vld [vmem:[%s6655_s1 + $0xb0] sm:$0xff] }
 0x22d   :  { %v582_v33 = vand.u32 2147483647, %v4083_v46  ;;  %730 = vadd.xlane.f32.xlu0 %v729_v42  ;;  %v1730_v40 = vsel %vm1298_vm0, 1.0, %v1586_v36  ;;  %v4100_v41 = vadd.f32 %v3681_v53, %v350_v25  ;;  %v4103_v45 = vadd.f32 %v3681_v53, %v351_v29 }
 0x22e   :  { %vm1297_vm2 = vcmp.gt.f32.partialorder %v4094_v31, 0.0  ;;  %vm1441_vm4 = vcmp.lt.f32.partialorder %v4094_v31, 0.0  ;;  %v353_v35 = vmul.f32 %v3645_v34, %v200_v30  ;;  %v4109_v47 = vadd.f32 %v3681_v53, %v352_v38 }
 0x22f   :  { %v777_v49 = vsel %vm701_vm3, %v582_v33, 0.0  ;;  %v1585_v50 = vsel %vm1441_vm4, -1.0, %v6670_v6  ;;  %vm1369_vm5 = vcmp.gt.f32.partialorder %v4100_v41, 0.0  ;;  %vm1370_vm6 = vcmp.gt.f32.partialorder %v4103_v45, 0.0 }
 0x230   :  { %778 = vadd.xlane.f32.xlu1 %v777_v49  ;;  %v1729_v58 = vsel %vm1297_vm2, 1.0, %v1585_v50  ;;  %vm1513_vm7 = vcmp.lt.f32.partialorder %v4100_v41, 0.0  ;;  %vm1514_vm8 = vcmp.lt.f32.partialorder %v4103_v45, 0.0  ;;  %v4118_v39 = vadd.f32 %v3681_v53, %v353_v35 }
 0x231   :  { %v1864_v51 = vpack.c.bf16 %v1730_v40, %v1729_v58  ;;  %v1657_v62 = vsel %vm1513_vm7, -1.0, %v6670_v6  ;;  %v1658_v37 = vsel %vm1514_vm8, -1.0, %v6670_v6  ;;  %vm1371_vm9 = vcmp.gt.f32.partialorder %v4109_v47, 0.0  ;;  %v201_v40 = vld [vmem:[%s6655_s1 + $0x2f0] sm:$0xff] }
 0x232   :  { %v1801_v56 = vsel %vm1369_vm5, 1.0, %v1657_v62  ;;  %v1802_v57 = vsel %vm1370_vm6, 1.0, %v1658_v37  ;;  %vm1372_vm10 = vcmp.gt.f32.partialorder %v4118_v39, 0.0  ;;  %vm1515_vm11 = vcmp.lt.f32.partialorder %v4109_v47, 0.0  ;;  %v203_v62 = vld [vmem:[%s6655_s1 + $0x300] sm:$0xff] }
 0x233   :  { %3387 = vmatmul.mubr.msk.bf16.gmra.mxu0 %vm701_vm3, %v1864_v51  ;;  %v1900_v32 = vpack.c.bf16 %v1802_v57, %v1801_v56  ;;  %vm1516_vm12 = vcmp.lt.f32.partialorder %v4118_v39, 0.0  ;;  %v1659_v5 = vsel %vm1515_vm11, -1.0, %v6670_v6  ;;  %v287_v8 = vmul.f32 %v3645_v34, %v134_v59 }
 0x234   :  { %v1660_v9 = vsel %vm1516_vm12, -1.0, %v6670_v6  ;;  %v1803_v11 = vsel %vm1371_vm9, 1.0, %v1659_v5  ;;  %v280_v12 = vmul.f32 %v3645_v34, %v127_v52  ;;  %vm1300_vm13 = vcmp.gt.f32.partialorder %v3985_v63, 0.0  ;;  %v138_v5 = vld [vmem:[%s6655_s1 + $0xf8] sm:$0xff] }
 0x235   :  { %3459 = vmatmul.mubr.msk.bf16.gmra.mxu1 %vm701_vm3, %v1900_v32  ;;  %v1804_v13 = vsel %vm1372_vm10, 1.0, %v1660_v9  ;;  %v4143_v27 = vadd.f32 %v3681_v53, %v287_v8  ;;  %vm1444_vm14 = vcmp.lt.f32.partialorder %v3985_v63, 0.0  ;;  %v567_v18 = vand.u32 2147483647, %v3911_v7  ;;  %v204_v32 = vld [vmem:[%s6655_s1 + $0x308] sm:$0xff]  ;;  %v131_v8 = vld [vmem:[%s6655_s1 + $0xc0] sm:$0xff] }
 0x236   :  { %v1901_v24 = vpack.c.bf16 %v1804_v13, %v1803_v11  ;;  %v4151_v25 = vadd.f32 %v3681_v53, %v280_v12  ;;  %v1588_v29 = vsel %vm1444_vm14, -1.0, %v6670_v6  ;;  %v289_v30 = vmul.f32 %v3645_v34, %v136_v28 }
 0x237   :  { %v584_v42 = vand.u32 2147483647, %v4143_v27  ;;  %v1732_v36 = vsel %vm1300_vm13, 1.0, %v1588_v29  ;;  %v732_v38 = vsel %vm701_vm3, %v567_v18, 0.0  ;;  %v569_v63 = vand.u32 2147483647, %v3965_v48 }
 0x238   :  { %3462 = vmatprep.mubr.msk.bf16.mxu1 %vm701_vm3, %v1901_v24  ;;  %vm1299_vm15 = vcmp.gt.f32.partialorder %v4151_v25, 0.0  ;;  %vm1443_vm0 = vcmp.lt.f32.partialorder %v4151_v25, 0.0  ;;  %733 = vadd.xlane.f32.xlu0 %v732_v38  ;;  %v4162_v7 = vadd.f32 %v3681_v53, %v289_v30  ;;  %v282_v33 = vmul.f32 %v3645_v34, %v129_v19  ;;  %v202_v48 = vld [vmem:[%s6655_s1 + $0x2f8] sm:$0xff] }
 0x239   :  { %v783_v35 = vsel %vm701_vm3, %v584_v42, 0.0  ;;  %v1587_v49 = vsel %vm1443_vm0, -1.0, %v6670_v6  ;;  %v738_v50 = vsel %vm701_vm3, %v569_v63, 0.0  ;;  %vm1302_vm1 = vcmp.gt.f32.partialorder %v4044_v54, 0.0 }
 0x23a   :  { %784 = vadd.xlane.f32.xlu1 %v783_v35  ;;  %v1731_v58 = vsel %vm1299_vm15, 1.0, %v1587_v49  ;;  %v586_v59 = vand.u32 2147483647, %v4162_v7  ;;  %v4177_v51 = vadd.f32 %v3681_v53, %v282_v33  ;;  %vm1446_vm2 = vcmp.lt.f32.partialorder %v4044_v54, 0.0 }
 0x23b   :  { %v1865_v37 = vpack.c.bf16 %v1732_v36, %v1731_v58  ;;  %v1590_v52 = vsel %vm1446_vm2, -1.0, %v6670_v6  ;;  %v354_v56 = vmul.f32 %v3645_v34, %v201_v40  ;;  %v355_v57 = vmul.f32 %v3645_v34, %v202_v48 }
 0x23c   :  { %v789_v28 = vsel %vm701_vm3, %v586_v59, 0.0  ;;  %739 = vadd.xlane.f32.xlu0 %v738_v50  ;;  %vm1301_vm4 = vcmp.gt.f32.partialorder %v4177_v51, 0.0  ;;  %vm1445_vm5 = vcmp.lt.f32.partialorder %v4177_v51, 0.0  ;;  %v1734_v9 = vsel %vm1302_vm1, 1.0, %v1590_v52 }
 0x23d   :  { %3390 = vmatprep.mubr.msk.bf16.mxu0 %vm701_vm3, %v1865_v37  ;;  %v1589_v11 = vsel %vm1445_vm5, -1.0, %v6670_v6  ;;  %v4203_v12 = vadd.f32 %v3681_v53, %v354_v56  ;;  %v4206_v13 = vadd.f32 %v3681_v53, %v355_v57  ;;  %v356_v18 = vmul.f32 %v3645_v34, %v203_v62  ;;  %v140_v37 = vld [vmem:[%s6655_s1 + $0x108] sm:$0xff]  ;;  %v133_v57 = vld [vmem:[%s6655_s1 + $0xd0] sm:$0xff] }
 0x23e   :  { %790 = vadd.xlane.f32.xlu1 %v789_v28  ;;  %v1733_v19 = vsel %vm1301_vm4, 1.0, %v1589_v11  ;;  %v357_v24 = vmul.f32 %v3645_v34, %v204_v32  ;;  %v291_v29 = vmul.f32 %v3645_v34, %v138_v5  ;;  %v284_v54 = vmul.f32 %v3645_v34, %v131_v8 }
 0x23f   :  { %v1866_v30 = vpack.c.bf16 %v1734_v9, %v1733_v19  ;;  %vm1373_vm6 = vcmp.gt.f32.partialorder %v4203_v12, 0.0  ;;  %vm1374_vm7 = vcmp.gt.f32.partialorder %v4206_v13, 0.0  ;;  %vm1517_vm8 = vcmp.lt.f32.partialorder %v4203_v12, 0.0  ;;  %v205_v9 = vld [vmem:[%s6655_s1 + $0x310] sm:$0xff] }
 0x240   :  { %vm1518_vm9 = vcmp.lt.f32.partialorder %v4206_v13, 0.0  ;;  %v1661_v42 = vsel %vm1517_vm8, -1.0, %v6670_v6  ;;  %v4218_v36 = vadd.f32 %v3681_v53, %v356_v18  ;;  %v4221_v38 = vadd.f32 %v3681_v53, %v357_v24  ;;  %v206_v24 = vld [vmem:[%s6655_s1 + $0x318] sm:$0xff] }
 0x241   :  { %3391 = vmatmul.mubr.msk.bf16.gmra.mxu0 %vm701_vm3, %v1866_v30  ;;  %v1662_v63 = vsel %vm1518_vm9, -1.0, %v6670_v6  ;;  %v1805_v33 = vsel %vm1373_vm6, 1.0, %v1661_v42  ;;  %v4226_v40 = vadd.f32 %v3681_v53, %v291_v29  ;;  %v4229_v48 = vadd.f32 %v3681_v53, %v284_v54  ;;  %v207_v29 = vld [vmem:[%s6655_s1 + $0x320] sm:$0xff] }
 0x242   :  { %v1806_v35 = vsel %vm1374_vm7, 1.0, %v1662_v63  ;;  %vm1375_vm10 = vcmp.gt.f32.partialorder %v4218_v36, 0.0  ;;  %vm1376_vm11 = vcmp.gt.f32.partialorder %v4221_v38, 0.0  ;;  %vm1519_vm12 = vcmp.lt.f32.partialorder %v4218_v36, 0.0 }
 0x243   :  { %v1902_v49 = vpack.c.bf16 %v1806_v35, %v1805_v33  ;;  %vm1520_vm13 = vcmp.lt.f32.partialorder %v4221_v38, 0.0  ;;  %v1663_v50 = vsel %vm1519_vm12, -1.0, %v6670_v6  ;;  %v588_v58 = vand.u32 2147483647, %v4226_v40 }
 0x244   :  { %v1664_v59 = vsel %vm1520_vm13, -1.0, %v6670_v6  ;;  %v1807_v62 = vsel %vm1375_vm10, 1.0, %v1663_v50  ;;  %vm1303_vm14 = vcmp.gt.f32.partialorder %v4229_v48, 0.0  ;;  %vm1304_vm15 = vcmp.gt.f32.partialorder %v4083_v46, 0.0 }
 0x245   :  { %3463 = vmatmul.mubr.msk.bf16.gmra.mxu1 %vm701_vm3, %v1902_v49  ;;  %v1808_v52 = vsel %vm1376_vm11, 1.0, %v1664_v59  ;;  %v795_v56 = vsel %vm701_vm3, %v588_v58, 0.0  ;;  %vm1447_vm0 = vcmp.lt.f32.partialorder %v4229_v48, 0.0  ;;  %vm1448_vm1 = vcmp.lt.f32.partialorder %v4083_v46, 0.0 }
 0x246   :  { %v1903_v32 = vpack.c.bf16 %v1808_v52, %v1807_v62  ;;  %796 = vadd.xlane.f32.xlu1 %v795_v56  ;;  %v1591_v5 = vsel %vm1447_vm0, -1.0, %v6670_v6  ;;  %v1592_v8 = vsel %vm1448_vm1, -1.0, %v6670_v6  ;;  %v571_v28 = vand.u32 2147483647, %v3990_v2 }
 0x247   :  { %v1735_v11 = vsel %vm1303_vm14, 1.0, %v1591_v5  ;;  %v1736_v18 = vsel %vm1304_vm15, 1.0, %v1592_v8  ;;  %v293_v46 = vmul.f32 %v3645_v34, %v140_v37  ;;  %v573_v19 = vand.u32 2147483647, %v4047_v55  ;;  %v208_v55 = vld [vmem:[%s6655_s1 + $0x328] sm:$0xff]  ;;  %v142_v5 = vld [vmem:[%s6655_s1 + $0x118] sm:$0xff] }
 0x248   :  { %3466 = vmatprep.mubr.msk.bf16.mxu1 %vm701_vm3, %v1903_v32  ;;  %v1867_v2 = vpack.c.bf16 %v1736_v18, %v1735_v11  ;;  %v744_v54 = vsel %vm701_vm3, %v571_v28, 0.0  ;;  %v286_v30 = vmul.f32 %v3645_v34, %v133_v57  ;;  %vm1306_vm2 = vcmp.gt.f32.partialorder %v4143_v27, 0.0 }
 0x249   :  { %745 = vadd.xlane.f32.xlu0 %v744_v54  ;;  %v4272_v42 = vadd.f32 %v3681_v53, %v293_v46  ;;  %v750_v63 = vsel %vm701_vm3, %v573_v19, 0.0  ;;  %vm1450_vm4 = vcmp.lt.f32.partialorder %v4143_v27, 0.0  ;;  %v358_v33 = vmul.f32 %v3645_v34, %v205_v9  ;;  %v135_v19 = vld [vmem:[%s6655_s1 + $0xe0] sm:$0xff] }
 0x24a   :  { %3394 = vmatprep.mubr.msk.bf16.mxu0 %vm701_vm3, %v1867_v2  ;;  %v4279_v35 = vadd.f32 %v3681_v53, %v286_v30  ;;  %v1594_v49 = vsel %vm1450_vm4, -1.0, %v6670_v6  ;;  %v359_v50 = vmul.f32 %v3645_v34, %v206_v24  ;;  %v360_v58 = vmul.f32 %v3645_v34, %v207_v29 }
 0x24b   :  { %v590_v59 = vand.u32 2147483647, %v4272_v42  ;;  %v1738_v62 = vsel %vm1306_vm2, 1.0, %v1594_v49  ;;  %v4286_v37 = vadd.f32 %v3681_v53, %v358_v33  ;;  %v361_v27 = vmul.f32 %v3645_v34, %v208_v55  ;;  %v144_v49 = vld [vmem:[%s6655_s1 + $0x128] sm:$0xff] }
 0x24c   :  { %vm1305_vm5 = vcmp.gt.f32.partialorder %v4279_v35, 0.0  ;;  %vm1449_vm6 = vcmp.lt.f32.partialorder %v4279_v35, 0.0  ;;  %v4292_v52 = vadd.f32 %v3681_v53, %v359_v50  ;;  %v4295_v56 = vadd.f32 %v3681_v53, %v360_v58 }
 0x24d   :  { %6696 = vst [vmem:[#allocation4_spill] sm:$0xff] %v4286_v37  ;;  %v801_v57 = vsel %vm701_vm3, %v590_v59, 0.0  ;;  %751 = vadd.xlane.f32.xlu0 %v750_v63  ;;  %v1593_v32 = vsel %vm1449_vm6, -1.0, %v6670_v6  ;;  %vm1377_vm7 = vcmp.gt.f32.partialorder %v4286_v37, 0.0  ;;  %vm1521_vm8 = vcmp.lt.f32.partialorder %v4286_v37, 0.0  ;;  %v137_v59 = vld [vmem:[%s6655_s1 + $0xf0] sm:$0xff] }
 0x24e   :  { %6697 = vst [vmem:[#allocation5_spill] sm:$0xff] %v4295_v56  ;;  %802 = vadd.xlane.f32.xlu1 %v801_v57  ;;  %v1737_v8 = vsel %vm1305_vm5, 1.0, %v1593_v32  ;;  %vm1378_vm9 = vcmp.gt.f32.partialorder %v4292_v52, 0.0  ;;  %vm1522_vm10 = vcmp.lt.f32.partialorder %v4292_v52, 0.0  ;;  %v1665_v28 = vsel %vm1521_vm8, -1.0, %v6670_v6 }
 0x24f   :  { %v1868_v9 = vpack.c.bf16 %v1738_v62, %v1737_v8  ;;  %v1666_v11 = vsel %vm1522_vm10, -1.0, %v6670_v6  ;;  %v1809_v18 = vsel %vm1377_vm7, 1.0, %v1665_v28  ;;  %v4309_v46 = vadd.f32 %v3681_v53, %v361_v27 }
 0x250   :  { %v1810_v24 = vsel %vm1378_vm9, 1.0, %v1666_v11  ;;  %vm1379_vm11 = vcmp.gt.f32.partialorder %v4295_v56, 0.0  ;;  %vm1523_vm12 = vcmp.lt.f32.partialorder %v4295_v56, 0.0  ;;  %v295_v29 = vmul.f32 %v3645_v34, %v142_v5 }
 0x251   :  { %3395 = vmatmul.mubr.msk.bf16.gmra.mxu0 %vm701_vm3, %v1868_v9  ;;  %v1904_v2 = vpack.c.bf16 %v1810_v24, %v1809_v18  ;;  %vm1380_vm13 = vcmp.gt.f32.partialorder %v4309_v46, 0.0  ;;  %vm1524_vm14 = vcmp.lt.f32.partialorder %v4309_v46, 0.0  ;;  %v1667_v54 = vsel %vm1523_vm12, -1.0, %v6670_v6  ;;  %v210_v18 = vld [vmem:[%s6655_s1 + $0x338] sm:$0xff] }
 0x252   :  { %v1668_v30 = vsel %vm1524_vm14, -1.0, %v6670_v6  ;;  %v1811_v55 = vsel %vm1379_vm11, 1.0, %v1667_v54  ;;  %v4323_v63 = vadd.f32 %v3681_v53, %v295_v29  ;;  %v288_v33 = vmul.f32 %v3645_v34, %v135_v19 }
 0x253   :  { %3467 = vmatmul.mubr.msk.bf16.gmra.mxu1 %vm701_vm3, %v1904_v2  ;;  %v1812_v50 = vsel %vm1380_vm13, 1.0, %v1668_v30  ;;  %vm1308_vm15 = vcmp.gt.f32.partialorder %v4162_v7, 0.0  ;;  %vm1452_vm0 = vcmp.lt.f32.partialorder %v4162_v7, 0.0  ;;  %v575_v58 = vand.u32 2147483647, %v4094_v31  ;;  %v209_v31 = vld [vmem:[%s6655_s1 + $0x330] sm:$0xff] }
 0x254   :  { %v1905_v62 = vpack.c.bf16 %v1812_v50, %v1811_v55  ;;  %v592_v27 = vand.u32 2147483647, %v4323_v63  ;;  %v4338_v57 = vadd.f32 %v3681_v53, %v288_v33  ;;  %v1596_v32 = vsel %vm1452_vm0, -1.0, %v6670_v6  ;;  %v211_v30 = vld [vmem:[%s6655_s1 + $0x340] sm:$0xff] }
 0x255   :  { %v1740_v5 = vsel %vm1308_vm15, 1.0, %v1596_v32  ;;  %v756_v8 = vsel %vm701_vm3, %v575_v58, 0.0  ;;  %v297_v28 = vmul.f32 %v3645_v34, %v144_v49  ;;  %v577_v7 = vand.u32 2147483647, %v4151_v25  ;;  %v212_v58 = vld [vmem:[%s6655_s1 + $0x348] sm:$0xff] }
 0x256   :  { %3470 = vmatprep.mubr.msk.bf16.mxu1 %vm701_vm3, %v1905_v62  ;;  %v807_v9 = vsel %vm701_vm3, %v592_v27, 0.0  ;;  %vm1307_vm1 = vcmp.gt.f32.partialorder %v4338_v57, 0.0  ;;  %vm1451_vm2 = vcmp.lt.f32.partialorder %v4338_v57, 0.0  ;;  %757 = vadd.xlane.f32.xlu0 %v756_v8  ;;  %v290_v11 = vmul.f32 %v3645_v34, %v137_v59 }
 0x257   :  { %808 = vadd.xlane.f32.xlu1 %v807_v9  ;;  %v1595_v25 = vsel %vm1451_vm2, -1.0, %v6670_v6  ;;  %v4357_v19 = vadd.f32 %v3681_v53, %v297_v28  ;;  %v762_v24 = vsel %vm701_vm3, %v577_v7, 0.0  ;;  %vm1310_vm4 = vcmp.gt.f32.partialorder %v4226_v40, 0.0  ;;  %v146_v7 = vld [vmem:[%s6655_s1 + $0x138] sm:$0xff] }
 0x258   :  { %v1739_v29 = vsel %vm1307_vm1, 1.0, %v1595_v25  ;;  %v4362_v2 = vadd.f32 %v3681_v53, %v290_v11  ;;  %vm1454_vm5 = vcmp.lt.f32.partialorder %v4226_v40, 0.0  ;;  %v362_v54 = vmul.f32 %v3645_v34, %v209_v31  ;;  %v139_v31 = vld [vmem:[%s6655_s1 + $0x100] sm:$0xff] }
 0x259   :  { %v1869_v55 = vpack.c.bf16 %v1740_v5, %v1739_v29  ;;  %v594_v33 = vand.u32 2147483647, %v4357_v19  ;;  %v1598_v49 = vsel %vm1454_vm5, -1.0, %v6670_v6  ;;  %v363_v50 = vmul.f32 %v3645_v34, %v210_v18 }
 0x25a   :  { %763 = vadd.xlane.f32.xlu0 %v762_v24  ;;  %vm1309_vm6 = vcmp.gt.f32.partialorder %v4362_v2, 0.0  ;;  %vm1453_vm7 = vcmp.lt.f32.partialorder %v4362_v2, 0.0  ;;  %v1742_v40 = vsel %vm1310_vm4, 1.0, %v1598_v49  ;;  %v4378_v59 = vadd.f32 %v3681_v53, %v362_v54 }
 0x25b   :  { %3398 = vmatprep.mubr.msk.bf16.mxu0 %vm701_vm3, %v1869_v55  ;;  %v813_v62 = vsel %vm701_vm3, %v594_v33, 0.0  ;;  %v1597_v27 = vsel %vm1453_vm7, -1.0, %v6670_v6  ;;  %v4384_v32 = vadd.f32 %v3681_v53, %v363_v50  ;;  %v364_v5 = vmul.f32 %v3645_v34, %v211_v30 }
 0x25c   :  { %6698 = vst [vmem:[#allocation6_spill] sm:$0xff] %v4378_v59  ;;  %814 = vadd.xlane.f32.xlu1 %v813_v62  ;;  %v1741_v8 = vsel %vm1309_vm6, 1.0, %v1597_v27  ;;  %vm1381_vm8 = vcmp.gt.f32.partialorder %v4378_v59, 0.0  ;;  %vm1525_vm9 = vcmp.lt.f32.partialorder %v4378_v59, 0.0  ;;  %v365_v28 = vmul.f32 %v3645_v34, %v212_v58 }
 0x25d   :  { %v1870_v9 = vpack.c.bf16 %v1742_v40, %v1741_v8  ;;  %vm1382_vm10 = vcmp.gt.f32.partialorder %v4384_v32, 0.0  ;;  %vm1526_vm11 = vcmp.lt.f32.partialorder %v4384_v32, 0.0  ;;  %v1669_v11 = vsel %vm1525_vm9, -1.0, %v6670_v6 }
 0x25e   :  { %v1670_v18 = vsel %vm1526_vm11, -1.0, %v6670_v6  ;;  %v1813_v25 = vsel %vm1381_vm8, 1.0, %v1669_v11  ;;  %v4401_v24 = vadd.f32 %v3681_v53, %v364_v5  ;;  %v4404_v29 = vadd.f32 %v3681_v53, %v365_v28  ;;  %v148_v5 = vld [vmem:[%s6655_s1 + $0x148] sm:$0xff] }
 0x25f   :  { %3399 = vmatmul.mubr.msk.bf16.gmra.mxu0 %vm701_vm3, %v1870_v9  ;;  %v1814_v54 = vsel %vm1382_vm10, 1.0, %v1670_v18  ;;  %v299_v30 = vmul.f32 %v3645_v34, %v146_v7  ;;  %v292_v55 = vmul.f32 %v3645_v34, %v139_v31  ;;  %vm1312_vm12 = vcmp.gt.f32.partialorder %v4272_v42, 0.0  ;;  %v141_v7 = vld [vmem:[%s6655_s1 + $0x110] sm:$0xff] }
 0x260   :  { %6699 = vst [vmem:[#allocation7_spill] sm:$0xff] %v4401_v24  ;;  %v1906_v33 = vpack.c.bf16 %v1814_v54, %v1813_v25  ;;  %vm1383_vm13 = vcmp.gt.f32.partialorder %v4401_v24, 0.0  ;;  %vm1384_vm14 = vcmp.gt.f32.partialorder %v4404_v29, 0.0  ;;  %vm1527_vm15 = vcmp.lt.f32.partialorder %v4401_v24, 0.0  ;;  %v213_v18 = vld [vmem:[%s6655_s1 + $0x350] sm:$0xff]  ;;  %v214_v25 = vld [vmem:[%s6655_s1 + $0x358] sm:$0xff] }
 0x261   :  { %vm1528_vm0 = vcmp.lt.f32.partialorder %v4404_v29, 0.0  ;;  %v1671_v49 = vsel %vm1527_vm15, -1.0, %v6670_v6  ;;  %v4416_v50 = vadd.f32 %v3681_v53, %v299_v30  ;;  %v4419_v58 = vadd.f32 %v3681_v53, %v292_v55 }
 0x262   :  { %3471 = vmatmul.mubr.msk.bf16.gmra.mxu1 %vm701_vm3, %v1906_v33  ;;  %v1672_v40 = vsel %vm1528_vm0, -1.0, %v6670_v6  ;;  %v1815_v62 = vsel %vm1383_vm13, 1.0, %v1671_v49  ;;  %vm1456_vm1 = vcmp.lt.f32.partialorder %v4272_v42, 0.0  ;;  %v579_v27 = vand.u32 2147483647, %v4177_v51  ;;  %v215_v49 = vld [vmem:[%s6655_s1 + $0x360] sm:$0xff] }
 0x263   :  { %v1816_v8 = vsel %vm1384_vm14, 1.0, %v1672_v40  ;;  %v596_v28 = vand.u32 2147483647, %v4416_v50  ;;  %vm1311_vm2 = vcmp.gt.f32.partialorder %v4419_v58, 0.0  ;;  %vm1455_vm4 = vcmp.lt.f32.partialorder %v4419_v58, 0.0 }
 0x264   :  { %v1907_v31 = vpack.c.bf16 %v1816_v8, %v1815_v62  ;;  %v1599_v9 = vsel %vm1455_vm4, -1.0, %v6670_v6  ;;  %v1600_v51 = vsel %vm1456_vm1, -1.0, %v6670_v6  ;;  %v768_v11 = vsel %vm701_vm3, %v579_v27, 0.0 }
 0x265   :  { %v819_v54 = vsel %vm701_vm3, %v596_v28, 0.0  ;;  %v1743_v30 = vsel %vm1311_vm2, 1.0, %v1599_v9  ;;  %v1744_v55 = vsel %vm1312_vm12, 1.0, %v1600_v51  ;;  %769 = vadd.xlane.f32.xlu0 %v768_v11  ;;  %v301_v33 = vmul.f32 %v3645_v34, %v148_v5  ;;  %v216_v28 = vld [vmem:[%s6655_s1 + $0x368] sm:$0xff] }
 0x266   :  { %3474 = vmatprep.mubr.msk.bf16.mxu1 %vm701_vm3, %v1907_v31  ;;  %820 = vadd.xlane.f32.xlu1 %v819_v54  ;;  %v1871_v40 = vpack.c.bf16 %v1744_v55, %v1743_v30  ;;  %v581_v62 = vand.u32 2147483647, %v4229_v48  ;;  %v294_v27 = vmul.f32 %v3645_v34, %v141_v7  ;;  %vm1314_vm5 = vcmp.gt.f32.partialorder %v4323_v63, 0.0 }
 0x267   :  { %v4455_v42 = vadd.f32 %v3681_v53, %v301_v33  ;;  %vm1458_vm6 = vcmp.lt.f32.partialorder %v4323_v63, 0.0  ;;  %v366_v5 = vmul.f32 %v3645_v34, %v213_v18  ;;  %v367_v8 = vmul.f32 %v3645_v34, %v214_v25 }
 0x268   :  { %3402 = vmatprep.mubr.msk.bf16.mxu0 %vm701_vm3, %v1871_v40  ;;  %v774_v48 = vsel %vm701_vm3, %v581_v62, 0.0  ;;  %v4466_v7 = vadd.f32 %v3681_v53, %v294_v27  ;;  %v1602_v31 = vsel %vm1458_vm6, -1.0, %v6670_v6  ;;  %v368_v9 = vmul.f32 %v3645_v34, %v215_v49  ;;  %v150_v40 = vld [vmem:[%s6655_s1 + $0x158] sm:$0xff] }
 0x269   :  { %v598_v63 = vand.u32 2147483647, %v4455_v42  ;;  %775 = vadd.xlane.f32.xlu0 %v774_v48  ;;  %v1746_v51 = vsel %vm1314_vm5, 1.0, %v1602_v31  ;;  %v4472_v11 = vadd.f32 %v3681_v53, %v366_v5  ;;  %v4475_v18 = vadd.f32 %v3681_v53, %v367_v8  ;;  %v143_v8 = vld [vmem:[%s6655_s1 + $0x120] sm:$0xff] }
 0x26a   :  { %vm1313_vm7 = vcmp.gt.f32.partialorder %v4466_v7, 0.0  ;;  %vm1457_vm8 = vcmp.lt.f32.partialorder %v4466_v7, 0.0  ;;  %v369_v25 = vmul.f32 %v3645_v34, %v216_v28  ;;  %v4481_v54 = vadd.f32 %v3681_v53, %v368_v9 }
 0x26b   :  { %6700 = vst [vmem:[#allocation8_spill] sm:$0xff] %v4472_v11  ;;  %v825_v30 = vsel %vm701_vm3, %v598_v63, 0.0  ;;  %v1601_v55 = vsel %vm1457_vm8, -1.0, %v6670_v6  ;;  %vm1385_vm9 = vcmp.gt.f32.partialorder %v4472_v11, 0.0  ;;  %vm1386_vm10 = vcmp.gt.f32.partialorder %v4475_v18, 0.0 }
 0x26c   :  { %6701 = vst [vmem:[#allocation9_spill] sm:$0xff] %v4481_v54  ;;  %826 = vadd.xlane.f32.xlu1 %v825_v30  ;;  %v1745_v33 = vsel %vm1313_vm7, 1.0, %v1601_v55  ;;  %vm1529_vm11 = vcmp.lt.f32.partialorder %v4472_v11, 0.0  ;;  %vm1530_vm12 = vcmp.lt.f32.partialorder %v4475_v18, 0.0  ;;  %v4490_v49 = vadd.f32 %v3681_v53, %v369_v25 }
 0x26d   :  { %v1872_v62 = vpack.c.bf16 %v1746_v51, %v1745_v33  ;;  %v1673_v27 = vsel %vm1529_vm11, -1.0, %v6670_v6  ;;  %v1674_v5 = vsel %vm1530_vm12, -1.0, %v6670_v6  ;;  %vm1387_vm13 = vcmp.gt.f32.partialorder %v4481_v54, 0.0  ;;  %v152_v51 = vld [vmem:[%s6655_s1 + $0x168] sm:$0xff] }
 0x26e   :  { %v1817_v28 = vsel %vm1385_vm9, 1.0, %v1673_v27  ;;  %v1818_v48 = vsel %vm1386_vm10, 1.0, %v1674_v5  ;;  %vm1388_vm14 = vcmp.gt.f32.partialorder %v4490_v49, 0.0  ;;  %vm1531_vm15 = vcmp.lt.f32.partialorder %v4481_v54, 0.0  ;;  %v145_v27 = vld [vmem:[%s6655_s1 + $0x130] sm:$0xff] }
 0x26f   :  { %3403 = vmatmul.mubr.msk.bf16.gmra.mxu0 %vm701_vm3, %v1872_v62  ;;  %v1908_v31 = vpack.c.bf16 %v1818_v48, %v1817_v28  ;;  %vm1532_vm0 = vcmp.lt.f32.partialorder %v4490_v49, 0.0  ;;  %v1675_v9 = vsel %vm1531_vm15, -1.0, %v6670_v6  ;;  %v303_v63 = vmul.f32 %v3645_v34, %v150_v40 }
 0x270   :  { %v1676_v25 = vsel %vm1532_vm0, -1.0, %v6670_v6  ;;  %v1819_v30 = vsel %vm1387_vm13, 1.0, %v1675_v9  ;;  %v296_v55 = vmul.f32 %v3645_v34, %v143_v8  ;;  %vm1316_vm1 = vcmp.gt.f32.partialorder %v4357_v19, 0.0 }
 0x271   :  { %3475 = vmatmul.mubr.msk.bf16.gmra.mxu1 %vm701_vm3, %v1908_v31  ;;  %v1820_v33 = vsel %vm1388_vm14, 1.0, %v1676_v25  ;;  %v4515_v62 = vadd.f32 %v3681_v53, %v303_v63  ;;  %vm1460_vm2 = vcmp.lt.f32.partialorder %v4357_v19, 0.0  ;;  %v583_v40 = vand.u32 2147483647, %v4279_v35 }
 0x272   :  { %v1909_v5 = vpack.c.bf16 %v1820_v33, %v1819_v30  ;;  %v4523_v28 = vadd.f32 %v3681_v53, %v296_v55  ;;  %v1604_v8 = vsel %vm1460_vm2, -1.0, %v6670_v6  ;;  %v305_v48 = vmul.f32 %v3645_v34, %v152_v51  ;;  %v217_v51 = vld [vmem:[%s6655_s1 + $0x370] sm:$0xff] }
 0x273   :  { %v600_v31 = vand.u32 2147483647, %v4515_v62  ;;  %v1748_v9 = vsel %vm1316_vm1, 1.0, %v1604_v8  ;;  %v780_v63 = vsel %vm701_vm3, %v583_v40, 0.0  ;;  %v585_v19 = vand.u32 2147483647, %v4338_v57 }
 0x274   :  { %3478 = vmatprep.mubr.msk.bf16.mxu1 %vm701_vm3, %v1909_v5  ;;  %vm1315_vm4 = vcmp.gt.f32.partialorder %v4523_v28, 0.0  ;;  %vm1459_vm5 = vcmp.lt.f32.partialorder %v4523_v28, 0.0  ;;  %781 = vadd.xlane.f32.xlu0 %v780_v63  ;;  %v4534_v35 = vadd.f32 %v3681_v53, %v305_v48  ;;  %v298_v25 = vmul.f32 %v3645_v34, %v145_v27  ;;  %v218_v57 = vld [vmem:[%s6655_s1 + $0x378] sm:$0xff]  ;;  %v219_v8 = vld [vmem:[%s6655_s1 + $0x380] sm:$0xff] }
 0x275   :  { %v831_v30 = vsel %vm701_vm3, %v600_v31, 0.0  ;;  %v1603_v55 = vsel %vm1459_vm5, -1.0, %v6670_v6  ;;  %v786_v33 = vsel %vm701_vm3, %v585_v19, 0.0  ;;  %vm1318_vm6 = vcmp.gt.f32.partialorder %v4416_v50, 0.0 }
 0x276   :  { %832 = vadd.xlane.f32.xlu1 %v831_v30  ;;  %v1747_v40 = vsel %vm1315_vm4, 1.0, %v1603_v55  ;;  %v602_v27 = vand.u32 2147483647, %v4534_v35  ;;  %v4549_v5 = vadd.f32 %v3681_v53, %v298_v25  ;;  %vm1462_vm7 = vcmp.lt.f32.partialorder %v4416_v50, 0.0  ;;  %v220_v30 = vld [vmem:[%s6655_s1 + $0x388] sm:$0xff]  ;;  %v154_v25 = vld [vmem:[%s6655_s1 + $0x178] sm:$0xff] }
 0x277   :  { %v1873_v48 = vpack.c.bf16 %v1748_v9, %v1747_v40  ;;  %v1606_v31 = vsel %vm1462_vm7, -1.0, %v6670_v6  ;;  %v370_v63 = vmul.f32 %v3645_v34, %v217_v51  ;;  %v371_v19 = vmul.f32 %v3645_v34, %v218_v57  ;;  %v147_v55 = vld [vmem:[%s6655_s1 + $0x140] sm:$0xff] }
 0x278   :  { %v837_v9 = vsel %vm701_vm3, %v602_v27, 0.0  ;;  %787 = vadd.xlane.f32.xlu0 %v786_v33  ;;  %vm1317_vm8 = vcmp.gt.f32.partialorder %v4549_v5, 0.0  ;;  %vm1461_vm9 = vcmp.lt.f32.partialorder %v4549_v5, 0.0  ;;  %v1750_v51 = vsel %vm1318_vm6, 1.0, %v1606_v31 }
 0x279   :  { %3406 = vmatprep.mubr.msk.bf16.mxu0 %vm701_vm3, %v1873_v48  ;;  %v1605_v57 = vsel %vm1461_vm9, -1.0, %v6670_v6  ;;  %v4575_v40 = vadd.f32 %v3681_v53, %v370_v63  ;;  %v4578_v54 = vadd.f32 %v3681_v53, %v371_v19  ;;  %v372_v27 = vmul.f32 %v3645_v34, %v219_v8 }
 0x27a   :  { %838 = vadd.xlane.f32.xlu1 %v837_v9  ;;  %v1749_v33 = vsel %vm1317_vm8, 1.0, %v1605_v57  ;;  %v373_v11 = vmul.f32 %v3645_v34, %v220_v30  ;;  %v307_v24 = vmul.f32 %v3645_v34, %v154_v25  ;;  %v300_v50 = vmul.f32 %v3645_v34, %v147_v55 }
 0x27b   :  { %6702 = vst [vmem:[#allocation10_spill] sm:$0xff] %v4575_v40  ;;  %v1874_v31 = vpack.c.bf16 %v1750_v51, %v1749_v33  ;;  %vm1389_vm10 = vcmp.gt.f32.partialorder %v4575_v40, 0.0  ;;  %vm1390_vm11 = vcmp.gt.f32.partialorder %v4578_v54, 0.0  ;;  %vm1533_vm12 = vcmp.lt.f32.partialorder %v4575_v40, 0.0  ;;  %v156_v33 = vld [vmem:[%s6655_s1 + $0x188] sm:$0xff] }
 0x27c   :  { %vm1534_vm13 = vcmp.lt.f32.partialorder %v4578_v54, 0.0  ;;  %v1677_v48 = vsel %vm1533_vm12, -1.0, %v6670_v6  ;;  %v4590_v8 = vadd.f32 %v3681_v53, %v372_v27  ;;  %v4593_v63 = vadd.f32 %v3681_v53, %v373_v11 }
 0x27d   :  { %3407 = vmatmul.mubr.msk.bf16.gmra.mxu0 %vm701_vm3, %v1874_v31  ;;  %v1678_v19 = vsel %vm1534_vm13, -1.0, %v6670_v6  ;;  %v1821_v30 = vsel %vm1389_vm10, 1.0, %v1677_v48  ;;  %v4598_v25 = vadd.f32 %v3681_v53, %v307_v24  ;;  %v4601_v55 = vadd.f32 %v3681_v53, %v300_v50  ;;  %v149_v48 = vld [vmem:[%s6655_s1 + $0x150] sm:$0xff] }
 0x27e   :  { %6703 = vst [vmem:[#allocation11_spill] sm:$0xff] %v4590_v8  ;;  %v1822_v9 = vsel %vm1390_vm11, 1.0, %v1678_v19  ;;  %vm1391_vm14 = vcmp.gt.f32.partialorder %v4590_v8, 0.0  ;;  %vm1392_vm15 = vcmp.gt.f32.partialorder %v4593_v63, 0.0  ;;  %vm1535_vm0 = vcmp.lt.f32.partialorder %v4590_v8, 0.0 }
 0x27f   :  { %v1910_v11 = vpack.c.bf16 %v1822_v9, %v1821_v30  ;;  %vm1536_vm1 = vcmp.lt.f32.partialorder %v4593_v63, 0.0  ;;  %v1679_v51 = vsel %vm1535_vm0, -1.0, %v6670_v6  ;;  %v604_v57 = vand.u32 2147483647, %v4598_v25 }
 0x280   :  { %v1680_v24 = vsel %vm1536_vm1, -1.0, %v6670_v6  ;;  %v1823_v27 = vsel %vm1391_vm14, 1.0, %v1679_v51  ;;  %vm1319_vm2 = vcmp.gt.f32.partialorder %v4601_v55, 0.0  ;;  %vm1320_vm4 = vcmp.gt.f32.partialorder %v4455_v42, 0.0 }
 0x281   :  { %3479 = vmatmul.mubr.msk.bf16.gmra.mxu1 %vm701_vm3, %v1910_v11  ;;  %v1824_v50 = vsel %vm1392_vm15, 1.0, %v1680_v24  ;;  %v843_v31 = vsel %vm701_vm3, %v604_v57, 0.0  ;;  %vm1463_vm5 = vcmp.lt.f32.partialorder %v4601_v55, 0.0  ;;  %vm1464_vm6 = vcmp.lt.f32.partialorder %v4455_v42, 0.0  ;;  %v221_v11 = vld [vmem:[%s6655_s1 + $0x390] sm:$0xff] }
 0x282   :  { %v1911_v19 = vpack.c.bf16 %v1824_v50, %v1823_v27  ;;  %844 = vadd.xlane.f32.xlu1 %v843_v31  ;;  %v1607_v30 = vsel %vm1463_vm5, -1.0, %v6670_v6  ;;  %v1608_v9 = vsel %vm1464_vm6, -1.0, %v6670_v6  ;;  %v587_v51 = vand.u32 2147483647, %v4362_v2  ;;  %v222_v27 = vld [vmem:[%s6655_s1 + $0x398] sm:$0xff]  ;;  %v223_v50 = vld [vmem:[%s6655_s1 + $0x3a0] sm:$0xff] }
 0x283   :  { %v1751_v57 = vsel %vm1319_vm2, 1.0, %v1607_v30  ;;  %v1752_v24 = vsel %vm1320_vm4, 1.0, %v1608_v9  ;;  %v309_v42 = vmul.f32 %v3645_v34, %v156_v33  ;;  %v589_v8 = vand.u32 2147483647, %v4419_v58  ;;  %v224_v58 = vld [vmem:[%s6655_s1 + $0x3a8] sm:$0xff] }
 0x284   :  { %3482 = vmatprep.mubr.msk.bf16.mxu1 %vm701_vm3, %v1911_v19  ;;  %v1875_v2 = vpack.c.bf16 %v1752_v24, %v1751_v57  ;;  %v792_v31 = vsel %vm701_vm3, %v587_v51, 0.0  ;;  %v302_v30 = vmul.f32 %v3645_v34, %v149_v48  ;;  %vm1322_vm7 = vcmp.gt.f32.partialorder %v4515_v62, 0.0 }
 0x285   :  { %793 = vadd.xlane.f32.xlu0 %v792_v31  ;;  %v4644_v33 = vadd.f32 %v3681_v53, %v309_v42  ;;  %v798_v9 = vsel %vm701_vm3, %v589_v8, 0.0  ;;  %vm1466_vm8 = vcmp.lt.f32.partialorder %v4515_v62, 0.0  ;;  %v374_v19 = vmul.f32 %v3645_v34, %v221_v11 }
 0x286   :  { %3410 = vmatprep.mubr.msk.bf16.mxu0 %vm701_vm3, %v1875_v2  ;;  %v4651_v48 = vadd.f32 %v3681_v53, %v302_v30  ;;  %v1610_v51 = vsel %vm1466_vm8, -1.0, %v6670_v6  ;;  %v375_v57 = vmul.f32 %v3645_v34, %v222_v27  ;;  %v376_v24 = vmul.f32 %v3645_v34, %v223_v50  ;;  %v158_v30 = vld [vmem:[%s6655_s1 + $0x198] sm:$0xff] }
 0x287   :  { %v606_v42 = vand.u32 2147483647, %v4644_v33  ;;  %v1754_v31 = vsel %vm1322_vm7, 1.0, %v1610_v51  ;;  %v4658_v8 = vadd.f32 %v3681_v53, %v374_v19  ;;  %v377_v62 = vmul.f32 %v3645_v34, %v224_v58 }
 0x288   :  { %vm1321_vm9 = vcmp.gt.f32.partialorder %v4651_v48, 0.0  ;;  %vm1465_vm10 = vcmp.lt.f32.partialorder %v4651_v48, 0.0  ;;  %v4664_v11 = vadd.f32 %v3681_v53, %v375_v57  ;;  %v4667_v2 = vadd.f32 %v3681_v53, %v376_v24 }
 0x289   :  { %6704 = vst [vmem:[#allocation12_spill] sm:$0xff] %v4658_v8  ;;  %v849_v27 = vsel %vm701_vm3, %v606_v42, 0.0  ;;  %799 = vadd.xlane.f32.xlu0 %v798_v9  ;;  %v1609_v50 = vsel %vm1465_vm10, -1.0, %v6670_v6  ;;  %vm1393_vm11 = vcmp.gt.f32.partialorder %v4658_v8, 0.0  ;;  %vm1537_vm12 = vcmp.lt.f32.partialorder %v4658_v8, 0.0  ;;  %v151_v42 = vld [vmem:[%s6655_s1 + $0x160] sm:$0xff] }
 0x28a   :  { %6705 = vst [vmem:[#allocation13_spill] sm:$0xff] %v4667_v2  ;;  %850 = vadd.xlane.f32.xlu1 %v849_v27  ;;  %v1753_v58 = vsel %vm1321_vm9, 1.0, %v1609_v50  ;;  %vm1394_vm13 = vcmp.gt.f32.partialorder %v4664_v11, 0.0  ;;  %vm1538_vm14 = vcmp.lt.f32.partialorder %v4664_v11, 0.0  ;;  %v1681_v19 = vsel %vm1537_vm12, -1.0, %v6670_v6 }
 0x28b   :  { %v1876_v51 = vpack.c.bf16 %v1754_v31, %v1753_v58  ;;  %v1682_v9 = vsel %vm1538_vm14, -1.0, %v6670_v6  ;;  %v1825_v57 = vsel %vm1393_vm11, 1.0, %v1681_v19  ;;  %v4681_v24 = vadd.f32 %v3681_v53, %v377_v62 }
 0x28c   :  { %v1826_v8 = vsel %vm1394_vm13, 1.0, %v1682_v9  ;;  %vm1395_vm15 = vcmp.gt.f32.partialorder %v4667_v2, 0.0  ;;  %vm1539_vm0 = vcmp.lt.f32.partialorder %v4667_v2, 0.0  ;;  %v311_v27 = vmul.f32 %v3645_v34, %v158_v30  ;;  %v160_v30 = vld [vmem:[%s6655_s1 + $0x1a8] sm:$0xff] }
 0x28d   :  { %6706 = vst [vmem:[#allocation14_spill] sm:$0xff] %v4681_v24  ;;  %3411 = vmatmul.mubr.msk.bf16.gmra.mxu0 %vm701_vm3, %v1876_v51  ;;  %v1912_v31 = vpack.c.bf16 %v1826_v8, %v1825_v57  ;;  %vm1396_vm1 = vcmp.gt.f32.partialorder %v4681_v24, 0.0  ;;  %vm1540_vm2 = vcmp.lt.f32.partialorder %v4681_v24, 0.0  ;;  %v1683_v62 = vsel %vm1539_vm0, -1.0, %v6670_v6  ;;  %v153_v57 = vld [vmem:[%s6655_s1 + $0x170] sm:$0xff] }
 0x28e   :  { %v1684_v50 = vsel %vm1540_vm2, -1.0, %v6670_v6  ;;  %v1827_v58 = vsel %vm1395_vm15, 1.0, %v1683_v62  ;;  %v4695_v19 = vadd.f32 %v3681_v53, %v311_v27  ;;  %v304_v9 = vmul.f32 %v3645_v34, %v151_v42 }
 0x28f   :  { %3483 = vmatmul.mubr.msk.bf16.gmra.mxu1 %vm701_vm3, %v1912_v31  ;;  %v1828_v8 = vsel %vm1396_vm1, 1.0, %v1684_v50  ;;  %vm1324_vm4 = vcmp.gt.f32.partialorder %v4534_v35, 0.0  ;;  %vm1468_vm5 = vcmp.lt.f32.partialorder %v4534_v35, 0.0  ;;  %v591_v51 = vand.u32 2147483647, %v4466_v7  ;;  %v225_v7 = vld [vmem:[%s6655_s1 + $0x3b0] sm:$0xff] }
 0x290   :  { %v1913_v27 = vpack.c.bf16 %v1828_v8, %v1827_v58  ;;  %v608_v42 = vand.u32 2147483647, %v4695_v19  ;;  %v4710_v62 = vadd.f32 %v3681_v53, %v304_v9  ;;  %v1612_v2 = vsel %vm1468_vm5, -1.0, %v6670_v6  ;;  %v226_v9 = vld [vmem:[%s6655_s1 + $0x3b8] sm:$0xff] }
 0x291   :  { %v1756_v31 = vsel %vm1324_vm4, 1.0, %v1612_v2  ;;  %v804_v50 = vsel %vm701_vm3, %v591_v51, 0.0  ;;  %v313_v40 = vmul.f32 %v3645_v34, %v160_v30  ;;  %v593_v35 = vand.u32 2147483647, %v4523_v28 }
 0x292   :  { %3486 = vmatprep.mubr.msk.bf16.mxu1 %vm701_vm3, %v1913_v27  ;;  %v855_v58 = vsel %vm701_vm3, %v608_v42, 0.0  ;;  %vm1323_vm6 = vcmp.gt.f32.partialorder %v4710_v62, 0.0  ;;  %vm1467_vm7 = vcmp.lt.f32.partialorder %v4710_v62, 0.0  ;;  %805 = vadd.xlane.f32.xlu0 %v804_v50  ;;  %v306_v2 = vmul.f32 %v3645_v34, %v153_v57  ;;  %v227_v42 = vld [vmem:[%s6655_s1 + $0x3c0] sm:$0xff] }
 0x293   :  { %856 = vadd.xlane.f32.xlu1 %v855_v58  ;;  %v1611_v28 = vsel %vm1467_vm7, -1.0, %v6670_v6  ;;  %v4729_v30 = vadd.f32 %v3681_v53, %v313_v40  ;;  %v810_v8 = vsel %vm701_vm3, %v593_v35, 0.0  ;;  %vm1326_vm8 = vcmp.gt.f32.partialorder %v4598_v25, 0.0 }
 0x294   :  { %v1755_v51 = vsel %vm1323_vm6, 1.0, %v1611_v28  ;;  %v4734_v27 = vadd.f32 %v3681_v53, %v306_v2  ;;  %vm1470_vm9 = vcmp.lt.f32.partialorder %v4598_v25, 0.0  ;;  %v378_v57 = vmul.f32 %v3645_v34, %v225_v7  ;;  %v228_v2 = vld [vmem:[%s6655_s1 + $0x3c8] sm:$0xff] }
 0x295   :  { %v1877_v50 = vpack.c.bf16 %v1756_v31, %v1755_v51  ;;  %v610_v40 = vand.u32 2147483647, %v4729_v30  ;;  %v1614_v58 = vsel %vm1470_vm9, -1.0, %v6670_v6  ;;  %v379_v35 = vmul.f32 %v3645_v34, %v226_v9 }
 0x296   :  { %811 = vadd.xlane.f32.xlu0 %v810_v8  ;;  %vm1325_vm10 = vcmp.gt.f32.partialorder %v4734_v27, 0.0  ;;  %vm1469_vm11 = vcmp.lt.f32.partialorder %v4734_v27, 0.0  ;;  %v1758_v25 = vsel %vm1326_vm8, 1.0, %v1614_v58  ;;  %v4750_v7 = vadd.f32 %v3681_v53, %v378_v57 }
 0x297   :  { %3414 = vmatprep.mubr.msk.bf16.mxu0 %vm701_vm3, %v1877_v50  ;;  %v861_v31 = vsel %vm701_vm3, %v610_v40, 0.0  ;;  %v1613_v28 = vsel %vm1469_vm11, -1.0, %v6670_v6  ;;  %v4756_v9 = vadd.f32 %v3681_v53, %v379_v35  ;;  %v380_v51 = vmul.f32 %v3645_v34, %v227_v42  ;;  %v162_v50 = vld [vmem:[%s6655_s1 + $0x1b8] sm:$0xff]  ;;  %v155_v40 = vld [vmem:[%s6655_s1 + $0x180] sm:$0xff] }
 0x298   :  { %6707 = vst [vmem:[#allocation15_spill] sm:$0xff] %v4750_v7  ;;  %862 = vadd.xlane.f32.xlu1 %v861_v31  ;;  %v1757_v8 = vsel %vm1325_vm10, 1.0, %v1613_v28  ;;  %vm1397_vm12 = vcmp.gt.f32.partialorder %v4750_v7, 0.0  ;;  %vm1541_vm13 = vcmp.lt.f32.partialorder %v4750_v7, 0.0  ;;  %v381_v57 = vmul.f32 %v3645_v34, %v228_v2 }
 0x299   :  { %6708 = vst [vmem:[#allocation16_spill] sm:$0xff] %v4756_v9  ;;  %v1878_v58 = vpack.c.bf16 %v1758_v25, %v1757_v8  ;;  %vm1398_vm14 = vcmp.gt.f32.partialorder %v4756_v9, 0.0  ;;  %vm1542_vm15 = vcmp.lt.f32.partialorder %v4756_v9, 0.0  ;;  %v1685_v42 = vsel %vm1541_vm13, -1.0, %v6670_v6 }
 0x29a   :  { %v1686_v35 = vsel %vm1542_vm15, -1.0, %v6670_v6  ;;  %v1829_v31 = vsel %vm1397_vm12, 1.0, %v1685_v42  ;;  %v4773_v2 = vadd.f32 %v3681_v53, %v380_v51  ;;  %v4776_v28 = vadd.f32 %v3681_v53, %v381_v57  ;;  %v164_v42 = vld [vmem:[%s6655_s1 + $0x1c8] sm:$0xff] }
 0x29b   :  { %3415 = vmatmul.mubr.msk.bf16.gmra.mxu0 %vm701_vm3, %v1878_v58  ;;  %v1830_v7 = vsel %vm1398_vm14, 1.0, %v1686_v35  ;;  %v315_v25 = vmul.f32 %v3645_v34, %v162_v50  ;;  %v308_v8 = vmul.f32 %v3645_v34, %v155_v40  ;;  %vm1328_vm0 = vcmp.gt.f32.partialorder %v4644_v33, 0.0 }
 0x29c   :  { %6709 = vst [vmem:[#allocation17_spill] sm:$0xff] %v4773_v2  ;;  %6710 = vst [vmem:[#allocation18_spill] sm:$0xff] %v4776_v28  ;;  %v1914_v59 = vpack.c.bf16 %v1830_v7, %v1829_v31  ;;  %vm1399_vm1 = vcmp.gt.f32.partialorder %v4773_v2, 0.0  ;;  %vm1400_vm2 = vcmp.gt.f32.partialorder %v4776_v28, 0.0  ;;  %vm1543_vm4 = vcmp.lt.f32.partialorder %v4773_v2, 0.0  ;;  %v230_v2 = vld [vmem:[%s6655_s1 + $0x3d8] sm:$0xff] }
 0x29d   :  { %vm1544_vm5 = vcmp.lt.f32.partialorder %v4776_v28, 0.0  ;;  %v1687_v51 = vsel %vm1543_vm4, -1.0, %v6670_v6  ;;  %v4788_v57 = vadd.f32 %v3681_v53, %v315_v25  ;;  %v4791_v50 = vadd.f32 %v3681_v53, %v308_v8 }
 0x29e   :  { %3487 = vmatmul.mubr.msk.bf16.gmra.mxu1 %vm701_vm3, %v1914_v59  ;;  %v1688_v7 = vsel %vm1544_vm5, -1.0, %v6670_v6  ;;  %v1831_v40 = vsel %vm1399_vm1, 1.0, %v1687_v51  ;;  %vm1472_vm6 = vcmp.lt.f32.partialorder %v4644_v33, 0.0  ;;  %v595_v58 = vand.u32 2147483647, %v4549_v5  ;;  %v157_v59 = vld [vmem:[%s6655_s1 + $0x190] sm:$0xff] }
 0x29f   :  { %v1832_v35 = vsel %vm1400_vm2, 1.0, %v1688_v7  ;;  %v612_v31 = vand.u32 2147483647, %v4788_v57  ;;  %vm1327_vm7 = vcmp.gt.f32.partialorder %v4791_v50, 0.0  ;;  %vm1471_vm8 = vcmp.lt.f32.partialorder %v4791_v50, 0.0  ;;  %v229_v7 = vld [vmem:[%s6655_s1 + $0x3d0] sm:$0xff] }
 0x2a0   :  { %v1915_v25 = vpack.c.bf16 %v1832_v35, %v1831_v40  ;;  %v1615_v8 = vsel %vm1471_vm8, -1.0, %v6670_v6  ;;  %v1616_v5 = vsel %vm1472_vm6, -1.0, %v6670_v6  ;;  %v816_v51 = vsel %vm701_vm3, %v595_v58, 0.0  ;;  %v231_v58 = vld [vmem:[%s6655_s1 + $0x3e0] sm:$0xff] }
 0x2a1   :  { %v867_v28 = vsel %vm701_vm3, %v612_v31, 0.0  ;;  %v1759_v9 = vsel %vm1327_vm7, 1.0, %v1615_v8  ;;  %v1760_v40 = vsel %vm1328_vm0, 1.0, %v1616_v5  ;;  %817 = vadd.xlane.f32.xlu0 %v816_v51  ;;  %v317_v35 = vmul.f32 %v3645_v34, %v164_v42 }
 0x2a2   :  { %3490 = vmatprep.mubr.msk.bf16.mxu1 %vm701_vm3, %v1915_v25  ;;  %868 = vadd.xlane.f32.xlu1 %v867_v28  ;;  %v1879_v6 = vpack.c.bf16 %v1760_v40, %v1759_v9  ;;  %v597_v56 = vand.u32 2147483647, %v4601_v55  ;;  %v310_v24 = vmul.f32 %v3645_v34, %v157_v59  ;;  %vm1330_vm9 = vcmp.gt.f32.partialorder %v4695_v19, 0.0  ;;  %v232_v28 = vld [vmem:[%s6655_s1 + $0x3e8] sm:$0xff] }
 0x2a3   :  { %v4827_v33 = vadd.f32 %v3681_v53, %v317_v35  ;;  %vm1474_vm10 = vcmp.lt.f32.partialorder %v4695_v19, 0.0  ;;  %v382_v42 = vmul.f32 %v3645_v34, %v229_v7  ;;  %v383_v31 = vmul.f32 %v3645_v34, %v230_v2 }
 0x2a4   :  { %3418 = vmatprep.mubr.msk.bf16.mxu0 %vm701_vm3, %v1879_v6  ;;  %v822_v55 = vsel %vm701_vm3, %v597_v56, 0.0  ;;  %v4838_v9 = vadd.f32 %v3681_v53, %v310_v24  ;;  %v6711_v59 = vmov 0.0   ;;  %v384_v8 = vmul.f32 %v3645_v34, %v231_v58  ;;  %v166_v58 = vld [vmem:[%s6655_s1 + $0x1d8] sm:$0xff] }
 0x2a5   :  { %v1618_v25 = vsel %vm1474_vm10, -1.0, %v6711_v59  ;;  %v614_v19 = vand.u32 2147483647, %v4827_v33  ;;  %823 = vadd.xlane.f32.xlu0 %v822_v55  ;;  %v4844_v2 = vadd.f32 %v3681_v53, %v382_v42  ;;  %v4847_v51 = vadd.f32 %v3681_v53, %v383_v31  ;;  %v159_v55 = vld [vmem:[%s6655_s1 + $0x1a0] sm:$0xff] }
 0x2a6   :  { %v1762_v5 = vsel %vm1330_vm9, 1.0, %v1618_v25  ;;  %vm1329_vm11 = vcmp.gt.f32.partialorder %v4838_v9, 0.0  ;;  %vm1473_vm12 = vcmp.lt.f32.partialorder %v4838_v9, 0.0  ;;  %v385_v6 = vmul.f32 %v3645_v34, %v232_v28 }
 0x2a7   :  { %6712 = vst [vmem:[#allocation19_spill] sm:$0xff] %v4844_v2  ;;  %6713 = vst [vmem:[#allocation20_spill] sm:$0xff] %v4847_v51  ;;  %v4853_v56 = vadd.f32 %v3681_v53, %v384_v8  ;;  %v873_v24 = vsel %vm701_vm3, %v614_v19, 0.0  ;;  %v1617_v7 = vsel %vm1473_vm12, -1.0, %v6711_v59  ;;  %vm1401_vm13 = vcmp.gt.f32.partialorder %v4844_v2, 0.0 }
 0x2a8   :  { %vm1402_vm14 = vcmp.gt.f32.partialorder %v4847_v51, 0.0  ;;  %874 = vadd.xlane.f32.xlu1 %v873_v24  ;;  %v1761_v40 = vsel %vm1329_vm11, 1.0, %v1617_v7  ;;  %vm1545_vm15 = vcmp.lt.f32.partialorder %v4844_v2, 0.0  ;;  %vm1546_vm0 = vcmp.lt.f32.partialorder %v4847_v51, 0.0  ;;  %v168_v24 = vld [vmem:[%s6655_s1 + $0x1e8] sm:$0xff]  ;;  %v4904_v2 = vpop.xlane.xlu0 %703 }
 0x2a9   :  { %6714 = vst [vmem:[#allocation21_spill] sm:$0xff] %v4853_v56  ;;  %v4862_v35 = vadd.f32 %v3681_v53, %v385_v6  ;;  %v1880_v42 = vpack.c.bf16 %v1762_v5, %v1761_v40  ;;  %v1689_v31 = vsel %vm1545_vm15, -1.0, %v6711_v59  ;;  %v1690_v28 = vsel %vm1546_vm0, -1.0, %v6711_v59  ;;  %6717 = vst [vmem:[#allocation24_spill] sm:$0xff] %v4904_v2 }
 0x2aa   :  { %vm1403_vm1 = vcmp.gt.f32.partialorder %v4853_v56, 0.0  ;;  %v1833_v25 = vsel %vm1401_vm13, 1.0, %v1689_v31  ;;  %v1834_v8 = vsel %vm1402_vm14, 1.0, %v1690_v28  ;;  %vm1547_vm4 = vcmp.lt.f32.partialorder %v4853_v56, 0.0 }
 0x2ab   :  { %6715 = vst [vmem:[#allocation22_spill] sm:$0xff] %v4862_v35  ;;  %vm1404_vm2 = vcmp.gt.f32.partialorder %v4862_v35, 0.0  ;;  %3419 = vmatmul.mubr.msk.bf16.gmra.mxu0 %vm701_vm3, %v1880_v42  ;;  %v1916_v19 = vpack.c.bf16 %v1834_v8, %v1833_v25  ;;  %vm1548_vm5 = vcmp.lt.f32.partialorder %v4862_v35, 0.0  ;;  %v1691_v5 = vsel %vm1547_vm4, -1.0, %v6711_v59  ;;  %v161_v25 = vld [vmem:[%s6655_s1 + $0x1b0] sm:$0xff]  ;;  %v4894_v8 = vpop.xlane.xlu1 %706 }
 0x2ac   :  { %v319_v6 = vmul.f32 %v3645_v34, %v166_v58  ;;  %v1692_v7 = vsel %vm1548_vm5, -1.0, %v6711_v59  ;;  %v1835_v40 = vsel %vm1403_vm1, 1.0, %v1691_v5  ;;  %v312_v31 = vmul.f32 %v3645_v34, %v159_v55  ;;  %6716 = vst [vmem:[#allocation23_spill] sm:$0xff] %v4894_v8 }
 0x2ad   :  { %vm1332_vm6 = vcmp.gt.f32.partialorder %v4729_v30, 0.0  ;;  %3491 = vmatmul.mubr.msk.bf16.gmra.mxu1 %vm701_vm3, %v1916_v19  ;;  %v1836_v42 = vsel %vm1404_vm2, 1.0, %v1692_v7  ;;  %vm1476_vm7 = vcmp.lt.f32.partialorder %v4729_v30, 0.0  ;;  %v599_v58 = vand.u32 2147483647, %v4651_v48 }
 0x2ae   :  { %v4887_v28 = vadd.f32 %v3681_v53, %v319_v6  ;;  %v1917_v5 = vpack.c.bf16 %v1836_v42, %v1835_v40  ;;  %v4897_v55 = vadd.f32 %v3681_v53, %v312_v31  ;;  %v1620_v19 = vsel %vm1476_vm7, -1.0, %v6711_v59  ;;  %v233_v31 = vld [vmem:[%s6655_s1 + $0x3f0] sm:$0xff] }
 0x2af   :  { %v321_v7 = vmul.f32 %v3645_v34, %v168_v24  ;;  %v1764_v56 = vsel %vm1332_vm6, 1.0, %v1620_v19  ;;  %v828_v30 = vsel %vm701_vm3, %v599_v58, 0.0  ;;  %v601_v48 = vand.u32 2147483647, %v4710_v62  ;;  %v234_v62 = vld [vmem:[%s6655_s1 + $0x3f8] sm:$0xff]  ;;  %v4943_v35 = vpop.xlane.xlu1 %736 }
 0x2b0   :  { %v616_v6 = vand.u32 2147483647, %v4887_v28  ;;  %3494 = vmatprep.mubr.msk.bf16.mxu1 %vm701_vm3, %v1917_v5  ;;  %vm1331_vm8 = vcmp.gt.f32.partialorder %v4897_v55, 0.0  ;;  %vm1475_vm9 = vcmp.lt.f32.partialorder %v4897_v55, 0.0  ;;  %829 = vadd.xlane.f32.xlu0 %v828_v30  ;;  %v314_v24 = vmul.f32 %v3645_v34, %v161_v25  ;;  %v235_v30 = vld [vmem:[%s6655_s1 + $0x400] sm:$0xff]  ;;  %6718 = vst [vmem:[#allocation25_spill] sm:$0xff] %v4943_v35 }
 0x2b1   :  { %v4910_v40 = vadd.f32 %v3681_v53, %v321_v7  ;;  %v1619_v58 = vsel %vm1475_vm9, -1.0, %v6711_v59  ;;  %v834_v5 = vsel %vm701_vm3, %v601_v48, 0.0  ;;  %vm1334_vm10 = vcmp.gt.f32.partialorder %v4788_v57, 0.0 }
 0x2b2   :  { %v879_v42 = vsel %vm701_vm3, %v616_v6, 0.0  ;;  %v1763_v19 = vsel %vm1331_vm8, 1.0, %v1619_v58  ;;  %v4925_v7 = vadd.f32 %v3681_v53, %v314_v24  ;;  %vm1478_vm11 = vcmp.lt.f32.partialorder %v4788_v57, 0.0  ;;  %v170_v24 = vld [vmem:[%s6655_s1 + $0x1f8] sm:$0xff]  ;;  %v163_v58 = vld [vmem:[%s6655_s1 + $0x1c0] sm:$0xff] }
 0x2b3   :  { %880 = vadd.xlane.f32.xlu1 %v879_v42  ;;  %v618_v25 = vand.u32 2147483647, %v4910_v40  ;;  %v1881_v6 = vpack.c.bf16 %v1764_v56, %v1763_v19  ;;  %v1622_v2 = vsel %vm1478_vm11, -1.0, %v6711_v59  ;;  %v386_v48 = vmul.f32 %v3645_v34, %v233_v31  ;;  %v236_v42 = vld [vmem:[%s6655_s1 + $0x408] sm:$0xff] }
 0x2b4   :  { %v387_v8 = vmul.f32 %v3645_v34, %v234_v62  ;;  %835 = vadd.xlane.f32.xlu0 %v834_v5  ;;  %vm1333_vm12 = vcmp.gt.f32.partialorder %v4925_v7, 0.0  ;;  %vm1477_vm13 = vcmp.lt.f32.partialorder %v4925_v7, 0.0  ;;  %v1766_v31 = vsel %vm1334_vm10, 1.0, %v1622_v2  ;;  %v4959_v5 = vpop.xlane.xlu0 %709 }
 0x2b5   :  { %v885_v56 = vsel %vm701_vm3, %v618_v25, 0.0  ;;  %3422 = vmatprep.mubr.msk.bf16.mxu0 %vm701_vm3, %v1881_v6  ;;  %v1621_v62 = vsel %vm1477_vm13, -1.0, %v6711_v59  ;;  %v4953_v19 = vadd.f32 %v3681_v53, %v386_v48  ;;  %v388_v25 = vmul.f32 %v3645_v34, %v235_v30  ;;  %6720 = vst [vmem:[#allocation27_spill] sm:$0xff] %v4959_v5 }
 0x2b6   :  { %v4956_v51 = vadd.f32 %v3681_v53, %v387_v8  ;;  %v1765_v35 = vsel %vm1333_vm12, 1.0, %v1621_v62  ;;  %v389_v37 = vmul.f32 %v3645_v34, %v236_v42  ;;  %v323_v57 = vmul.f32 %v3645_v34, %v170_v24 }
 0x2b7   :  { %6719 = vst [vmem:[#allocation26_spill] sm:$0xff] %v4953_v19  ;;  %886 = vadd.xlane.f32.xlu1 %v885_v56  ;;  %v316_v2 = vmul.f32 %v3645_v34, %v163_v58  ;;  %v1882_v6 = vpack.c.bf16 %v1766_v31, %v1765_v35  ;;  %vm1405_vm14 = vcmp.gt.f32.partialorder %v4953_v19, 0.0  ;;  %vm1549_vm0 = vcmp.lt.f32.partialorder %v4953_v19, 0.0  ;;  %v4967_v8 = vpop.f32.mrf.mxu0  ;;  %v4985_v31 = vpop.xlane.xlu1 %742 }
 0x2b8   :  { %vm1406_vm15 = vcmp.gt.f32.partialorder %v4956_v51, 0.0  ;;  %6721 = vst [vmem:[#allocation28_spill] sm:$0xff] %v4967_v8  ;;  %vm1550_vm1 = vcmp.lt.f32.partialorder %v4956_v51, 0.0  ;;  %v1693_v30 = vsel %vm1549_vm0, -1.0, %v6711_v59  ;;  %v4972_v48 = vadd.f32 %v3681_v53, %v388_v25  ;;  %6724 = vst [vmem:[#allocation31_spill] sm:$0xff] %v4985_v31 }
 0x2b9   :  { %v4975_v42 = vadd.f32 %v3681_v53, %v389_v37  ;;  %3423 = vmatmul.mubr.msk.bf16.gmra.mxu0 %vm701_vm3, %v1882_v6  ;;  %v1694_v35 = vsel %vm1550_vm1, -1.0, %v6711_v59  ;;  %v1837_v24 = vsel %vm1405_vm14, 1.0, %v1693_v30  ;;  %v4980_v58 = vadd.f32 %v3681_v53, %v323_v57  ;;  %v4990_v37 = vpop.f32.mrf.mxu0 }
 0x2ba   :  { %6722 = vst [vmem:[#allocation29_spill] sm:$0xff] %v4972_v48  ;;  %v4983_v56 = vadd.f32 %v3681_v53, %v316_v2  ;;  %v1838_v62 = vsel %vm1406_vm15, 1.0, %v1694_v35  ;;  %vm1407_vm2 = vcmp.gt.f32.partialorder %v4972_v48, 0.0  ;;  %vm1551_vm5 = vcmp.lt.f32.partialorder %v4972_v48, 0.0  ;;  %6725 = vst [vmem:[#allocation32_spill] sm:$0xff] %v4990_v37  ;;  %v4995_v2 = vpop.xlane.xlu0 %712  ;;  %v172_v48 = vld [vmem:[%s6655_s1 + $0x208] sm:$0xff] }
 0x2bb   :  { %6723 = vst [vmem:[#allocation30_spill] sm:$0xff] %v4975_v42  ;;  %vm1408_vm4 = vcmp.gt.f32.partialorder %v4975_v42, 0.0  ;;  %v1918_v25 = vpack.c.bf16 %v1838_v62, %v1837_v24  ;;  %vm1552_vm6 = vcmp.lt.f32.partialorder %v4975_v42, 0.0  ;;  %v1695_v57 = vsel %vm1551_vm5, -1.0, %v6711_v59  ;;  %6726 = vst [vmem:[#allocation33_spill] sm:$0xff] %v4995_v2  ;;  %v5010_v19 = vpop.f32.mrf.mxu0 }
 0x2bc   :  { %v620_v6 = vand.u32 2147483647, %v4980_v58  ;;  %v1696_v30 = vsel %vm1552_vm6, -1.0, %v6711_v59  ;;  %v1839_v35 = vsel %vm1407_vm2, 1.0, %v1695_v57  ;;  %vm1335_vm7 = vcmp.gt.f32.partialorder %v4983_v56, 0.0  ;;  %v165_v57 = vld [vmem:[%s6655_s1 + $0x1d0] sm:$0xff] }
 0x2bd   :  { %vm1336_vm8 = vcmp.gt.f32.partialorder %v4827_v33, 0.0  ;;  %3495 = vmatmul.mubr.msk.bf16.gmra.mxu1 %vm701_vm3, %v1918_v25  ;;  %v1840_v24 = vsel %vm1408_vm4, 1.0, %v1696_v30  ;;  %vm1479_vm9 = vcmp.lt.f32.partialorder %v4983_v56, 0.0  ;;  %vm1480_vm10 = vcmp.lt.f32.partialorder %v4827_v33, 0.0  ;;  %6727 = vst [vmem:[#allocation34_spill] sm:$0xff] %v5010_v19 }
 0x2be   :  { %v891_v62 = vsel %vm701_vm3, %v620_v6, 0.0  ;;  %v1919_v37 = vpack.c.bf16 %v1840_v24, %v1839_v35  ;;  %v1623_v2 = vsel %vm1479_vm9, -1.0, %v6711_v59  ;;  %v1624_v31 = vsel %vm1480_vm10, -1.0, %v6711_v59  ;;  %v237_v6 = vld [vmem:[%s6655_s1 + $0x410] sm:$0xff]  ;;  %v238_v24 = vld [vmem:[%s6655_s1 + $0x418] sm:$0xff] }
 0x2bf   :  { %892 = vadd.xlane.f32.xlu1 %v891_v62  ;;  %v603_v25 = vand.u32 2147483647, %v4734_v27  ;;  %v1767_v30 = vsel %vm1335_vm7, 1.0, %v1623_v2  ;;  %v1768_v8 = vsel %vm1336_vm8, 1.0, %v1624_v31  ;;  %v325_v19 = vmul.f32 %v3645_v34, %v172_v48  ;;  %v239_v27 = vld [vmem:[%s6655_s1 + $0x420] sm:$0xff]  ;;  %v5030_v62 = vpop.xlane.xlu1 %748 }
 0x2c0   :  { %v605_v35 = vand.u32 2147483647, %v4791_v50  ;;  %6728 = vst [vmem:[#allocation35_spill] sm:$0xff] %v5030_v62  ;;  %3498 = vmatprep.mubr.msk.bf16.mxu1 %vm701_vm3, %v1919_v37  ;;  %v1883_v2 = vpack.c.bf16 %v1768_v8, %v1767_v30  ;;  %v318_v31 = vmul.f32 %v3645_v34, %v165_v57  ;;  %vm1338_vm11 = vcmp.gt.f32.partialorder %v4887_v28, 0.0  ;;  %v240_v50 = vld [vmem:[%s6655_s1 + $0x428] sm:$0xff]  ;;  %v5045_v37 = vpop.xlane.xlu0 %715 }
 0x2c1   :  { %v840_v33 = vsel %vm701_vm3, %v603_v25, 0.0  ;;  %v5040_v48 = vadd.f32 %v3681_v53, %v325_v19  ;;  %vm1482_vm12 = vcmp.lt.f32.partialorder %v4887_v28, 0.0  ;;  %v390_v8 = vmul.f32 %v3645_v34, %v237_v6  ;;  %6729 = vst [vmem:[#allocation36_spill] sm:$0xff] %v5045_v37  ;;  %v5047_v25 = vpop.f32.mrf.mxu0 }
 0x2c2   :  { %841 = vadd.xlane.f32.xlu0 %v840_v33  ;;  %v846_v5 = vsel %vm701_vm3, %v605_v35, 0.0  ;;  %6730 = vst [vmem:[#allocation37_spill] sm:$0xff] %v5047_v25  ;;  %3426 = vmatprep.mubr.msk.bf16.mxu0 %vm701_vm3, %v1883_v2  ;;  %v5051_v57 = vadd.f32 %v3681_v53, %v318_v31  ;;  %v1626_v30 = vsel %vm1482_vm12, -1.0, %v6711_v59  ;;  %v391_v19 = vmul.f32 %v3645_v34, %v238_v24 }
 0x2c3   :  { %v392_v33 = vmul.f32 %v3645_v34, %v239_v27  ;;  %v622_v35 = vand.u32 2147483647, %v5040_v48  ;;  %v1770_v28 = vsel %vm1338_vm11, 1.0, %v1626_v30  ;;  %v5058_v6 = vadd.f32 %v3681_v53, %v390_v8  ;;  %v5076_v8 = vpop.xlane.xlu1 %754 }
 0x2c4   :  { %v393_v37 = vmul.f32 %v3645_v34, %v240_v50  ;;  %vm1337_vm13 = vcmp.gt.f32.partialorder %v5051_v57, 0.0  ;;  %vm1481_vm14 = vcmp.lt.f32.partialorder %v5051_v57, 0.0  ;;  %v5064_v2 = vadd.f32 %v3681_v53, %v391_v19  ;;  %v174_v50 = vld [vmem:[%s6655_s1 + $0x218] sm:$0xff]  ;;  %6734 = vst [vmem:[#allocation41_spill] sm:$0xff] %v5076_v8  ;;  %v5078_v30 = vpop.f32.mrf.mxu0  ;;  %v167_v8 = vld [vmem:[%s6655_s1 + $0x1e0] sm:$0xff] }
 0x2c5   :  { %6731 = vst [vmem:[#allocation38_spill] sm:$0xff] %v5058_v6  ;;  %v5067_v31 = vadd.f32 %v3681_v53, %v392_v33  ;;  %v897_v24 = vsel %vm701_vm3, %v622_v35, 0.0  ;;  %v1625_v27 = vsel %vm1481_vm14, -1.0, %v6711_v59  ;;  %vm1409_vm15 = vcmp.gt.f32.partialorder %v5058_v6, 0.0  ;;  %6735 = vst [vmem:[#allocation42_spill] sm:$0xff] %v5078_v30  ;;  %v5090_v30 = vpop.xlane.xlu0 %718 }
 0x2c6   :  { %6732 = vst [vmem:[#allocation39_spill] sm:$0xff] %v5064_v2  ;;  %847 = vadd.xlane.f32.xlu0 %v846_v5  ;;  %vm1553_vm0 = vcmp.lt.f32.partialorder %v5058_v6, 0.0  ;;  %898 = vadd.xlane.f32.xlu1 %v897_v24  ;;  %v1769_v19 = vsel %vm1337_vm13, 1.0, %v1625_v27  ;;  %vm1410_vm1 = vcmp.gt.f32.partialorder %v5064_v2, 0.0  ;;  %vm1554_vm2 = vcmp.lt.f32.partialorder %v5064_v2, 0.0  ;;  %6737 = vst [vmem:[#allocation44_spill] sm:$0xff] %v5090_v30 }
 0x2c7   :  { %6733 = vst [vmem:[#allocation40_spill] sm:$0xff] %v5067_v31  ;;  %v1697_v5 = vsel %vm1553_vm0, -1.0, %v6711_v59  ;;  %v1884_v33 = vpack.c.bf16 %v1770_v28, %v1769_v19  ;;  %v1698_v35 = vsel %vm1554_vm2, -1.0, %v6711_v59  ;;  %v5085_v25 = vadd.f32 %v3681_v53, %v393_v37  ;;  %v5099_v19 = vpop.f32.mrf.mxu0 }
 0x2c8   :  { %v1841_v6 = vsel %vm1409_vm15, 1.0, %v1697_v5  ;;  %v1842_v24 = vsel %vm1410_vm1, 1.0, %v1698_v35  ;;  %vm1411_vm4 = vcmp.gt.f32.partialorder %v5067_v31, 0.0  ;;  %vm1555_vm5 = vcmp.lt.f32.partialorder %v5067_v31, 0.0  ;;  %6738 = vst [vmem:[#allocation45_spill] sm:$0xff] %v5099_v19 }
 0x2c9   :  { %6736 = vst [vmem:[#allocation43_spill] sm:$0xff] %v5085_v25  ;;  %v327_v27 = vmul.f32 %v3645_v34, %v174_v50  ;;  %3427 = vmatmul.mubr.msk.bf16.gmra.mxu0 %vm701_vm3, %v1884_v33  ;;  %v1920_v28 = vpack.c.bf16 %v1842_v24, %v1841_v6  ;;  %vm1412_vm6 = vcmp.gt.f32.partialorder %v5085_v25, 0.0  ;;  %vm1556_vm7 = vcmp.lt.f32.partialorder %v5085_v25, 0.0  ;;  %v176_v6 = vld [vmem:[%s6655_s1 + $0x228] sm:$0xff]  ;;  %v169_v24 = vld [vmem:[%s6655_s1 + $0x1f0] sm:$0xff] }
 0x2ca   :  { %v1699_v37 = vsel %vm1555_vm5, -1.0, %v6711_v59  ;;  %v1700_v5 = vsel %vm1556_vm7, -1.0, %v6711_v59  ;;  %v320_v31 = vmul.f32 %v3645_v34, %v167_v8  ;;  %vm1340_vm8 = vcmp.gt.f32.partialorder %v4910_v40, 0.0  ;;  %v241_v25 = vld [vmem:[%s6655_s1 + $0x430] sm:$0xff] }
 0x2cb   :  { %v1843_v35 = vsel %vm1411_vm4, 1.0, %v1699_v37  ;;  %v5103_v30 = vadd.f32 %v3681_v53, %v327_v27  ;;  %3499 = vmatmul.mubr.msk.bf16.gmra.mxu1 %vm701_vm3, %v1920_v28  ;;  %v1844_v50 = vsel %vm1412_vm6, 1.0, %v1700_v5  ;;  %vm1484_vm9 = vcmp.lt.f32.partialorder %v4910_v40, 0.0  ;;  %v5116_v27 = vpop.xlane.xlu1 %760 }
 0x2cc   :  { %v607_v33 = vand.u32 2147483647, %v4838_v9  ;;  %6739 = vst [vmem:[#allocation46_spill] sm:$0xff] %v5116_v27  ;;  %v1921_v8 = vpack.c.bf16 %v1844_v50, %v1843_v35  ;;  %v5120_v19 = vadd.f32 %v3681_v53, %v320_v31  ;;  %v1628_v28 = vsel %vm1484_vm9, -1.0, %v6711_v59  ;;  %v5129_v27 = vpop.xlane.xlu0 %721  ;;  %v5131_v35 = vpop.f32.mrf.mxu0 }
 0x2cd   :  { %v624_v37 = vand.u32 2147483647, %v5103_v30  ;;  %v1772_v5 = vsel %vm1340_vm8, 1.0, %v1628_v28  ;;  %v329_v40 = vmul.f32 %v3645_v34, %v176_v6  ;;  %v609_v9 = vand.u32 2147483647, %v4897_v55  ;;  %6740 = vst [vmem:[#allocation47_spill] sm:$0xff] %v5129_v27 }
 0x2ce   :  { %v852_v62 = vsel %vm701_vm3, %v607_v33, 0.0  ;;  %6741 = vst [vmem:[#allocation48_spill] sm:$0xff] %v5131_v35  ;;  %3502 = vmatprep.mubr.msk.bf16.mxu1 %vm701_vm3, %v1921_v8  ;;  %vm1339_vm10 = vcmp.gt.f32.partialorder %v5120_v19, 0.0  ;;  %vm1483_vm11 = vcmp.lt.f32.partialorder %v5120_v19, 0.0  ;;  %v322_v6 = vmul.f32 %v3645_v34, %v169_v24  ;;  %v242_v55 = vld [vmem:[%s6655_s1 + $0x438] sm:$0xff]  ;;  %v243_v24 = vld [vmem:[%s6655_s1 + $0x440] sm:$0xff]  ;;  %v5163_v27 = vpop.f32.mrf.mxu0 }
 0x2cf   :  { %v903_v31 = vsel %vm701_vm3, %v624_v37, 0.0  ;;  %853 = vadd.xlane.f32.xlu0 %v852_v62  ;;  %v1627_v50 = vsel %vm1483_vm11, -1.0, %v6711_v59  ;;  %v5143_v33 = vadd.f32 %v3681_v53, %v329_v40  ;;  %v858_v8 = vsel %vm701_vm3, %v609_v9, 0.0  ;;  %6743 = vst [vmem:[#allocation50_spill] sm:$0xff] %v5163_v27 }
 0x2d0   :  { %904 = vadd.xlane.f32.xlu1 %v903_v31  ;;  %vm1342_vm12 = vcmp.gt.f32.partialorder %v4980_v58, 0.0  ;;  %v1771_v37 = vsel %vm1339_vm10, 1.0, %v1627_v50  ;;  %v5148_v28 = vadd.f32 %v3681_v53, %v322_v6  ;;  %vm1486_vm13 = vcmp.lt.f32.partialorder %v4980_v58, 0.0  ;;  %v244_v6 = vld [vmem:[%s6655_s1 + $0x448] sm:$0xff]  ;;  %v5161_v50 = vpop.xlane.xlu1 %766  ;;  %v5179_v27 = vpop.xlane.xlu0 %724 }
 0x2d1   :  { %v394_v62 = vmul.f32 %v3645_v34, %v241_v25  ;;  %v1885_v31 = vpack.c.bf16 %v1772_v5, %v1771_v37  ;;  %v626_v40 = vand.u32 2147483647, %v5143_v33  ;;  %v1630_v35 = vsel %vm1486_vm13, -1.0, %v6711_v59  ;;  %6742 = vst [vmem:[#allocation49_spill] sm:$0xff] %v5161_v50  ;;  %6746 = vst [vmem:[#allocation53_spill] sm:$0xff] %v5179_v27 }
 0x2d2   :  { %v395_v9 = vmul.f32 %v3645_v34, %v242_v55  ;;  %vm1341_vm14 = vcmp.gt.f32.partialorder %v5148_v28, 0.0  ;;  %vm1485_vm15 = vcmp.lt.f32.partialorder %v5148_v28, 0.0  ;;  %v1774_v25 = vsel %vm1342_vm12, 1.0, %v1630_v35  ;;  %v178_v35 = vld [vmem:[%s6655_s1 + $0x238] sm:$0xff] }
 0x2d3   :  { %859 = vadd.xlane.f32.xlu0 %v858_v8  ;;  %v5170_v5 = vadd.f32 %v3681_v53, %v394_v62  ;;  %3430 = vmatprep.mubr.msk.bf16.mxu0 %vm701_vm3, %v1885_v31  ;;  %v909_v55 = vsel %vm701_vm3, %v626_v40, 0.0  ;;  %v1629_v37 = vsel %vm1485_vm15, -1.0, %v6711_v59  ;;  %v396_v8 = vmul.f32 %v3645_v34, %v243_v24  ;;  %v171_v62 = vld [vmem:[%s6655_s1 + $0x200] sm:$0xff] }
 0x2d4   :  { %v5176_v50 = vadd.f32 %v3681_v53, %v395_v9  ;;  %910 = vadd.xlane.f32.xlu1 %v909_v55  ;;  %v1773_v2 = vsel %vm1341_vm14, 1.0, %v1629_v37  ;;  %v397_v58 = vmul.f32 %v3645_v34, %v244_v6  ;;  %vm1344_vm5 = vcmp.gt.f32.partialorder %v5040_v48, 0.0  ;;  %v5206_v27 = vpop.xlane.xlu1 %772 }
 0x2d5   :  { %6744 = vst [vmem:[#allocation51_spill] sm:$0xff] %v5170_v5  ;;  %vm1413_vm0 = vcmp.gt.f32.partialorder %v5170_v5, 0.0  ;;  %vm1557_vm1 = vcmp.lt.f32.partialorder %v5170_v5, 0.0  ;;  %v1886_v31 = vpack.c.bf16 %v1774_v25, %v1773_v2  ;;  %v5193_v40 = vpop.f32.mrf.mxu0  ;;  %v5197_v55 = vadd.f32 %v3681_v53, %v396_v8  ;;  %6750 = vst [vmem:[#allocation57_spill] sm:$0xff] %v5206_v27  ;;  %v246_v27 = vld [vmem:[%s6655_s1 + $0x458] sm:$0xff] }
 0x2d6   :  { %6745 = vst [vmem:[#allocation52_spill] sm:$0xff] %v5176_v50  ;;  %vm1414_vm2 = vcmp.gt.f32.partialorder %v5176_v50, 0.0  ;;  %vm1558_vm4 = vcmp.lt.f32.partialorder %v5176_v50, 0.0  ;;  %v1701_v24 = vsel %vm1557_vm1, -1.0, %v6711_v59  ;;  %6747 = vst [vmem:[#allocation54_spill] sm:$0xff] %v5193_v40  ;;  %v5200_v37 = vadd.f32 %v3681_v53, %v397_v58 }
 0x2d7   :  { %v1702_v9 = vsel %vm1558_vm4, -1.0, %v6711_v59  ;;  %v1845_v6 = vsel %vm1413_vm0, 1.0, %v1701_v24  ;;  %6748 = vst [vmem:[#allocation55_spill] sm:$0xff] %v5197_v55  ;;  %3431 = vmatmul.mubr.msk.bf16.gmra.mxu0 %vm701_vm3, %v1886_v31  ;;  %v331_v25 = vmul.f32 %v3645_v34, %v178_v35  ;;  %v324_v5 = vmul.f32 %v3645_v34, %v171_v62  ;;  %v5208_v50 = vpop.f32.mrf.mxu0  ;;  %v5221_v62 = vpop.xlane.xlu0 %727 }
 0x2d8   :  { %6749 = vst [vmem:[#allocation56_spill] sm:$0xff] %v5200_v37  ;;  %v1846_v2 = vsel %vm1414_vm2, 1.0, %v1702_v9  ;;  %6751 = vst [vmem:[#allocation58_spill] sm:$0xff] %v5208_v50  ;;  %vm1415_vm6 = vcmp.gt.f32.partialorder %v5197_v55, 0.0  ;;  %vm1416_vm7 = vcmp.gt.f32.partialorder %v5200_v37, 0.0  ;;  %vm1559_vm8 = vcmp.lt.f32.partialorder %v5197_v55, 0.0 }
 0x2d9   :  { %v1922_v24 = vpack.c.bf16 %v1846_v2, %v1845_v6  ;;  %vm1560_vm9 = vcmp.lt.f32.partialorder %v5200_v37, 0.0  ;;  %v1703_v8 = vsel %vm1559_vm8, -1.0, %v6711_v59  ;;  %v5216_v58 = vadd.f32 %v3681_v53, %v331_v25  ;;  %6752 = vst [vmem:[#allocation59_spill] sm:$0xff] %v5221_v62  ;;  %v5227_v2 = vpop.f32.mrf.mxu1 }
 0x2da   :  { %v5219_v35 = vadd.f32 %v3681_v53, %v324_v5  ;;  %v1704_v31 = vsel %vm1560_vm9, -1.0, %v6711_v59  ;;  %v1847_v9 = vsel %vm1415_vm6, 1.0, %v1703_v8  ;;  %vm1488_vm10 = vcmp.lt.f32.partialorder %v5040_v48, 0.0  ;;  %6753 = vst [vmem:[#allocation60_spill] sm:$0xff] %v5227_v2  ;;  %v173_v5 = vld [vmem:[%s6655_s1 + $0x210] sm:$0xff] }
 0x2db   :  { %3503 = vmatmul.mubr.msk.bf16.gmra.mxu1 %vm701_vm3, %v1922_v24  ;;  %v611_v6 = vand.u32 2147483647, %v4925_v7  ;;  %v1848_v50 = vsel %vm1416_vm7, 1.0, %v1704_v31  ;;  %v628_v25 = vand.u32 2147483647, %v5216_v58  ;;  %v5235_v24 = vpop.f32.mrf.mxu0  ;;  %v1632_v7 = vsel %vm1488_vm10, -1.0, %v6711_v59  ;;  %v5262_v48 = vpop.f32.mrf.mxu1 }
 0x2dc   :  { %vm1343_vm11 = vcmp.gt.f32.partialorder %v5219_v35, 0.0  ;;  %vm1487_vm12 = vcmp.lt.f32.partialorder %v5219_v35, 0.0  ;;  %6754 = vst [vmem:[#allocation61_spill] sm:$0xff] %v5235_v24  ;;  %v1923_v8 = vpack.c.bf16 %v1848_v50, %v1847_v9  ;;  %v245_v31 = vld [vmem:[%s6655_s1 + $0x450] sm:$0xff]  ;;  %v1776_v50 = vsel %vm1344_vm5, 1.0, %v1632_v7  ;;  %v5253_v24 = vpop.xlane.xlu1 %778 }
 0x2dd   :  { %v1631_v62 = vsel %vm1487_vm12, -1.0, %v6711_v59  ;;  %v864_v55 = vsel %vm701_vm3, %v611_v6, 0.0  ;;  %v915_v2 = vsel %vm701_vm3, %v628_v25, 0.0  ;;  %v630_v9 = vand.u32 2147483647, %v3701_v61  ;;  %v247_v6 = vld [vmem:[%s6655_s1 + $0x460] sm:$0xff] }
 0x2de   :  { %v1775_v37 = vsel %vm1343_vm11, 1.0, %v1631_v62  ;;  %865 = vadd.xlane.f32.xlu0 %v864_v55  ;;  %3506 = vmatprep.mubr.msk.bf16.mxu1 %vm701_vm3, %v1923_v8  ;;  %v613_v42 = vand.u32 2147483647, %v4983_v56  ;;  %v326_v62 = vmul.f32 %v3645_v34, %v173_v5  ;;  %vm1346_vm13 = vcmp.gt.f32.partialorder %v5103_v30, 0.0  ;;  %v248_v61 = vld [vmem:[%s6655_s1 + $0x468] sm:$0xff]  ;;  %v5270_v56 = vpop.f32.mrf.mxu0 }
 0x2df   :  { %916 = vadd.xlane.f32.xlu1 %v915_v2  ;;  %v1887_v40 = vpack.c.bf16 %v1776_v50, %v1775_v37  ;;  %v921_v55 = vsel %vm701_vm3, %v630_v9, 0.0  ;;  %vm1490_vm14 = vcmp.lt.f32.partialorder %v5103_v30, 0.0  ;;  %v398_v25 = vmul.f32 %v3645_v34, %v245_v31  ;;  %v5268_v2 = vpop.xlane.xlu0 %730  ;;  %6756 = vst [vmem:[#allocation63_spill] sm:$0xff] %v5270_v56  ;;  %v175_v56 = vld [vmem:[%s6655_s1 + $0x220] sm:$0xff] }
 0x2e0   :  { %v399_v37 = vmul.f32 %v3645_v34, %v246_v27  ;;  %6755 = vst [vmem:[#allocation62_spill] sm:$0xff] %v5268_v2  ;;  %v870_v5 = vsel %vm701_vm3, %v613_v42, 0.0  ;;  %v5275_v8 = vadd.f32 %v3681_v53, %v326_v62  ;;  %v1634_v7 = vsel %vm1490_vm14, -1.0, %v6711_v59 }
 0x2e1   :  { %3434 = vmatprep.mubr.msk.bf16.mxu0 %vm701_vm3, %v1887_v40  ;;  %v400_v50 = vmul.f32 %v3645_v34, %v247_v6  ;;  %v1778_v30 = vsel %vm1346_vm13, 1.0, %v1634_v7  ;;  %v5280_v31 = vadd.f32 %v3681_v53, %v398_v25  ;;  %v401_v9 = vmul.f32 %v3645_v34, %v248_v61  ;;  %v5292_v6 = vpop.f32.mrf.mxu1  ;;  %v5298_v61 = vpop.xlane.xlu1 %784 }
 0x2e2   :  { %871 = vadd.xlane.f32.xlu0 %v870_v5  ;;  %v5283_v27 = vadd.f32 %v3681_v53, %v399_v37  ;;  %vm1345_vm15 = vcmp.gt.f32.partialorder %v5275_v8, 0.0  ;;  %vm1489_vm0 = vcmp.lt.f32.partialorder %v5275_v8, 0.0  ;;  %v632_v40 = vand.u32 2147483647, %v3713_v1  ;;  %6759 = vst [vmem:[#allocation66_spill] sm:$0xff] %v5292_v6  ;;  %6760 = vst [vmem:[#allocation67_spill] sm:$0xff] %v5298_v61 }
 0x2e3   :  { %6757 = vst [vmem:[#allocation64_spill] sm:$0xff] %v5280_v31  ;;  %922 = vadd.xlane.f32.xlu1 %v921_v55  ;;  %v5289_v42 = vadd.f32 %v3681_v53, %v400_v50  ;;  %v1633_v62 = vsel %vm1489_vm0, -1.0, %v6711_v59  ;;  %vm1417_vm1 = vcmp.gt.f32.partialorder %v5280_v31, 0.0  ;;  %vm1561_vm4 = vcmp.lt.f32.partialorder %v5280_v31, 0.0  ;;  %v5300_v55 = vpop.f32.mrf.mxu0  ;;  %v5312_v31 = vpop.xlane.xlu0 %733 }
 0x2e4   :  { %vm1418_vm2 = vcmp.gt.f32.partialorder %v5283_v27, 0.0  ;;  %v1777_v25 = vsel %vm1345_vm15, 1.0, %v1633_v62  ;;  %vm1562_vm5 = vcmp.lt.f32.partialorder %v5283_v27, 0.0  ;;  %v1705_v37 = vsel %vm1561_vm4, -1.0, %v6711_v59 }
 0x2e5   :  { %6758 = vst [vmem:[#allocation65_spill] sm:$0xff] %v5289_v42  ;;  %v5305_v1 = vadd.f32 %v3681_v53, %v401_v9  ;;  %v1888_v5 = vpack.c.bf16 %v1778_v30, %v1777_v25  ;;  %v1706_v7 = vsel %vm1562_vm5, -1.0, %v6711_v59  ;;  %v1849_v50 = vsel %vm1417_vm1, 1.0, %v1705_v37  ;;  %v5317_v9 = vpop.f32.mrf.mxu1  ;;  %v5323_v61 = vpop.f32.mrf.mxu0 }
 0x2e6   :  { %vm1419_vm6 = vcmp.gt.f32.partialorder %v5289_v42, 0.0  ;;  %v1850_v62 = vsel %vm1418_vm2, 1.0, %v1706_v7  ;;  %vm1563_vm8 = vcmp.lt.f32.partialorder %v5289_v42, 0.0  ;;  %6762 = vst [vmem:[#allocation69_spill] sm:$0xff] %v5317_v9  ;;  %v927_v6 = vsel %vm701_vm3, %v632_v40, 0.0  ;;  %v177_v40 = vld [vmem:[%s6655_s1 + $0x230] sm:$0xff] }
 0x2e7   :  { %6761 = vst [vmem:[#allocation68_spill] sm:$0xff] %v5305_v1  ;;  %vm1420_vm7 = vcmp.gt.f32.partialorder %v5305_v1, 0.0  ;;  %vm1564_vm9 = vcmp.lt.f32.partialorder %v5305_v1, 0.0  ;;  %3435 = vmatmul.mubr.msk.bf16.gmra.mxu0 %vm701_vm3, %v1888_v5  ;;  %v1924_v30 = vpack.c.bf16 %v1850_v62, %v1849_v50  ;;  %v1707_v25 = vsel %vm1563_vm8, -1.0, %v6711_v59  ;;  %928 = vadd.xlane.f32.xlu1 %v927_v6  ;;  %v5334_v62 = vpop.xlane.xlu1 %790 }
 0x2e8   :  { %v1708_v37 = vsel %vm1564_vm9, -1.0, %v6711_v59  ;;  %v1851_v7 = vsel %vm1419_vm6, 1.0, %v1707_v25  ;;  %v328_v42 = vmul.f32 %v3645_v34, %v175_v56  ;;  %vm1348_vm10 = vcmp.gt.f32.partialorder %v5143_v33, 0.0  ;;  %6763 = vst [vmem:[#allocation70_spill] sm:$0xff] %v5334_v62 }
 0x2e9   :  { %v1852_v2 = vsel %vm1420_vm7, 1.0, %v1708_v37  ;;  %3507 = vmatmul.mubr.msk.bf16.gmra.mxu1 %vm701_vm3, %v1924_v30  ;;  %vm1492_vm11 = vcmp.lt.f32.partialorder %v5143_v33, 0.0  ;;  %v615_v5 = vand.u32 2147483647, %v5051_v57  ;;  %v634_v50 = vand.u32 2147483647, %v3747_v26  ;;  %v5344_v57 = vpop.f32.mrf.mxu1  ;;  %v5352_v37 = vpop.xlane.xlu0 %739 }
 0x2ea   :  { %v1925_v1 = vpack.c.bf16 %v1852_v2, %v1851_v7  ;;  %v5337_v6 = vadd.f32 %v3681_v53, %v328_v42  ;;  %v1636_v56 = vsel %vm1492_vm11, -1.0, %v6711_v59  ;;  %v617_v30 = vand.u32 2147483647, %v5120_v19  ;;  %v249_v33 = vld [vmem:[%s6655_s1 + $0x470] sm:$0xff]  ;;  %6764 = vst [vmem:[#allocation71_spill] sm:$0xff] %v5344_v57  ;;  %v250_v42 = vld [vmem:[%s6655_s1 + $0x478] sm:$0xff]  ;;  %v5354_v19 = vpop.f32.mrf.mxu0 }
 0x2eb   :  { %v1780_v26 = vsel %vm1348_vm10, 1.0, %v1636_v56  ;;  %v876_v2 = vsel %vm701_vm3, %v615_v5, 0.0  ;;  %v933_v25 = vsel %vm701_vm3, %v634_v50, 0.0  ;;  %6765 = vst [vmem:[#allocation72_spill] sm:$0xff] %v5354_v19  ;;  %v330_v7 = vmul.f32 %v3645_v34, %v177_v40 }
 0x2ec   :  { %3510 = vmatprep.mubr.msk.bf16.mxu1 %vm701_vm3, %v1925_v1  ;;  %vm1347_vm12 = vcmp.gt.f32.partialorder %v5337_v6, 0.0  ;;  %vm1491_vm13 = vcmp.lt.f32.partialorder %v5337_v6, 0.0  ;;  %877 = vadd.xlane.f32.xlu0 %v876_v2  ;;  %v882_v1 = vsel %vm701_vm3, %v617_v30, 0.0  ;;  %vm1350_vm14 = vcmp.gt.f32.partialorder %v5216_v58, 0.0 }
 0x2ed   :  { %934 = vadd.xlane.f32.xlu1 %v933_v25  ;;  %v1635_v5 = vsel %vm1491_vm13, -1.0, %v6711_v59  ;;  %vm1494_vm15 = vcmp.lt.f32.partialorder %v5216_v58, 0.0  ;;  %v402_v50 = vmul.f32 %v3645_v34, %v249_v33  ;;  %v5365_v57 = vadd.f32 %v3681_v53, %v330_v7  ;;  %v5369_v25 = vpop.f32.mrf.mxu1  ;;  %v5375_v58 = vpop.xlane.xlu1 %796 }
 0x2ee   :  { %v1779_v56 = vsel %vm1347_vm12, 1.0, %v1635_v5  ;;  %v1638_v62 = vsel %vm1494_vm15, -1.0, %v6711_v59  ;;  %v403_v2 = vmul.f32 %v3645_v34, %v250_v42  ;;  %v636_v9 = vand.u32 2147483647, %v3821_v4  ;;  %v5377_v33 = vpop.f32.mrf.mxu0  ;;  %v5390_v42 = vpop.xlane.xlu0 %745 }
 0x2ef   :  { %v1889_v30 = vpack.c.bf16 %v1780_v26, %v1779_v56  ;;  %v1782_v40 = vsel %vm1350_vm14, 1.0, %v1638_v62  ;;  %v5372_v19 = vadd.f32 %v3681_v53, %v402_v50  ;;  %vm1349_vm0 = vcmp.gt.f32.partialorder %v5365_v57, 0.0 }
 0x2f0   :  { %883 = vadd.xlane.f32.xlu0 %v882_v1  ;;  %vm1493_vm1 = vcmp.lt.f32.partialorder %v5365_v57, 0.0  ;;  %v5382_v34 = vadd.f32 %v3681_v53, %v403_v2  ;;  %v619_v26 = vand.u32 2147483647, %v5148_v28  ;;  %v939_v4 = vsel %vm701_vm3, %v636_v9, 0.0  ;;  %v5395_v28 = vpop.f32.mrf.mxu1 }
 0x2f1   :  { %6766 = vst [vmem:[#allocation73_spill] sm:$0xff] %v5372_v19  ;;  %3438 = vmatprep.mubr.msk.bf16.mxu0 %vm701_vm3, %v1889_v30  ;;  %v1637_v62 = vsel %vm1493_vm1, -1.0, %v6711_v59  ;;  %vm1421_vm2 = vcmp.gt.f32.partialorder %v5372_v19, 0.0  ;;  %vm1565_vm4 = vcmp.lt.f32.partialorder %v5372_v19, 0.0  ;;  %940 = vadd.xlane.f32.xlu1 %v939_v4  ;;  %6767 = vst [vmem:[#allocation74_spill] sm:$0xff] %v5395_v28  ;;  %v5404_v4 = vpop.xlane.xlu1 %802 }
 0x2f2   :  { %v1781_v1 = vsel %vm1349_vm0, 1.0, %v1637_v62  ;;  %vm1422_vm5 = vcmp.gt.f32.partialorder %v5382_v34, 0.0  ;;  %vm1566_vm6 = vcmp.lt.f32.partialorder %v5382_v34, 0.0  ;;  %v1709_v53 = vsel %vm1565_vm4, -1.0, %v6711_v59  ;;  %v5406_v28 = vpop.f32.mrf.mxu1 }
 0x2f3   :  { %v1890_v7 = vpack.c.bf16 %v1782_v40, %v1781_v1  ;;  %v1710_v5 = vsel %vm1566_vm6, -1.0, %v6711_v59  ;;  %v1853_v50 = vsel %vm1421_vm2, 1.0, %v1709_v53  ;;  %v888_v56 = vsel %vm701_vm3, %v619_v26, 0.0  ;;  %v5399_v2 = vpop.f32.mrf.mxu0 }
 0x2f4   :  { %v1854_v9 = vsel %vm1422_vm5, 1.0, %v1710_v5  ;;  %889 = vadd.xlane.f32.xlu0 %v888_v56  ;;  %v638_v62 = vand.u32 2147483647, %v3840_v15  ;;  %v621_v19 = vand.u32 2147483647, %v5219_v35  ;;  %v5419_v35 = vpop.f32.mrf.mxu1 }
 0x2f5   :  { %3439 = vmatmul.mubr.msk.bf16.gmra.mxu0 %vm701_vm3, %v1890_v7  ;;  %v1926_v30 = vpack.c.bf16 %v1854_v9, %v1853_v50  ;;  %v5408_v40 = vpop.f32.mrf.mxu0  ;;  %v640_v1 = vand.u32 2147483647, %v3926_v17  ;;  %v623_v53 = vand.u32 2147483647, %v5275_v8  ;;  %v5415_v7 = vpop.xlane.xlu0 %751  ;;  %6768 = vst [vmem:[#allocation75_spill] sm:$0xff] %v5419_v35 }
 0x2f6   :  { %v945_v59 = vsel %vm701_vm3, %v638_v62, 0.0  ;;  %v894_v26 = vsel %vm701_vm3, %v621_v19, 0.0  ;;  %v642_v56 = vand.u32 2147483647, %v3935_v21  ;;  %v625_v19 = vand.u32 2147483647, %v5337_v6  ;;  %v5425_v9 = vpop.xlane.xlu1 %808 }
 0x2f7   :  { %3511 = vmatmul.mubr.msk.bf16.gmra.mxu1 %vm701_vm3, %v1926_v30  ;;  %946 = vadd.xlane.f32.xlu1 %v945_v59  ;;  %v5417_v15 = vpop.f32.mrf.mxu0  ;;  %v951_v5 = vsel %vm701_vm3, %v640_v1, 0.0  ;;  %v900_v50 = vsel %vm701_vm3, %v623_v53, 0.0  ;;  %v5431_v30 = vpop.f32.mrf.mxu1  ;;  %v627_v21 = vand.u32 2147483647, %v5365_v57 }
 0x2f8   :  { %895 = vadd.xlane.f32.xlu0 %v894_v26  ;;  %6769 = vst [vmem:[#allocation76_spill] sm:$0xff] %v5431_v30  ;;  %v957_v62 = vsel %vm701_vm3, %v642_v56, 0.0  ;;  %v906_v59 = vsel %vm701_vm3, %v625_v19, 0.0  ;;  %v644_v26 = vand.u32 2147483647, %v4012_v23 }
 0x2f9   :  { %v5427_v17 = vpop.xlane.xlu0 %757  ;;  %v5429_v8 = vpop.f32.mrf.mxu0  ;;  %v646_v56 = vand.u32 2147483647, %v4032_v44  ;;  %v629_v19 = vand.u32 2147483647, %v3698_v60 }
 0x2fa   :  { %v5437_v6 = vpop.xlane.xlu1 %814  ;;  %v5441_v53 = vpop.f32.mrf.mxu1 }
 0x2fb   :  { %952 = vadd.xlane.f32.xlu1 %v951_v5  ;;  %v963_v5 = vsel %vm701_vm3, %v644_v26, 0.0  ;;  %v648_v26 = vand.u32 2147483647, %v4103_v45  ;;  %v633_v45 = vand.u32 2147483647, %v3743_v22 }
 0x2fc   :  { %901 = vadd.xlane.f32.xlu0 %v900_v50  ;;  %v912_v50 = vsel %vm701_vm3, %v627_v21, 0.0  ;;  %v5451_v57 = vpop.f32.mrf.mxu1  ;;  %v631_v21 = vand.u32 2147483647, %v3710_v0 }
 0x2fd   :  { %v5447_v30 = vpop.xlane.xlu0 %763 }
 0x2fe   :  { %v5457_v35 = vpop.xlane.xlu1 %820 }
 0x2ff   :  { %958 = vadd.xlane.f32.xlu1 %v957_v62  ;;  %v969_v62 = vsel %vm701_vm3, %v646_v56, 0.0  ;;  %v924_v56 = vsel %vm701_vm3, %v631_v21, 0.0  ;;  %v635_v21 = vand.u32 2147483647, %v3818_v3 }
 0x300   :  { %907 = vadd.xlane.f32.xlu0 %v906_v59  ;;  %v918_v59 = vsel %vm701_vm3, %v629_v19, 0.0  ;;  %v650_v19 = vand.u32 2147483647, %v4118_v39 }
 0x301   :  { %v5439_v1 = vpop.f32.mrf.mxu0  ;;  %v5459_v60 = vpop.xlane.xlu0 %769 }
 0x302   :  { %v5469_v0 = vpop.xlane.xlu1 %826 }
 0x303   :  { %964 = vadd.xlane.f32.xlu1 %v963_v5  ;;  %v5449_v23 = vpop.f32.mrf.mxu0  ;;  %v5463_v5 = vpop.f32.mrf.mxu1 }
 0x304   :  { %913 = vadd.xlane.f32.xlu0 %v912_v50  ;;  %6770 = vst [vmem:[#allocation77_spill] sm:$0xff] %v5449_v23  ;;  %6772 = vst [vmem:[#allocation79_spill] sm:$0xff] %v5463_v5  ;;  %v975_v50 = vsel %vm701_vm3, %v648_v26, 0.0  ;;  %v930_v5 = vsel %vm701_vm3, %v633_v45, 0.0  ;;  %v652_v26 = vand.u32 2147483647, %v4206_v13 }
 0x305   :  { %v5461_v44 = vpop.f32.mrf.mxu0  ;;  %v5479_v23 = vpop.xlane.xlu0 %775  ;;  %v637_v45 = vand.u32 2147483647, %v3837_v14 }
 0x306   :  { %6771 = vst [vmem:[#allocation78_spill] sm:$0xff] %v5461_v44  ;;  %v981_v44 = vsel %vm701_vm3, %v650_v19, 0.0  ;;  %v654_v19 = vand.u32 2147483647, %v4221_v38  ;;  %v639_v38 = vand.u32 2147483647, %v3916_v10 }
 0x307   :  { %970 = vadd.xlane.f32.xlu1 %v969_v62  ;;  %v5471_v62 = vpop.f32.mrf.mxu0 }
 0x308   :  { %919 = vadd.xlane.f32.xlu0 %v918_v59  ;;  %6773 = vst [vmem:[#allocation80_spill] sm:$0xff] %v5471_v62  ;;  %v5473_v59 = vpop.f32.mrf.mxu1 }
 0x309   :  { %6774 = vst [vmem:[#allocation81_spill] sm:$0xff] %v5473_v59  ;;  %v5489_v59 = vpop.xlane.xlu1 %832  ;;  %v5493_v13 = vpop.xlane.xlu0 %781 }
 0x30a   :  { %v5483_v39 = vpop.f32.mrf.mxu1  ;;  %6778 = vst [vmem:[#allocation85_spill] sm:$0xff] %v5493_v13 }
 0x30b   :  { %976 = vadd.xlane.f32.xlu1 %v975_v50  ;;  %6776 = vst [vmem:[#allocation83_spill] sm:$0xff] %v5483_v39  ;;  %v987_v50 = vsel %vm701_vm3, %v652_v26, 0.0  ;;  %v942_v26 = vsel %vm701_vm3, %v637_v45, 0.0  ;;  %v641_v45 = vand.u32 2147483647, %v3932_v20 }
 0x30c   :  { %925 = vadd.xlane.f32.xlu0 %v924_v56  ;;  %v936_v56 = vsel %vm701_vm3, %v635_v21, 0.0  ;;  %v656_v21 = vand.u32 2147483647, %v4292_v52 }
 0x30d   :  { %v5503_v14 = vpop.xlane.xlu1 %838  ;;  %v5511_v62 = vpop.xlane.xlu0 %787 }
 0x30e   :  { %6781 = vst [vmem:[#allocation88_spill] sm:$0xff] %v5503_v14  ;;  %6783 = vst [vmem:[#allocation90_spill] sm:$0xff] %v5511_v62 }
 0x30f   :  { %982 = vadd.xlane.f32.xlu1 %v981_v44  ;;  %v5495_v44 = vpop.f32.mrf.mxu1 }
 0x310   :  { %931 = vadd.xlane.f32.xlu0 %v930_v5  ;;  %6779 = vst [vmem:[#allocation86_spill] sm:$0xff] %v5495_v44  ;;  %v993_v5 = vsel %vm701_vm3, %v654_v19, 0.0  ;;  %v658_v19 = vand.u32 2147483647, %v4309_v46 }
 0x311   :  { %v5481_v22 = vpop.f32.mrf.mxu0  ;;  %v5521_v14 = vpop.xlane.xlu1 %844 }
 0x312   :  { %6775 = vst [vmem:[#allocation82_spill] sm:$0xff] %v5481_v22  ;;  %v5525_v20 = vpop.xlane.xlu0 %793 }
 0x313   :  { %988 = vadd.xlane.f32.xlu1 %v987_v50  ;;  %v5491_v3 = vpop.f32.mrf.mxu0  ;;  %v5505_v50 = vpop.f32.mrf.mxu1  ;;  %6787 = vst [vmem:[#allocation94_spill] sm:$0xff] %v5525_v20 }
 0x314   :  { %937 = vadd.xlane.f32.xlu0 %v936_v56  ;;  %6777 = vst [vmem:[#allocation84_spill] sm:$0xff] %v5491_v3  ;;  %6782 = vst [vmem:[#allocation89_spill] sm:$0xff] %v5505_v50  ;;  %v999_v56 = vsel %vm701_vm3, %v656_v21, 0.0  ;;  %v948_v3 = vsel %vm701_vm3, %v639_v38, 0.0  ;;  %v660_v21 = vand.u32 2147483647, %v4384_v32 }
 0x315   :  { %v5501_v22 = vpop.f32.mrf.mxu0  ;;  %v5515_v10 = vpop.f32.mrf.mxu1  ;;  %v643_v38 = vand.u32 2147483647, %v4006_v16  ;;  %v645_v32 = vand.u32 2147483647, %v4029_v43 }
 0x316   :  { %6780 = vst [vmem:[#allocation87_spill] sm:$0xff] %v5501_v22  ;;  %6785 = vst [vmem:[#allocation92_spill] sm:$0xff] %v5515_v10  ;;  %v5535_v16 = vpop.xlane.xlu1 %850 }
 0x317   :  { %994 = vadd.xlane.f32.xlu1 %v993_v5  ;;  %v5513_v52 = vpop.f32.mrf.mxu0  ;;  %v1005_v5 = vsel %vm701_vm3, %v658_v19, 0.0  ;;  %v960_v19 = vsel %vm701_vm3, %v643_v38, 0.0  ;;  %v966_v50 = vsel %vm701_vm3, %v645_v32, 0.0  ;;  %v647_v38 = vand.u32 2147483647, %v4100_v41 }
 0x318   :  { %943 = vadd.xlane.f32.xlu0 %v942_v26  ;;  %6784 = vst [vmem:[#allocation91_spill] sm:$0xff] %v5513_v52  ;;  %v954_v26 = vsel %vm701_vm3, %v641_v45, 0.0  ;;  %v662_v45 = vand.u32 2147483647, %v4404_v29  ;;  %v649_v32 = vand.u32 2147483647, %v4109_v47 }
 0x31b   :  { %1000 = vadd.xlane.f32.xlu1 %v999_v56  ;;  %v5527_v56 = vpop.f32.mrf.mxu1 }
 0x31c   :  { %949 = vadd.xlane.f32.xlu0 %v948_v3  ;;  %6788 = vst [vmem:[#allocation95_spill] sm:$0xff] %v5527_v56  ;;  %v1011_v3 = vsel %vm701_vm3, %v660_v21, 0.0  ;;  %v664_v21 = vand.u32 2147483647, %v4475_v18 }
 0x31f   :  { %v5523_v46 = vpop.f32.mrf.mxu0  ;;  %1006 = vadd.xlane.f32.xlu1 %v1005_v5  ;;  %v5537_v5 = vpop.f32.mrf.mxu1 }
 0x320   :  { %6786 = vst [vmem:[#allocation93_spill] sm:$0xff] %v5523_v46  ;;  %955 = vadd.xlane.f32.xlu0 %v954_v26  ;;  %6790 = vst [vmem:[#allocation97_spill] sm:$0xff] %v5537_v5  ;;  %v1017_v26 = vsel %vm701_vm3, %v662_v45, 0.0  ;;  %v5543_v46 = vpop.xlane.xlu0 %799  ;;  %v666_v45 = vand.u32 2147483647, %v4490_v49 }
 0x321   :  { %v5533_v10 = vpop.f32.mrf.mxu0  ;;  %6791 = vst [vmem:[#allocation98_spill] sm:$0xff] %v5543_v46  ;;  %v5547_v43 = vpop.f32.mrf.mxu1  ;;  %v651_v49 = vand.u32 2147483647, %v4203_v12 }
 0x322   :  { %6789 = vst [vmem:[#allocation96_spill] sm:$0xff] %v5533_v10  ;;  %6793 = vst [vmem:[#allocation100_spill] sm:$0xff] %v5547_v43  ;;  %v5553_v10 = vpop.xlane.xlu1 %856 }
 0x323   :  { %1012 = vadd.xlane.f32.xlu1 %v1011_v3  ;;  %v5545_v29 = vpop.f32.mrf.mxu0  ;;  %v1023_v3 = vsel %vm701_vm3, %v664_v21, 0.0  ;;  %v978_v21 = vsel %vm701_vm3, %v649_v32, 0.0  ;;  %v670_v32 = vand.u32 2147483647, %v4593_v63 }
 0x324   :  { %961 = vadd.xlane.f32.xlu0 %v960_v19  ;;  %6792 = vst [vmem:[#allocation99_spill] sm:$0xff] %v5545_v29  ;;  %v972_v19 = vsel %vm701_vm3, %v647_v38, 0.0  ;;  %v5557_v41 = vpop.xlane.xlu0 %805  ;;  %v668_v38 = vand.u32 2147483647, %v4578_v54  ;;  %v653_v54 = vand.u32 2147483647, %v4218_v36 }
 0x325   :  { %v5555_v18 = vpop.f32.mrf.mxu0  ;;  %6795 = vst [vmem:[#allocation102_spill] sm:$0xff] %v5557_v41  ;;  %v6813_v41 = vld [vmem:[#allocation6_spill] sm:$0xff] }
 0x326   :  { %6794 = vst [vmem:[#allocation101_spill] sm:$0xff] %v5555_v18  ;;  %v5567_v47 = vpop.xlane.xlu1 %862  ;;  %v1035_v18 = vsel %vm701_vm3, %v668_v38, 0.0  ;;  %v672_v38 = vand.u32 2147483647, %v4664_v11 }
 0x327   :  { %1018 = vadd.xlane.f32.xlu1 %v1017_v26  ;;  %v5559_v26 = vpop.f32.mrf.mxu1 }
 0x328   :  { %967 = vadd.xlane.f32.xlu0 %v966_v50  ;;  %6796 = vst [vmem:[#allocation103_spill] sm:$0xff] %v5559_v26  ;;  %v1029_v50 = vsel %vm701_vm3, %v666_v45, 0.0  ;;  %v984_v45 = vsel %vm701_vm3, %v651_v49, 0.0  ;;  %v5577_v26 = vpop.xlane.xlu0 %811 }
 0x329   :  { %6800 = vst [vmem:[#allocation107_spill] sm:$0xff] %v5577_v26  ;;  %v6807_v26 = vld [vmem:[#allocation14_spill] sm:$0xff] }
 0x32b   :  { %1024 = vadd.xlane.f32.xlu1 %v1023_v3  ;;  %v5569_v3 = vpop.f32.mrf.mxu1  ;;  %v5587_v29 = vpop.xlane.xlu1 %868 }
 0x32c   :  { %973 = vadd.xlane.f32.xlu0 %v972_v19  ;;  %6798 = vst [vmem:[#allocation105_spill] sm:$0xff] %v5569_v3  ;;  %v5589_v36 = vpop.xlane.xlu0 %817 }
 0x32f   :  { %v5565_v43 = vpop.f32.mrf.mxu0  ;;  %1030 = vadd.xlane.f32.xlu1 %v1029_v50  ;;  %v5581_v50 = vpop.f32.mrf.mxu1 }
 0x330   :  { %6797 = vst [vmem:[#allocation104_spill] sm:$0xff] %v5565_v43  ;;  %979 = vadd.xlane.f32.xlu0 %v978_v21  ;;  %6802 = vst [vmem:[#allocation109_spill] sm:$0xff] %v5581_v50  ;;  %v1041_v21 = vsel %vm701_vm3, %v670_v32, 0.0  ;;  %v6803_v43 = vld [vmem:[#allocation4_spill] sm:$0xff]  ;;  %v5609_v3 = vpop.xlane.xlu0 %823 }
 0x331   :  { %v5571_v19 = vpop.f32.mrf.mxu0  ;;  %v655_v49 = vand.u32 2147483647, %v6803_v43  ;;  %6804 = vst [vmem:[#allocation4_spill] sm:$0xff] %v5589_v36  ;;  %v5599_v43 = vpop.xlane.xlu1 %874 }
 0x332   :  { %6799 = vst [vmem:[#allocation106_spill] sm:$0xff] %v5571_v19  ;;  %v990_v19 = vsel %vm701_vm3, %v653_v54, 0.0  ;;  %v674_v54 = vand.u32 2147483647, %v6807_v26  ;;  %6809 = vst [vmem:[#allocation14_spill] sm:$0xff] %v5599_v43  ;;  %v6858_v43 = vld [vmem:[#allocation15_spill] sm:$0xff] }
 0x333   :  { %1036 = vadd.xlane.f32.xlu1 %v1035_v18  ;;  %v5579_v12 = vpop.f32.mrf.mxu0  ;;  %v5593_v18 = vpop.f32.mrf.mxu1  ;;  %v996_v32 = vsel %vm701_vm3, %v655_v49, 0.0  ;;  %v659_v49 = vand.u32 2147483647, %v6813_v41  ;;  %v675_v5 = vand.u32 2147483647, %v6858_v43 }
 0x334   :  { %985 = vadd.xlane.f32.xlu0 %v984_v45  ;;  %6801 = vst [vmem:[#allocation108_spill] sm:$0xff] %v5579_v12  ;;  %6806 = vst [vmem:[#allocation111_spill] sm:$0xff] %v5593_v18  ;;  %v1047_v45 = vsel %vm701_vm3, %v672_v38, 0.0  ;;  %v6808_v12 = vld [vmem:[#allocation5_spill] sm:$0xff]  ;;  %v1053_v36 = vsel %vm701_vm3, %v674_v54, 0.0 }
 0x335   :  { %v5591_v63 = vpop.f32.mrf.mxu0  ;;  %v657_v11 = vand.u32 2147483647, %v6808_v12 }
 0x336   :  { %6805 = vst [vmem:[#allocation110_spill] sm:$0xff] %v5591_v63  ;;  %v6812_v63 = vld [vmem:[#allocation16_spill] sm:$0xff] }
 0x337   :  { %1042 = vadd.xlane.f32.xlu1 %v1041_v21  ;;  %v1002_v18 = vsel %vm701_vm3, %v657_v11, 0.0  ;;  %v676_v38 = vand.u32 2147483647, %v6812_v63  ;;  %6814 = vst [vmem:[#allocation16_spill] sm:$0xff] %v5609_v3  ;;  %v6823_v3 = vld [vmem:[#allocation20_spill] sm:$0xff] }
 0x338   :  { %991 = vadd.xlane.f32.xlu0 %v990_v19  ;;  %v5603_v19 = vpop.f32.mrf.mxu1 }
 0x339   :  { %6811 = vst [vmem:[#allocation112_spill] sm:$0xff] %v5603_v19  ;;  %v6818_v19 = vld [vmem:[#allocation7_spill] sm:$0xff]  ;;  %v5621_v41 = vpop.xlane.xlu0 %829 }
 0x33a   :  { %v5613_v12 = vpop.f32.mrf.mxu1  ;;  %v661_v11 = vand.u32 2147483647, %v6818_v19  ;;  %6820 = vst [vmem:[#allocation7_spill] sm:$0xff] %v5621_v41 }
 0x33b   :  { %1048 = vadd.xlane.f32.xlu1 %v1047_v45  ;;  %6816 = vst [vmem:[#allocation113_spill] sm:$0xff] %v5613_v12  ;;  %v1059_v45 = vsel %vm701_vm3, %v676_v38, 0.0  ;;  %v6828_v12 = vld [vmem:[#allocation22_spill] sm:$0xff] }
 0x33c   :  { %997 = vadd.xlane.f32.xlu0 %v996_v32  ;;  %v1008_v32 = vsel %vm701_vm3, %v659_v49, 0.0  ;;  %v5619_v52 = vpop.xlane.xlu1 %880  ;;  %v5625_v63 = vpop.f32.mrf.mxu1  ;;  %v1014_v38 = vsel %vm701_vm3, %v661_v11, 0.0  ;;  %v680_v49 = vand.u32 2147483647, %v6823_v3 }
 0x33d   :  { %v5601_v21 = vpop.f32.mrf.mxu0  ;;  %6822 = vst [vmem:[#allocation115_spill] sm:$0xff] %v5625_v63  ;;  %v6829_v63 = vld [vmem:[#allocation9_spill] sm:$0xff]  ;;  %v5641_v50 = vpop.xlane.xlu0 %835 }
 0x33e   :  { %6810 = vst [vmem:[#allocation5_spill] sm:$0xff] %v5601_v21  ;;  %v6817_v21 = vld [vmem:[#allocation18_spill] sm:$0xff]  ;;  %v1071_v41 = vsel %vm701_vm3, %v680_v49, 0.0  ;;  %v665_v11 = vand.u32 2147483647, %v6829_v63  ;;  %6830 = vst [vmem:[#allocation22_spill] sm:$0xff] %v5641_v50 }
 0x33f   :  { %1054 = vadd.xlane.f32.xlu1 %v1053_v36  ;;  %v5611_v26 = vpop.f32.mrf.mxu0  ;;  %v678_v54 = vand.u32 2147483647, %v6817_v21  ;;  %6819 = vst [vmem:[#allocation18_spill] sm:$0xff] %v5619_v52  ;;  %v684_v49 = vand.u32 2147483647, %v4956_v51 }
 0x340   :  { %1003 = vadd.xlane.f32.xlu0 %v1002_v18  ;;  %6815 = vst [vmem:[#allocation6_spill] sm:$0xff] %v5611_v26  ;;  %v6824_v26 = vld [vmem:[#allocation8_spill] sm:$0xff]  ;;  %v5631_v19 = vpop.xlane.xlu1 %886 }
 0x341   :  { %v5623_v36 = vpop.f32.mrf.mxu0  ;;  %v1065_v18 = vsel %vm701_vm3, %v678_v54, 0.0  ;;  %v663_v21 = vand.u32 2147483647, %v6824_v26  ;;  %6825 = vst [vmem:[#allocation20_spill] sm:$0xff] %v5631_v19  ;;  %v682_v54 = vand.u32 2147483647, %v6828_v12 }
 0x342   :  { %6821 = vst [vmem:[#allocation114_spill] sm:$0xff] %v5623_v36  ;;  %v1083_v63 = vsel %vm701_vm3, %v684_v49, 0.0  ;;  %v1145_v19 = vmul.f32 0.04, %v5312_v31 }
 0x343   :  { %1060 = vadd.xlane.f32.xlu1 %v1059_v45  ;;  %v5633_v45 = vpop.f32.mrf.mxu0  ;;  %v1020_v36 = vsel %vm701_vm3, %v663_v21, 0.0 }
 0x344   :  { %1009 = vadd.xlane.f32.xlu0 %v1008_v32  ;;  %6826 = vst [vmem:[#allocation8_spill] sm:$0xff] %v5633_v45  ;;  %v5635_v32 = vpop.f32.mrf.mxu1 }
 0x345   :  { %6827 = vst [vmem:[#allocation116_spill] sm:$0xff] %v5635_v32  ;;  %v6833_v32 = vld [vmem:[#allocation10_spill] sm:$0xff] }
 0x346   :  { %v5645_v26 = vpop.f32.mrf.mxu1  ;;  %v667_v21 = vand.u32 2147483647, %v6833_v32 }
 0x347   :  { %1066 = vadd.xlane.f32.xlu1 %v1065_v18  ;;  %6832 = vst [vmem:[#allocation117_spill] sm:$0xff] %v5645_v26  ;;  %v1077_v18 = vsel %vm701_vm3, %v682_v54, 0.0  ;;  %v6837_v54 = vld [vmem:[#allocation30_spill] sm:$0xff] }
 0x348   :  { %1015 = vadd.xlane.f32.xlu0 %v1014_v38  ;;  %v1026_v38 = vsel %vm701_vm3, %v665_v11, 0.0  ;;  %v5651_v45 = vpop.xlane.xlu1 %892  ;;  %v1032_v50 = vsel %vm701_vm3, %v667_v21, 0.0  ;;  %v6838_v11 = vld [vmem:[#allocation11_spill] sm:$0xff] }
 0x349   :  { %6834 = vst [vmem:[#allocation10_spill] sm:$0xff] %v5651_v45  ;;  %v669_v26 = vand.u32 2147483647, %v6838_v11  ;;  %v6843_v11 = vld [vmem:[#allocation12_spill] sm:$0xff] }
 0x34b   :  { %1072 = vadd.xlane.f32.xlu1 %v1071_v41  ;;  %v842_v41 = vpop.xlane.xlu0 %841  ;;  %v1038_v21 = vsel %vm701_vm3, %v669_v26, 0.0 }
 0x34c   :  { %1021 = vadd.xlane.f32.xlu0 %v1020_v36  ;;  %v5655_v36 = vpop.f32.mrf.mxu1  ;;  %v1181_v31 = vmul.f32 0.04, %v842_v41 }
 0x34d   :  { %v5643_v3 = vpop.f32.mrf.mxu0  ;;  %6836 = vst [vmem:[#allocation119_spill] sm:$0xff] %v5655_v36  ;;  %v671_v36 = vand.u32 2147483647, %v6843_v11  ;;  %v6848_v11 = vld [vmem:[#allocation13_spill] sm:$0xff] }
 0x34e   :  { %6831 = vst [vmem:[#allocation9_spill] sm:$0xff] %v5643_v3  ;;  %v686_v3 = vand.u32 2147483647, %v6837_v54  ;;  %v6842_v54 = vld [vmem:[#allocation39_spill] sm:$0xff]  ;;  %v673_v46 = vand.u32 2147483647, %v6848_v11 }
 0x34f   :  { %1078 = vadd.xlane.f32.xlu1 %v1077_v18  ;;  %v5653_v12 = vpop.f32.mrf.mxu0  ;;  %v5663_v32 = vpop.xlane.xlu1 %898  ;;  %v5668_v18 = vld [vmem:[%s6656_s5] ss:$0 sm:$0xff]  ;;  %v1044_v26 = vsel %vm701_vm3, %v671_v36, 0.0  ;;  %v6852_v36 = vld [vmem:[#allocation25_spill] sm:$0xff] }
 0x350   :  { %1027 = vadd.xlane.f32.xlu0 %v1026_v38  ;;  %6835 = vst [vmem:[#allocation118_spill] sm:$0xff] %v5653_v12  ;;  %6840 = vst [vmem:[#allocation11_spill] sm:$0xff] %v5663_v32  ;;  %v5670_v38 = vpop.f32.mrf.mxu1  ;;  %v1089_v49 = vsel %vm701_vm3, %v686_v3, 0.0  ;;  %v688_v12 = vand.u32 2147483647, %v6842_v54  ;;  %v6847_v54 = vld [vmem:[#allocation43_spill] sm:$0xff] }
 0x351   :  { %v5661_v51 = vpop.f32.mrf.mxu0  ;;  %6841 = vst [vmem:[#allocation120_spill] sm:$0xff] %v5670_v38  ;;  %v690_v45 = vand.u32 2147483647, %v6847_v54  ;;  %v1146_v56 = vmul.f32 0.04, %v6852_v36 }
 0x352   :  { %6839 = vst [vmem:[#allocation30_spill] sm:$0xff] %v5661_v51  ;;  %v5676_v51 = vpop.xlane.xlu0 %847  ;;  %v5683_v38 = vpop.f32.mrf.mxu1  ;;  %v1095_v3 = vsel %vm701_vm3, %v688_v12, 0.0 }
 0x353   :  { %1084 = vadd.xlane.f32.xlu1 %v1083_v63  ;;  %v6845_v63 = vld [vmem:[#allocation54_spill] sm:$0xff]  ;;  %6846 = vst [vmem:[#allocation12_spill] sm:$0xff] %v5683_v38  ;;  %v6851_v38 = vld [vmem:[#allocation23_spill] sm:$0xff] }
 0x354   :  { %1033 = vadd.xlane.f32.xlu0 %v1032_v50  ;;  %v5678_v50 = vpop.f32.mrf.mxu0  ;;  %v2247_v32 = vadd.f32 %v6845_v63, %v5668_v18  ;;  %v6850_v63 = vld [vmem:[#allocation61_spill] sm:$0xff]  ;;  %v5695_v12 = vmul.f32 0.04, %v6851_v38  ;;  %v1050_v38 = vsel %vm701_vm3, %v673_v46, 0.0 }
 0x355   :  { %6844 = vst [vmem:[#allocation39_spill] sm:$0xff] %v5678_v50 }
 0x356   :  { %v2791_v22 = vmul.f32 %v2247_v32, %v1145_v19  ;;  %v6855_v19 = vld [vmem:[#allocation28_spill] sm:$0xff] }
 0x357   :  { %1090 = vadd.xlane.f32.xlu1 %v1089_v49  ;;  %v2250_v49 = vadd.f32 %v6850_v63, %v5668_v18  ;;  %v2215_v32 = vadd.f32 %v6855_v19, %v5668_v18  ;;  %v6857_v63 = vld [vmem:[#allocation52_spill] sm:$0xff] }
 0x358   :  { %1039 = vadd.xlane.f32.xlu0 %v1038_v21  ;;  %v5698_v54 = vpop.xlane.xlu0 %853  ;;  %v692_v36 = vand.u32 2147483647, %v6857_v63  ;;  %v6863_v63 = vld [vmem:[#allocation35_spill] sm:$0xff] }
 0x359   :  { %v5689_v20 = vpop.xlane.xlu1 %904  ;;  %v2792_v39 = vmul.f32 %v2250_v49, %v1146_v56  ;;  %v5721_v13 = vmul.f32 0.04, %v6863_v63 }
 0x35a   :  { %6849 = vst [vmem:[#allocation54_spill] sm:$0xff] %v5689_v20  ;;  %v6854_v20 = vld [vmem:[#allocation27_spill] sm:$0xff] }
 0x35b   :  { %v3416_v50 = vpop.f32.mrf.mxu0  ;;  %1096 = vadd.xlane.f32.xlu1 %v1095_v3  ;;  %v1137_v62 = vmul.f32 0.04, %v6854_v20  ;;  %v1182_v3 = vmul.f32 0.04, %v5521_v14  ;;  %v6859_v14 = vld [vmem:[#allocation24_spill] sm:$0xff] }
 0x35c   :  { %1045 = vadd.xlane.f32.xlu0 %v1044_v26  ;;  %v2391_v21 = vadd.f32 %v3416_v50, %v5668_v18  ;;  %v5706_v26 = vpop.f32.mrf.mxu1  ;;  %v1101_v50 = vsel %vm701_vm3, %v690_v45, 0.0  ;;  %v1135_v44 = vmul.f32 0.04, %v6859_v14  ;;  %v6861_v45 = vld [vmem:[#allocation33_spill] sm:$0xff] }
 0x35d   :  { %v5700_v11 = vpop.f32.mrf.mxu0  ;;  %6856 = vst [vmem:[#allocation13_spill] sm:$0xff] %v5706_v26  ;;  %v6860_v26 = vld [vmem:[#allocation31_spill] sm:$0xff]  ;;  %v5718_v46 = vpop.xlane.xlu1 %910  ;;  %v5723_v43 = vmul.f32 %v2215_v32, %v1137_v62  ;;  %v6871_v62 = vld [vmem:[#allocation41_spill] sm:$0xff] }
 0x35e   :  { %6853 = vst [vmem:[#allocation43_spill] sm:$0xff] %v5700_v11  ;;  %v2827_v41 = vmul.f32 %v2391_v21, %v1181_v31  ;;  %v2935_v11 = vmax.f32 %v2791_v22, 0.0  ;;  %v5715_v31 = vmul.f32 0.04, %v6860_v26  ;;  %v1138_v21 = vmul.f32 0.04, %v6861_v45  ;;  %v5725_v22 = vpop.f32.mrf.mxu1  ;;  %v5733_v45 = vpop.xlane.xlu0 %859 }
 0x35f   :  { %v3417_v52 = vpop.f32.mrf.mxu0  ;;  %1102 = vadd.xlane.f32.xlu1 %v1101_v50  ;;  %6862 = vst [vmem:[#allocation61_spill] sm:$0xff] %v5718_v46  ;;  %6864 = vst [vmem:[#allocation23_spill] sm:$0xff] %v5723_v43  ;;  %v6867_v26 = vld [vmem:[#allocation56_spill] sm:$0xff]  ;;  %v5739_v32 = vmul.f32 0.04, %v6871_v62 }
 0x360   :  { %1051 = vadd.xlane.f32.xlu0 %v1050_v38  ;;  %v2971_v20 = vmax.f32 %v2827_v41, 0.0  ;;  %v2394_v19 = vadd.f32 %v3417_v52, %v5668_v18  ;;  %6865 = vst [vmem:[#allocation25_spill] sm:$0xff] %v5725_v22  ;;  %v1107_v52 = vsel %vm701_vm3, %v692_v36, 0.0  ;;  %v1056_v41 = vsel %vm701_vm3, %v675_v5, 0.0  ;;  %v6868_v38 = vld [vmem:[#allocation17_spill] sm:$0xff]  ;;  %v6869_v46 = vld [vmem:[#allocation36_spill] sm:$0xff] }
 0x361   :  { %v694_v50 = vand.u32 2147483647, %v6867_v26  ;;  %v677_v14 = vand.u32 2147483647, %v6868_v38  ;;  %v5736_v63 = vmul.f32 0.04, %v6869_v46 }
 0x362   :  { %v5727_v56 = vmax.f32 %v2935_v11, %v2971_v20  ;;  %v2828_v49 = vmul.f32 %v2394_v19, %v1182_v3  ;;  %v2936_v22 = vmax.f32 %v2792_v39, 0.0  ;;  %v6872_v3 = vld [vmem:[#allocation44_spill] sm:$0xff]  ;;  %v6874_v5 = vld [vmem:[#allocation46_spill] sm:$0xff]  ;;  %v6886_v39 = vld [vmem:[#allocation49_spill] sm:$0xff] }
 0x363   :  { %6870 = vst [vmem:[#allocation28_spill] sm:$0xff] %v5736_v63  ;;  %1108 = vadd.xlane.f32.xlu1 %v1107_v52  ;;  %v5742_v36 = vmul.f32 0.04, %v6872_v3  ;;  %v5745_v20 = vmul.f32 0.04, %v6874_v5  ;;  %v6875_v19 = vld [vmem:[#allocation60_spill] sm:$0xff] }
 0x364   :  { %6866 = vst [vmem:[#allocation27_spill] sm:$0xff] %v5727_v56  ;;  %1057 = vadd.xlane.f32.xlu0 %v1056_v41  ;;  %v2972_v11 = vmax.f32 %v2828_v49, 0.0  ;;  %v5749_v26 = vadd.f32 %v6875_v19, %v5668_v18  ;;  %v6877_v38 = vld [vmem:[#allocation32_spill] sm:$0xff]  ;;  %v6878_v56 = vld [vmem:[#allocation47_spill] sm:$0xff]  ;;  %v6880_v49 = vld [vmem:[#allocation34_spill] sm:$0xff]  ;;  %v5759_v41 = vpop.f32.mrf.mxu1  ;;  %v1113_v5 = vsel %vm701_vm3, %v694_v50, 0.0  ;;  %v2263_v50 = vadd.f32 %v5300_v55, %v5668_v18 }
 0x365   :  { %6873 = vst [vmem:[#allocation52_spill] sm:$0xff] %v5742_v36  ;;  %v2207_v46 = vadd.f32 %v5668_v18, %v6877_v38  ;;  %v5754_v62 = vmul.f32 0.04, %v6878_v56  ;;  %v2218_v52 = vadd.f32 %v6880_v49, %v5668_v18  ;;  %6881 = vst [vmem:[#allocation31_spill] sm:$0xff] %v5759_v41  ;;  %v1062_v19 = vsel %vm701_vm3, %v677_v14, 0.0  ;;  %v5769_v56 = vpop.f32.mrf.mxu0  ;;  %v6887_v49 = vld [vmem:[#allocation53_spill] sm:$0xff] }
 0x366   :  { %6876 = vst [vmem:[#allocation15_spill] sm:$0xff] %v5749_v26  ;;  %v5761_v3 = vmax.f32 %v2936_v22, %v2972_v11  ;;  %v696_v63 = vand.u32 2147483647, %v5283_v27  ;;  %v6883_v26 = vld [vmem:[#allocation19_spill] sm:$0xff]  ;;  %6885 = vst [vmem:[#allocation56_spill] sm:$0xff] %v5769_v56  ;;  %v5779_v22 = vadd.f32 %v5668_v18, %v5262_v48  ;;  %v6888_v27 = vld [vmem:[#allocation57_spill] sm:$0xff] }
 0x367   :  { %6879 = vst [vmem:[#allocation24_spill] sm:$0xff] %v5754_v62  ;;  %v679_v38 = vand.u32 2147483647, %v6883_v26  ;;  %v5772_v43 = vmul.f32 0.04, %v6886_v39  ;;  %1114 = vadd.xlane.f32.xlu1 %v1113_v5  ;;  %v5789_v26 = vmul.f32 %v2207_v46, %v1135_v44  ;;  %v2255_v39 = vadd.f32 %v5668_v18, %v5323_v61  ;;  %v6891_v5 = vld [vmem:[#allocation69_spill] sm:$0xff] }
 0x368   :  { %6882 = vst [vmem:[#allocation33_spill] sm:$0xff] %v5761_v3  ;;  %v5767_v36 = vpop.xlane.xlu1 %916  ;;  %v5775_v62 = vmul.f32 0.04, %v6887_v49  ;;  %1063 = vadd.xlane.f32.xlu0 %v1062_v19  ;;  %v5784_v14 = vmul.f32 0.04, %v6888_v27  ;;  %v5793_v49 = vpop.xlane.xlu0 %865  ;;  %v5797_v55 = vmul.f32 %v2218_v52, %v1138_v21  ;;  %v2498_v19 = vadd.f32 %v5668_v18, %v6891_v5  ;;  %v6893_v46 = vld [vmem:[#allocation68_spill] sm:$0xff] }
 0x369   :  { %6884 = vst [vmem:[#allocation35_spill] sm:$0xff] %v5767_v36  ;;  %v5787_v11 = vmul.f32 0.04, %v5253_v24  ;;  %6890 = vst [vmem:[#allocation36_spill] sm:$0xff] %v5789_v26  ;;  %v1147_v48 = vmul.f32 0.04, %v5352_v37  ;;  %v5801_v27 = vpop.f32.mrf.mxu1 }
 0x36a   :  { %v1149_v3 = vmul.f32 0.04, %v5390_v42  ;;  %6892 = vst [vmem:[#allocation41_spill] sm:$0xff] %v5801_v27  ;;  %v1119_v24 = vsel %vm701_vm3, %v696_v63, 0.0  ;;  %v1068_v44 = vsel %vm701_vm3, %v679_v38, 0.0  ;;  %v6894_v61 = vld [vmem:[#allocation21_spill] sm:$0xff]  ;;  %v2258_v38 = vadd.f32 %v5668_v18, %v5377_v33 }
 0x36b   :  { %6889 = vst [vmem:[#allocation17_spill] sm:$0xff] %v5787_v11  ;;  %v698_v26 = vand.u32 2147483647, %v6893_v46  ;;  %v681_v56 = vand.u32 2147483647, %v6894_v61  ;;  %v3420_v41 = vpop.f32.mrf.mxu0  ;;  %1120 = vadd.xlane.f32.xlu1 %v1119_v24  ;;  %v2793_v5 = vmul.f32 %v2255_v39, %v1147_v48  ;;  %v6895_v27 = vld [vmem:[#allocation72_spill] sm:$0xff] }
 0x36c   :  { %v923_v36 = vpop.xlane.xlu1 %922  ;;  %v2795_v37 = vmul.f32 %v2263_v50, %v1149_v3  ;;  %v1185_v42 = vmul.f32 0.04, %v5698_v54  ;;  %1069 = vadd.xlane.f32.xlu0 %v1068_v44  ;;  %v2407_v52 = vadd.f32 %v3420_v41, %v5668_v18  ;;  %v2266_v63 = vadd.f32 %v6895_v27, %v5668_v18  ;;  %v5817_v54 = vpop.f32.mrf.mxu1  ;;  %v6897_v41 = vld [vmem:[#allocation62_spill] sm:$0xff] }
 0x36d   :  { %v1208_v21 = vmul.f32 0.04, %v923_v36  ;;  %v700_v46 = vand.u32 2147483647, %v5382_v34  ;;  %v2398_v61 = vpop.f32.mrf.mxu0  ;;  %v1183_v11 = vmul.f32 0.04, %v5676_v51  ;;  %v5825_v33 = vpop.xlane.xlu0 %871 }
 0x36e   :  { %6896 = vst [vmem:[#allocation44_spill] sm:$0xff] %v5817_v54  ;;  %v2831_v50 = vmul.f32 %v2407_v52, %v1185_v42  ;;  %v2399_v36 = vadd.f32 %v5668_v18, %v2398_v61  ;;  %v5821_v39 = vmul.f32 0.04, %v6897_v41  ;;  %v1125_v48 = vsel %vm701_vm3, %v698_v26, 0.0  ;;  %v6899_v34 = vld [vmem:[#allocation26_spill] sm:$0xff] }
 0x36f   :  { %v5815_v3 = vmul.f32 %v2498_v19, %v1208_v21  ;;  %v1074_v27 = vsel %vm701_vm3, %v681_v56, 0.0  ;;  %v683_v24 = vand.u32 2147483647, %v6899_v34  ;;  %v3421_v44 = vpop.f32.mrf.mxu0  ;;  %v1184_v51 = vmul.f32 0.04, %v5535_v16  ;;  %1126 = vadd.xlane.f32.xlu1 %v1125_v48 }
 0x370   :  { %6898 = vst [vmem:[#allocation46_spill] sm:$0xff] %v5821_v39  ;;  %v2939_v19 = vmax.f32 %v2795_v37, 0.0  ;;  %1075 = vadd.xlane.f32.xlu0 %v1074_v27  ;;  %v2975_v42 = vmax.f32 %v2831_v50, 0.0  ;;  %v2829_v21 = vmul.f32 %v2399_v36, %v1183_v11  ;;  %v1186_v52 = vmul.f32 0.04, %v5553_v10  ;;  %v5831_v26 = vpop.xlane.xlu1 %928  ;;  %v5836_v39 = vpop.f32.mrf.mxu1  ;;  %v6901_v10 = vld [vmem:[#allocation29_spill] sm:$0xff] }
 0x371   :  { %v2937_v61 = vmax.f32 %v2793_v5, 0.0  ;;  %v2796_v41 = vmul.f32 %v2266_v63, %v5721_v13  ;;  %v2410_v56 = vadd.f32 %v3421_v44, %v5668_v18  ;;  %v2794_v54 = vmul.f32 %v2258_v38, %v5715_v31  ;;  %v2401_v50 = vpop.f32.mrf.mxu0  ;;  %v6902_v63 = vld [vmem:[#allocation67_spill] sm:$0xff]  ;;  %v6903_v38 = vld [vmem:[#allocation37_spill] sm:$0xff]  ;;  %v6905_v44 = vld [vmem:[#allocation66_spill] sm:$0xff] }
 0x372   :  { %v1131_v34 = vsel %vm701_vm3, %v700_v46, 0.0  ;;  %v5838_v16 = vmax.f32 %v2939_v19, %v2975_v42  ;;  %v2973_v37 = vmax.f32 %v2829_v21, 0.0  ;;  %v1080_v11 = vsel %vm701_vm3, %v683_v24, 0.0 }
 0x373   :  { %v685_v5 = vand.u32 2147483647, %v6901_v10  ;;  %v2832_v36 = vmul.f32 %v2410_v56, %v1186_v52  ;;  %v2402_v13 = vadd.f32 %v5668_v18, %v2401_v50  ;;  %v5844_v48 = vmul.f32 0.04, %v6902_v63  ;;  %1132 = vadd.xlane.f32.xlu1 %v1131_v34  ;;  %v6906_v63 = vld [vmem:[#allocation38_spill] sm:$0xff] }
 0x374   :  { %6900 = vst [vmem:[#allocation60_spill] sm:$0xff] %v5838_v16  ;;  %v2210_v46 = vadd.f32 %v5668_v18, %v6903_v38  ;;  %1081 = vadd.xlane.f32.xlu0 %v1080_v11  ;;  %v5849_v27 = vmax.f32 %v2937_v61, %v2973_v37  ;;  %v5853_v24 = vadd.f32 %v6905_v44, %v5668_v18  ;;  %v2940_v19 = vmax.f32 %v2796_v41, 0.0  ;;  %v5861_v11 = vpop.f32.mrf.mxu1 }
 0x375   :  { %v5855_v42 = vpop.xlane.xlu0 %877  ;;  %v2976_v52 = vmax.f32 %v2832_v36, 0.0  ;;  %v2830_v56 = vmul.f32 %v2402_v13, %v1184_v51  ;;  %v2514_v50 = vadd.f32 %v5668_v18, %v5406_v28  ;;  %v2938_v10 = vmax.f32 %v2794_v54, 0.0  ;;  %v6908_v54 = vld [vmem:[#allocation70_spill] sm:$0xff] }
 0x376   :  { %6904 = vst [vmem:[#allocation32_spill] sm:$0xff] %v5849_v27  ;;  %v935_v21 = vpop.xlane.xlu1 %934  ;;  %v2279_v34 = vadd.f32 %v5399_v2, %v5668_v18  ;;  %v1086_v37 = vsel %vm701_vm3, %v685_v5, 0.0  ;;  %v687_v38 = vand.u32 2147483647, %v6906_v63  ;;  %v1153_v36 = vmul.f32 0.04, %v5427_v17 }
 0x377   :  { %v1212_v61 = vmul.f32 0.04, %v935_v21  ;;  %v5865_v41 = vmax.f32 %v2940_v19, %v2976_v52  ;;  %v2974_v44 = vmax.f32 %v2830_v56, 0.0  ;;  %v5869_v51 = vmul.f32 %v2210_v46, %v5695_v12  ;;  %v5889_v56 = vpop.f32.mrf.mxu1 }
 0x378   :  { %v2271_v28 = vadd.f32 %v5668_v18, %v5408_v40  ;;  %1087 = vadd.xlane.f32.xlu0 %v1086_v37  ;;  %v5876_v13 = vmul.f32 0.04, %v6908_v54  ;;  %v5879_v5 = vmul.f32 0.04, %v5375_v58  ;;  %v1151_v19 = vmul.f32 0.04, %v5415_v7 }
 0x379   :  { %6907 = vst [vmem:[#allocation47_spill] sm:$0xff] %v5865_v41  ;;  %v5873_v2 = vmul.f32 %v2514_v50, %v1212_v61  ;;  %v5882_v21 = vpop.xlane.xlu0 %883  ;;  %v5884_v17 = vmax.f32 %v2938_v10, %v2974_v44  ;;  %v3424_v12 = vpop.f32.mrf.mxu0  ;;  %v2799_v46 = vmul.f32 %v2279_v34, %v1153_v36  ;;  %v2282_v40 = vadd.f32 %v5417_v15, %v5668_v18  ;;  %v6911_v7 = vld [vmem:[#allocation42_spill] sm:$0xff]  ;;  %v6912_v34 = vld [vmem:[#allocation40_spill] sm:$0xff] }
 0x37a   :  { %v1189_v52 = vmul.f32 0.04, %v5793_v49  ;;  %6910 = vst [vmem:[#allocation19_spill] sm:$0xff] %v5889_v56  ;;  %v2423_v50 = vadd.f32 %v3424_v12, %v5668_v18  ;;  %v5893_v58 = vmul.f32 0.04, %v5404_v4  ;;  %v5897_v61 = vadd.f32 %v6911_v7, %v5668_v18  ;;  %v5900_v37 = vpop.xlane.xlu1 %940 }
 0x37b   :  { %6909 = vst [vmem:[#allocation34_spill] sm:$0xff] %v5884_v17  ;;  %v1092_v10 = vsel %vm701_vm3, %v687_v38, 0.0  ;;  %v689_v63 = vand.u32 2147483647, %v6912_v34  ;;  %v2414_v15 = vpop.f32.mrf.mxu0  ;;  %v2797_v44 = vmul.f32 %v2271_v28, %v1151_v19  ;;  %v5906_v4 = vmul.f32 0.04, %v5425_v9 }
 0x37c   :  { %1093 = vadd.xlane.f32.xlu0 %v1092_v10  ;;  %v2835_v36 = vmul.f32 %v2423_v50, %v1189_v52  ;;  %v2415_v54 = vadd.f32 %v5668_v18, %v2414_v15  ;;  %v5909_v12 = vmul.f32 0.04, %v5437_v6  ;;  %v2274_v38 = vadd.f32 %v5668_v18, %v5429_v8  ;;  %v5918_v10 = vpop.f32.mrf.mxu1  ;;  %v6914_v6 = vld [vmem:[#allocation51_spill] sm:$0xff]  ;;  %v6936_v17 = vld [vmem:[#allocation80_spill] sm:$0xff] }
 0x37d   :  { %v1187_v7 = vmul.f32 0.04, %v5733_v45  ;;  %v5914_v34 = vpop.xlane.xlu0 %889  ;;  %v2943_v31 = vmax.f32 %v2799_v46, 0.0  ;;  %v1190_v28 = vmul.f32 0.04, %v5587_v29  ;;  %v2800_v19 = vmul.f32 %v2282_v40, %v5745_v20  ;;  %v3425_v50 = vpop.f32.mrf.mxu0  ;;  %6913 = vst [vmem:[#allocation49_spill] sm:$0xff] %v5918_v10 }
 0x37e   :  { %v2979_v52 = vmax.f32 %v2835_v36, 0.0  ;;  %v1098_v9 = vsel %vm701_vm3, %v689_v63, 0.0  ;;  %v691_v15 = vand.u32 2147483647, %v6914_v6  ;;  %v2426_v8 = vadd.f32 %v3425_v50, %v5668_v18  ;;  %v6915_v45 = vld [vmem:[#allocation48_spill] sm:$0xff] }
 0x37f   :  { %v2833_v49 = vmul.f32 %v2415_v54, %v1187_v7  ;;  %v2234_v16 = vadd.f32 %v6915_v45, %v5668_v18  ;;  %v1188_v46 = vmul.f32 0.04, %v5567_v47  ;;  %v2941_v27 = vmax.f32 %v2797_v44, 0.0  ;;  %v2417_v20 = vpop.f32.mrf.mxu0  ;;  %v6917_v47 = vld [vmem:[#allocation55_spill] sm:$0xff] }
 0x380   :  { %1099 = vadd.xlane.f32.xlu0 %v1098_v9  ;;  %v5926_v29 = vmax.f32 %v2943_v31, %v2979_v52  ;;  %v2798_v40 = vmul.f32 %v2274_v38, %v5739_v32  ;;  %v947_v36 = vpop.xlane.xlu1 %946  ;;  %v2836_v6 = vmul.f32 %v2426_v8, %v1190_v28  ;;  %v2418_v54 = vadd.f32 %v5668_v18, %v2417_v20  ;;  %v5935_v9 = vpop.f32.mrf.mxu1 }
 0x381   :  { %v5929_v10 = vpop.xlane.xlu0 %895  ;;  %v2977_v63 = vmax.f32 %v2833_v49, 0.0  ;;  %v2530_v7 = vadd.f32 %v5668_v18, %v5451_v57  ;;  %v2944_v50 = vmax.f32 %v2800_v19, 0.0  ;;  %v1216_v45 = vmul.f32 0.04, %v947_v36 }
 0x382   :  { %6916 = vst [vmem:[#allocation53_spill] sm:$0xff] %v5926_v29  ;;  %v693_v44 = vand.u32 2147483647, %v6917_v47  ;;  %v1104_v31 = vsel %vm701_vm3, %v691_v15, 0.0  ;;  %v2980_v32 = vmax.f32 %v2836_v6, 0.0  ;;  %v2834_v38 = vmul.f32 %v2418_v54, %v1188_v46  ;;  %v6923_v54 = vld [vmem:[#allocation64_spill] sm:$0xff] }
 0x383   :  { %v5938_v52 = vmax.f32 %v2941_v27, %v2977_v63  ;;  %v1155_v49 = vmul.f32 0.04, %v5447_v30  ;;  %v5943_v28 = vadd.f32 %v5668_v18, %v5369_v25  ;;  %v2295_v57 = vadd.f32 %v5439_v1, %v5668_v18  ;;  %v6921_v25 = vld [vmem:[#allocation45_spill] sm:$0xff] }
 0x384   :  { %v5947_v19 = vmul.f32 %v2530_v7, %v1216_v45  ;;  %1105 = vadd.xlane.f32.xlu0 %v1104_v31  ;;  %v5950_v8 = vmul.f32 %v2234_v16, %v5775_v62  ;;  %v2942_v15 = vmax.f32 %v2798_v40, 0.0  ;;  %v953_v27 = vpop.xlane.xlu1 %952  ;;  %v5954_v46 = vmax.f32 %v2944_v50, %v2980_v32  ;;  %v5966_v16 = vpop.f32.mrf.mxu1  ;;  %v6925_v47 = vld [vmem:[#allocation77_spill] sm:$0xff] }
 0x385   :  { %6918 = vst [vmem:[#allocation57_spill] sm:$0xff] %v5938_v52  ;;  %v5952_v20 = vpop.xlane.xlu0 %901  ;;  %v2978_v30 = vmax.f32 %v2834_v38, 0.0  ;;  %v1157_v36 = vmul.f32 0.04, %v5459_v60  ;;  %v5959_v63 = vadd.f32 %v5668_v18, %v6921_v25  ;;  %v2538_v1 = vadd.f32 %v5441_v53, %v5668_v18  ;;  %v6927_v38 = vld [vmem:[#allocation78_spill] sm:$0xff] }
 0x386   :  { %6919 = vst [vmem:[#allocation69_spill] sm:$0xff] %v5947_v19  ;;  %6920 = vst [vmem:[#allocation68_spill] sm:$0xff] %v5954_v46  ;;  %v1218_v6 = vmul.f32 0.04, %v953_v27  ;;  %v5964_v62 = vmul.f32 0.04, %v5457_v35  ;;  %v2287_v31 = vadd.f32 %v5668_v18, %v6925_v47 }
 0x387   :  { %6922 = vst [vmem:[#allocation21_spill] sm:$0xff] %v5959_v63  ;;  %v1110_v40 = vsel %vm701_vm3, %v693_v44, 0.0  ;;  %v695_v7 = vand.u32 2147483647, %v6923_v54  ;;  %v5970_v50 = vmax.f32 %v2942_v15, %v2978_v30  ;;  %v5973_v60 = vmul.f32 0.04, %v5469_v0  ;;  %v5998_v54 = vpop.f32.mrf.mxu1 }
 0x388   :  { %v2803_v45 = vmul.f32 %v2295_v57, %v1157_v36  ;;  %v5977_v53 = vmul.f32 %v2538_v1, %v1218_v6  ;;  %1111 = vadd.xlane.f32.xlu0 %v1110_v40  ;;  %v5980_v35 = vmul.f32 0.04, %v5479_v23  ;;  %v5983_v32 = vmul.f32 0.04, %v5489_v59  ;;  %v959_v0 = vpop.xlane.xlu1 %958  ;;  %v6928_v57 = vld [vmem:[#allocation85_spill] sm:$0xff]  ;;  %v6929_v36 = vld [vmem:[#allocation50_spill] sm:$0xff] }
 0x389   :  { %6924 = vst [vmem:[#allocation72_spill] sm:$0xff] %v5970_v50  ;;  %v2298_v15 = vadd.f32 %v6927_v38, %v5668_v18  ;;  %v5988_v27 = vpop.xlane.xlu0 %907  ;;  %v5991_v30 = vmul.f32 0.04, %v6928_v57  ;;  %v2226_v25 = vadd.f32 %v5668_v18, %v6929_v36  ;;  %v6930_v1 = vld [vmem:[#allocation86_spill] sm:$0xff]  ;;  %v1220_v6 = vmul.f32 0.04, %v959_v0  ;;  %v3428_v59 = vpop.f32.mrf.mxu0 }
 0x38a   :  { %6926 = vst [vmem:[#allocation62_spill] sm:$0xff] %v5977_v53  ;;  %v2546_v23 = vadd.f32 %v5668_v18, %v6930_v1  ;;  %v1193_v40 = vmul.f32 0.04, %v5855_v42  ;;  %6931 = vst [vmem:[#allocation26_spill] sm:$0xff] %v5998_v54  ;;  %v1116_v47 = vsel %vm701_vm3, %v695_v7, 0.0  ;;  %v6932_v38 = vld [vmem:[#allocation65_spill] sm:$0xff]  ;;  %v2439_v29 = vadd.f32 %v3428_v59, %v5668_v18 }
 0x38b   :  { %v697_v44 = vand.u32 2147483647, %v6932_v38  ;;  %v6933_v57 = vld [vmem:[#allocation83_spill] sm:$0xff]  ;;  %v2947_v46 = vmax.f32 %v2803_v45, 0.0  ;;  %v2801_v36 = vmul.f32 %v2287_v31, %v1155_v49  ;;  %v2430_v0 = vpop.f32.mrf.mxu0  ;;  %v2804_v1 = vmul.f32 %v2298_v15, %v5784_v14  ;;  %v6935_v59 = vld [vmem:[#allocation18_spill] sm:$0xff]  ;;  %v6937_v31 = vld [vmem:[#allocation73_spill] sm:$0xff] }
 0x38c   :  { %v2554_v52 = vadd.f32 %v6933_v57, %v5668_v18  ;;  %v6005_v50 = vmul.f32 %v2546_v23, %v1220_v6  ;;  %1117 = vadd.xlane.f32.xlu0 %v1116_v47  ;;  %v1191_v42 = vmul.f32 0.04, %v5825_v33  ;;  %v965_v54 = vpop.xlane.xlu1 %964  ;;  %v2839_v7 = vmul.f32 %v2439_v29, %v1193_v40  ;;  %v6016_v47 = vpop.f32.mrf.mxu1  ;;  %v6939_v29 = vld [vmem:[#allocation97_spill] sm:$0xff] }
 0x38d   :  { %v6009_v56 = vpop.xlane.xlu0 %913  ;;  %v2431_v38 = vadd.f32 %v5668_v18, %v2430_v0  ;;  %v1194_v41 = vmul.f32 0.04, %v6935_v59  ;;  %v2290_v45 = vadd.f32 %v5668_v18, %v6936_v17  ;;  %v1222_v49 = vmul.f32 0.04, %v965_v54  ;;  %v3429_v6 = vpop.f32.mrf.mxu0  ;;  %6938 = vst [vmem:[#allocation67_spill] sm:$0xff] %v6016_v47  ;;  %v6940_v59 = vld [vmem:[#allocation82_spill] sm:$0xff] }
 0x38e   :  { %6934 = vst [vmem:[#allocation29_spill] sm:$0xff] %v6005_v50  ;;  %v699_v23 = vand.u32 2147483647, %v6937_v31  ;;  %v1122_v14 = vsel %vm701_vm3, %v697_v44, 0.0  ;;  %v2983_v33 = vmax.f32 %v2839_v7, 0.0  ;;  %v2442_v57 = vadd.f32 %v3429_v6, %v5668_v18  ;;  %v6943_v7 = vld [vmem:[#allocation14_spill] sm:$0xff] }
 0x38f   :  { %v2837_v15 = vmul.f32 %v2431_v38, %v1191_v42  ;;  %v2562_v40 = vadd.f32 %v5668_v18, %v6939_v29  ;;  %v2945_v0 = vmax.f32 %v2801_v36, 0.0  ;;  %v2311_v50 = vadd.f32 %v6940_v59, %v5668_v18  ;;  %v2433_v54 = vpop.f32.mrf.mxu0  ;;  %v6031_v59 = vpop.f32.mrf.mxu1 }
 0x390   :  { %v6024_v17 = vmul.f32 %v2554_v52, %v1222_v49  ;;  %1123 = vadd.xlane.f32.xlu0 %v1122_v14  ;;  %v2948_v31 = vmax.f32 %v2804_v1, 0.0  ;;  %v971_v53 = vpop.xlane.xlu1 %970  ;;  %v6026_v19 = vmax.f32 %v2947_v46, %v2983_v33  ;;  %v2840_v42 = vmul.f32 %v2442_v57, %v1194_v41  ;;  %v6945_v46 = vld [vmem:[#allocation74_spill] sm:$0xff]  ;;  %v6948_v33 = vld [vmem:[#allocation52_spill] sm:$0xff] }
 0x391   :  { %v920_v47 = vpop.xlane.xlu0 %919  ;;  %v2981_v44 = vmax.f32 %v2837_v15, 0.0  ;;  %v1192_v38 = vmul.f32 0.04, %v6943_v7  ;;  %v1224_v6 = vmul.f32 0.04, %v971_v53  ;;  %v2434_v36 = vadd.f32 %v5668_v18, %v2433_v54 }
 0x392   :  { %6941 = vst [vmem:[#allocation37_spill] sm:$0xff] %v6024_v17  ;;  %6942 = vst [vmem:[#allocation66_spill] sm:$0xff] %v6026_v19  ;;  %v1207_v63 = vmul.f32 0.04, %v920_v47  ;;  %v2802_v29 = vmul.f32 %v2290_v45, %v5772_v43  ;;  %v1128_v52 = vsel %vm701_vm3, %v699_v23, 0.0  ;;  %v2984_v1 = vmax.f32 %v2840_v42, 0.0 }
 0x393   :  { %v6034_v49 = vmax.f32 %v2945_v0, %v2981_v44  ;;  %v6038_v14 = vadd.f32 %v6945_v46, %v5668_v18  ;;  %v6040_v41 = vmul.f32 %v2562_v40, %v1224_v6  ;;  %v2838_v47 = vmul.f32 %v2434_v36, %v1192_v38  ;;  %v6949_v45 = vld [vmem:[#allocation90_spill] sm:$0xff]  ;;  %v6950_v23 = vld [vmem:[#allocation75_spill] sm:$0xff]  ;;  %v6954_v36 = vld [vmem:[#allocation84_spill] sm:$0xff]  ;;  %v6066_v46 = vpop.f32.mrf.mxu1 }
 0x394   :  { %v6043_v53 = vmul.f32 %v5779_v22, %v1207_v63  ;;  %1129 = vadd.xlane.f32.xlu0 %v1128_v52  ;;  %v6046_v43 = vmul.f32 %v2226_v25, %v6948_v33  ;;  %v6049_v15 = vmul.f32 0.04, %v6949_v45  ;;  %v6053_v57 = vadd.f32 %v6950_v23, %v5668_v18  ;;  %v977_v0 = vpop.xlane.xlu1 %976  ;;  %v6952_v40 = vld [vmem:[#allocation95_spill] sm:$0xff]  ;;  %v6953_v25 = vld [vmem:[#allocation76_spill] sm:$0xff] }
 0x395   :  { %6944 = vst [vmem:[#allocation38_spill] sm:$0xff] %v6034_v49  ;;  %6946 = vst [vmem:[#allocation70_spill] sm:$0xff] %v6040_v41  ;;  %v926_v54 = vpop.xlane.xlu0 %925  ;;  %v6055_v44 = vmax.f32 %v2948_v31, %v2984_v1  ;;  %v2570_v22 = vadd.f32 %v6952_v40, %v5668_v18  ;;  %v2807_v63 = vmul.f32 %v2311_v50, %v5991_v30  ;;  %v1226_v42 = vmul.f32 0.04, %v977_v0  ;;  %v6955_v1 = vld [vmem:[#allocation87_spill] sm:$0xff] }
 0x396   :  { %6947 = vst [vmem:[#allocation42_spill] sm:$0xff] %v6043_v53  ;;  %v1209_v7 = vmul.f32 0.04, %v926_v54  ;;  %v6062_v38 = vadd.f32 %v5668_v18, %v6953_v25  ;;  %v2946_v6 = vmax.f32 %v2802_v29, 0.0  ;;  %v2303_v52 = vadd.f32 %v5668_v18, %v6954_v36  ;;  %v6957_v50 = vld [vmem:[#allocation15_spill] sm:$0xff]  ;;  %v6959_v54 = vld [vmem:[#allocation94_spill] sm:$0xff] }
 0x397   :  { %6951 = vst [vmem:[#allocation40_spill] sm:$0xff] %v6055_v44  ;;  %v2982_v33 = vmax.f32 %v2838_v47, 0.0  ;;  %v3432_v31 = vpop.f32.mrf.mxu0  ;;  %v2314_v45 = vadd.f32 %v6955_v1, %v5668_v18  ;;  %v6070_v23 = vmul.f32 %v2570_v22, %v1226_v42  ;;  %v1165_v40 = vmul.f32 0.04, %v6959_v54  ;;  %v6960_v29 = vld [vmem:[#allocation98_spill] sm:$0xff]  ;;  %v6962_v44 = vld [vmem:[#allocation109_spill] sm:$0xff] }
 0x398   :  { %v6073_v30 = vmul.f32 %v6957_v50, %v1209_v7  ;;  %v2455_v0 = vadd.f32 %v3432_v31, %v5668_v18  ;;  %v6078_v25 = vmul.f32 0.04, %v6960_v29  ;;  %v1197_v36 = vmul.f32 0.04, %v5914_v34  ;;  %v983_v19 = vpop.xlane.xlu1 %982 }
 0x399   :  { %6956 = vst [vmem:[#allocation51_spill] sm:$0xff] %v6070_v23  ;;  %v932_v47 = vpop.xlane.xlu0 %931  ;;  %v6081_v49 = vmax.f32 %v2946_v6, %v2982_v33  ;;  %v2578_v22 = vadd.f32 %v5668_v18, %v6962_v44  ;;  %v2951_v42 = vmax.f32 %v2807_v63, 0.0  ;;  %v1228_v1 = vmul.f32 0.04, %v983_v19  ;;  %v2446_v50 = vpop.f32.mrf.mxu0  ;;  %v6964_v6 = vld [vmem:[#allocation91_spill] sm:$0xff]  ;;  %v6967_v63 = vld [vmem:[#allocation10_spill] sm:$0xff] }
 0x39a   :  { %6958 = vst [vmem:[#allocation48_spill] sm:$0xff] %v6073_v30  ;;  %v1211_v7 = vmul.f32 0.04, %v932_v47  ;;  %v2805_v31 = vmul.f32 %v2303_v52, %v5980_v35  ;;  %v1195_v54 = vmul.f32 0.04, %v5882_v21  ;;  %v6087_v30 = vpop.f32.mrf.mxu1  ;;  %v2843_v29 = vmul.f32 %v2455_v0, %v1197_v36 }
 0x39b   :  { %6961 = vst [vmem:[#allocation55_spill] sm:$0xff] %v6081_v49  ;;  %6963 = vst [vmem:[#allocation45_spill] sm:$0xff] %v6087_v30  ;;  %v2447_v34 = vadd.f32 %v5668_v18, %v2446_v50  ;;  %v2808_v23 = vmul.f32 %v2314_v45, %v5844_v48  ;;  %v2306_v33 = vadd.f32 %v5668_v18, %v6964_v6  ;;  %v3433_v44 = vpop.f32.mrf.mxu0  ;;  %v1198_v35 = vmul.f32 0.04, %v6967_v63  ;;  %v6969_v48 = vld [vmem:[#allocation79_spill] sm:$0xff]  ;;  %v6970_v50 = vld [vmem:[#allocation81_spill] sm:$0xff] }
 0x39c   :  { %v6093_v49 = vmul.f32 %v2578_v22, %v1228_v1  ;;  %v6096_v19 = vmul.f32 %v5943_v28, %v1211_v7  ;;  %v989_v52 = vpop.xlane.xlu1 %988  ;;  %v2987_v47 = vmax.f32 %v2843_v29, 0.0  ;;  %v2458_v36 = vadd.f32 %v3433_v44, %v5668_v18  ;;  %v6971_v28 = vld [vmem:[#allocation105_spill] sm:$0xff]  ;;  %v6112_v30 = vpop.f32.mrf.mxu1 }
 0x39d   :  { %v6099_v21 = vpop.xlane.xlu0 %937  ;;  %v2841_v0 = vmul.f32 %v2447_v34, %v1195_v54  ;;  %v6104_v45 = vadd.f32 %v6969_v48, %v5668_v18  ;;  %v6108_v22 = vadd.f32 %v5668_v18, %v6970_v50  ;;  %v2586_v1 = vadd.f32 %v6971_v28, %v5668_v18  ;;  %v2449_v6 = vpop.f32.mrf.mxu0  ;;  %6972 = vst [vmem:[#allocation85_spill] sm:$0xff] %v6112_v30  ;;  %v6974_v48 = vld [vmem:[#allocation93_spill] sm:$0xff] }
 0x39e   :  { %6965 = vst [vmem:[#allocation64_spill] sm:$0xff] %v6093_v49  ;;  %6966 = vst [vmem:[#allocation77_spill] sm:$0xff] %v6096_v19  ;;  %v1230_v7 = vmul.f32 0.04, %v989_v52  ;;  %v2949_v63 = vmax.f32 %v2805_v31, 0.0  ;;  %v6114_v29 = vmax.f32 %v2951_v42, %v2987_v47  ;;  %v2844_v34 = vmul.f32 %v2458_v36, %v1198_v35  ;;  %v6977_v28 = vld [vmem:[#allocation17_spill] sm:$0xff] }
 0x39f   :  { %6968 = vst [vmem:[#allocation78_spill] sm:$0xff] %v6099_v21  ;;  %v2985_v54 = vmax.f32 %v2841_v0, 0.0  ;;  %v2952_v44 = vmax.f32 %v2808_v23, 0.0  ;;  %v2327_v19 = vadd.f32 %v6974_v48, %v5668_v18  ;;  %v2450_v50 = vadd.f32 %v5668_v18, %v2449_v6  ;;  %v6976_v21 = vld [vmem:[#allocation20_spill] sm:$0xff]  ;;  %v6979_v47 = vld [vmem:[#allocation115_spill] sm:$0xff] }
 0x3a0   :  { %6973 = vst [vmem:[#allocation50_spill] sm:$0xff] %v6114_v29  ;;  %v6118_v49 = vmul.f32 %v2586_v1, %v1230_v7  ;;  %v1196_v53 = vmul.f32 0.04, %v6976_v21  ;;  %v2806_v52 = vmul.f32 %v2306_v33, %v6977_v28  ;;  %v995_v41 = vpop.xlane.xlu1 %994  ;;  %v2988_v42 = vmax.f32 %v2844_v34, 0.0  ;;  %v6980_v23 = vld [vmem:[#allocation96_spill] sm:$0xff]  ;;  %v6981_v7 = vld [vmem:[#allocation102_spill] sm:$0xff]  ;;  %v6132_v29 = vpop.f32.mrf.mxu1 }
 0x3a1   :  { %v944_v31 = vpop.xlane.xlu0 %943  ;;  %v6123_v17 = vmax.f32 %v2949_v63, %v2985_v54  ;;  %v2594_v35 = vadd.f32 %v5668_v18, %v6979_v47  ;;  %v2319_v0 = vadd.f32 %v5668_v18, %v6980_v23  ;;  %v1232_v36 = vmul.f32 0.04, %v995_v41  ;;  %v6982_v6 = vld [vmem:[#allocation99_spill] sm:$0xff]  ;;  %6983 = vst [vmem:[#allocation83_spill] sm:$0xff] %v6132_v29  ;;  %v6985_v54 = vld [vmem:[#allocation89_spill] sm:$0xff]  ;;  %v6986_v28 = vld [vmem:[#allocation92_spill] sm:$0xff] }
 0x3a2   :  { %6975 = vst [vmem:[#allocation86_spill] sm:$0xff] %v6118_v49  ;;  %v1215_v1 = vmul.f32 0.04, %v944_v31  ;;  %v1169_v48 = vmul.f32 0.04, %v6981_v7  ;;  %v2330_v21 = vadd.f32 %v6982_v6, %v5668_v18  ;;  %v6134_v33 = vmax.f32 %v2952_v44, %v2988_v42  ;;  %v6989_v23 = vld [vmem:[#allocation100_spill] sm:$0xff] }
 0x3a3   :  { %6978 = vst [vmem:[#allocation65_spill] sm:$0xff] %v6123_v17  ;;  %v2842_v63 = vmul.f32 %v2450_v50, %v1196_v53  ;;  %v6138_v34 = vadd.f32 %v6985_v54, %v5668_v18  ;;  %v6142_v47 = vadd.f32 %v5668_v18, %v6986_v28  ;;  %v6144_v41 = vmul.f32 %v2594_v35, %v1232_v36  ;;  %v6990_v54 = vld [vmem:[#allocation113_spill] sm:$0xff]  ;;  %v6991_v36 = vld [vmem:[#allocation103_spill] sm:$0xff] }
 0x3a4   :  { %6984 = vst [vmem:[#allocation18_spill] sm:$0xff] %v6134_v33  ;;  %v6147_v31 = vmul.f32 %v6062_v38, %v1215_v1  ;;  %v6151_v7 = vadd.f32 %v6989_v23, %v5668_v18  ;;  %v2950_v44 = vmax.f32 %v2806_v52, 0.0  ;;  %v2811_v42 = vmul.f32 %v2327_v19, %v1165_v40  ;;  %v1001_v53 = vpop.xlane.xlu1 %1000  ;;  %v6992_v1 = vld [vmem:[#allocation112_spill] sm:$0xff]  ;;  %v6167_v19 = vpop.f32.mrf.mxu1 }
 0x3a5   :  { %6987 = vst [vmem:[#allocation80_spill] sm:$0xff] %v6144_v41  ;;  %v950_v50 = vpop.xlane.xlu0 %949  ;;  %v2986_v6 = vmax.f32 %v2842_v63, 0.0  ;;  %v2602_v17 = vadd.f32 %v6990_v54, %v5668_v18  ;;  %v2809_v28 = vmul.f32 %v2319_v0, %v6049_v15  ;;  %v1234_v33 = vmul.f32 0.04, %v1001_v53  ;;  %v6994_v54 = vld [vmem:[#allocation101_spill] sm:$0xff] }
 0x3a6   :  { %6988 = vst [vmem:[#allocation73_spill] sm:$0xff] %v6147_v31  ;;  %v1217_v35 = vmul.f32 0.04, %v950_v50  ;;  %v6158_v38 = vadd.f32 %v5668_v18, %v6991_v36  ;;  %v6162_v23 = vadd.f32 %v5668_v18, %v6992_v1  ;;  %v6165_v40 = vmul.f32 %v2330_v21, %v5879_v5  ;;  %v6997_v1 = vld [vmem:[#allocation119_spill] sm:$0xff]  ;;  %v6998_v21 = vld [vmem:[#allocation120_spill] sm:$0xff] }
 0x3a7   :  { %v6169_v52 = vmax.f32 %v2950_v44, %v2986_v6  ;;  %v3436_v63 = vpop.f32.mrf.mxu0  ;;  %v2322_v15 = vadd.f32 %v5668_v18, %v6994_v54  ;;  %v6173_v0 = vmul.f32 %v2602_v17, %v1234_v33  ;;  %v2955_v36 = vmax.f32 %v2811_v42, 0.0  ;;  %v6999_v17 = vld [vmem:[#allocation104_spill] sm:$0xff] }
 0x3a8   :  { %v6176_v53 = vmul.f32 %v6053_v57, %v1217_v35  ;;  %v2471_v50 = vadd.f32 %v3436_v63, %v5668_v18  ;;  %v2618_v5 = vadd.f32 %v6997_v1, %v5668_v18  ;;  %v2610_v30 = vadd.f32 %v5668_v18, %v6998_v21  ;;  %v1007_v6 = vpop.xlane.xlu1 %1006 }
 0x3a9   :  { %6993 = vst [vmem:[#allocation97_spill] sm:$0xff] %v6169_v52  ;;  %6995 = vst [vmem:[#allocation82_spill] sm:$0xff] %v6173_v0  ;;  %v1201_v44 = vmul.f32 0.04, %v5952_v20  ;;  %v956_v52 = vpop.xlane.xlu0 %955  ;;  %v2953_v31 = vmax.f32 %v2809_v28, 0.0  ;;  %v2343_v33 = vadd.f32 %v6999_v17, %v5668_v18  ;;  %v2462_v35 = vpop.f32.mrf.mxu0  ;;  %v2956_v63 = vmax.f32 %v6165_v40, 0.0 }
 0x3aa   :  { %6996 = vst [vmem:[#allocation14_spill] sm:$0xff] %v6176_v53  ;;  %v1236_v54 = vmul.f32 0.04, %v1007_v6  ;;  %v1219_v57 = vmul.f32 0.04, %v956_v52  ;;  %v6188_v53 = vpop.f32.mrf.mxu1  ;;  %v2463_v21 = vadd.f32 %v5668_v18, %v2462_v35  ;;  %v2810_v20 = vmul.f32 %v2322_v15, %v5876_v13  ;;  %v7001_v0 = vld [vmem:[#allocation106_spill] sm:$0xff] }
 0x3ab   :  { %v1199_v42 = vmul.f32 0.04, %v5929_v10  ;;  %7000 = vst [vmem:[#allocation74_spill] sm:$0xff] %v6188_v53  ;;  %v2847_v1 = vmul.f32 %v2471_v50, %v1201_v44  ;;  %v2335_v28 = vadd.f32 %v5668_v18, %v7001_v0  ;;  %v3437_v52 = vpop.f32.mrf.mxu0  ;;  %v7003_v17 = vld [vmem:[#allocation54_spill] sm:$0xff]  ;;  %v6201_v44 = vmul.f32 %v2343_v33, %v1169_v48  ;;  %v7004_v13 = vld [vmem:[#allocation108_spill] sm:$0xff] }
 0x3ac   :  { %v6194_v41 = vmul.f32 %v2610_v30, %v1236_v54  ;;  %v6197_v6 = vmul.f32 %v6108_v22, %v1219_v57  ;;  %v1202_v40 = vmul.f32 0.04, %v7003_v17  ;;  %v1013_v10 = vpop.xlane.xlu1 %1012  ;;  %v2474_v50 = vadd.f32 %v3437_v52, %v5668_v18  ;;  %v7005_v35 = vld [vmem:[#allocation110_spill] sm:$0xff]  ;;  %v6207_v57 = vpop.f32.mrf.mxu1 }
 0x3ad   :  { %v2991_v49 = vmax.f32 %v2847_v1, 0.0  ;;  %v2845_v29 = vmul.f32 %v2463_v21, %v1199_v42  ;;  %v962_v53 = vpop.xlane.xlu0 %961  ;;  %v2346_v15 = vadd.f32 %v7004_v13, %v5668_v18  ;;  %v1238_v0 = vmul.f32 0.04, %v1013_v10  ;;  %v2465_v54 = vpop.f32.mrf.mxu0  ;;  %v7007_v21 = vld [vmem:[#allocation11_spill] sm:$0xff]  ;;  %v7008_v10 = vld [vmem:[#allocation8_spill] sm:$0xff] }
 0x3ae   :  { %7002 = vst [vmem:[#allocation52_spill] sm:$0xff] %v6197_v6  ;;  %v1221_v30 = vmul.f32 0.04, %v962_v53  ;;  %v2338_v22 = vadd.f32 %v5668_v18, %v7005_v35  ;;  %v2848_v42 = vmul.f32 %v2474_v50, %v1202_v40  ;;  %v1200_v6 = vmul.f32 0.04, %v7007_v21  ;;  %v7010_v50 = vld [vmem:[#allocation31_spill] sm:$0xff] }
 0x3af   :  { %v6209_v17 = vmax.f32 %v2955_v36, %v2991_v49  ;;  %v2989_v1 = vmax.f32 %v2845_v29, 0.0  ;;  %v6212_v52 = vmul.f32 %v2618_v5, %v1238_v0  ;;  %v2466_v33 = vadd.f32 %v5668_v18, %v2465_v54 }
 0x3b0   :  { %v6215_v48 = vmul.f32 %v6104_v45, %v1221_v30  ;;  %v6219_v53 = vmul.f32 %v2335_v28, %v6078_v25  ;;  %v2354_v13 = vadd.f32 %v5668_v18, %v7008_v10  ;;  %v2992_v49 = vmax.f32 %v2848_v42, 0.0  ;;  %v1019_v29 = vpop.xlane.xlu1 %1018  ;;  %v6233_v28 = vpop.f32.mrf.mxu1 }
 0x3b1   :  { %7006 = vst [vmem:[#allocation90_spill] sm:$0xff] %v6209_v17  ;;  %v6223_v35 = vmax.f32 %v2953_v31, %v2989_v1  ;;  %v968_v36 = vpop.xlane.xlu0 %967  ;;  %v2954_v40 = vmax.f32 %v2810_v20, 0.0  ;;  %v2626_v5 = vadd.f32 %v5668_v18, %v7010_v50  ;;  %v1240_v0 = vmul.f32 0.04, %v1019_v29  ;;  %v7011_v20 = vld [vmem:[#allocation25_spill] sm:$0xff] }
 0x3b2   :  { %v2846_v45 = vmul.f32 %v2466_v33, %v1200_v6  ;;  %v6228_v30 = vmul.f32 %v2346_v15, %v5906_v4  ;;  %v6231_v25 = vmul.f32 %v2338_v22, %v5893_v58  ;;  %v6235_v54 = vmax.f32 %v2956_v63, %v2992_v49  ;;  %v7012_v4 = vld [vmem:[#allocation114_spill] sm:$0xff] }
 0x3b3   :  { %7009 = vst [vmem:[#allocation75_spill] sm:$0xff] %v6223_v35  ;;  %v1223_v31 = vmul.f32 0.04, %v968_v36  ;;  %v2959_v1 = vmax.f32 %v6201_v44, 0.0  ;;  %v2634_v42 = vadd.f32 %v7011_v20, %v5668_v18  ;;  %v6240_v21 = vmul.f32 %v2626_v5, %v1240_v0 }
 0x3b4   :  { %v2990_v10 = vmax.f32 %v2846_v45, 0.0  ;;  %v2957_v6 = vmax.f32 %v6219_v53, 0.0  ;;  %v2362_v15 = vadd.f32 %v7012_v4, %v5668_v18  ;;  %v2818_v58 = vmul.f32 %v2354_v13, %v5909_v12  ;;  %v1025_v33 = vpop.xlane.xlu1 %1024  ;;  %v6257_v13 = vpop.f32.mrf.mxu1 }
 0x3b5   :  { %v6247_v22 = vmul.f32 %v6142_v47, %v1223_v31  ;;  %v3440_v63 = vpop.f32.mrf.mxu0  ;;  %v1205_v44 = vmul.f32 0.04, %v6009_v56  ;;  %v1242_v36 = vmul.f32 0.04, %v1025_v33  ;;  %v974_v50 = vpop.xlane.xlu0 %973  ;;  %v2960_v53 = vmax.f32 %v6228_v30, 0.0 }
 0x3b6   :  { %v6250_v49 = vmax.f32 %v2954_v40, %v2990_v10  ;;  %v2487_v29 = vadd.f32 %v3440_v63, %v5668_v18  ;;  %v2958_v5 = vmax.f32 %v6231_v25, 0.0  ;;  %v2650_v12 = vadd.f32 %v5836_v39, %v5668_v18  ;;  %v7013_v63 = vld [vmem:[#allocation39_spill] sm:$0xff] }
 0x3b7   :  { %v2478_v47 = vpop.f32.mrf.mxu0  ;;  %v1225_v0 = vmul.f32 0.04, %v974_v50  ;;  %v1203_v45 = vmul.f32 0.04, %v5988_v27  ;;  %v6260_v40 = vmul.f32 %v2634_v42, %v1242_v36  ;;  %v2820_v20 = vmul.f32 %v2362_v15, %v5964_v62  ;;  %v7014_v36 = vld [vmem:[#allocation35_spill] sm:$0xff]  ;;  %v6273_v62 = vpop.f32.mrf.mxu1 }
 0x3b8   :  { %v2851_v56 = vmul.f32 %v2487_v29, %v1205_v44  ;;  %v2479_v31 = vadd.f32 %v5668_v18, %v2478_v47  ;;  %v2642_v30 = vadd.f32 %v5668_v18, %v5861_v11  ;;  %v2962_v25 = vmax.f32 %v2818_v58, 0.0  ;;  %v1031_v44 = vpop.xlane.xlu1 %1030  ;;  %7015 = vst [vmem:[#allocation95_spill] sm:$0xff] %v6273_v62  ;;  %v6278_v11 = vld [vmem:[%s6656_s5] ss:$0 sm:$0xff]  ;;  %v7016_v47 = vld [vmem:[#allocation61_spill] sm:$0xff] }
 0x3b9   :  { %v6267_v10 = vmul.f32 %v6138_v34, %v1225_v0  ;;  %v3441_v39 = vpop.f32.mrf.mxu0  ;;  %v1210_v4 = vmul.f32 0.04, %v5831_v26  ;;  %v2370_v27 = vadd.f32 %v5668_v18, %v7013_v63  ;;  %v980_v29 = vpop.xlane.xlu0 %979  ;;  %v1206_v50 = vmul.f32 0.04, %v7014_v36 }
 0x3ba   :  { %v2995_v33 = vmax.f32 %v2851_v56, 0.0  ;;  %v2849_v42 = vmul.f32 %v2479_v31, %v1203_v45  ;;  %v2490_v34 = vadd.f32 %v6278_v11, %v3441_v39  ;;  %v1244_v15 = vmul.f32 0.04, %v1031_v44 }
 0x3bb   :  { %v2481_v26 = vpop.f32.mrf.mxu0  ;;  %v1227_v58 = vmul.f32 0.04, %v980_v29  ;;  %v1204_v18 = vmul.f32 0.04, %v7016_v47  ;;  %v2964_v31 = vmax.f32 %v2820_v20, 0.0  ;;  %v2856_v35 = vmul.f32 %v5853_v24, %v1210_v4 }
 0x3bc   :  { %v6282_v0 = vmax.f32 %v2959_v1, %v2995_v33  ;;  %v2993_v45 = vmax.f32 %v2849_v42, 0.0  ;;  %v2482_v56 = vadd.f32 %v6278_v11, %v2481_v26  ;;  %v2852_v63 = vmul.f32 %v2490_v34, %v1206_v50  ;;  %v1037_v47 = vpop.xlane.xlu1 %1036  ;;  %v6294_v42 = vpop.f32.mrf.mxu1  ;;  %v7020_v34 = vld [vmem:[#allocation30_spill] sm:$0xff] }
 0x3bd   :  { %v2890_v36 = vmul.f32 %v2642_v30, %v1244_v15  ;;  %v6286_v17 = vmul.f32 %v6158_v38, %v1227_v58  ;;  %v7018_v39 = vmax.f32 %v5869_v51, 0.0  ;;  %v986_v1 = vpop.xlane.xlu0 %985  ;;  %v2998_v33 = vmax.f32 %v5815_v3, 0.0 }
 0x3be   :  { %7017 = vst [vmem:[#allocation76_spill] sm:$0xff] %v6282_v0  ;;  %v6291_v62 = vmax.f32 %v2957_v6, %v2993_v45  ;;  %v2850_v29 = vmul.f32 %v2482_v56, %v1204_v18  ;;  %v2996_v20 = vmax.f32 %v2852_v63, 0.0  ;;  %v1246_v30 = vmul.f32 0.04, %v1037_v47  ;;  %v7023_v47 = vld [vmem:[#allocation56_spill] sm:$0xff]  ;;  %v7065_v0 = vld [vmem:[#allocation47_spill] sm:$0xff] }
 0x3bf   :  { %v3070_v44 = vmax.f32 %v7018_v39, %v2962_v25  ;;  %v3034_v50 = vmax.f32 %v2890_v36, 0.0  ;;  %v2378_v38 = vadd.f32 %v6278_v11, %v7020_v34  ;;  %v2822_v24 = vmul.f32 %v2370_v27, %v5973_v60  ;;  %v6309_v60 = vpop.f32.mrf.mxu1 }
 0x3c0   :  { %7019 = vst [vmem:[#allocation84_spill] sm:$0xff] %v6291_v62  ;;  %v2994_v4 = vmax.f32 %v2850_v29, 0.0  ;;  %v1229_v51 = vmul.f32 0.04, %v986_v1  ;;  %v2658_v6 = vadd.f32 %v6278_v11, %v5966_v16  ;;  %v6301_v25 = vmax.f32 %v2960_v53, %v2996_v20  ;;  %v1043_v56 = vpop.xlane.xlu1 %1042  ;;  %v7021_v53 = vld [vmem:[#allocation63_spill] sm:$0xff]  ;;  %v7024_v20 = vld [vmem:[#allocation88_spill] sm:$0xff] }
 0x3c1   :  { %v3106_v15 = vmax.f32 %v2998_v33, %v3034_v50  ;;  %v2892_v26 = vmul.f32 %v2650_v12, %v1246_v30  ;;  %v3000_v3 = vmax.f32 %v2856_v35, 0.0  ;;  %v1214_v58 = vmul.f32 0.04, %v5900_v37  ;;  %v992_v63 = vpop.xlane.xlu0 %991 }
 0x3c2   :  { %v6304_v18 = vmax.f32 %v2958_v5, %v2994_v4  ;;  %v6307_v45 = vmul.f32 %v6151_v7, %v1229_v51  ;;  %v1248_v39 = vmul.f32 0.04, %v1043_v56  ;;  %v1231_v16 = vmul.f32 0.04, %v992_v63  ;;  %v7027_v63 = vld [vmem:[#allocation117_spill] sm:$0xff] }
 0x3c3   :  { %v3142_v27 = vmax.f32 %v3070_v44, %v3106_v15  ;;  %v3036_v36 = vmax.f32 %v2892_v26, 0.0  ;;  %v2242_v29 = vadd.f32 %v6278_v11, %v7021_v53  ;;  %v7022_v35 = vmax.f32 %v5797_v55, 0.0  ;;  %v7026_v26 = vld [vmem:[#allocation111_spill] sm:$0xff] }
 0x3c4   :  { %v2824_v37 = vmul.f32 %v2378_v38, %v5983_v32  ;;  %v2966_v5 = vmax.f32 %v2822_v24, 0.0  ;;  %v2386_v7 = vadd.f32 %v6278_v11, %v7023_v47  ;;  %v2894_v1 = vmul.f32 %v2658_v6, %v1248_v39  ;;  %v1049_v30 = vpop.xlane.xlu1 %1048  ;;  %v6330_v24 = vpop.f32.mrf.mxu1 }
 0x3c5   :  { %v3072_v12 = vmax.f32 %v7022_v35, %v2964_v31  ;;  %3178 = vst [vmem:[%s6657_s6 + $0x8] sm:$0xff] %v3142_v27  ;;  %v3108_v44 = vmax.f32 %v3000_v3, %v3036_v36  ;;  %v6322_v33 = vmul.f32 %v6162_v23, %v1231_v16  ;;  %v1180_v50 = vmul.f32 0.04, %v7024_v20  ;;  %v998_v34 = vpop.xlane.xlu0 %997  ;;  %v7025_v23 = vld [vmem:[#allocation46_spill] sm:$0xff] }
 0x3c6   :  { %v2930_v55 = vmax.f32 %v6046_v43, 0.0  ;;  %v2860_v31 = vmul.f32 %v6038_v14, %v1214_v58  ;;  %v2666_v32 = vadd.f32 %v6278_v11, %v5935_v9  ;;  %v3002_v38 = vmax.f32 %v5873_v2, 0.0  ;;  %v6344_v35 = vpop.f32.mrf.mxu1 }
 0x3c7   :  { %v3144_v4 = vmax.f32 %v3072_v12, %v3108_v44  ;;  %v3038_v51 = vmax.f32 %v2894_v1, 0.0  ;;  %v1250_v6 = vmul.f32 0.04, %v1049_v30  ;;  %v2790_v15 = vmul.f32 %v2242_v29, %v7025_v23  ;;  %v7029_v1 = vld [vmem:[#allocation36_spill] sm:$0xff]  ;;  %v7034_v23 = vld [vmem:[#allocation58_spill] sm:$0xff] }
 0x3c8   :  { %v2599_v3 = vadd.f32 %v6278_v11, %v7026_v26  ;;  %v2968_v43 = vmax.f32 %v2824_v37, 0.0  ;;  %v1233_v56 = vmul.f32 0.04, %v998_v34  ;;  %v3074_v14 = vmax.f32 %v2930_v55, %v2966_v5  ;;  %v1055_v53 = vpop.xlane.xlu1 %1054 }
 0x3c9   :  { %v2826_v58 = vmul.f32 %v2386_v7, %v1180_v50  ;;  %3180 = vst [vmem:[%s6657_s6 + $0x18] sm:$0xff] %v3144_v4  ;;  %v3110_v9 = vmax.f32 %v3002_v38, %v3038_v51  ;;  %v2896_v2 = vmul.f32 %v2666_v32, %v1250_v6  ;;  %v2607_v27 = vadd.f32 %v6278_v11, %v7027_v63  ;;  %v1004_v29 = vpop.xlane.xlu0 %1003  ;;  %v7028_v7 = vld [vmem:[#allocation59_spill] sm:$0xff]  ;;  %v7030_v50 = vld [vmem:[#allocation24_spill] sm:$0xff]  ;;  %v7033_v51 = vld [vmem:[#allocation21_spill] sm:$0xff] }
 0x3ca   :  { %v3004_v36 = vmax.f32 %v2860_v31, 0.0  ;;  %v2674_v39 = vadd.f32 %v6278_v11, %v6066_v46  ;;  %v6342_v16 = vmul.f32 %v2599_v3, %v1233_v56  ;;  %v1252_v5 = vmul.f32 0.04, %v1055_v53  ;;  %v7032_v4 = vld [vmem:[#allocation28_spill] sm:$0xff]  ;;  %v7035_v56 = vld [vmem:[#allocation69_spill] sm:$0xff] }
 0x3cb   :  { %v3146_v12 = vmax.f32 %v3074_v14, %v3110_v9  ;;  %v3040_v37 = vmax.f32 %v2896_v2, 0.0  ;;  %v1235_v47 = vmul.f32 0.04, %v1004_v29  ;;  %v1143_v44 = vmul.f32 0.04, %v7028_v7  ;;  %v7038_v29 = vld [vmem:[#allocation13_spill] sm:$0xff] }
 0x3cc   :  { %v6350_v55 = vmul.f32 %v5897_v61, %v7030_v50  ;;  %v7031_v46 = vmax.f32 %v5950_v8, 0.0  ;;  %v2970_v32 = vmax.f32 %v2826_v58, 0.0  ;;  %v2898_v34 = vmul.f32 %v2674_v39, %v1252_v5  ;;  %v1061_v3 = vpop.xlane.xlu1 %1060  ;;  %v6368_v58 = vpop.f32.mrf.mxu1  ;;  %v7037_v39 = vld [vmem:[#allocation116_spill] sm:$0xff]  ;;  %v7040_v50 = vld [vmem:[#allocation6_spill] sm:$0xff] }
 0x3cd   :  { %3182 = vst [vmem:[%s6657_s6 + $0x28] sm:$0xff] %v3146_v12  ;;  %v3112_v30 = vmax.f32 %v3004_v36, %v3040_v37  ;;  %v6357_v38 = vmul.f32 %v2607_v27, %v1235_v47  ;;  %v6361_v6 = vmul.f32 %v7033_v51, %v7032_v4  ;;  %v2239_v61 = vadd.f32 %v6278_v11, %v7034_v23  ;;  %v7036_v27 = vld [vmem:[#allocation4_spill] sm:$0xff]  ;;  %v7039_v37 = vld [vmem:[#allocation5_spill] sm:$0xff] }
 0x3ce   :  { %v3076_v31 = vmax.f32 %v7031_v46, %v2968_v43  ;;  %v2934_v26 = vmax.f32 %v2790_v15, 0.0  ;;  %v2682_v8 = vadd.f32 %v6278_v11, %v6031_v59  ;;  %v1010_v43 = vpop.xlane.xlu0 %1009  ;;  %v3006_v14 = vmax.f32 %v7035_v56, 0.0 }
 0x3cf   :  { %v3042_v2 = vmax.f32 %v2898_v34, 0.0  ;;  %v1254_v63 = vmul.f32 0.04, %v1061_v3  ;;  %v1173_v36 = vmul.f32 0.04, %v7036_v27  ;;  %v2615_v53 = vadd.f32 %v6278_v11, %v7037_v39  ;;  %v6387_v3 = vpop.f32.mrf.mxu1 }
 0x3d0   :  { %v3148_v9 = vmax.f32 %v3076_v31, %v3112_v30  ;;  %v2623_v15 = vadd.f32 %v6278_v11, %v7038_v29  ;;  %v1237_v12 = vmul.f32 0.04, %v1010_v43  ;;  %v2359_v59 = vadd.f32 %v6278_v11, %v7039_v37  ;;  %v7041_v31 = vld [vmem:[#allocation62_spill] sm:$0xff]  ;;  %v1067_v51 = vpop.xlane.xlu1 %1066  ;;  %v7046_v37 = vld [vmem:[#allocation16_spill] sm:$0xff] }
 0x3d1   :  { %v3078_v5 = vmax.f32 %v2934_v26, %v2970_v32  ;;  %v3114_v47 = vmax.f32 %v3006_v14, %v3042_v2  ;;  %v2900_v7 = vmul.f32 %v2682_v8, %v1254_v63  ;;  %v2351_v46 = vadd.f32 %v6278_v11, %v7040_v50  ;;  %v7043_v14 = vld [vmem:[#allocation71_spill] sm:$0xff] }
 0x3d2   :  { %3184 = vst [vmem:[%s6657_s6 + $0x38] sm:$0xff] %v3148_v9  ;;  %v3008_v30 = vmax.f32 %v7041_v31, 0.0  ;;  %v2690_v34 = vadd.f32 %v6278_v11, %v6167_v19  ;;  %v6385_v4 = vmul.f32 %v2615_v53, %v1237_v12  ;;  %v1016_v23 = vpop.xlane.xlu0 %1015  ;;  %v1256_v43 = vmul.f32 0.04, %v1067_v51  ;;  %v7044_v63 = vld [vmem:[#allocation107_spill] sm:$0xff] }
 0x3d3   :  { %v3150_v32 = vmax.f32 %v3078_v5, %v3114_v47  ;;  %v3044_v26 = vmax.f32 %v2900_v7, 0.0  ;;  %v1239_v56 = vmul.f32 0.04, %v1016_v23  ;;  %v6392_v9 = vadd.f32 %v6278_v11, %v7043_v14  ;;  %v7047_v7 = vld [vmem:[#allocation83_spill] sm:$0xff]  ;;  %v7048_v23 = vld [vmem:[#allocation29_spill] sm:$0xff] }
 0x3d4   :  { %7042 = vst [vmem:[#allocation87_spill] sm:$0xff] %v6385_v4  ;;  %v1171_v19 = vmul.f32 0.04, %v7044_v63  ;;  %v2819_v27 = vmul.f32 %v2359_v59, %v1173_v36  ;;  %v2902_v53 = vmul.f32 %v2690_v34, %v1256_v43  ;;  %v6401_v12 = vmul.f32 %v2239_v61, %v1143_v44  ;;  %v1073_v31 = vpop.xlane.xlu1 %1072  ;;  %v6407_v59 = vpop.f32.mrf.mxu1  ;;  %v7049_v14 = vld [vmem:[#allocation33_spill] sm:$0xff]  ;;  %v7051_v44 = vld [vmem:[#allocation12_spill] sm:$0xff] }
 0x3d5   :  { %3186 = vst [vmem:[%s6657_s6 + $0x48] sm:$0xff] %v3150_v32  ;;  %v3116_v39 = vmax.f32 %v3008_v30, %v3044_v26  ;;  %v6399_v29 = vmul.f32 %v2623_v15, %v1239_v56  ;;  %v1175_v5 = vmul.f32 0.04, %v7046_v37  ;;  %v2698_v50 = vadd.f32 %v6278_v11, %v7047_v7  ;;  %v7050_v15 = vld [vmem:[#allocation7_spill] sm:$0xff]  ;;  %v7052_v43 = vld [vmem:[#allocation9_spill] sm:$0xff] }
 0x3d6   :  { %v2817_v47 = vmul.f32 %v2351_v46, %v1171_v19  ;;  %v1022_v51 = vpop.xlane.xlu0 %1021  ;;  %v3010_v36 = vmax.f32 %v7048_v23, 0.0  ;;  %v3046_v30 = vmax.f32 %v2902_v53, 0.0  ;;  %v1258_v34 = vmul.f32 0.04, %v1073_v31  ;;  %v7053_v19 = vld [vmem:[#allocation44_spill] sm:$0xff]  ;;  %v7054_v31 = vld [vmem:[#allocation37_spill] sm:$0xff] }
 0x3d7   :  { %7045 = vst [vmem:[#allocation15_spill] sm:$0xff] %v6399_v29  ;;  %v3152_v32 = vmax.f32 %v7049_v14, %v3116_v39  ;;  %v1177_v26 = vmul.f32 0.04, %v7050_v15  ;;  %v2631_v61 = vadd.f32 %v6278_v11, %v7051_v44  ;;  %v2375_v46 = vadd.f32 %v6278_v11, %v7052_v43  ;;  %v7056_v43 = vld [vmem:[#allocation34_spill] sm:$0xff] }
 0x3d8   :  { %v1241_v56 = vmul.f32 0.04, %v1022_v51  ;;  %v2963_v63 = vmax.f32 %v2819_v27, 0.0  ;;  %v2639_v37 = vadd.f32 %v6278_v11, %v7053_v19  ;;  %v3118_v39 = vmax.f32 %v3010_v36, %v3046_v30  ;;  %v1079_v44 = vpop.xlane.xlu1 %1078  ;;  %v6425_v27 = vpop.f32.mrf.mxu1 }
 0x3d9   :  { %3188 = vst [vmem:[%s6657_s6 + $0x58] sm:$0xff] %v3152_v32  ;;  %v2904_v53 = vmul.f32 %v2698_v50, %v1258_v34  ;;  %v2961_v7 = vmax.f32 %v2817_v47, 0.0  ;;  %v3012_v23 = vmax.f32 %v7054_v31, 0.0  ;;  %v2706_v14 = vadd.f32 %v6278_v11, %v6257_v13  ;;  %v7057_v32 = vld [vmem:[#allocation22_spill] sm:$0xff]  ;;  %v7058_v47 = vld [vmem:[#allocation41_spill] sm:$0xff] }
 0x3da   :  { %v6423_v15 = vmul.f32 %v2631_v61, %v1241_v56  ;;  %v1028_v51 = vpop.xlane.xlu0 %1027  ;;  %v3154_v19 = vmax.f32 %v7056_v43, %v3118_v39  ;;  %v1260_v2 = vmul.f32 0.04, %v1079_v44  ;;  %v6429_v36 = vmul.f32 0.04, %v7057_v32  ;;  %v7059_v13 = vld [vmem:[#allocation118_spill] sm:$0xff]  ;;  %v7060_v61 = vld [vmem:[#allocation23_spill] sm:$0xff] }
 0x3db   :  { %v3048_v8 = vmax.f32 %v2904_v53, 0.0  ;;  %v1243_v20 = vmul.f32 0.04, %v1028_v51  ;;  %v2647_v50 = vadd.f32 %v6278_v11, %v7058_v47  ;;  %v6433_v30 = vmul.f32 %v2375_v46, %v1177_v26  ;;  %v7063_v32 = vld [vmem:[#allocation70_spill] sm:$0xff] }
 0x3dc   :  { %7055 = vst [vmem:[#allocation94_spill] sm:$0xff] %v6423_v15  ;;  %v2367_v34 = vadd.f32 %v6278_v11, %v7059_v13  ;;  %v7061_v56 = vmax.f32 %v7060_v61, 0.0  ;;  %3190 = vst [vmem:[%s6657_s6 + $0x68] sm:$0xff] %v3154_v19  ;;  %v2906_v53 = vmul.f32 %v2706_v14, %v1260_v2  ;;  %v7062_v51 = vmax.f32 %v7029_v1, 0.0  ;;  %v7064_v46 = vld [vmem:[#allocation42_spill] sm:$0xff]  ;;  %v1085_v61 = vpop.xlane.xlu1 %1084  ;;  %v7066_v1 = vld [vmem:[#allocation19_spill] sm:$0xff] }
 0x3dd   :  { %v3120_v39 = vmax.f32 %v3012_v23, %v3048_v8  ;;  %v2889_v44 = vmul.f32 %v2639_v37, %v1243_v20  ;;  %v3014_v26 = vmax.f32 %v7063_v32, 0.0  ;;  %v2997_v47 = vmax.f32 %v7064_v46, 0.0  ;;  %v7067_v14 = vld [vmem:[#allocation49_spill] sm:$0xff] }
 0x3de   :  { %v6439_v31 = vmax.f32 %v7061_v56, %v2963_v63  ;;  %v3069_v43 = vmax.f32 %v7062_v51, %v2961_v7  ;;  %v2714_v13 = vadd.f32 %v6278_v11, %v6233_v28  ;;  %v1034_v63 = vpop.xlane.xlu0 %1033  ;;  %v6450_v56 = vpop.f32.mrf.mxu1  ;;  %v3050_v19 = vmax.f32 %v2906_v53, 0.0 }
 0x3df   :  { %v3156_v62 = vmax.f32 %v7065_v0, %v3120_v39  ;;  %v3033_v8 = vmax.f32 %v2889_v44, 0.0  ;;  %v1262_v2 = vmul.f32 0.04, %v1085_v61  ;;  %v2967_v20 = vmax.f32 %v6433_v30, 0.0  ;;  %v7068_v39 = vld [vmem:[#allocation51_spill] sm:$0xff]  ;;  %v7069_v44 = vld [vmem:[#allocation78_spill] sm:$0xff] }
 0x3e0   :  { %v2663_v37 = vadd.f32 %v6278_v11, %v7066_v1  ;;  %v2821_v7 = vmul.f32 %v2367_v34, %v1175_v5  ;;  %v1245_v23 = vmul.f32 0.04, %v1034_v63  ;;  %v2655_v51 = vadd.f32 %v6278_v11, %v7067_v14  ;;  %v1091_v5 = vpop.xlane.xlu1 %1090  ;;  %v6465_v63 = vpop.f32.mrf.mxu1  ;;  %v7070_v1 = vld [vmem:[#allocation72_spill] sm:$0xff] }
 0x3e1   :  { %3192 = vst [vmem:[%s6657_s6 + $0x78] sm:$0xff] %v3156_v62  ;;  %v3122_v28 = vmax.f32 %v3014_v26, %v3050_v19  ;;  %v3105_v32 = vmax.f32 %v2997_v47, %v3033_v8  ;;  %v2908_v0 = vmul.f32 %v2714_v13, %v1262_v2  ;;  %v3016_v53 = vmax.f32 %v7068_v39, 0.0  ;;  %v7071_v47 = vld [vmem:[#allocation48_spill] sm:$0xff]  ;;  %v7072_v2 = vld [vmem:[#allocation43_spill] sm:$0xff] }
 0x3e2   :  { %v1213_v46 = vmul.f32 0.04, %v7069_v44  ;;  %v2722_v30 = vadd.f32 %v6278_v11, %v6330_v24  ;;  %v2891_v61 = vmul.f32 %v2647_v50, %v1245_v23  ;;  %v1040_v34 = vpop.xlane.xlu0 %1039  ;;  %v1264_v62 = vmul.f32 0.04, %v1091_v5  ;;  %v2753_v5 = vpop.f32.mrf.mxu1 }
 0x3e3   :  { %v3158_v14 = vmax.f32 %v7070_v1, %v3122_v28  ;;  %v3141_v15 = vmax.f32 %v3069_v43, %v3105_v32  ;;  %v3052_v29 = vmax.f32 %v2908_v0, 0.0  ;;  %v2965_v26 = vmax.f32 %v2821_v7, 0.0  ;;  %v7073_v7 = vld [vmem:[#allocation64_spill] sm:$0xff] }
 0x3e4   :  { %v2999_v13 = vmax.f32 %v7071_v47, 0.0  ;;  %v3035_v19 = vmax.f32 %v2891_v61, 0.0  ;;  %v1247_v8 = vmul.f32 0.04, %v1040_v34  ;;  %v2383_v39 = vadd.f32 %v6278_v11, %v7072_v2  ;;  %v1097_v44 = vpop.xlane.xlu1 %1096 }
 0x3e5   :  { %v2730_v24 = vadd.f32 %v6278_v11, %v6309_v60  ;;  %3194 = vst [vmem:[%s6657_s6 + $0x88] sm:$0xff] %v3158_v14  ;;  %3177 = vst [vmem:[%s6657_s6] sm:$0xff] %v3141_v15  ;;  %v3124_v50 = vmax.f32 %v3016_v53, %v3052_v29  ;;  %v2910_v43 = vmul.f32 %v2722_v30, %v1264_v62  ;;  %v3018_v23 = vmax.f32 %v7073_v7, 0.0  ;;  %v7074_v60 = vld [vmem:[#allocation68_spill] sm:$0xff]  ;;  %v7076_v15 = vld [vmem:[#allocation77_spill] sm:$0xff] }
 0x3e6   :  { %v2859_v28 = vmul.f32 %v6392_v9, %v1213_v46  ;;  %v3107_v32 = vmax.f32 %v2999_v13, %v3035_v19  ;;  %v2893_v0 = vmul.f32 %v2655_v51, %v1247_v8  ;;  %v1046_v61 = vpop.xlane.xlu0 %1045  ;;  %v1266_v47 = vmul.f32 0.04, %v1097_v44  ;;  %v7077_v13 = vld [vmem:[#allocation86_spill] sm:$0xff] }
 0x3e7   :  { %v3160_v34 = vmax.f32 %v7074_v60, %v3124_v50  ;;  %v3054_v1 = vmax.f32 %v2910_v43, 0.0  ;;  %v1249_v14 = vmul.f32 0.04, %v1046_v61  ;;  %v7075_v2 = vmax.f32 %v6361_v6, 0.0  ;;  %v7078_v50 = vld [vmem:[#allocation55_spill] sm:$0xff] }
 0x3e8   :  { %v3001_v29 = vmax.f32 %v7076_v15, 0.0  ;;  %v3143_v53 = vmax.f32 %v6439_v31, %v3107_v32  ;;  %v3037_v30 = vmax.f32 %v2893_v0, 0.0  ;;  %v2825_v9 = vmul.f32 %v2383_v39, %v6429_v36  ;;  %v6496_v39 = vpop.f32.mrf.mxu1  ;;  %v7080_v32 = vld [vmem:[#allocation67_spill] sm:$0xff] }
 0x3e9   :  { %v3073_v4 = vmax.f32 %v7075_v2, %v2965_v26  ;;  %3196 = vst [vmem:[%s6657_s6 + $0x98] sm:$0xff] %v3160_v34  ;;  %v3126_v51 = vmax.f32 %v3018_v23, %v3054_v1  ;;  %v2912_v46 = vmul.f32 %v2730_v24, %v1266_v47  ;;  %v2895_v62 = vmul.f32 %v2663_v37, %v1249_v14  ;;  %v1103_v26 = vpop.xlane.xlu1 %1102  ;;  %v7081_v14 = vld [vmem:[#allocation80_spill] sm:$0xff] }
 0x3ea   :  { %v3020_v19 = vmax.f32 %v7077_v13, 0.0  ;;  %v3003_v8 = vmax.f32 %v2859_v28, 0.0  ;;  %v2738_v6 = vadd.f32 %v6278_v11, %v6407_v59  ;;  %3179 = vst [vmem:[%s6657_s6 + $0x10] sm:$0xff] %v3143_v53  ;;  %v3109_v31 = vmax.f32 %v3001_v29, %v3037_v30  ;;  %v1052_v36 = vpop.xlane.xlu0 %1051  ;;  %v6513_v29 = vpop.f32.mrf.mxu1  ;;  %v7082_v53 = vld [vmem:[#allocation40_spill] sm:$0xff]  ;;  %v7084_v13 = vld [vmem:[#allocation73_spill] sm:$0xff] }
 0x3eb   :  { %v3162_v43 = vmax.f32 %v7078_v50, %v3126_v51  ;;  %v3056_v7 = vmax.f32 %v2912_v46, 0.0  ;;  %v3039_v24 = vmax.f32 %v2895_v62, 0.0  ;;  %v1268_v37 = vmul.f32 0.04, %v1103_v26 }
 0x3ec   :  { %v7079_v23 = vmax.f32 %v6350_v55, 0.0  ;;  %v2671_v59 = vadd.f32 %v6278_v11, %v7080_v32  ;;  %v3145_v0 = vmax.f32 %v3073_v4, %v3109_v31  ;;  %v1251_v44 = vmul.f32 0.04, %v1052_v36  ;;  %v7085_v31 = vld [vmem:[#allocation85_spill] sm:$0xff] }
 0x3ed   :  { %v2969_v61 = vmax.f32 %v2825_v9, 0.0  ;;  %3198 = vst [vmem:[%s6657_s6 + $0xa8] sm:$0xff] %v3162_v43  ;;  %v3128_v60 = vmax.f32 %v3020_v19, %v3056_v7  ;;  %v3111_v34 = vmax.f32 %v3003_v8, %v3039_v24  ;;  %v2914_v1 = vmul.f32 %v2738_v6, %v1268_v37  ;;  %v7086_v43 = vld [vmem:[#allocation82_spill] sm:$0xff] }
 0x3ee   :  { %v3075_v28 = vmax.f32 %v7079_v23, %v2967_v20  ;;  %v2933_v47 = vmax.f32 %v6401_v12, 0.0  ;;  %v3022_v2 = vmax.f32 %v7081_v14, 0.0  ;;  %v2746_v55 = vadd.f32 %v6278_v11, %v6387_v3  ;;  %3181 = vst [vmem:[%s6657_s6 + $0x20] sm:$0xff] %v3145_v0  ;;  %v1109_v20 = vpop.xlane.xlu1 %1108  ;;  %v1058_v15 = vpop.xlane.xlu0 %1057  ;;  %v7083_v12 = vld [vmem:[#allocation26_spill] sm:$0xff]  ;;  %v7087_v0 = vld [vmem:[#allocation97_spill] sm:$0xff] }
 0x3ef   :  { %v2897_v4 = vmul.f32 %v2671_v59, %v1251_v44  ;;  %v3164_v30 = vmax.f32 %v7082_v53, %v3128_v60  ;;  %v3058_v51 = vmax.f32 %v2914_v1, 0.0  ;;  %v1270_v46 = vmul.f32 0.04, %v1109_v20  ;;  %v3513_v59 = vpop.f32.mrf.mxu1  ;;  %v7088_v1 = vld [vmem:[#allocation14_spill] sm:$0xff] }
 0x3f0   :  { %v3147_v9 = vmax.f32 %v3075_v28, %v3111_v34  ;;  %v2679_v62 = vadd.f32 %v6278_v11, %v7083_v12  ;;  %v3005_v19 = vmax.f32 %v7084_v13, 0.0  ;;  %v1253_v8 = vmul.f32 0.04, %v1058_v15  ;;  %v7089_v15 = vld [vmem:[#allocation52_spill] sm:$0xff] }
 0x3f1   :  { %v3041_v3 = vmax.f32 %v2897_v4, 0.0  ;;  %v3077_v6 = vmax.f32 %v2933_v47, %v2969_v61  ;;  %v2687_v26 = vadd.f32 %v6278_v11, %v7085_v31  ;;  %3200 = vst [vmem:[%s6657_s6 + $0xb8] sm:$0xff] %v3164_v30  ;;  %v3130_v36 = vmax.f32 %v3022_v2, %v3058_v51  ;;  %v2769_v12 = vpop.f32.mrf.mxu1  ;;  %v7092_v31 = vld [vmem:[#allocation27_spill] sm:$0xff] }
 0x3f2   :  { %3183 = vst [vmem:[%s6657_s6 + $0x30] sm:$0xff] %v3147_v9  ;;  %v2916_v50 = vmul.f32 %v2746_v55, %v1270_v46  ;;  %v3024_v7 = vmax.f32 %v7086_v43, 0.0  ;;  %v2754_v24 = vadd.f32 %v6278_v11, %v2753_v5  ;;  %v2899_v23 = vmul.f32 %v2679_v62, %v1253_v8  ;;  %v1115_v28 = vpop.xlane.xlu1 %1114  ;;  %v1064_v32 = vpop.xlane.xlu0 %1063  ;;  %v7090_v62 = vld [vmem:[#allocation18_spill] sm:$0xff] }
 0x3f3   :  { %v3113_v37 = vmax.f32 %v3005_v19, %v3041_v3  ;;  %v3166_v44 = vmax.f32 %v7087_v0, %v3130_v36  ;;  %v1272_v60 = vmul.f32 0.04, %v1115_v28  ;;  %v1255_v34 = vmul.f32 0.04, %v1064_v32  ;;  %v7093_v0 = vld [vmem:[#allocation32_spill] sm:$0xff] }
 0x3f4   :  { %v3060_v61 = vmax.f32 %v2916_v50, 0.0  ;;  %v3007_v47 = vmax.f32 %v7088_v1, 0.0  ;;  %v3043_v4 = vmax.f32 %v2899_v23, 0.0  ;;  %v3026_v20 = vmax.f32 %v6194_v41, 0.0 }
 0x3f5   :  { %v3149_v14 = vmax.f32 %v3077_v6, %v3113_v37  ;;  %3202 = vst [vmem:[%s6657_s6 + $0xc8] sm:$0xff] %v3166_v44  ;;  %v2918_v5 = vmul.f32 %v2754_v24, %v1272_v60  ;;  %v2901_v55 = vmul.f32 %v2687_v26, %v1255_v34  ;;  %v3009_v53 = vmax.f32 %v7089_v15, 0.0  ;;  %v7091_v6 = vld [vmem:[#allocation45_spill] sm:$0xff] }
 0x3f6   :  { %v3132_v2 = vmax.f32 %v3024_v7, %v3060_v61  ;;  %v2762_v30 = vadd.f32 %v6278_v11, %v6465_v63  ;;  %v3115_v9 = vmax.f32 %v3007_v47, %v3043_v4  ;;  %v1121_v51 = vpop.xlane.xlu1 %1120  ;;  %v1070_v46 = vpop.xlane.xlu0 %1069  ;;  %v2695_v41 = vadd.f32 %v6278_v11, %v7091_v6 }
 0x3f7   :  { %3185 = vst [vmem:[%s6657_s6 + $0x40] sm:$0xff] %v3149_v14  ;;  %v3062_v19 = vmax.f32 %v2918_v5, 0.0  ;;  %v3045_v3 = vmax.f32 %v2901_v55, 0.0  ;;  %v1274_v8 = vmul.f32 0.04, %v1121_v51  ;;  %v3028_v7 = vmax.f32 %v6212_v52, 0.0 }
 0x3f8   :  { %v3168_v13 = vmax.f32 %v7090_v62, %v3132_v2  ;;  %v3151_v26 = vmax.f32 %v7092_v31, %v3115_v9  ;;  %v1257_v36 = vmul.f32 0.04, %v1070_v46  ;;  %v2770_v24 = vadd.f32 %v6278_v11, %v2769_v12  ;;  %v7094_v14 = vld [vmem:[#allocation74_spill] sm:$0xff]  ;;  %v7095_v12 = vld [vmem:[#allocation60_spill] sm:$0xff] }
 0x3f9   :  { %v3134_v63 = vmax.f32 %v3026_v20, %v3062_v19  ;;  %v3117_v50 = vmax.f32 %v3009_v53, %v3045_v3  ;;  %v2920_v43 = vmul.f32 %v2762_v30, %v1274_v8  ;;  %v2703_v34 = vadd.f32 %v6278_v11, %v6207_v57 }
 0x3fa   :  { %3204 = vst [vmem:[%s6657_s6 + $0xd8] sm:$0xff] %v3168_v13  ;;  %3187 = vst [vmem:[%s6657_s6 + $0x50] sm:$0xff] %v3151_v26  ;;  %v2903_v37 = vmul.f32 %v2695_v41, %v1257_v36  ;;  %v1127_v23 = vpop.xlane.xlu1 %1126  ;;  %v1076_v28 = vpop.xlane.xlu0 %1075  ;;  %v3011_v52 = vmax.f32 %v6215_v48, 0.0  ;;  %v2711_v4 = vadd.f32 %v6278_v11, %v7094_v14  ;;  %v3030_v5 = vmax.f32 %v6240_v21, 0.0 }
 0x3fb   :  { %v3170_v32 = vmax.f32 %v6250_v49, %v3134_v63  ;;  %v3153_v44 = vmax.f32 %v7093_v0, %v3117_v50  ;;  %v3064_v61 = vmax.f32 %v2920_v43, 0.0  ;;  %v1276_v60 = vmul.f32 0.04, %v1127_v23  ;;  %v7096_v63 = vld [vmem:[#allocation57_spill] sm:$0xff]  ;;  %v7097_v43 = vld [vmem:[#allocation95_spill] sm:$0xff] }
 0x3fc   :  { %v3047_v1 = vmax.f32 %v2903_v37, 0.0  ;;  %v1259_v47 = vmul.f32 0.04, %v1076_v28  ;;  %v2778_v57 = vadd.f32 %v6278_v11, %v3513_v59  ;;  %v3013_v46 = vmax.f32 %v6247_v22, 0.0  ;;  %v7098_v23 = vld [vmem:[#allocation53_spill] sm:$0xff] }
 0x3fd   :  { %3206 = vst [vmem:[%s6657_s6 + $0xe8] sm:$0xff] %v3170_v32  ;;  %3189 = vst [vmem:[%s6657_s6 + $0x60] sm:$0xff] %v3153_v44  ;;  %v3136_v49 = vmax.f32 %v3028_v7, %v3064_v61  ;;  %v2922_v2 = vmul.f32 %v2770_v24, %v1276_v60  ;;  %v2719_v3 = vadd.f32 %v6278_v11, %v6294_v42  ;;  %v3015_v8 = vmax.f32 %v6267_v10, 0.0 }
 0x3fe   :  { %v3119_v48 = vmax.f32 %v3011_v52, %v3047_v1  ;;  %v2905_v55 = vmul.f32 %v2703_v34, %v1259_v47  ;;  %v1133_v20 = vpop.xlane.xlu1 %1132  ;;  %v1082_v15 = vpop.xlane.xlu0 %1081  ;;  %v2727_v7 = vadd.f32 %v6278_v11, %v7097_v43  ;;  %v3017_v24 = vmax.f32 %v6286_v17, 0.0  ;;  %v7099_v34 = vld [vmem:[#allocation38_spill] sm:$0xff] }
 0x3ff   :  { %v3172_v53 = vmax.f32 %v6235_v54, %v3136_v49  ;;  %v3066_v30 = vmax.f32 %v2922_v2, 0.0  ;;  %v1278_v9 = vmul.f32 0.04, %v1133_v20  ;;  %v1261_v51 = vmul.f32 0.04, %v1082_v15 }
 0x400   :  { %v3155_v62 = vmax.f32 %v7095_v12, %v3119_v48  ;;  %v3049_v13 = vmax.f32 %v2905_v55, 0.0  ;;  %v3032_v54 = vmax.f32 %v6260_v40, 0.0  ;;  %v2735_v61 = vadd.f32 %v6278_v11, %v6368_v58  ;;  %v7100_v58 = vld [vmem:[#allocation66_spill] sm:$0xff] }
 0x401   :  { %3208 = vst [vmem:[%s6657_s6 + $0xf8] sm:$0xff] %v3172_v53  ;;  %v3138_v21 = vmax.f32 %v3030_v5, %v3066_v30  ;;  %v2924_v59 = vmul.f32 %v2778_v57, %v1278_v9  ;;  %v2907_v19 = vmul.f32 %v2711_v4, %v1261_v51  ;;  %v2743_v49 = vadd.f32 %v6278_v11, %v6344_v35  ;;  %v7101_v35 = vld [vmem:[#allocation65_spill] sm:$0xff] }
 0x402   :  { %3191 = vst [vmem:[%s6657_s6 + $0x70] sm:$0xff] %v3155_v62  ;;  %v3121_v22 = vmax.f32 %v3013_v46, %v3049_v13  ;;  %v1088_v6 = vpop.xlane.xlu0 %1087  ;;  %v3021_v5 = vmax.f32 %v6322_v33, 0.0  ;;  %v2751_v15 = vadd.f32 %v6278_v11, %v6450_v56  ;;  %v3023_v30 = vmax.f32 %v6342_v16, 0.0  ;;  %v7102_v56 = vld [vmem:[#allocation50_spill] sm:$0xff] }
 0x403   :  { %v3174_v41 = vmax.f32 %v6304_v18, %v3138_v21  ;;  %v3068_v31 = vmax.f32 %v2924_v59, 0.0  ;;  %v3051_v26 = vmax.f32 %v2907_v19, 0.0  ;;  %v1263_v36 = vmul.f32 0.04, %v1088_v6  ;;  %v7103_v6 = vld [vmem:[#allocation87_spill] sm:$0xff] }
 0x404   :  { %v3157_v50 = vmax.f32 %v7096_v63, %v3121_v22  ;;  %v2759_v62 = vadd.f32 %v6278_v11, %v6425_v27  ;;  %v3025_v21 = vmax.f32 %v6357_v38, 0.0  ;;  %v7104_v27 = vld [vmem:[#allocation75_spill] sm:$0xff] }
 0x405   :  { %3210 = vst [vmem:[%s6657_s6 + $0x108] sm:$0xff] %v3174_v41  ;;  %v3140_v40 = vmax.f32 %v3032_v54, %v3068_v31  ;;  %v3123_v42 = vmax.f32 %v3015_v8, %v3051_v26  ;;  %v2909_v10 = vmul.f32 %v2719_v3, %v1263_v36  ;;  %v2767_v8 = vadd.f32 %v6278_v11, %v6513_v29  ;;  %v7106_v29 = vld [vmem:[#allocation90_spill] sm:$0xff] }
 0x406   :  { %3193 = vst [vmem:[%s6657_s6 + $0x80] sm:$0xff] %v3157_v50  ;;  %v1094_v18 = vpop.xlane.xlu0 %1093  ;;  %v3027_v41 = vmax.f32 %v7103_v6, 0.0  ;;  %v2775_v50 = vadd.f32 %v6278_v11, %v6496_v39  ;;  %v7109_v39 = vld [vmem:[#allocation76_spill] sm:$0xff] }
 0x407   :  { %v3176_v37 = vmax.f32 %v6301_v25, %v3140_v40  ;;  %v3159_v28 = vmax.f32 %v7098_v23, %v3123_v42  ;;  %v3053_v32 = vmax.f32 %v2909_v10, 0.0  ;;  %v1265_v0 = vmul.f32 0.04, %v1094_v18  ;;  %v7105_v42 = vld [vmem:[#allocation15_spill] sm:$0xff]  ;;  %v7107_v23 = vld [vmem:[#allocation94_spill] sm:$0xff] }
 0x408   :  { %v3019_v25 = vmax.f32 %v6307_v45, 0.0  ;;  %v3029_v10 = vmax.f32 %v7105_v42, 0.0 }
 0x409   :  { %3212 = vst [vmem:[%s6657_s6 + $0x118] sm:$0xff] %v3176_v37  ;;  %3195 = vst [vmem:[%s6657_s6 + $0x90] sm:$0xff] %v3159_v28  ;;  %v3125_v17 = vmax.f32 %v3017_v24, %v3053_v32  ;;  %v2911_v44 = vmul.f32 %v2727_v7, %v1265_v0  ;;  %v3031_v28 = vmax.f32 %v7107_v23, 0.0  ;;  %v7108_v32 = vld [vmem:[#allocation84_spill] sm:$0xff] }
 0x40a   :  { %v1100_v60 = vpop.xlane.xlu0 %1099 }
 0x40b   :  { %v3161_v52 = vmax.f32 %v7099_v34, %v3125_v17  ;;  %v3055_v1 = vmax.f32 %v2911_v44, 0.0  ;;  %v1267_v47 = vmul.f32 0.04, %v1100_v60 }
 0x40d   :  { %3197 = vst [vmem:[%s6657_s6 + $0xa0] sm:$0xff] %v3161_v52  ;;  %v3127_v14 = vmax.f32 %v3019_v25, %v3055_v1  ;;  %v2913_v4 = vmul.f32 %v2735_v61, %v1267_v47 }
 0x40e   :  { %v1106_v2 = vpop.xlane.xlu0 %1105 }
 0x40f   :  { %v3163_v57 = vmax.f32 %v7100_v58, %v3127_v14  ;;  %v3057_v48 = vmax.f32 %v2913_v4, 0.0  ;;  %v1269_v45 = vmul.f32 0.04, %v1106_v2 }
 0x411   :  { %3199 = vst [vmem:[%s6657_s6 + $0xb0] sm:$0xff] %v3163_v57  ;;  %v3129_v55 = vmax.f32 %v3021_v5, %v3057_v48  ;;  %v2915_v20 = vmul.f32 %v2743_v49, %v1269_v45 }
 0x412   :  { %v1112_v53 = vpop.xlane.xlu0 %1111 }
 0x413   :  { %v3165_v9 = vmax.f32 %v7101_v35, %v3129_v55  ;;  %v3059_v51 = vmax.f32 %v2915_v20, 0.0  ;;  %v1271_v33 = vmul.f32 0.04, %v1112_v53 }
 0x415   :  { %3201 = vst [vmem:[%s6657_s6 + $0xc0] sm:$0xff] %v3165_v9  ;;  %v3131_v46 = vmax.f32 %v3023_v30, %v3059_v51  ;;  %v2917_v12 = vmul.f32 %v2751_v15, %v1271_v33 }
 0x416   :  { %v1118_v13 = vpop.xlane.xlu0 %1117 }
 0x417   :  { %v3167_v59 = vmax.f32 %v7102_v56, %v3131_v46  ;;  %v3061_v19 = vmax.f32 %v2917_v12, 0.0  ;;  %v1273_v16 = vmul.f32 0.04, %v1118_v13 }
 0x419   :  { %3203 = vst [vmem:[%s6657_s6 + $0xd0] sm:$0xff] %v3167_v59  ;;  %v3133_v3 = vmax.f32 %v3025_v21, %v3061_v19  ;;  %v2919_v54 = vmul.f32 %v2759_v62, %v1273_v16 }
 0x41a   :  { %v1124_v22 = vpop.xlane.xlu0 %1123 }
 0x41b   :  { %v3169_v31 = vmax.f32 %v7104_v27, %v3133_v3  ;;  %v3063_v26 = vmax.f32 %v2919_v54, 0.0  ;;  %v1275_v38 = vmul.f32 0.04, %v1124_v22 }
 0x41d   :  { %3205 = vst [vmem:[%s6657_s6 + $0xe0] sm:$0xff] %v3169_v31  ;;  %v3135_v36 = vmax.f32 %v3027_v41, %v3063_v26  ;;  %v2921_v63 = vmul.f32 %v2767_v8, %v1275_v38 }
 0x41e   :  { %v1130_v40 = vpop.xlane.xlu0 %1129 }
 0x41f   :  { %v3171_v43 = vmax.f32 %v7106_v29, %v3135_v36  ;;  %v3065_v7 = vmax.f32 %v2921_v63, 0.0  ;;  %v1277_v24 = vmul.f32 0.04, %v1130_v40 }
 0x421   :  { %3207 = vst [vmem:[%s6657_s6 + $0xf0] sm:$0xff] %v3171_v43  ;;  %v3137_v18 = vmax.f32 %v3029_v10, %v3065_v7  ;;  %v2923_v37 = vmul.f32 %v2775_v50, %v1277_v24 }
 0x423   :  { %v3173_v0 = vmax.f32 %v7108_v32, %v3137_v18  ;;  %v3067_v17 = vmax.f32 %v2923_v37, 0.0 }
 0x425   :  { %3209 = vst [vmem:[%s6657_s6 + $0x100] sm:$0xff] %v3173_v0  ;;  %v3139_v11 = vmax.f32 %v3031_v28, %v3067_v17 }
 0x427   :  { %v3175_v44 = vmax.f32 %v7109_v39, %v3139_v11 }
 0x429   :  { %3211 = vst [vmem:[%s6657_s6 + $0x110] sm:$0xff] %v3175_v44 }

// kernel: xnor_model.3
= control target key start
LH: loop header
LB: loop body
LE: loop exit
PB: predicated region body
PF: predicated region fallthrough
CT: control target
= control target key end

     0   :  { %vm52_vm0 = vcmask 1045504   ;;  %vm56_vm1 = vcmask 259072   ;;  %s2874_s0 = inlined_call_operand.vmem [shape: f32[6,288], index: 0, kind: input, shape index: {}]   ;;  %s2875_s1 = inlined_call_operand.vmem [shape: f32[224,54], index: 1, kind: input, shape index: {}]   ;;  %s2876_s2 = inlined_call_operand.vmem [shape: f32[6,1], index: 2, kind: input, shape index: {}]   ;;  %s2877_s3 = inlined_call_operand.vmem [shape: f32[6,1], index: 3, kind: input, shape index: {}]   ;;  %s2878_s4 = inlined_call_operand.vmem [shape: bf16[54,128], index: 4, kind: input, shape index: {}]   ;;  %s2879_s5 = inlined_call_operand.vmem [shape: f32[1,128], index: 5, kind: input, shape index: {}]   ;;  %s2880_s6 = inlined_call_operand.vmem [shape: f32[1,400], index: 6, kind: input, shape index: {}]   ;;  %s2881_s7 = inlined_call_operand.vmem [shape: f32[1,400], index: 7, kind: input, shape index: {}]   ;;  %s2882_s8 = inlined_call_operand.vmem [shape: bf16[400,128], index: 8, kind: input, shape index: {}]   ;;  %s2883_s9 = inlined_call_operand.vmem [shape: f32[1,128], index: 9, kind: input, shape index: {}]   ;;  %s2884_s10 = inlined_call_operand.vmem [shape: f32[1,128], index: 10, kind: input, shape index: {}]   ;;  %s2885_s11 = inlined_call_operand.vmem [shape: f32[1,128], index: 11, kind: input, shape index: {}]   ;;  %s2886_s12 = inlined_call_operand.vmem [shape: bf16[128,128], index: 12, kind: input, shape index: {}]   ;;  %s2887_s13 = inlined_call_operand.vmem [shape: f32[1,128], index: 13, kind: input, shape index: {}]   ;;  %s2888_s14 = inlined_call_operand.hbm [shape: f32[2,128], index: 14, kind: output, shape index: {}]  }
   0x1   :  { %v49_v0 = vld [vmem:[%s2874_s0] sm:$0x3f]  ;;  %v50_v1 = vld [vmem:[%s2874_s0 + $0x8] sm:$0x3f]  ;;  %v51_v2 = vld [vmem:[%s2874_s0 + $0x10] sm:$0x3f] }
   0x2   :  { %v53_v3 = vsel %vm52_vm0, %v49_v0, 0.0  ;;  %v54_v4 = vsel %vm52_vm0, %v50_v1, 0.0  ;;  %v57_v5 = vsel %vm56_vm1, %v51_v2, 0.0 }
   0x3   :  { %v55_v6 = vadd.f32 %v54_v4, %v53_v3 }
   0x5   :  { %v58_v7 = vadd.f32 %v57_v5, %v55_v6 }
   0x7   :  { %59 = vadd.xlane.f32.xlu0 %v58_v7 }
   0x8   :  { %19 = vsyncpa [#allocation3], 0  ;;  %v1909_v21 = vmov 0   ;;  %v77_v25 = vld [vmem:[%s2876_s2] sm:$0x3f]  ;;  %vm566_vm2 = vcmask 1042432   ;;  %v157_v37 = vlaneseq }
   0x9   :  { %1836 = vset.pattern.permute.xlu1 %v1909_v21  ;;  %1837 = vset.pattern.permute.xlu0 %v1909_v21  ;;  %v81_v28 = vld [vmem:[%s2877_s3] sm:$0x3f]  ;;  %v1838_v30 = vld [vmem:[%s2878_s4 + $0x18] ss:$0 sps:$4 sm:$0x77]   ;;  %v1839_v33 = vld [vmem:[%s2878_s4 + $0x10] sm:$0xff]  }
   0xa   :  { %1824 = vmatprep.subr.msk.bf16.mxu0 %vm566_vm2, %v1838_v30  ;;  %v568_v32 = vsel %vm566_vm2, %v1838_v30, 0  ;;  %v1840_v34 = vld [vmem:[%s2878_s4 + $0x8] sm:$0xff]   ;;  %v1841_v35 = vld [vmem:[%s2878_s4] sm:$0xff]   ;;  %v1910_v36 = vmov 0.0   ;;  %vm99_vm3 = vcmask 72704   ;;  %v2031_v38 = vshrl.u32 %v157_v37, 7 }
   0xb   :  { %1769 = vmatpush3.bf16.msra.mxu0 %v568_v32  ;;  %vm101_vm4 = vcmask 146432   ;;  %vm103_vm5 = vcmask 220160   ;;  %vm105_vm6 = vcmask 293888   ;;  %vm107_vm7 = vcmask 367616   ;;  %v133_v53 = vld [vmem:[%s2875_s1 + $0x20] sm:$0xff]  ;;  %v130_v57 = vld [vmem:[%s2875_s1 + $0x8] sm:$0xff] }
   0xc   :  { %1770 = vmatprep.subr.bf16.mxu0 %v1839_v33  ;;  %v2035_v44 = vsub.s32 0, %v2031_v38  ;;  %v129_v58 = vld [vmem:[%s2875_s1] sm:$0xff]  ;;  %v131_v59 = vld [vmem:[%s2875_s1 + $0x10] sm:$0xff]  ;;  %v132_v63 = vld [vmem:[%s2875_s1 + $0x18] sm:$0xff]  ;;  %vm249_vm8 = vcmask 441344   ;;  %s1912_s3 = smov 16  }
   0xd   :  { %v134_v4 = vld [vmem:[%s2875_s1 + $0x28] sm:$0xff]  ;;  %v140_v6 = vld [vmem:[%s2875_s1 + $0x58] sm:$0xff]  ;;  %s1913_s26 = smov 48   ;;  %s1914_s27 = smov 64  }
   0xe   :  { %v146_v5 = vld [vmem:[%s2875_s1 + $0x88] sm:$0xff]  ;;  %s1915_s4 = smov 80   ;;  %s1916_s28 = smov 96  }
   0xf   :  { %1771 = vmatpush3.bf16.msra.mxu0 %v1839_v33  ;;  %s1917_s29 = smov 112  }
  0x10   :  { %1772 = vmatprep.subr.bf16.mxu0 %v1840_v34 }
  0x13   :  { %1773 = vmatpush3.bf16.msra.mxu0 %v1840_v34 }
  0x14   :  { %1774 = vmatprep.subr.bf16.mxu0 %v1841_v35 }
  0x17   :  { %1775 = vmatpush3.bf16.msra.mxu0 %v1841_v35 }
  0x18   :  { %1804 = vmatprep.subr.bf16.mxu0 %v1910_v36 }
  0x90   :  { %v60_v8 = vpop.xlane.xlu0 %59 }
  0x91   :  { %v62_v9 = vmul.f32 0.0034722222, %v60_v8 }
  0x93   :  { %v63_v10 = vsub.f32 %v49_v0, %v62_v9  ;;  %v64_v11 = vsub.f32 %v50_v1, %v62_v9  ;;  %v65_v12 = vsub.f32 %v51_v2, %v62_v9  ;;  %v139_v0 = vld [vmem:[%s2875_s1 + $0x50] sm:$0xff]  ;;  %v137_v1 = vld [vmem:[%s2875_s1 + $0x40] sm:$0xff] }
  0x95   :  { %v66_v13 = vmul.f32 %v63_v10, %v63_v10  ;;  %v67_v14 = vmul.f32 %v64_v11, %v64_v11  ;;  %v68_v15 = vmul.f32 %v65_v12, %v65_v12  ;;  %v135_v11 = vld [vmem:[%s2875_s1 + $0x30] sm:$0xff]  ;;  %v136_v12 = vld [vmem:[%s2875_s1 + $0x38] sm:$0xff] }
  0x97   :  { %v69_v16 = vsel %vm52_vm0, %v66_v13, 0.0  ;;  %v70_v17 = vsel %vm52_vm0, %v67_v14, 0.0  ;;  %v72_v19 = vsel %vm56_vm1, %v68_v15, 0.0  ;;  %v153_v13 = vld [vmem:[%s2875_s1 + $0xc0] sm:$0xff] }
  0x98   :  { %v71_v18 = vadd.f32 %v70_v17, %v69_v16 }
  0x9a   :  { %v73_v20 = vadd.f32 %v72_v19, %v71_v18 }
  0x9c   :  { %74 = vadd.xlane.f32.xlu0 %v73_v20 }
 0x125   :  { %v75_v22 = vpop.xlane.xlu0 %74 }
 0x126   :  { %v76_v23 = vmul.f32 0.0034722222, %v75_v22 }
 0x128   :  { %v78_v24 = vadd.f32 1e-05, %v76_v23 }
 0x12a   :  { %1875 = vrsqrt.f32 %v78_v24 }
 0x137   :  { %v1876_v26 = vpop.eup %1875 }
 0x138   :  { %v80_v27 = vmul.f32 %v1876_v26, %v77_v25 }
 0x13a   :  { %86 = vperm.xlu1 %1836, %v80_v27   ;;  %v82_v29 = vmul.f32 %v80_v27, %v62_v9 }
 0x13c   :  { %v83_v31 = vsub.f32 %v81_v28, %v82_v29 }
 0x13e   :  { %111 = vperm.xlu1 %1836, %v83_v31  }
 0x1b5   :  { %v87_v39 = vpop.permute.xlu1 %86 }
 0x1b6   :  { %v89_v40 = vrot.slane %v87_v39, 1  ;;  %v91_v41 = vrot.slane %v87_v39, 2  ;;  %v93_v42 = vrot.slane %v87_v39, 3  ;;  %v95_v45 = vrot.slane %v87_v39, 4 }
 0x1b7   :  { %v97_v48 = vrot.slane %v87_v39, 5 }
 0x1b8   :  { %v100_v43 = vsel %vm99_vm3, %v87_v39, %v89_v40 }
 0x1b9   :  { %v102_v46 = vsel %vm101_vm4, %v100_v43, %v91_v41  ;;  %v112_v47 = vpop.permute.xlu1 %111 }
 0x1ba   :  { %v104_v49 = vsel %vm103_vm5, %v102_v46, %v93_v42  ;;  %v114_v50 = vrot.slane %v112_v47, 1  ;;  %v116_v51 = vrot.slane %v112_v47, 2  ;;  %v118_v55 = vrot.slane %v112_v47, 3 }
 0x1bb   :  { %v106_v52 = vsel %vm105_vm6, %v104_v49, %v95_v45  ;;  %v120_v61 = vrot.slane %v112_v47, 4  ;;  %v122_v2 = vrot.slane %v112_v47, 5 }
 0x1bc   :  { %v108_v54 = vsel %vm107_vm7, %v106_v52, %v97_v48  ;;  %v124_v56 = vsel %vm99_vm3, %v112_v47, %v114_v50 }
 0x1bd   :  { %v2055_v60 = vrot.slane %v108_v54, %v2035_v44  ;;  %v125_v62 = vsel %vm101_vm4, %v124_v56, %v116_v51 }
 0x1be   :  { %v126_v3 = vsel %vm103_vm5, %v125_v62, %v118_v55 }
 0x1bf   :  { %v127_v7 = vsel %vm105_vm6, %v126_v3, %v120_v61  ;;  %v165_v8 = vmul.f32 %v2055_v60, %v133_v53  ;;  %v162_v9 = vmul.f32 %v2055_v60, %v130_v57  ;;  %v161_v10 = vmul.f32 %v2055_v60, %v129_v58 }
 0x1c0   :  { %v128_v14 = vsel %vm107_vm7, %v127_v7, %v122_v2  ;;  %v163_v15 = vmul.f32 %v2055_v60, %v131_v59  ;;  %v164_v16 = vmul.f32 %v2055_v60, %v132_v63  ;;  %v171_v17 = vmul.f32 %v2055_v60, %v139_v0 }
 0x1c1   :  { %v2095_v18 = vrot.slane %v128_v14, %v2035_v44  ;;  %v169_v19 = vmul.f32 %v2055_v60, %v137_v1  ;;  %v166_v20 = vmul.f32 %v2055_v60, %v134_v4  ;;  %v178_v22 = vmul.f32 %v2055_v60, %v146_v5  ;;  %v144_v5 = vld [vmem:[%s2875_s1 + $0x78] sm:$0xff]  ;;  %v147_v14 = vld [vmem:[%s2875_s1 + $0x90] sm:$0xff] }
 0x1c2   :  { %v172_v23 = vmul.f32 %v2055_v60, %v140_v6  ;;  %v167_v24 = vmul.f32 %v2055_v60, %v135_v11  ;;  %v168_v25 = vmul.f32 %v2055_v60, %v136_v12  ;;  %v185_v26 = vmul.f32 %v2055_v60, %v153_v13  ;;  %v138_v6 = vld [vmem:[%s2875_s1 + $0x48] sm:$0xff] }
 0x1c3   :  { %v197_v27 = vadd.f32 %v2095_v18, %v165_v8  ;;  %v194_v28 = vadd.f32 %v2095_v18, %v162_v9  ;;  %v2107_v29 = vadd.f32 %v2095_v18, %v161_v10  ;;  %v2110_v30 = vadd.f32 %v2095_v18, %v163_v15  ;;  %v141_v9 = vld [vmem:[%s2875_s1 + $0x60] sm:$0xff] }
 0x1c4   :  { %v2113_v31 = vadd.f32 %v2095_v18, %v164_v16  ;;  %v2116_v32 = vadd.f32 %v2095_v18, %v171_v17  ;;  %v2119_v33 = vadd.f32 %v2095_v18, %v169_v19  ;;  %v2122_v34 = vadd.f32 %v2095_v18, %v166_v20 }
 0x1c5   :  { %v225_v35 = vand.u32 2147483647, %v197_v27  ;;  %v222_v37 = vand.u32 2147483647, %v194_v28  ;;  %vm363_vm9 = vcmp.gt.f32.partialorder %v2107_v29, 0.0  ;;  %vm364_vm10 = vcmp.gt.f32.partialorder %v194_v28, 0.0 }
 0x1c6   :  { %vm391_vm11 = vcmp.lt.f32.partialorder %v2107_v29, 0.0  ;;  %vm392_vm12 = vcmp.lt.f32.partialorder %v194_v28, 0.0  ;;  %vm365_vm13 = vcmp.gt.f32.partialorder %v2110_v30, 0.0  ;;  %vm366_vm14 = vcmp.gt.f32.partialorder %v2113_v31, 0.0 }
 0x1c7   :  { %v262_v39 = vsel %vm249_vm8, %v225_v35, 0.0  ;;  %v253_v40 = vsel %vm249_vm8, %v222_v37, 0.0  ;;  %v419_v41 = vsel %vm391_vm11, -1.0, %v1910_v36  ;;  %v420_v42 = vsel %vm392_vm12, -1.0, %v1910_v36  ;;  %v155_v37 = vld [vmem:[%s2875_s1 + $0xd0] sm:$0xff] }
 0x1c8   :  { %263 = vadd.xlane.f32.xlu1 %v262_v39  ;;  %254 = vadd.xlane.f32.xlu0 %v253_v40  ;;  %v447_v43 = vsel %vm363_vm9, 1.0, %v419_v41  ;;  %v448_v45 = vsel %vm364_vm10, 1.0, %v420_v42  ;;  %vm393_vm15 = vcmp.lt.f32.partialorder %v2110_v30, 0.0  ;;  %vm394_vm0 = vcmp.lt.f32.partialorder %v2113_v31, 0.0  ;;  %v151_v41 = vld [vmem:[%s2875_s1 + $0xb0] sm:$0xff] }
 0x1c9   :  { %v475_v46 = vpack.c.bf16 %v448_v45, %v447_v43  ;;  %v421_v47 = vsel %vm393_vm15, -1.0, %v1910_v36  ;;  %v422_v48 = vsel %vm394_vm0, -1.0, %v1910_v36  ;;  %v231_v49 = vand.u32 2147483647, %v2116_v32 }
 0x1ca   :  { %v449_v50 = vsel %vm365_vm13, 1.0, %v421_v47  ;;  %v450_v51 = vsel %vm366_vm14, 1.0, %v422_v48  ;;  %v229_v52 = vand.u32 2147483647, %v2119_v33  ;;  %vm367_vm1 = vcmp.gt.f32.partialorder %v197_v27, 0.0  ;;  %v142_v47 = vld [vmem:[%s2875_s1 + $0x68] sm:$0xff] }
 0x1cb   :  { %1776 = vmatprep.mubr.msk.bf16.mxu0 %vm249_vm8, %v475_v46  ;;  %v476_v53 = vpack.c.bf16 %v450_v51, %v449_v50  ;;  %v280_v54 = vsel %vm249_vm8, %v231_v49, 0.0  ;;  %vm368_vm2 = vcmp.gt.f32.partialorder %v2122_v34, 0.0  ;;  %vm395_vm3 = vcmp.lt.f32.partialorder %v197_v27, 0.0 }
 0x1cc   :  { %281 = vadd.xlane.f32.xlu1 %v280_v54  ;;  %v274_v55 = vsel %vm249_vm8, %v229_v52, 0.0  ;;  %vm396_vm4 = vcmp.lt.f32.partialorder %v2122_v34, 0.0  ;;  %v423_v56 = vsel %vm395_vm3, -1.0, %v1910_v36  ;;  %v2149_v57 = vadd.f32 %v2095_v18, %v178_v22 }
 0x1cd   :  { %1777 = vmatmul.mubr.msk.bf16.vlgmr.msra.gmra.mxu0 %vm249_vm8, %v476_v53  ;;  %275 = vadd.xlane.f32.xlu0 %v274_v55  ;;  %v424_v58 = vsel %vm396_vm4, -1.0, %v1910_v36  ;;  %v451_v59 = vsel %vm367_vm1, 1.0, %v423_v56  ;;  %v2154_v61 = vadd.f32 %v2095_v18, %v172_v23  ;;  %v2157_v62 = vadd.f32 %v2095_v18, %v167_v24  ;;  %v154_v56 = vld [vmem:[%s2875_s1 + $0xc8] sm:$0xff] }
 0x1ce   :  { %v452_v63 = vsel %vm368_vm2, 1.0, %v424_v58  ;;  %v238_v0 = vand.u32 2147483647, %v2149_v57  ;;  %v2161_v1 = vadd.f32 %v2095_v18, %v168_v25  ;;  %v2164_v2 = vadd.f32 %v2095_v18, %v185_v26  ;;  %v143_v58 = vld [vmem:[%s2875_s1 + $0x70] sm:$0xff] }
 0x1cf   :  { %v477_v3 = vpack.c.bf16 %v452_v63, %v451_v59  ;;  %v232_v4 = vand.u32 2147483647, %v2154_v61  ;;  %vm369_vm5 = vcmp.gt.f32.partialorder %v2157_v62, 0.0  ;;  %vm397_vm6 = vcmp.lt.f32.partialorder %v2157_v62, 0.0 }
 0x1d0   :  { %v301_v7 = vsel %vm249_vm8, %v238_v0, 0.0  ;;  %vm370_vm7 = vcmp.gt.f32.partialorder %v2161_v1, 0.0  ;;  %vm398_vm9 = vcmp.lt.f32.partialorder %v2161_v1, 0.0  ;;  %v425_v8 = vsel %vm397_vm6, -1.0, %v1910_v36 }
 0x1d1   :  { %1780 = vmatprep.mubr.msk.bf16.mxu0 %vm249_vm8, %v477_v3  ;;  %302 = vadd.xlane.f32.xlu1 %v301_v7  ;;  %v283_v10 = vsel %vm249_vm8, %v232_v4, 0.0  ;;  %v426_v11 = vsel %vm398_vm9, -1.0, %v1910_v36  ;;  %v453_v12 = vsel %vm369_vm5, 1.0, %v425_v8  ;;  %v245_v13 = vand.u32 2147483647, %v2164_v2 }
 0x1d2   :  { %284 = vadd.xlane.f32.xlu0 %v283_v10  ;;  %v454_v15 = vsel %vm370_vm7, 1.0, %v426_v11  ;;  %v176_v16 = vmul.f32 %v2055_v60, %v144_v5  ;;  %v170_v17 = vmul.f32 %v2055_v60, %v138_v6  ;;  %vm371_vm10 = vcmp.gt.f32.partialorder %v2119_v33, 0.0 }
 0x1d3   :  { %v478_v19 = vpack.c.bf16 %v454_v15, %v453_v12  ;;  %v322_v20 = vsel %vm249_vm8, %v245_v13, 0.0  ;;  %vm399_vm11 = vcmp.lt.f32.partialorder %v2119_v33, 0.0  ;;  %v173_v22 = vmul.f32 %v2055_v60, %v141_v9  ;;  %v152_v13 = vld [vmem:[%s2875_s1 + $0xb8] sm:$0xff] }
 0x1d4   :  { %v2196_v23 = vadd.f32 %v2095_v18, %v176_v16  ;;  %v202_v24 = vadd.f32 %v2095_v18, %v170_v17  ;;  %v427_v25 = vsel %vm399_vm11, -1.0, %v1910_v36  ;;  %v179_v26 = vmul.f32 %v2055_v60, %v147_v14  ;;  %v145_v17 = vld [vmem:[%s2875_s1 + $0x80] sm:$0xff] }
 0x1d5   :  { %1781 = vmatmul.mubr.msk.bf16.gmra.mxu0 %vm249_vm8, %v478_v19  ;;  %323 = vadd.xlane.f32.xlu1 %v322_v20  ;;  %v455_v27 = vsel %vm371_vm10, 1.0, %v427_v25  ;;  %v205_v28 = vadd.f32 %v2095_v18, %v173_v22  ;;  %vm373_vm12 = vcmp.gt.f32.partialorder %v2116_v32, 0.0  ;;  %vm374_vm13 = vcmp.gt.f32.partialorder %v2154_v61, 0.0 }
 0x1d6   :  { %v236_v33 = vand.u32 2147483647, %v2196_v23  ;;  %vm372_vm14 = vcmp.gt.f32.partialorder %v202_v24, 0.0  ;;  %vm400_vm15 = vcmp.lt.f32.partialorder %v202_v24, 0.0  ;;  %v2207_v35 = vadd.f32 %v2095_v18, %v179_v26 }
 0x1d7   :  { %v428_v39 = vsel %vm400_vm15, -1.0, %v1910_v36  ;;  %v233_v40 = vand.u32 2147483647, %v205_v28  ;;  %vm401_vm0 = vcmp.lt.f32.partialorder %v2116_v32, 0.0  ;;  %vm402_vm1 = vcmp.lt.f32.partialorder %v2154_v61, 0.0 }
 0x1d8   :  { %v295_v42 = vsel %vm249_vm8, %v236_v33, 0.0  ;;  %v456_v43 = vsel %vm372_vm14, 1.0, %v428_v39  ;;  %v239_v45 = vand.u32 2147483647, %v2207_v35  ;;  %v429_v46 = vsel %vm401_vm0, -1.0, %v1910_v36  ;;  %v148_v39 = vld [vmem:[%s2875_s1 + $0x98] sm:$0xff] }
 0x1d9   :  { %296 = vadd.xlane.f32.xlu0 %v295_v42  ;;  %v479_v48 = vpack.c.bf16 %v456_v43, %v455_v27  ;;  %v286_v49 = vsel %vm249_vm8, %v233_v40, 0.0  ;;  %v430_v50 = vsel %vm402_vm1, -1.0, %v1910_v36  ;;  %v457_v51 = vsel %vm373_vm12, 1.0, %v429_v46 }
 0x1da   :  { %287 = vadd.xlane.f32.xlu1 %v286_v49  ;;  %v304_v52 = vsel %vm249_vm8, %v239_v45, 0.0  ;;  %v458_v53 = vsel %vm374_vm13, 1.0, %v430_v50  ;;  %v187_v54 = vmul.f32 %v2055_v60, %v155_v37  ;;  %v183_v55 = vmul.f32 %v2055_v60, %v151_v41 }
 0x1db   :  { %1784 = vmatprep.mubr.msk.bf16.mxu0 %vm249_vm8, %v479_v48  ;;  %v480_v32 = vpack.c.bf16 %v458_v53, %v457_v51  ;;  %v174_v59 = vmul.f32 %v2055_v60, %v142_v47  ;;  %vm375_vm2 = vcmp.gt.f32.partialorder %v205_v28, 0.0  ;;  %vm403_vm3 = vcmp.lt.f32.partialorder %v205_v28, 0.0 }
 0x1dc   :  { %v2242_v61 = vadd.f32 %v2095_v18, %v187_v54  ;;  %v2245_v63 = vadd.f32 %v2095_v18, %v183_v55  ;;  %v431_v0 = vsel %vm403_vm3, -1.0, %v1910_v36  ;;  %v230_v3 = vand.u32 2147483647, %v202_v24  ;;  %v149_v54 = vld [vmem:[%s2875_s1 + $0xa0] sm:$0xff] }
 0x1dd   :  { %305 = vadd.xlane.f32.xlu0 %v304_v52  ;;  %1785 = vmatmul.mubr.msk.bf16.gmra.mxu0 %vm249_vm8, %v480_v32  ;;  %v206_v4 = vadd.f32 %v2095_v18, %v174_v59  ;;  %v459_v5 = vsel %vm375_vm2, 1.0, %v431_v0  ;;  %v186_v6 = vmul.f32 %v2055_v60, %v154_v56  ;;  %v175_v7 = vmul.f32 %v2055_v60, %v143_v58  ;;  %v150_v56 = vld [vmem:[%s2875_s1 + $0xa8] sm:$0xff] }
 0x1de   :  { %v247_v8 = vand.u32 2147483647, %v2242_v61  ;;  %v243_v9 = vand.u32 2147483647, %v2245_v63  ;;  %v277_v10 = vsel %vm249_vm8, %v230_v3, 0.0  ;;  %vm378_vm4 = vcmp.gt.f32.partialorder %v2196_v23, 0.0 }
 0x1df   :  { %vm376_vm5 = vcmp.gt.f32.partialorder %v206_v4, 0.0  ;;  %vm404_vm6 = vcmp.lt.f32.partialorder %v206_v4, 0.0  ;;  %v2257_v11 = vadd.f32 %v2095_v18, %v186_v6  ;;  %v2260_v12 = vadd.f32 %v2095_v18, %v175_v7 }
 0x1e0   :  { %v328_v14 = vsel %vm249_vm8, %v247_v8, 0.0  ;;  %v316_v15 = vsel %vm249_vm8, %v243_v9, 0.0  ;;  %v432_v16 = vsel %vm404_vm6, -1.0, %v1910_v36  ;;  %vm406_vm7 = vcmp.lt.f32.partialorder %v2196_v23, 0.0 }
 0x1e1   :  { %329 = vadd.xlane.f32.xlu1 %v328_v14  ;;  %317 = vadd.xlane.f32.xlu0 %v316_v15  ;;  %v460_v19 = vsel %vm376_vm5, 1.0, %v432_v16  ;;  %v246_v20 = vand.u32 2147483647, %v2257_v11  ;;  %vm377_vm9 = vcmp.gt.f32.partialorder %v2260_v12, 0.0  ;;  %vm405_vm10 = vcmp.lt.f32.partialorder %v2260_v12, 0.0 }
 0x1e2   :  { %v481_v22 = vpack.c.bf16 %v460_v19, %v459_v5  ;;  %v433_v24 = vsel %vm405_vm10, -1.0, %v1910_v36  ;;  %v434_v25 = vsel %vm406_vm7, -1.0, %v1910_v36  ;;  %v184_v26 = vmul.f32 %v2055_v60, %v152_v13 }
 0x1e3   :  { %v325_v27 = vsel %vm249_vm8, %v246_v20, 0.0  ;;  %v461_v28 = vsel %vm377_vm9, 1.0, %v433_v24  ;;  %v462_v33 = vsel %vm378_vm4, 1.0, %v434_v25  ;;  %v177_v37 = vmul.f32 %v2055_v60, %v145_v17 }
 0x1e4   :  { %1788 = vmatprep.mubr.msk.bf16.mxu0 %vm249_vm8, %v481_v22  ;;  %v482_v40 = vpack.c.bf16 %v462_v33, %v461_v28  ;;  %v2287_v41 = vadd.f32 %v2095_v18, %v184_v26  ;;  %vm380_vm11 = vcmp.gt.f32.partialorder %v2149_v57, 0.0  ;;  %vm408_vm12 = vcmp.lt.f32.partialorder %v2149_v57, 0.0  ;;  %v156_v57 = vld [vmem:[%s2875_s1 + $0xd8] sm:$0xff] }
 0x1e5   :  { %278 = vadd.xlane.f32.xlu1 %v277_v10  ;;  %326 = vadd.xlane.f32.xlu0 %v325_v27  ;;  %v2292_v23 = vadd.f32 %v2095_v18, %v177_v37  ;;  %v436_v42 = vsel %vm408_vm12, -1.0, %v1910_v36  ;;  %v221_v43 = vand.u32 2147483647, %v2107_v29  ;;  %v234_v45 = vand.u32 2147483647, %v206_v4 }
 0x1e6   :  { %1789 = vmatmul.mubr.msk.bf16.gmra.mxu0 %vm249_vm8, %v482_v40  ;;  %v244_v46 = vand.u32 2147483647, %v2287_v41  ;;  %v464_v47 = vsel %vm380_vm11, 1.0, %v436_v42  ;;  %v180_v48 = vmul.f32 %v2055_v60, %v148_v39  ;;  %v224_v29 = vand.u32 2147483647, %v2113_v31 }
 0x1e7   :  { %vm379_vm13 = vcmp.gt.f32.partialorder %v2292_v23, 0.0  ;;  %vm407_vm14 = vcmp.lt.f32.partialorder %v2292_v23, 0.0  ;;  %v250_v49 = vsel %vm249_vm8, %v221_v43, 0.0  ;;  %v289_v52 = vsel %vm249_vm8, %v234_v45, 0.0 }
 0x1e8   :  { %v319_v50 = vsel %vm249_vm8, %v244_v46, 0.0  ;;  %v435_v51 = vsel %vm407_vm14, -1.0, %v1910_v36  ;;  %v2310_v53 = vadd.f32 %v2095_v18, %v180_v48  ;;  %vm381_vm15 = vcmp.gt.f32.partialorder %v2207_v35, 0.0 }
 0x1e9   :  { %320 = vadd.xlane.f32.xlu1 %v319_v50  ;;  %v463_v55 = vsel %vm379_vm13, 1.0, %v435_v51  ;;  %251 = vadd.xlane.f32.xlu0 %v250_v49  ;;  %vm409_vm0 = vcmp.lt.f32.partialorder %v2207_v35, 0.0  ;;  %v188_v31 = vmul.f32 %v2055_v60, %v156_v57  ;;  %v181_v35 = vmul.f32 %v2055_v60, %v149_v54 }
 0x1ea   :  { %v483_v58 = vpack.c.bf16 %v464_v47, %v463_v55  ;;  %vm382_vm1 = vcmp.gt.f32.partialorder %v2310_v53, 0.0  ;;  %vm410_vm2 = vcmp.lt.f32.partialorder %v2310_v53, 0.0  ;;  %v437_v32 = vsel %vm409_vm0, -1.0, %v1910_v36 }
 0x1eb   :  { %v438_v59 = vsel %vm410_vm2, -1.0, %v1910_v36  ;;  %v465_v0 = vsel %vm381_vm15, 1.0, %v437_v32  ;;  %v2326_v3 = vadd.f32 %v2095_v18, %v188_v31  ;;  %v259_v4 = vsel %vm249_vm8, %v224_v29, 0.0 }
 0x1ec   :  { %1792 = vmatprep.mubr.msk.bf16.mxu0 %vm249_vm8, %v483_v58  ;;  %v466_v5 = vsel %vm382_vm1, 1.0, %v438_v59  ;;  %v182_v6 = vmul.f32 %v2055_v60, %v150_v56  ;;  %v228_v7 = vand.u32 2147483647, %v2161_v1  ;;  %v2335_v10 = vadd.f32 %v2095_v18, %v181_v35 }
 0x1ed   :  { %290 = vadd.xlane.f32.xlu1 %v289_v52  ;;  %260 = vadd.xlane.f32.xlu0 %v259_v4  ;;  %v484_v8 = vpack.c.bf16 %v466_v5, %v465_v0  ;;  %v248_v9 = vand.u32 2147483647, %v2326_v3  ;;  %v235_v13 = vand.u32 2147483647, %v2260_v12  ;;  %vm385_vm3 = vcmp.gt.f32.partialorder %v2245_v63, 0.0 }
 0x1ee   :  { %v214_v14 = vadd.f32 %v2095_v18, %v182_v6  ;;  %v271_v15 = vsel %vm249_vm8, %v228_v7, 0.0  ;;  %vm386_vm4 = vcmp.gt.f32.partialorder %v2287_v41, 0.0  ;;  %vm383_vm5 = vcmp.gt.f32.partialorder %v2335_v10, 0.0 }
 0x1ef   :  { %1793 = vmatmul.mubr.msk.bf16.gmra.mxu0 %vm249_vm8, %v484_v8  ;;  %v331_v60 = vsel %vm249_vm8, %v248_v9, 0.0  ;;  %vm411_vm6 = vcmp.lt.f32.partialorder %v2335_v10, 0.0  ;;  %vm413_vm7 = vcmp.lt.f32.partialorder %v2245_v63, 0.0  ;;  %vm414_vm11 = vcmp.lt.f32.partialorder %v2287_v41, 0.0 }
 0x1f0   :  { %vm384_vm9 = vcmp.gt.f32.partialorder %v214_v14, 0.0  ;;  %vm412_vm10 = vcmp.lt.f32.partialorder %v214_v14, 0.0  ;;  %v439_v18 = vsel %vm411_vm6, -1.0, %v1910_v36  ;;  %v441_v16 = vsel %vm413_vm7, -1.0, %v1910_v36 }
 0x1f1   :  { %332 = vadd.xlane.f32.xlu1 %v331_v60  ;;  %v440_v1 = vsel %vm412_vm10, -1.0, %v1910_v36  ;;  %v467_v12 = vsel %vm383_vm5, 1.0, %v439_v18  ;;  %272 = vadd.xlane.f32.xlu0 %v271_v15  ;;  %v442_v17 = vsel %vm414_vm11, -1.0, %v1910_v36  ;;  %v469_v20 = vsel %vm385_vm3, 1.0, %v441_v16 }
 0x1f2   :  { %v468_v19 = vsel %vm384_vm9, 1.0, %v440_v1  ;;  %v470_v22 = vsel %vm386_vm4, 1.0, %v442_v17  ;;  %vm387_vm12 = vcmp.gt.f32.partialorder %v2164_v2, 0.0  ;;  %vm388_vm13 = vcmp.gt.f32.partialorder %v2257_v11, 0.0 }
 0x1f3   :  { %v485_v24 = vpack.c.bf16 %v468_v19, %v467_v12  ;;  %vm415_vm14 = vcmp.lt.f32.partialorder %v2164_v2, 0.0  ;;  %v292_v25 = vsel %vm249_vm8, %v235_v13, 0.0  ;;  %vm416_vm15 = vcmp.lt.f32.partialorder %v2257_v11, 0.0 }
 0x1f4   :  { %v443_v26 = vsel %vm415_vm14, -1.0, %v1910_v36  ;;  %v242_v27 = vand.u32 2147483647, %v214_v14  ;;  %v486_v63 = vpack.c.bf16 %v470_v22, %v469_v20  ;;  %v444_v28 = vsel %vm416_vm15, -1.0, %v1910_v36  ;;  %v2427_v14 = vld [vmem:[%s2879_s5] ss:$0 sm:$0xff] }
 0x1f5   :  { %1796 = vmatprep.mubr.msk.bf16.mxu0 %vm249_vm8, %v485_v24  ;;  %293 = vadd.xlane.f32.xlu0 %v292_v25  ;;  %v471_v33 = vsel %vm387_vm12, 1.0, %v443_v26  ;;  %v472_v37 = vsel %vm388_vm13, 1.0, %v444_v28  ;;  %vm389_vm0 = vcmp.gt.f32.partialorder %v2242_v61, 0.0  ;;  %vm417_vm1 = vcmp.lt.f32.partialorder %v2242_v61, 0.0  ;;  %s1911_s5 = smov 32  }
 0x1f6   :  { %v487_v2 = vpack.c.bf16 %v472_v37, %v471_v33  ;;  %vm390_vm2 = vcmp.gt.f32.partialorder %v2326_v3, 0.0  ;;  %vm418_vm3 = vcmp.lt.f32.partialorder %v2326_v3, 0.0  ;;  %v445_v11 = vsel %vm417_vm1, -1.0, %v1910_v36 }
 0x1f7   :  { %1797 = vmatmul.mubr.msk.bf16.gmra.mxu0 %vm249_vm8, %v486_v63  ;;  %v313_v39 = vsel %vm249_vm8, %v242_v27, 0.0  ;;  %v226_v40 = vand.u32 2147483647, %v2122_v34  ;;  %v446_v41 = vsel %vm418_vm3, -1.0, %v1910_v36  ;;  %v473_v42 = vsel %vm389_vm0, 1.0, %v445_v11 }
 0x1f8   :  { %1800 = vmatprep.mubr.msk.bf16.mxu0 %vm249_vm8, %v487_v2  ;;  %v474_v61 = vsel %vm390_vm2, 1.0, %v446_v41  ;;  %v240_v45 = vand.u32 2147483647, %v2310_v53  ;;  %v223_v48 = vand.u32 2147483647, %v2110_v30  ;;  %vm1043_vm4 = vcmask 123904  }
 0x1f9   :  { %314 = vadd.xlane.f32.xlu0 %v313_v39  ;;  %v265_v43 = vsel %vm249_vm8, %v226_v40, 0.0  ;;  %v488_v46 = vpack.c.bf16 %v474_v61, %v473_v42  ;;  %v237_v57 = vand.u32 2147483647, %v2292_v23  ;;  %v227_v29 = vand.u32 2147483647, %v2157_v62 }
 0x1fa   :  { %v307_v47 = vsel %vm249_vm8, %v240_v45, 0.0  ;;  %v256_v34 = vsel %vm249_vm8, %v223_v48, 0.0  ;;  %v241_v51 = vand.u32 2147483647, %v2335_v10  ;;  %vm850_vm5 = vcmask 130048  }
 0x1fb   :  { %v298_v49 = vsel %vm249_vm8, %v237_v57, 0.0  ;;  %v268_v50 = vsel %vm249_vm8, %v227_v29, 0.0  ;;  %vm852_vm6 = vcmask 261120   ;;  %vm854_vm7 = vcmask 392192  }
 0x1fc   :  { %v310_v52 = vsel %vm249_vm8, %v241_v51, 0.0  ;;  %vm856_vm9 = vcmask 523264   ;;  %vm858_vm10 = vcmask 654336   ;;  %vm860_vm11 = vcmask 785408  }
 0x1fd   :  { %266 = vadd.xlane.f32.xlu0 %v265_v43  ;;  %vm862_vm12 = vcmask 916480   ;;  %vm1021_vm13 = vcmask 1041408  }
 0x1ff   :  { %1801 = vmatmul.mubr.msk.bf16.gmra.mxu0 %vm249_vm8, %v488_v46  ;;  %vm1016_vm8 = vcmask 1040384  }
 0x201   :  { %308 = vadd.xlane.f32.xlu0 %v307_v47 }
 0x205   :  { %257 = vadd.xlane.f32.xlu0 %v256_v34 }
 0x209   :  { %299 = vadd.xlane.f32.xlu0 %v298_v49 }
 0x20d   :  { %269 = vadd.xlane.f32.xlu0 %v268_v50 }
 0x211   :  { %311 = vadd.xlane.f32.xlu0 %v310_v52 }
 0x251   :  { %v2386_v30 = vpop.xlane.xlu0 %254  ;;  %v2404_v32 = vpop.xlane.xlu1 %263 }
 0x255   :  { %v2408_v0 = vpop.xlane.xlu1 %281 }
 0x256   :  { %v2388_v53 = vpop.xlane.xlu0 %275 }
 0x25a   :  { %v2412_v35 = vpop.xlane.xlu1 %302 }
 0x25b   :  { %v2390_v54 = vpop.xlane.xlu0 %284 }
 0x25e   :  { %v2416_v5 = vpop.xlane.xlu1 %323 }
 0x262   :  { %v2392_v23 = vpop.xlane.xlu0 %296 }
 0x263   :  { %v2422_v10 = vpop.xlane.xlu1 %287 }
 0x266   :  { %v2394_v55 = vpop.xlane.xlu0 %305 }
 0x26a   :  { %v2396_v62 = vpop.xlane.xlu0 %317  ;;  %v2434_v12 = vpop.xlane.xlu1 %329 }
 0x26e   :  { %v2398_v31 = vpop.xlane.xlu0 %326  ;;  %v279_v22 = vpop.xlane.xlu1 %278 }
 0x26f   :  { %v344_v33 = vmul.f32 0.018518519, %v279_v22 }
 0x272   :  { %v2400_v56 = vpop.xlane.xlu0 %251  ;;  %v2445_v37 = vpop.xlane.xlu1 %320 }
 0x276   :  { %v2402_v58 = vpop.xlane.xlu0 %260  ;;  %v291_v45 = vpop.xlane.xlu1 %290 }
 0x277   :  { %v348_v57 = vmul.f32 0.018518519, %v291_v45 }
 0x27a   :  { %v2406_v59 = vpop.xlane.xlu0 %272 }
 0x27e   :  { %v2410_v3 = vpop.xlane.xlu0 %293 }
 0x282   :  { %v2414_v4 = vpop.xlane.xlu0 %314 }
 0x286   :  { %v2418_v8 = vpop.xlane.xlu0 %266 }
 0x28a   :  { %v2429_v60 = vpop.xlane.xlu0 %308 }
 0x28d   :  { %v1778_v6 = vpop.f32.mrf.mxu0 }
 0x28e   :  { %v258_v19 = vpop.xlane.xlu0 %257  ;;  %v613_v25 = vadd.f32 %v1778_v6, %v2427_v14 }
 0x28f   :  { %v604_v7 = vpop.f32.mrf.mxu0  ;;  %v337_v27 = vmul.f32 0.018518519, %v258_v19 }
 0x291   :  { %v2420_v9 = vpop.f32.mrf.mxu0  ;;  %v717_v2 = vmul.f32 %v613_v25, %v337_v27  ;;  %v343_v27 = vmul.f32 0.018518519, %v2388_v53  ;;  %v342_v53 = vmul.f32 0.018518519, %v2406_v59  ;;  %v356_v59 = vmul.f32 0.018518519, %v2414_v4 }
 0x292   :  { %v2443_v63 = vpop.xlane.xlu0 %299 }
 0x293   :  { %v607_v13 = vpop.f32.mrf.mxu0  ;;  %v745_v41 = vmax.f32 %v717_v2, 0.0  ;;  %v336_v2 = vmul.f32 0.018518519, %v2386_v30 }
 0x295   :  { %v1782_v15 = vpop.f32.mrf.mxu0 }
 0x296   :  { %v629_v18 = vadd.f32 %v1782_v15, %v2427_v14  ;;  %v270_v42 = vpop.xlane.xlu0 %269 }
 0x297   :  { %v2432_v1 = vpop.f32.mrf.mxu0  ;;  %v341_v48 = vmul.f32 0.018518519, %v270_v42 }
 0x299   :  { %v1783_v16 = vpop.f32.mrf.mxu0  ;;  %v721_v49 = vmul.f32 %v629_v18, %v341_v48 }
 0x29b   :  { %v2436_v17 = vpop.f32.mrf.mxu0  ;;  %v749_v52 = vmax.f32 %v721_v49, 0.0  ;;  %v349_v49 = vmul.f32 0.018518519, %v2410_v3 }
 0x29d   :  { %v2438_v20 = vpop.f32.mrf.mxu0 }
 0x29f   :  { %v636_v24 = vpop.f32.mrf.mxu0 }
 0x2a0   :  { %v637_v19 = vadd.f32 %v2427_v14, %v636_v24 }
 0x2a1   :  { %v2441_v26 = vpop.f32.mrf.mxu0 }
 0x2a3   :  { %v639_v28 = vpop.f32.mrf.mxu0 }
 0x2a4   :  { %v640_v11 = vadd.f32 %v2427_v14, %v639_v28  ;;  %v608_v28 = vadd.f32 %v2427_v14, %v607_v13  ;;  %v605_v13 = vadd.f32 %v2427_v14, %v604_v7 }
 0x2a6   :  { %v724_v39 = vmul.f32 %v640_v11, %v344_v33  ;;  %v1790_v40 = vpop.f32.mrf.mxu0  ;;  %v350_v11 = vmul.f32 0.018518519, %v2392_v23  ;;  %v716_v24 = vmul.f32 %v608_v28, %v336_v2 }
 0x2a7   :  { %v661_v30 = vadd.f32 %v1790_v40, %v2427_v14 }
 0x2a8   :  { %v752_v61 = vmax.f32 %v724_v39, 0.0  ;;  %v2448_v43 = vpop.f32.mrf.mxu0  ;;  %v723_v39 = vmul.f32 %v637_v19, %v343_v27 }
 0x2a9   :  { %v729_v28 = vmul.f32 %v661_v30, %v349_v49 }
 0x2aa   :  { %v2450_v46 = vmax.f32 %v745_v41, %v752_v61  ;;  %v1791_v47 = vpop.f32.mrf.mxu0  ;;  %v357_v41 = vmul.f32 0.018518519, %v2396_v62  ;;  %v632_v61 = vadd.f32 %v1783_v16, %v2427_v14  ;;  %v335_v62 = vmul.f32 0.018518519, %v2400_v56 }
 0x2ab   :  { %v664_v18 = vadd.f32 %v1791_v47, %v2427_v14  ;;  %v744_v16 = vmax.f32 %v716_v24, 0.0 }
 0x2ac   :  { %v655_v34 = vpop.f32.mrf.mxu0  ;;  %v715_v7 = vmul.f32 %v605_v13, %v335_v62 }
 0x2ad   :  { %v656_v29 = vadd.f32 %v2427_v14, %v655_v34  ;;  %v730_v45 = vmul.f32 %v664_v18, %v350_v11  ;;  %v751_v34 = vmax.f32 %v723_v39, 0.0  ;;  %v312_v11 = vpop.xlane.xlu0 %311 }
 0x2ae   :  { %v743_v24 = vmax.f32 %v715_v7, 0.0 }
 0x2af   :  { %v728_v50 = vmul.f32 %v656_v29, %v348_v57  ;;  %v2453_v51 = vpop.f32.mrf.mxu0  ;;  %v772_v27 = vmax.f32 %v744_v16, %v751_v34  ;;  %v345_v16 = vmul.f32 0.018518519, %v2408_v0 }
 0x2b1   :  { %v756_v6 = vmax.f32 %v728_v50, 0.0  ;;  %v2455_v15 = vpop.f32.mrf.mxu0  ;;  %v722_v50 = vmul.f32 %v632_v61, %v342_v53  ;;  %v757_v61 = vmax.f32 %v729_v28, 0.0  ;;  %v355_v53 = vmul.f32 0.018518519, %v312_v11 }
 0x2b3   :  { %v2458_v22 = vmax.f32 %v749_v52, %v756_v6  ;;  %v2460_v25 = vpop.f32.mrf.mxu0  ;;  %v758_v52 = vmax.f32 %v730_v45, 0.0  ;;  %v750_v56 = vmax.f32 %v722_v50, 0.0 }
 0x2b5   :  { %v671_v33 = vpop.f32.mrf.mxu0  ;;  %v771_v30 = vmax.f32 %v743_v24, %v750_v56 }
 0x2b6   :  { %v672_v62 = vadd.f32 %v2427_v14, %v671_v33 }
 0x2b7   :  { %v1798_v42 = vpop.f32.mrf.mxu0 }
 0x2b8   :  { %v693_v48 = vadd.f32 %v1798_v42, %v2427_v14  ;;  %v333_v42 = vpop.xlane.xlu1 %332 }
 0x2b9   :  { %v684_v47 = vpop.f32.mrf.mxu0  ;;  %v362_v50 = vmul.f32 0.018518519, %v333_v42 }
 0x2ba   :  { %v737_v57 = vmul.f32 %v693_v48, %v357_v41  ;;  %v685_v23 = vadd.f32 %v2427_v14, %v684_v47  ;;  %v359_v48 = vmul.f32 0.018518519, %v2416_v5  ;;  %v352_v5 = vmul.f32 0.018518519, %v2412_v35 }
 0x2bb   :  { %v2476_v29 = vpop.f32.mrf.mxu0 }
 0x2bc   :  { %v765_v6 = vmax.f32 %v737_v57, 0.0  ;;  %v645_v57 = vadd.f32 %v2438_v20, %v2427_v14  ;;  %v616_v20 = vadd.f32 %v2420_v9, %v2427_v14  ;;  %v346_v9 = vmul.f32 0.018518519, %v2390_v54 }
 0x2bd   :  { %v687_v19 = vpop.f32.mrf.mxu0  ;;  %v680_v54 = vadd.f32 %v2460_v25, %v2427_v14 }
 0x2be   :  { %v779_v40 = vmax.f32 %v758_v52, %v765_v6  ;;  %v688_v18 = vadd.f32 %v2427_v14, %v687_v19  ;;  %v735_v52 = vmul.f32 %v685_v23, %v355_v53  ;;  %v338_v23 = vmul.f32 0.018518519, %v2402_v58 }
 0x2bf   :  { %v1802_v2 = vpop.f32.mrf.mxu0  ;;  %v725_v19 = vmul.f32 %v645_v57, %v345_v16  ;;  %v653_v53 = vadd.f32 %v2427_v14, %v2448_v43 }
 0x2c0   :  { %v2480_v39 = vmax.f32 %v772_v27, %v779_v40  ;;  %v736_v3 = vmul.f32 %v688_v18, %v356_v59  ;;  %v732_v27 = vmul.f32 %v672_v62, %v352_v5  ;;  %v763_v40 = vmax.f32 %v735_v52, 0.0 }
 0x2c1   :  { %v700_v41 = vpop.f32.mrf.mxu0  ;;  %v718_v35 = vmul.f32 %v616_v20, %v338_v23  ;;  %v709_v56 = vadd.f32 %v1802_v2, %v2427_v14  ;;  %v753_v42 = vmax.f32 %v725_v19, 0.0  ;;  %v354_v2 = vmul.f32 0.018518519, %v2429_v60 }
 0x2c2   :  { %v764_v45 = vmax.f32 %v736_v3, 0.0  ;;  %v701_v4 = vadd.f32 %v2427_v14, %v700_v41  ;;  %v826_v47 = vrot.slane %v2480_v39, 2  ;;  %v822_v34 = vrot.slane %v2480_v39, 1 }
 0x2c3   :  { %v1803_v13 = vpop.f32.mrf.mxu0  ;;  %v830_v0 = vrot.slane %v2480_v39, 3  ;;  %v834_v58 = vrot.slane %v2480_v39, 4  ;;  %v347_v41 = vmul.f32 0.018518519, %v2422_v10  ;;  %v760_v24 = vmax.f32 %v732_v27, 0.0 }
 0x2c4   :  { %v778_v49 = vmax.f32 %v757_v61, %v764_v45  ;;  %v712_v6 = vadd.f32 %v1803_v13, %v2427_v14  ;;  %827 = vrot.lane.b32.xlu1 %v826_v47, %s1911_s5  ;;  %823 = vrot.lane.b32.xlu0 %v822_v34, %s1912_s3  ;;  %v739_v33 = vmul.f32 %v701_v4, %v359_v48  ;;  %v353_v4 = vmul.f32 0.018518519, %v2394_v55 }
 0x2c5   :  { %v703_v61 = vpop.f32.mrf.mxu0  ;;  %v361_v48 = vmul.f32 0.018518519, %v2434_v12  ;;  %v360_v10 = vmul.f32 0.018518519, %v2398_v31  ;;  %v746_v13 = vmax.f32 %v718_v35, 0.0  ;;  %v624_v55 = vadd.f32 %v2427_v14, %v2436_v17 }
 0x2c6   :  { %v2496_v59 = vmax.f32 %v771_v30, %v778_v49  ;;  %v742_v7 = vmul.f32 %v712_v6, %v362_v50  ;;  %v767_v11 = vmax.f32 %v739_v33, 0.0  ;;  %v704_v43 = vadd.f32 %v2427_v14, %v703_v61 }
 0x2c7   :  { %v741_v12 = vmul.f32 %v709_v56, %v361_v48  ;;  %v838_v34 = vrot.slane %v2480_v39, 5  ;;  %v774_v25 = vmax.f32 %v746_v13, %v753_v42  ;;  %v648_v30 = vadd.f32 %v2441_v26, %v2427_v14 }
 0x2c8   :  { %v797_v28 = vrot.slane %v2496_v59, 2  ;;  %v770_v18 = vmax.f32 %v742_v7, 0.0  ;;  %831 = vrot.lane.b32.xlu1 %v830_v0, %s1913_s26  ;;  %v801_v45 = vrot.slane %v2496_v59, 3  ;;  %v781_v47 = vmax.f32 %v760_v24, %v767_v11 }
 0x2c9   :  { %v805_v31 = vrot.slane %v2496_v59, 4  ;;  %v340_v60 = vmul.f32 0.018518519, %v2418_v8  ;;  %v727_v57 = vmul.f32 %v653_v53, %v347_v41  ;;  %v677_v62 = vadd.f32 %v2453_v51, %v2427_v14 }
 0x2ca   :  { %798 = vrot.lane.b32.xlu0 %v797_v28, %s1911_s5  ;;  %v784_v3 = vmax.f32 %v763_v40, %v770_v18  ;;  %v734_v49 = vmul.f32 %v680_v54, %v354_v2  ;;  %v621_v17 = vadd.f32 %v2427_v14, %v2432_v1  ;;  %v2531_v16 = vmax.f32 %v774_v25, %v781_v47 }
 0x2cb   :  { %v720_v8 = vmul.f32 %v624_v55, %v340_v60  ;;  %v769_v50 = vmax.f32 %v741_v12, 0.0  ;;  %v740_v52 = vmul.f32 %v704_v43, %v360_v10  ;;  %v842_v51 = vrot.slane %v2480_v39, 6 }
 0x2cc   :  { %835 = vrot.lane.b32.xlu1 %v834_v58, %s1914_s27  ;;  %v2535_v26 = vmax.f32 %v2458_v22, %v784_v3  ;;  %v339_v6 = vmul.f32 0.018518519, %v2404_v32  ;;  %v726_v5 = vmul.f32 %v648_v30, %v346_v9  ;;  %v809_v20 = vrot.slane %v2496_v59, 5 }
 0x2cd   :  { %v755_v33 = vmax.f32 %v727_v57, 0.0  ;;  %v733_v7 = vmul.f32 %v677_v62, %v353_v4  ;;  %v762_v0 = vmax.f32 %v734_v49, 0.0  ;;  %v748_v32 = vmax.f32 %v720_v8, 0.0 }
 0x2ce   :  { %802 = vrot.lane.b32.xlu0 %v801_v45, %s1913_s26  ;;  %v1020_v1 = vsel %vm1016_vm8, %v2531_v16, %v2535_v26  ;;  %v719_v23 = vmul.f32 %v621_v17, %v339_v6  ;;  %v768_v28 = vmax.f32 %v740_v52, 0.0  ;;  %v846_v40 = vrot.slane %v2480_v39, 7 }
 0x2cf   :  { %v1044_v22 = vsel %vm1043_vm4, %v1020_v1, 0.0  ;;  %v783_v27 = vmax.f32 %v762_v0, %v769_v50  ;;  %v813_v18 = vrot.slane %v2496_v59, 6  ;;  %v754_v11 = vmax.f32 %v726_v5, 0.0 }
 0x2d0   :  { %839 = vrot.lane.b32.xlu1 %v838_v34, %s1915_s4  ;;  %v1045_v19 = vrot.slane %v1044_v22, 4  ;;  %v776_v9 = vmax.f32 %v748_v32, %v755_v33  ;;  %v761_v56 = vmax.f32 %v733_v7, 0.0  ;;  %v747_v58 = vmax.f32 %v719_v23, 0.0 }
 0x2d1   :  { %v793_v24 = vrot.slane %v2496_v59, 1  ;;  %v908_v61 = vrot.slane %v2531_v16, 1  ;;  %v912_v10 = vrot.slane %v2531_v16, 2  ;;  %v696_v55 = vadd.f32 %v2476_v29, %v2427_v14 }
 0x2d2   :  { %806 = vrot.lane.b32.xlu0 %v805_v31, %s1914_s27  ;;  %v1046_v35 = vadd.f32 %v1045_v19, %v1044_v22  ;;  %v2550_v41 = vmax.f32 %v776_v9, %v783_v27  ;;  %v782_v42 = vmax.f32 %v761_v56, %v768_v28  ;;  %v775_v4 = vmax.f32 %v747_v58, %v754_v11  ;;  %v2615_v56 = vld [vmem:[%s2881_s7] sm:$0xf] }
 0x2d3   :  { %v916_v12 = vrot.slane %v2531_v16, 3  ;;  %v358_v34 = vmul.f32 0.018518519, %v2445_v37  ;;  %v669_v25 = vadd.f32 %v2427_v14, %v2455_v15  ;;  %v351_v60 = vmul.f32 0.018518519, %v2443_v63 }
 0x2d4   :  { %843 = vrot.lane.b32.xlu1 %v842_v51, %s1916_s28  ;;  %v1047_v3 = vrot.slane %v1046_v35, 2  ;;  %v2556_v53 = vmax.f32 %v775_v4, %v782_v42  ;;  %v962_v54 = vrot.slane %v2550_v41, 7  ;;  %v920_v29 = vrot.slane %v2531_v16, 4 }
 0x2d5   :  { %v738_v57 = vmul.f32 %v696_v55, %v358_v34  ;;  %v731_v17 = vmul.f32 %v669_v25, %v351_v60  ;;  %v924_v8 = vrot.slane %v2531_v16, 5  ;;  %v928_v5 = vrot.slane %v2531_v16, 6 }
 0x2d6   :  { %810 = vrot.lane.b32.xlu0 %v809_v20, %s1915_s4  ;;  %v1048_v45 = vadd.f32 %v1047_v3, %v1046_v35  ;;  %v937_v47 = vrot.slane %v2556_v53, 1  ;;  %v941_v31 = vrot.slane %v2556_v53, 2  ;;  %v945_v14 = vrot.slane %v2556_v53, 3  ;;  %v2608_v35 = vld [vmem:[%s2880_s6] sm:$0xf] }
 0x2d7   :  { %v766_v15 = vmax.f32 %v738_v57, 0.0  ;;  %v759_v50 = vmax.f32 %v731_v17, 0.0  ;;  %v949_v52 = vrot.slane %v2556_v53, 4  ;;  %v817_v0 = vrot.slane %v2496_v59, 7  ;;  %v1843_v57 = vld [vmem:[%s2882_s8 + $0x38] sm:$0xff]   ;;  %v1846_v17 = vld [vmem:[%s2882_s8 + $0x68] sm:$0xff]  }
 0x2d8   :  { %847 = vrot.lane.b32.xlu1 %v846_v40, %s1917_s29  ;;  %v1049_v48 = vrot.slane %v1048_v45, 1  ;;  %v957_v23 = vrot.slane %v2556_v53, 6  ;;  %v980_v28 = vrot.slane %v2550_v41, 1  ;;  %v984_v11 = vrot.slane %v2550_v41, 2 }
 0x2d9   :  { %v780_v6 = vmax.f32 %v759_v50, %v766_v15  ;;  %v988_v42 = vrot.slane %v2550_v41, 3  ;;  %v1848_v15 = vld [vmem:[%s2882_s8 + $0x60] sm:$0xff]  }
 0x2da   :  { %814 = vrot.lane.b32.xlu0 %v813_v18, %s1916_s28  ;;  %v1050_v2 = vadd.f32 %v1049_v48, %v1048_v45  ;;  %v1124_v18 = vsub.s32 3, %v2031_v38  ;;  %v992_v48 = vrot.slane %v2550_v41, 4 }
 0x2db   :  { %v2587_v7 = vmax.f32 %v2450_v46, %v780_v6  ;;  %v933_v46 = vrot.slane %v2556_v53, 7  ;;  %v1851_v6 = vld [vmem:[%s2882_s8 + $0x18] sm:$0xff]  }
 0x2dc   :  { %794 = vrot.lane.b32.xlu1 %v793_v24, %s1912_s3  ;;  %v1055_v13 = vmul.f32 0.5, %v1050_v2  ;;  %v1125_v3 = vrot.slane %v2608_v35, %v1124_v18 }
 0x2dd   :  { %v872_v32 = vrot.slane %v2587_v7, 1  ;;  %v876_v27 = vrot.slane %v2587_v7, 2  ;;  %v880_v40 = vrot.slane %v2587_v7, 3  ;;  %v884_v9 = vrot.slane %v2587_v7, 4 }
 0x2de   :  { %909 = vrot.lane.b32.xlu0 %v908_v61, %s1912_s3  ;;  %v1059_v43 = vsub.f32 %v1020_v1, %v1055_v13  ;;  %v953_v1 = vrot.slane %v2556_v53, 5  ;;  %v1151_v61 = vrot.slane %v2615_v56, %v1124_v18  ;;  %v888_v45 = vrot.slane %v2587_v7, 5 }
 0x2df   :  { %v996_v13 = vrot.slane %v2550_v41, 5  ;;  %v896_v55 = vrot.slane %v2587_v7, 7 }
 0x2e0   :  { %963 = vrot.lane.b32.xlu1 %v962_v54, %s1917_s29  ;;  %v1063_v30 = vmul.f32 %v1059_v43, %v1059_v43 }
 0x2e2   :  { %913 = vrot.lane.b32.xlu0 %v912_v10, %s1911_s5  ;;  %v1085_v62 = vsel %vm1043_vm4, %v1063_v30, 0.0  ;;  %v892_v10 = vrot.slane %v2587_v7, 6 }
 0x2e3   :  { %v1086_v49 = vrot.slane %v1085_v62, 4 }
 0x2e4   :  { %938 = vrot.lane.b32.xlu1 %v937_v47, %s1912_s3 }
 0x2e5   :  { %v1087_v37 = vadd.f32 %v1086_v49, %v1085_v62  ;;  %v1845_v49 = vld [vmem:[%s2882_s8 + $0x30] sm:$0xff]  }
 0x2e6   :  { %917 = vrot.lane.b32.xlu0 %v916_v12, %s1913_s26  ;;  %v1000_v12 = vrot.slane %v2550_v41, 6 }
 0x2e7   :  { %v1088_v63 = vrot.slane %v1087_v37, 2 }
 0x2e8   :  { %942 = vrot.lane.b32.xlu1 %v941_v31, %s1911_s5  ;;  %v1842_v31 = vld [vmem:[%s2882_s8 + $0x78] sm:$0xff]  }
 0x2e9   :  { %v1089_v51 = vadd.f32 %v1088_v63, %v1087_v37  ;;  %1737 = vmatprep.subr.bf16.mxu1 %v1842_v31  ;;  %v1849_v63 = vld [vmem:[%s2882_s8 + $0x20] sm:$0xff]  }
 0x2ea   :  { %921 = vrot.lane.b32.xlu0 %v920_v29, %s1914_s27  ;;  %1738 = vmatpush3.bf16.msra.mxu1 %v1843_v57 }
 0x2eb   :  { %v1090_v20 = vrot.slane %v1089_v51, 1 }
 0x2ec   :  { %946 = vrot.lane.b32.xlu1 %v945_v14, %s1913_s26  ;;  %v1847_v14 = vld [vmem:[%s2882_s8 + $0x28] sm:$0xff]  }
 0x2ed   :  { %v1091_v33 = vadd.f32 %v1090_v20, %v1089_v51  ;;  %v1852_v20 = vld [vmem:[%s2882_s8 + $0x50] sm:$0xff]  }
 0x2ee   :  { %925 = vrot.lane.b32.xlu0 %v924_v8, %s1915_s4 }
 0x2ef   :  { %v1095_v22 = vmul.f32 0.5, %v1091_v33  ;;  %v1853_v33 = vld [vmem:[%s2882_s8 + $0x10] sm:$0xff]  }
 0x2f0   :  { %950 = vrot.lane.b32.xlu1 %v949_v52, %s1914_s27  ;;  %v1850_v52 = vld [vmem:[%s2882_s8 + $0x58] sm:$0xff]  }
 0x2f1   :  { %v1099_v19 = vadd.f32 1e-05, %v1095_v22  ;;  %v1854_v22 = vld [vmem:[%s2882_s8 + $0x48] sm:$0xff]  }
 0x2f2   :  { %929 = vrot.lane.b32.xlu0 %v928_v5, %s1916_s28 }
 0x2f3   :  { %1877 = vrsqrt.f32 %v1099_v19  ;;  %v1855_v19 = vld [vmem:[%s2882_s8 + $0x8] sm:$0xff]  }
 0x2f4   :  { %954 = vrot.lane.b32.xlu1 %v953_v1, %s1915_s4 }
 0x2f6   :  { %818 = vrot.lane.b32.xlu0 %v817_v0, %s1917_s29 }
 0x2f8   :  { %958 = vrot.lane.b32.xlu1 %v957_v23, %s1916_s28 }
 0x2fa   :  { %873 = vrot.lane.b32.xlu0 %v872_v32, %s1912_s3 }
 0x2fc   :  { %934 = vrot.lane.b32.xlu1 %v933_v46, %s1917_s29  ;;  %v1856_v46 = vld [vmem:[%s2882_s8 + $0x40] sm:$0xff]  }
 0x2fe   :  { %877 = vrot.lane.b32.xlu0 %v876_v27, %s1911_s5 }
 0x300   :  { %981 = vrot.lane.b32.xlu1 %v980_v28, %s1912_s3  ;;  %v1878_v58 = vpop.eup %1877  ;;  %v1857_v28 = vld [vmem:[%s2882_s8] sm:$0xff]  }
 0x301   :  { %v1107_v24 = vmul.f32 %v1878_v58, %v1059_v43  ;;  %v1005_v43 = vrot.slane %v2535_v26, 7  ;;  %v1844_v26 = vld [vmem:[%s2882_s8 + $0x70] sm:$0xff]  }
 0x302   :  { %881 = vrot.lane.b32.xlu0 %v880_v40, %s1913_s26  ;;  %1739 = vmatprep.subr.bf16.mxu1 %v1844_v26 }
 0x303   :  { %v1133_v4 = vmul.f32 %v1125_v3, %v1107_v24  ;;  %1740 = vmatpush3.bf16.msra.mxu1 %v1845_v49 }
 0x304   :  { %985 = vrot.lane.b32.xlu1 %v984_v11, %s1911_s5  ;;  %1741 = vmatprep.subr.bf16.mxu1 %v1846_v17 }
 0x305   :  { %v2626_v54 = vadd.f32 %v1151_v61, %v1133_v4 }
 0x306   :  { %885 = vrot.lane.b32.xlu0 %v884_v9, %s1914_s27 }
 0x307   :  { %v1163_v2 = vand.u32 2147483647, %v2626_v54  ;;  %1742 = vmatpush3.bf16.msra.mxu1 %v1847_v14  ;;  %vm1181_vm14 = vcmp.lt.f32.partialorder %v2626_v54, 0.0  ;;  %vm1177_vm1 = vcmp.gt.f32.partialorder %v2626_v54, 0.0  ;;  %v1858_v54 = vld [vmem:[%s2882_s8 + $0xb8] sm:$0xff]  }
 0x308   :  { %989 = vrot.lane.b32.xlu1 %v988_v42, %s1913_s26  ;;  %1743 = vmatprep.subr.bf16.mxu1 %v1848_v15 }
 0x309   :  { %v2634_v47 = vsel %vm1043_vm4, %v1163_v2, 0.0 }
 0x30a   :  { %889 = vrot.lane.b32.xlu0 %v888_v45, %s1915_s4 }
 0x30b   :  { %1744 = vmatpush3.bf16.msra.mxu1 %v1849_v63 }
 0x30c   :  { %993 = vrot.lane.b32.xlu1 %v992_v48, %s1914_s27  ;;  %1745 = vmatprep.subr.bf16.mxu1 %v1850_v52 }
 0x30e   :  { %893 = vrot.lane.b32.xlu0 %v892_v10, %s1916_s28 }
 0x30f   :  { %1746 = vmatpush3.bf16.msra.mxu1 %v1851_v6 }
 0x310   :  { %997 = vrot.lane.b32.xlu1 %v996_v13, %s1915_s4  ;;  %1747 = vmatprep.subr.bf16.mxu1 %v1852_v20 }
 0x312   :  { %897 = vrot.lane.b32.xlu0 %v896_v55, %s1917_s29 }
 0x313   :  { %1748 = vmatpush3.bf16.msra.mxu1 %v1853_v33 }
 0x314   :  { %1001 = vrot.lane.b32.xlu1 %v1000_v12, %s1916_s28  ;;  %1749 = vmatprep.subr.bf16.mxu1 %v1854_v22 }
 0x317   :  { %1750 = vmatpush3.bf16.msra.mxu1 %v1855_v19 }
 0x318   :  { %1006 = vrot.lane.b32.xlu1 %v1005_v43, %s1917_s29  ;;  %1751 = vmatprep.subr.bf16.mxu1 %v1856_v46 }
 0x31b   :  { %1752 = vmatpush3.bf16.msra.mxu1 %v1857_v28 }
 0x31c   :  { %1437 = vmatprep.subr.bf16.mxu1 %v1909_v21 }
 0x336   :  { %v2643_v34 = vpop.permute.xlu1 %827  ;;  %v824_v25 = vpop.permute.xlu0 %823 }
 0x337   :  { %v864_v4 = vsel %vm850_vm5, %v2480_v39, %v824_v25 }
 0x33a   :  { %v2645_v30 = vpop.permute.xlu1 %831 }
 0x33c   :  { %v799_v60 = vpop.permute.xlu0 %798 }
 0x33e   :  { %v2653_v29 = vpop.permute.xlu1 %835 }
 0x340   :  { %v803_v62 = vpop.permute.xlu0 %802 }
 0x342   :  { %v2667_v37 = vpop.permute.xlu1 %839 }
 0x344   :  { %v807_v8 = vpop.permute.xlu0 %806 }
 0x346   :  { %v2675_v50 = vpop.permute.xlu1 %843 }
 0x348   :  { %v811_v51 = vpop.permute.xlu0 %810 }
 0x34a   :  { %v848_v5 = vpop.permute.xlu1 %847 }
 0x34c   :  { %v2686_v1 = vpop.permute.xlu0 %814 }
 0x34e   :  { %v795_v0 = vpop.permute.xlu1 %794 }
 0x34f   :  { %v851_v58 = vsel %vm850_vm5, %v2496_v59, %v795_v0  ;;  %v865_v59 = vsel %vm852_vm6, %v864_v4, %v2643_v34 }
 0x350   :  { %v910_v23 = vpop.permute.xlu0 %909  ;;  %v853_v24 = vsel %vm852_vm6, %v851_v58, %v799_v60  ;;  %v866_v12 = vsel %vm854_vm7, %v865_v59, %v2645_v30 }
 0x351   :  { %v855_v48 = vsel %vm854_vm7, %v853_v24, %v803_v62  ;;  %v867_v25 = vsel %vm856_vm9, %v866_v12, %v2653_v29 }
 0x352   :  { %v964_v32 = vpop.permute.xlu1 %963  ;;  %v857_v43 = vsel %vm856_vm9, %v855_v48, %v807_v8  ;;  %v868_v31 = vsel %vm858_vm10, %v867_v25, %v2667_v37 }
 0x353   :  { %v869_v26 = vsel %vm860_vm11, %v868_v31, %v2675_v50  ;;  %v859_v62 = vsel %vm858_vm10, %v857_v43, %v811_v51 }
 0x354   :  { %v914_v27 = vpop.permute.xlu0 %913  ;;  %v870_v17 = vsel %vm862_vm12, %v869_v26, %v848_v5  ;;  %v861_v50 = vsel %vm860_vm11, %v859_v62, %v2686_v1 }
 0x356   :  { %v939_v40 = vpop.permute.xlu1 %938 }
 0x357   :  { %v973_v10 = vsel %vm850_vm5, %v2556_v53, %v939_v40  ;;  %v966_v53 = vsel %vm850_vm5, %v2531_v16, %v910_v23 }
 0x358   :  { %v918_v18 = vpop.permute.xlu0 %917  ;;  %v967_v60 = vsel %vm852_vm6, %v966_v53, %v914_v27 }
 0x359   :  { %v968_v29 = vsel %vm854_vm7, %v967_v60, %v918_v18 }
 0x35a   :  { %v943_v11 = vpop.permute.xlu1 %942 }
 0x35b   :  { %v974_v13 = vsel %vm852_vm6, %v973_v10, %v943_v11 }
 0x35c   :  { %v922_v9 = vpop.permute.xlu0 %921 }
 0x35d   :  { %v969_v14 = vsel %vm856_vm9, %v968_v29, %v922_v9 }
 0x35e   :  { %v947_v3 = vpop.permute.xlu1 %946 }
 0x35f   :  { %v975_v39 = vsel %vm854_vm7, %v974_v13, %v947_v3 }
 0x360   :  { %v926_v42 = vpop.permute.xlu0 %925 }
 0x361   :  { %v970_v15 = vsel %vm858_vm10, %v969_v14, %v926_v42 }
 0x362   :  { %v951_v61 = vpop.permute.xlu1 %950 }
 0x363   :  { %v976_v34 = vsel %vm856_vm9, %v975_v39, %v951_v61 }
 0x364   :  { %v930_v45 = vpop.permute.xlu0 %929 }
 0x365   :  { %v971_v63 = vsel %vm860_vm11, %v970_v15, %v930_v45 }
 0x366   :  { %v955_v2 = vpop.permute.xlu1 %954 }
 0x367   :  { %v977_v30 = vsel %vm858_vm10, %v976_v34, %v955_v2 }
 0x368   :  { %v819_v55 = vpop.permute.xlu0 %818 }
 0x369   :  { %v863_v6 = vsel %vm862_vm12, %v861_v50, %v819_v55 }
 0x36a   :  { %v959_v57 = vpop.permute.xlu1 %958 }
 0x36b   :  { %v978_v16 = vsel %vm860_vm11, %v977_v30, %v959_v57 }
 0x36c   :  { %v874_v49 = vpop.permute.xlu0 %873  ;;  %v979_v37 = vsel %vm862_vm12, %v978_v16, %v964_v32 }
 0x36d   :  { %v1018_v8 = vsel %vm1016_vm8, %v870_v17, %v979_v37  ;;  %v900_v31 = vsel %vm850_vm5, %v2587_v7, %v874_v49 }
 0x36e   :  { %v1029_v52 = vsel %vm1021_vm13, %v1018_v8, 0.0  ;;  %v935_v51 = vpop.permute.xlu1 %934 }
 0x36f   :  { %v1030_v20 = vrot.slane %v1029_v52, 4  ;;  %v972_v5 = vsel %vm862_vm12, %v971_v63, %v935_v51 }
 0x370   :  { %v878_v33 = vpop.permute.xlu0 %877  ;;  %v1017_v0 = vsel %vm1016_vm8, %v863_v6, %v972_v5 }
 0x371   :  { %v1031_v22 = vadd.f32 %v1030_v20, %v1029_v52  ;;  %v1022_v23 = vsel %vm1021_vm13, %v1017_v0, 0.0  ;;  %v901_v26 = vsel %vm852_vm6, %v900_v31, %v878_v33  ;;  %v1139_v31 = vrot.slane %v2615_v56, %v2035_v44 }
 0x372   :  { %v1023_v19 = vrot.slane %v1022_v23, 4  ;;  %v982_v32 = vpop.permute.xlu1 %981 }
 0x373   :  { %v1032_v46 = vrot.slane %v1031_v22, 2  ;;  %v1009_v30 = vsel %vm850_vm5, %v2550_v41, %v982_v32 }
 0x374   :  { %v882_v27 = vpop.permute.xlu0 %881  ;;  %v1024_v28 = vadd.f32 %v1023_v19, %v1022_v23 }
 0x375   :  { %v1033_v1 = vadd.f32 %v1032_v46, %v1031_v22  ;;  %v902_v17 = vsel %vm854_vm7, %v901_v26, %v882_v27 }
 0x376   :  { %v1025_v40 = vrot.slane %v1024_v28, 2  ;;  %v986_v18 = vpop.permute.xlu1 %985 }
 0x377   :  { %v1034_v11 = vrot.slane %v1033_v1, 1  ;;  %v1010_v29 = vsel %vm852_vm6, %v1009_v30, %v986_v18 }
 0x378   :  { %v886_v9 = vpop.permute.xlu0 %885  ;;  %v1026_v3 = vadd.f32 %v1025_v40, %v1024_v28 }
 0x379   :  { %v1035_v58 = vadd.f32 %v1034_v11, %v1033_v1  ;;  %v903_v15 = vsel %vm856_vm9, %v902_v17, %v886_v9 }
 0x37a   :  { %v1027_v42 = vrot.slane %v1026_v3, 1  ;;  %v990_v24 = vpop.permute.xlu1 %989 }
 0x37b   :  { %v1053_v61 = vmul.f32 0.5, %v1035_v58  ;;  %v1011_v14 = vsel %vm854_vm7, %v1010_v29, %v990_v24  ;;  %v1116_v24 = vsub.s32 1, %v2031_v38 }
 0x37c   :  { %v1028_v45 = vadd.f32 %v1027_v42, %v1026_v3  ;;  %v890_v4 = vpop.permute.xlu0 %889 }
 0x37d   :  { %v1057_v48 = vsub.f32 %v1018_v8, %v1053_v61  ;;  %v904_v41 = vsel %vm858_vm10, %v903_v15, %v890_v4  ;;  %v1117_v4 = vrot.slane %v2608_v35, %v1116_v24 }
 0x37e   :  { %v1052_v10 = vmul.f32 0.5, %v1028_v45  ;;  %v994_v2 = vpop.permute.xlu1 %993 }
 0x37f   :  { %v1061_v59 = vmul.f32 %v1057_v48, %v1057_v48  ;;  %v1012_v7 = vsel %vm856_vm9, %v1011_v14, %v994_v2 }
 0x380   :  { %v1056_v13 = vsub.f32 %v1017_v0, %v1052_v10  ;;  %v894_v43 = vpop.permute.xlu0 %893 }
 0x381   :  { %v1071_v55 = vsel %vm1021_vm13, %v1061_v59, 0.0  ;;  %v905_v52 = vsel %vm860_vm11, %v904_v41, %v894_v43 }
 0x382   :  { %v1072_v12 = vrot.slane %v1071_v55, 4  ;;  %v1060_v39 = vmul.f32 %v1056_v13, %v1056_v13  ;;  %v998_v25 = vpop.permute.xlu1 %997 }
 0x383   :  { %v1013_v63 = vsel %vm858_vm10, %v1012_v7, %v998_v25 }
 0x384   :  { %v1073_v53 = vadd.f32 %v1072_v12, %v1071_v55  ;;  %v1064_v34 = vsel %vm1021_vm13, %v1060_v39, 0.0  ;;  %v898_v49 = vpop.permute.xlu0 %897  ;;  %v1143_v55 = vrot.slane %v2615_v56, %v1116_v24  ;;  %v1113_v12 = vrot.slane %v2608_v35, %v2035_v44  ;;  %v1867_v24 = vld [vmem:[%s2886_s12 + $0x38] sm:$0xff]  }
 0x385   :  { %v1065_v60 = vrot.slane %v1064_v34, 4  ;;  %v906_v5 = vsel %vm862_vm12, %v905_v52, %v898_v49  ;;  %v1861_v52 = vld [vmem:[%s2882_s8 + $0xa0] sm:$0xff]   ;;  %1805 = vmatpush3.bf16.msra.mxu0 %v1867_v24 }
 0x386   :  { %v1074_v57 = vrot.slane %v1073_v53, 2  ;;  %v1002_v62 = vpop.permute.xlu1 %1001  ;;  %1806 = vmatprep.subr.bf16.mxu0 %v1910_v36 }
 0x387   :  { %v1066_v16 = vadd.f32 %v1065_v60, %v1064_v34  ;;  %v1014_v51 = vsel %vm860_vm11, %v1013_v63, %v1002_v62  ;;  %v1185_v62 = vsel %vm1181_vm14, -1.0, %v1910_v36  ;;  %v1859_v63 = vld [vmem:[%s2882_s8 + $0xb0] sm:$0xff]  }
 0x388   :  { %v1075_v37 = vadd.f32 %v1074_v57, %v1073_v53  ;;  %v1189_v14 = vsel %vm1177_vm1, 1.0, %v1185_v62 }
 0x389   :  { %v1067_v8 = vrot.slane %v1066_v16, 2 }
 0x38a   :  { %v1076_v50 = vrot.slane %v1075_v37, 1  ;;  %v1007_v6 = vpop.permute.xlu1 %1006 }
 0x38b   :  { %v1068_v20 = vadd.f32 %v1067_v8, %v1066_v16  ;;  %v1015_v33 = vsel %vm862_vm12, %v1014_v51, %v1007_v6  ;;  %v1193_v8 = vpack.c.bf16 %v1189_v14, %v1189_v14  ;;  %v1120_v51 = vsub.s32 2, %v2031_v38  ;;  %v1862_v6 = vld [vmem:[%s2882_s8 + $0x98] sm:$0xff]  }
 0x38c   :  { %v1077_v0 = vadd.f32 %v1076_v50, %v1075_v37  ;;  %v1019_v22 = vsel %vm1016_vm8, %v906_v5, %v1015_v33  ;;  %v1860_v50 = vld [vmem:[%s2882_s8 + $0xa8] sm:$0xff]  }
 0x38d   :  { %v1069_v23 = vrot.slane %v1068_v20, 1  ;;  %v1036_v19 = vsel %vm1021_vm13, %v1019_v22, 0.0 }
 0x38e   :  { %v1093_v32 = vmul.f32 0.5, %v1077_v0  ;;  %v1037_v46 = vrot.slane %v1036_v19, 4  ;;  %v1863_v0 = vld [vmem:[%s2882_s8 + $0x90] sm:$0xff]  }
 0x38f   :  { %v1070_v27 = vadd.f32 %v1069_v23, %v1068_v20  ;;  %v1121_v20 = vrot.slane %v2608_v35, %v1120_v51 }
 0x390   :  { %v1097_v28 = vadd.f32 1e-05, %v1093_v32  ;;  %v1038_v1 = vadd.f32 %v1037_v46, %v1036_v19  ;;  %v1864_v32 = vld [vmem:[%s2882_s8 + $0x88] sm:$0xff]  }
 0x391   :  { %v1092_v40 = vmul.f32 0.5, %v1070_v27 }
 0x392   :  { %1879 = vrsqrt.f32 %v1097_v28  ;;  %v1039_v18 = vrot.slane %v1038_v1, 2 }
 0x393   :  { %v1096_v11 = vadd.f32 1e-05, %v1092_v40 }
 0x394   :  { %v1040_v9 = vadd.f32 %v1039_v18, %v1038_v1 }
 0x395   :  { %1881 = vrsqrt.f32 %v1096_v11 }
 0x396   :  { %v1041_v3 = vrot.slane %v1040_v9, 1 }
 0x398   :  { %v1042_v58 = vadd.f32 %v1041_v3, %v1040_v9  ;;  %v1866_v3 = vld [vmem:[%s2882_s8 + $0xc0] sm:$0xff]  }
 0x39a   :  { %v1054_v42 = vmul.f32 0.5, %v1042_v58 }
 0x39c   :  { %v1058_v61 = vsub.f32 %v1019_v22, %v1054_v42  ;;  %v1147_v22 = vrot.slane %v2615_v56, %v1120_v51  ;;  %v1865_v56 = vld [vmem:[%s2882_s8 + $0x80] sm:$0xff]  }
 0x39e   :  { %v1062_v45 = vmul.f32 %v1058_v61, %v1058_v61 }
 0x39f   :  { %v1880_v10 = vpop.eup %1879 }
 0x3a0   :  { %v1105_v2 = vmul.f32 %v1880_v10, %v1057_v48  ;;  %v1078_v59 = vsel %vm1021_vm13, %v1062_v45, 0.0  ;;  %v1871_v45 = vld [vmem:[%s2886_s12 + $0x18] sm:$0xff]   ;;  %v1873_v10 = vld [vmem:[%s2886_s12 + $0x8] sm:$0xff]  }
 0x3a1   :  { %v1079_v39 = vrot.slane %v1078_v59, 4 }
 0x3a2   :  { %v1882_v43 = vpop.eup %1881  ;;  %v1131_v25 = vmul.f32 %v1117_v4, %v1105_v2  ;;  %v1872_v4 = vld [vmem:[%s2886_s12 + $0x10] sm:$0xff]   ;;  %v1874_v2 = vld [vmem:[%s2886_s12] sm:$0xff]  }
 0x3a3   :  { %v1104_v53 = vmul.f32 %v1882_v43, %v1056_v13  ;;  %v1080_v34 = vadd.f32 %v1079_v39, %v1078_v59 }
 0x3a4   :  { %v1157_v60 = vadd.f32 %v1143_v55, %v1131_v25 }
 0x3a5   :  { %v1130_v30 = vmul.f32 %v1113_v12, %v1104_v53  ;;  %v1081_v48 = vrot.slane %v1080_v34, 2 }
 0x3a6   :  { %vm1175_vm15 = vcmp.gt.f32.partialorder %v1157_v60, 0.0  ;;  %vm1179_vm0 = vcmp.lt.f32.partialorder %v1157_v60, 0.0  ;;  %v1161_v19 = vand.u32 2147483647, %v1157_v60  ;;  %v1707_v60 = vld [vmem:[%s2883_s9] ss:$0 sm:$0xff] }
 0x3a7   :  { %v1082_v57 = vadd.f32 %v1081_v48, %v1080_v34  ;;  %v1183_v26 = vsel %vm1179_vm0, -1.0, %v1910_v36  ;;  %v1156_v29 = vadd.f32 %v1139_v31, %v1130_v30 }
 0x3a8   :  { %v1187_v13 = vsel %vm1175_vm15, 1.0, %v1183_v26  ;;  %v1165_v28 = vsel %vm1021_vm13, %v1161_v19, 0.0 }
 0x3a9   :  { %v1083_v16 = vrot.slane %v1082_v57, 1  ;;  %v1191_v17 = vpack.c.bf16 %v1187_v13, %v1187_v13  ;;  %vm1174_vm2 = vcmp.gt.f32.partialorder %v1156_v29, 0.0  ;;  %vm1178_vm3 = vcmp.lt.f32.partialorder %v1156_v29, 0.0 }
 0x3aa   :  { %v1182_v44 = vsel %vm1178_vm3, -1.0, %v1910_v36  ;;  %v1160_v23 = vand.u32 2147483647, %v1156_v29 }
 0x3ab   :  { %v1084_v37 = vadd.f32 %v1083_v16, %v1082_v57  ;;  %1429 = vmatprep.mubr.bf16.mxu1 %v1191_v17  ;;  %v1186_v15 = vsel %vm1174_vm2, 1.0, %v1182_v44 }
 0x3ac   :  { %v1190_v7 = vpack.c.bf16 %v1186_v15, %v1186_v15  ;;  %v1164_v46 = vsel %vm1021_vm13, %v1160_v23, 0.0  ;;  %v1709_v23 = vld [vmem:[%s2885_s11] ss:$0 sm:$0xff]  ;;  %s1919_s11 = smov [#allocation2]  }
 0x3ad   :  { %v1094_v49 = vmul.f32 0.5, %v1084_v37  ;;  %v1166_v1 = vadd.f32 %v1165_v28, %v1164_v46  ;;  %s1654_s16 = sshll.u32 %s1919_s11, 4  ;;  %s1655_s16 = int_to_ptr.vmem [resolvable:$true] %s1654_s16 }
 0x3ae   :  { %1430 = vmatmul.mubr.bf16.vlgmr.msra.gmra.mxu1 %v1190_v7  ;;  %s1887_s17 = scalar_lea.vmem %s1655_s16, 32  ;;  %p1892_p1 = scmp.lt.s32.totalorder %s1655_s16, %s1655_s16 }
 0x3af   :  { %v1098_v41 = vadd.f32 1e-05, %v1094_v49  ;;  %1438 = vmatpush1.bf16.msra.mxu1 %v1858_v54  ;;  %1706 = vmatprep.mubr.msk.bf16.mxu1 %vm850_vm5, %v1193_v8  ;;  %vm1918_vm5 = vmmov 0   ;;  %p1888_p0 = scmp.ne.s32.totalorder %s1655_s16, %s1887_s17  ;;  %p1893_p2 = scmp.lt.s32.totalorder %s1887_s17, %s1887_s17 }
 0x3b0   :  { %1439 = vmatprep.subr.bf16.mxu1 %v1909_v21  ;;  %1820 = vmatprep.mubr.msk.bf16.mxu0 %vm1918_vm5, %v1910_v36 }
 0x3b1   :  { %1883 = vrsqrt.f32 %v1098_v41  ;;  %p1894_p3 = por %p1893_p2, %p1892_p1 }
 0x3b3   :  { %1440 = vmatpush1.bf16.msra.mxu1 %v1859_v63  ;;  %p1895_p4 = pnand %p1894_p3, %p1888_p0 }
 0x3b4   :  { %1441 = vmatprep.subr.bf16.mxu1 %v1909_v21 }
 0x3b7   :  { %1442 = vmatpush1.bf16.msra.mxu1 %v1860_v50 }
 0x3b8   :  { %1443 = vmatprep.subr.bf16.mxu1 %v1909_v21 }
 0x3bb   :  { %1444 = vmatpush1.bf16.msra.mxu1 %v1861_v52 }
 0x3bc   :  { %1445 = vmatprep.subr.bf16.mxu1 %v1909_v21 }
 0x3be   :  { %v1884_v5 = vpop.eup %1883 }
 0x3bf   :  { %v1106_v33 = vmul.f32 %v1884_v5, %v1058_v61  ;;  %1446 = vmatpush1.bf16.msra.mxu1 %v1862_v6  ;;  %v1870_v61 = vld [vmem:[%s2886_s12 + $0x20] sm:$0xff]  }
 0x3c0   :  { %1447 = vmatprep.subr.bf16.mxu1 %v1909_v21 }
 0x3c1   :  { %v1132_v38 = vmul.f32 %v1121_v20, %v1106_v33 }
 0x3c3   :  { %1448 = vmatpush1.bf16.msra.mxu1 %v1863_v0  ;;  %v1158_v35 = vadd.f32 %v1147_v22, %v1132_v38  ;;  %v1708_v0 = vld [vmem:[%s2884_s10] ss:$0 sm:$0xff] }
 0x3c4   :  { %1449 = vmatprep.subr.bf16.mxu1 %v1909_v21 }
 0x3c5   :  { %v1162_v27 = vand.u32 2147483647, %v1158_v35  ;;  %vm1180_vm8 = vcmp.lt.f32.partialorder %v1158_v35, 0.0  ;;  %vm1176_vm4 = vcmp.gt.f32.partialorder %v1158_v35, 0.0 }
 0x3c6   :  { %v1184_v9 = vsel %vm1180_vm8, -1.0, %v1910_v36 }
 0x3c7   :  { %1450 = vmatpush1.bf16.msra.mxu1 %v1864_v32  ;;  %v1167_v40 = vsel %vm1021_vm13, %v1162_v27, 0.0  ;;  %v1188_v58 = vsel %vm1176_vm4, 1.0, %v1184_v9 }
 0x3c8   :  { %1451 = vmatprep.subr.bf16.mxu1 %v1909_v21  ;;  %v1168_v18 = vadd.f32 %v1167_v40, %v1166_v1  ;;  %v1192_v42 = vpack.c.bf16 %v1188_v58, %v1188_v58 }
 0x3ca   :  { %v1170_v11 = vadd.f32 %v2634_v47, %v1168_v18  ;;  %v1868_v47 = vld [vmem:[%s2886_s12 + $0x30] sm:$0xff]   ;;  %v1718_v18 = vld [vmem:[%s2887_s13] ss:$0 sm:$0xff] }
 0x3cb   :  { %1452 = vmatpush1.bf16.msra.mxu1 %v1865_v56  ;;  %1807 = vmatpush3.bf16.msra.mxu0 %v1868_v47 }
 0x3cc   :  { %1171 = vadd.xlane.f32.xlu0 %v1170_v11  ;;  %1467 = vmatprep.subr.bf16.mxu1 %v1909_v21  ;;  %v1869_v21 = vld [vmem:[%s2886_s12 + $0x28] sm:$0xff]  }
 0x3cd   :  { %1808 = vmatprep.subr.bf16.mxu0 %v1910_v36 }
 0x3cf   :  { %1468 = vmatpush2.bf16.msra.mxu1 %v1866_v3  ;;  %1809 = vmatpush3.bf16.msra.mxu0 %v1869_v21 }
 0x3d0   :  { %1810 = vmatprep.subr.bf16.mxu0 %v1910_v36 }
 0x3d2   :  { %1470 = vmatmul.mubr.bf16.vlgmr.msra.gmra.mxu1 %v1192_v42 }
 0x3d3   :  { %1811 = vmatpush3.bf16.msra.mxu0 %v1870_v61 }
 0x3d4   :  { %1812 = vmatprep.subr.bf16.mxu0 %v1910_v36 }
 0x3d7   :  { %1813 = vmatpush3.bf16.msra.mxu0 %v1871_v45 }
 0x3d8   :  { %1814 = vmatprep.subr.bf16.mxu0 %v1910_v36 }
 0x3db   :  { %1815 = vmatpush3.bf16.msra.mxu0 %v1872_v4 }
 0x3dc   :  { %1816 = vmatprep.subr.bf16.mxu0 %v1910_v36 }
 0x3df   :  { %1817 = vmatpush3.bf16.msra.mxu0 %v1873_v10 }
 0x3e0   :  { %1818 = vmatprep.subr.bf16.mxu0 %v1910_v36 }
 0x3e3   :  { %1819 = vmatpush3.bf16.msra.mxu0 %v1874_v2 }
 0x455   :  { %v1172_v43 = vpop.xlane.xlu0 %1171 }
 0x456   :  { %v1173_v34 = vmul.f32 0.0025, %v1172_v43 }
 0x46e   :  { %v1753_v59 = vpop.f32.mrf.mxu1 }
 0x470   :  { %v1754_v55 = vpop.f32.mrf.mxu1 }
 0x471   :  { %v1755_v25 = vadd.f32 %v1754_v55, %v1753_v59 }
 0x472   :  { %v1756_v12 = vpop.f32.mrf.mxu1 }
 0x474   :  { %v1757_v39 = vpop.f32.mrf.mxu1 }
 0x492   :  { %v1471_v53 = vpop.f32.mrf.mxu1 }
 0x493   :  { %v1472_v31 = vadd.f32 %v1755_v25, %v1471_v53 }
 0x494   :  { %v1473_v30 = vpop.f32.mrf.mxu1 }
 0x495   :  { %v1477_v48 = vmul.f32 %v1472_v31, %v1173_v34 }
 0x496   :  { %v1474_v57 = vpop.f32.mrf.mxu1 }
 0x497   :  { %v1485_v26 = vadd.f32 %v1707_v60, %v1477_v48 }
 0x498   :  { %v1475_v29 = vpop.f32.mrf.mxu1 }
 0x499   :  { %v1486_v62 = vmax.f32 %v1485_v26, 0.0 }
 0x49b   :  { %v1487_v13 = vsel %vm1021_vm13, %v1486_v62, 0.0 }
 0x49c   :  { %v1488_v16 = vrot.slane %v1487_v13, 4 }
 0x49e   :  { %v1489_v17 = vadd.f32 %v1488_v16, %v1487_v13 }
 0x4a0   :  { %v1490_v44 = vrot.slane %v1489_v17, 2 }
 0x4a2   :  { %v1491_v14 = vadd.f32 %v1490_v44, %v1489_v17 }
 0x4a4   :  { %v1492_v37 = vrot.slane %v1491_v14, 1 }
 0x4a6   :  { %v1493_v15 = vadd.f32 %v1492_v37, %v1491_v14 }
 0x4a8   :  { %v1494_v54 = vmul.f32 0.5, %v1493_v15 }
 0x4aa   :  { %v1495_v7 = vsub.f32 %v1486_v62, %v1494_v54 }
 0x4ac   :  { %v1496_v49 = vmul.f32 %v1495_v7, %v1495_v7 }
 0x4ae   :  { %v1497_v8 = vsel %vm1021_vm13, %v1496_v49, 0.0 }
 0x4af   :  { %v1498_v41 = vrot.slane %v1497_v8, 4 }
 0x4b1   :  { %v1499_v63 = vadd.f32 %v1498_v41, %v1497_v8 }
 0x4b3   :  { %v1500_v50 = vrot.slane %v1499_v63, 2 }
 0x4b5   :  { %v1501_v52 = vadd.f32 %v1500_v50, %v1499_v63 }
 0x4b7   :  { %v1502_v51 = vrot.slane %v1501_v52, 1 }
 0x4b9   :  { %v1503_v6 = vadd.f32 %v1502_v51, %v1501_v52 }
 0x4bb   :  { %v1504_v20 = vmul.f32 0.5, %v1503_v6 }
 0x4bd   :  { %v1505_v5 = vadd.f32 1e-05, %v1504_v20 }
 0x4bf   :  { %1885 = vrsqrt.f32 %v1505_v5 }
 0x4cc   :  { %v1886_v33 = vpop.eup %1885 }
 0x4cd   :  { %v1507_v22 = vmul.f32 %v1886_v33, %v1495_v7 }
 0x4cf   :  { %v1515_v38 = vmul.f32 %v1708_v0, %v1507_v22 }
 0x4d1   :  { %v1523_v19 = vadd.f32 %v1709_v23, %v1515_v38 }
 0x4d3   :  { %v1524_v32 = vand.u32 2147483647, %v1523_v19  ;;  %vm1529_vm6 = vcmp.gt.f32.partialorder %v1523_v19, 0.0  ;;  %vm1530_vm7 = vcmp.lt.f32.partialorder %v1523_v19, 0.0 }
 0x4d4   :  { %v1531_v35 = vsel %vm1530_vm7, -1.0, %v1910_v36 }
 0x4d5   :  { %v1525_v46 = vsel %vm1021_vm13, %v1524_v32, 0.0  ;;  %v1532_v27 = vsel %vm1529_vm6, 1.0, %v1531_v35 }
 0x4d6   :  { %1526 = vadd.xlane.f32.xlu1 %v1525_v46  ;;  %v1533_v28 = vpack.c.bf16 %v1532_v27, %v1532_v27 }
 0x4d8   :  { %1821 = vmatmul.mubr.bf16.vlgmr.msra.gmra.mxu0 %v1533_v28 }
 0x55f   :  { %v1527_v1 = vpop.xlane.xlu1 %1526 }
 0x560   :  { %v1528_v56 = vmul.f32 0.02, %v1527_v1 }
 0x598   :  { %v1632_v40 = vpop.f32.mrf.mxu0 }
 0x599   :  { %v1638_v11 = vmul.f32 %v1632_v40, %v1528_v56 }
 0x59a   :  { %v1822_v9 = vpop.f32.mrf.mxu0 }
 0x59b   :  { %v1646_v3 = vadd.f32 %v1718_v18, %v1638_v11 }
 0x59c   :  { %v1635_v36 = vpop.f32.mrf.mxu0 }
 0x59d   :  { %1647 = vst [vmem:[#allocation2] sm:$0x3] %v1646_v3 }
 0x59e   :  { %v1823_v58 = vpop.f32.mrf.mxu0 }
 0x59f   :  { %1898 = shalt.err (!%p1895_p4)
}
 0x5a0   :  { %1657 = dma.vmem_to_hbm [thread:$0]  %s1655_s16, 32, %s2888_s14, [#allocation3]  }
 0x5a1   :  { %1907 = dma.done.wait [#allocation3], 32  }
 0x5a2   :  { %1908 = vsyncadd [#allocation3], 4294967264 }
 0x5a3   :  { %1661 = vsyncpa [#allocation3], 1 }

</bundles_post_ra>
